<compile_context>
chip_gen: v7x
topology: tpu7x:2x2x1
jax: 0.10.0
libtpu: 0.0.40
codegen_flags: <defaults>
</compile_context>

<pallas_src>
import functools

import jax
import jax.numpy as jnp
from jax import lax
from jax.experimental import pallas as pl
from jax.experimental.pallas import tpu as pltpu


def _round_up(x, m):
    return (x + m - 1) // m * m


_TAPS = [(kh - 1, kw - 1) for kh in range(3) for kw in range(3)]  # t = kh*3 + kw


def _make_fused_backbone_kernel(num_layers, out_idx, W):
    """Builds the fused num_layers x (conv3x3 + bias + ReLU) kernel body."""
    out_pos = {layer: k for k, layer in enumerate(out_idx)}

    def kernel(*refs):
        x_ref = refs[0]                                       # (1, Cin0_p, lanes) f32
        m_ref = refs[1]                                       # (9, 1, lanes) f32
        w_refs = refs[2:2 + num_layers]                       # (Cout_p, 9*Cin_p) bf16
        b_refs = refs[2 + num_layers:2 + 2 * num_layers]      # (Cout_p, 1) f32
        o_refs = refs[2 + 2 * num_layers:2 + 2 * num_layers + len(out_idx)]
        patch_ref = refs[-1]                                  # (9*max_Cin_p, lanes) bf16

        act = x_ref[0]                                        # (Cin0_p, lanes) f32
        lanes = act.shape[1]
        for layer in range(num_layers):
            w_ref = w_refs[layer]
            b_ref = b_refs[layer]
            cinp = w_ref.shape[1] // 9

            # im2col: 9 shifted copies (XLU lane roll) * precomputed border
            # mask (VPU), written straight into the persistent bf16 scratch.
            for t, (dh, dw) in enumerate(_TAPS):
                if dh == 0 and dw == 0:
                    col = act
                else:
                    s = dh * W + dw                           # flat spatial shift
                    col = pltpu.roll(act, shift=(-s) % lanes, axis=1) * m_ref[t]
                patch_ref[pl.ds(t * cinp, cinp), :] = col.astype(jnp.bfloat16)

            # One big-K bf16 MXU contraction per layer, f32 accumulation.
            out = jnp.dot(w_ref[...], patch_ref[pl.ds(0, 9 * cinp), :],
                          preferred_element_type=jnp.float32)  # (Cout_p, lanes)
            out = jnp.maximum(out + b_ref[...], 0.0)           # bias + ReLU (f32)

            if layer in out_pos:
                o_ref = o_refs[out_pos[layer]]
                o_ref[0] = out.astype(o_ref.dtype)             # lane-dense store
            act = out

    return kernel


def custom_backbone_pallas(x_nchw, params, out_idx=(4, 6, 8), batch_block=None):
    """Mirrors CustomBackbone.forward over fused Conv2d(3x3, SAME)+ReLU layers.

    x_nchw: (N, C0, H, W) float32 (PyTorch NCHW layout).
    params: list of (w, b) with w: (3, 3, Cin, Cout) HWIO and b: (Cout,).
    Returns the list of NCHW activations at `out_idx`.
    """
    N, C0, H, W = x_nchw.shape
    HW = H * W
    num_layers = len(params)
    out_idx = tuple(out_idx)

    if batch_block is None:
        batch_block = N                      # full batch-into-lanes fold
    assert N % batch_block == 0
    num_blocks = N // batch_block
    lanes = batch_block * HW

    cpad = lambda c: _round_up(c, 8)
    c0p = cpad(C0)

    # Input: pad channels to a sublane multiple, fold batch into the lane axis.
    x = jnp.pad(x_nchw.astype(jnp.float32),
                ((0, 0), (0, c0p - C0), (0, 0), (0, 0)))
    x = x.reshape(num_blocks, batch_block, c0p, HW)
    x = jnp.transpose(x, (0, 2, 1, 3)).reshape(num_blocks, c0p, lanes)

    # Border-validity masks per tap, hoisted out of the kernel (no pow2-W req).
    r = jnp.arange(HW, dtype=jnp.int32)
    hh, ww = r // W, r % W
    mask_rows = []
    for (dh, dw) in _TAPS:
        mh = (hh >= max(0, -dh)) & (hh < H - max(0, dh))
        mw = (ww >= max(0, -dw)) & (ww < W - max(0, dw))
        mask_rows.append((mh & mw).astype(jnp.float32))
    masks = jnp.stack(mask_rows)                             # (9, HW)
    masks = jnp.tile(masks, (1, batch_block)).reshape(9, 1, lanes)

    # Weights -> bf16 (Cout_p, 9*Cin_p), column order (kh, kw, cin) matching the
    # in-kernel patch stacking; biases -> f32 (Cout_p, 1). Zero padding.
    w_mats, b_mats, couts, coutps, cinps = [], [], [], [], []
    for (w, b) in params:
        _, _, cin, cout = w.shape
        cinp, coutp = cpad(cin), cpad(cout)
        wt = jnp.transpose(w, (3, 0, 1, 2))                  # (Cout, 3, 3, Cin)
        wt = jnp.pad(wt, ((0, coutp - cout), (0, 0), (0, 0), (0, cinp - cin)))
        w_mats.append(wt.reshape(coutp, 9 * cinp).astype(jnp.bfloat16))
        b_mats.append(jnp.pad(b, (0, coutp - cout)).reshape(coutp, 1)
                      .astype(jnp.float32))
        couts.append(cout)
        coutps.append(coutp)
        cinps.append(cinp)
    max_cinp = max(cinps)

    kernel = _make_fused_backbone_kernel(num_layers, out_idx, W)

    # Constant operands: constant index_map + single-buffered.
    def const_spec(shape):
        return pl.BlockSpec(shape, lambda g: (0,) * len(shape),
                            pipeline_mode=pl.Buffered(1))

    in_specs = [pl.BlockSpec((1, c0p, lanes), lambda g: (g, 0, 0)),
                const_spec((9, 1, lanes))]
    in_specs += [const_spec(wm.shape) for wm in w_mats]
    in_specs += [const_spec(bm.shape) for bm in b_mats]

    out_shapes = tuple(jax.ShapeDtypeStruct((num_blocks, coutps[i], lanes),
                                            jnp.float32) for i in out_idx)
    out_specs = tuple(pl.BlockSpec((1, coutps[i], lanes), lambda g: (g, 0, 0))
                      for i in out_idx)

    # Explicit VMEM budget: floor at 32 MiB (helps v5e's 16 MiB default),
    # cap at 64 MiB (v7x physical ceiling).
    est = (2 * (x.size // num_blocks) * 4
           + 2 * masks.size * 4
           + sum(wm.size * 2 for wm in w_mats)
           + sum(bm.size * 4 for bm in b_mats)
           + 2 * sum(coutps[i] * lanes * 4 for i in out_idx)
           + 9 * max_cinp * lanes * 2
           + 4 * (max(coutps) + max_cinp) * lanes * 4)
    vmem_limit = int(min(64 * 1024 * 1024, max(32 * 1024 * 1024, 2 * est)))

    outs = pl.pallas_call(
        kernel,
        out_shape=out_shapes,
        grid=(num_blocks,),
        in_specs=in_specs,
        out_specs=out_specs,
        scratch_shapes=[pltpu.VMEM((9 * max_cinp, lanes), jnp.bfloat16)],
        compiler_params=pltpu.CompilerParams(
            dimension_semantics=("parallel",),
            vmem_limit_bytes=vmem_limit),
    )(x, masks, *w_mats, *b_mats)

    # Back to NCHW, dropping channel padding (layout plumbing only).
    res = []
    for k, i in enumerate(out_idx):
        o = outs[k].reshape(num_blocks, coutps[i], batch_block, HW)
        o = jnp.transpose(o, (0, 2, 1, 3)).reshape(N, coutps[i], H, W)
        res.append(o[:, :couts[i]])
    return res


def init_backbone_params(key, channels):
    """Deterministic synthetic params for len(channels)-1 conv layers."""
    params = []
    for i in range(len(channels) - 1):
        key, k_w, k_b = jax.random.split(key, 3)
        cin, cout = channels[i], channels[i + 1]
        fan_in = 3 * 3 * cin
        w = jax.random.normal(k_w, (3, 3, cin, cout), jnp.float32) / jnp.sqrt(
            jnp.float32(fan_in))
        b = 0.01 * jax.random.normal(k_b, (cout,), jnp.float32)
        params.append((w, b))
    return params


# ----- pure-JAX reference (for correctness check only) -----
def _conv_relu_ref(x, w, b):
    y = lax.conv_general_dilated(
        x, w, window_strides=(1, 1), padding="SAME",
        dimension_numbers=("NCHW", "HWIO", "NCHW"))
    return jnp.maximum(y + b[None, :, None, None], 0.0)


def _backbone_ref(x, params, out_idx=(4, 6, 8)):
    outputs = []
    for idx, (w, b) in enumerate(params):
        x = _conv_relu_ref(x, w, b)
        if idx in out_idx:
            outputs.append(x)
    return outputs


if __name__ == "__main__":
    key = jax.random.PRNGKey(0)
    key, k_x = jax.random.split(key)

    # Small shapes consistent with the module (>= 9 layers so out_idx=[4,6,8]
    # all exist).  Input is NCHW like PyTorch.
    N, H, W = 2, 16, 16
    channels = [4, 8, 8, 16, 16, 16, 32, 32, 32, 32]   # 9 conv+ReLU layers
    out_idx = (4, 6, 8)

    x = jax.random.normal(k_x, (N, channels[0], H, W), jnp.float32)
    params = init_backbone_params(key, channels)

    run = jax.jit(functools.partial(custom_backbone_pallas, out_idx=out_idx))
    outs = jax.block_until_ready(run(x, params))

    refs = _backbone_ref(x, params, out_idx=out_idx)
    for o, r in zip(outs, refs):
        assert o.shape == r.shape, (o.shape, r.shape)
        # bf16 MXU operands (f32 accumulation): tolerance loosened deliberately.
        assert float(jnp.max(jnp.abs(o - r))) < 5e-2

    print("KERNEL_OK")
</pallas_src>

<mosaic_0001>
module attributes {stable_mosaic.version = 11 : i64} {
  func.func @kernel(%arg0: i32, %arg1: memref<1x8x512xf32, #tpu.memory_space<vmem>>, %arg2: memref<9x1x512xf32, #tpu.memory_space<vmem>>, %arg3: memref<8x72xbf16, #tpu.memory_space<vmem>>, %arg4: memref<8x72xbf16, #tpu.memory_space<vmem>>, %arg5: memref<16x72xbf16, #tpu.memory_space<vmem>>, %arg6: memref<16x144xbf16, #tpu.memory_space<vmem>>, %arg7: memref<16x144xbf16, #tpu.memory_space<vmem>>, %arg8: memref<32x144xbf16, #tpu.memory_space<vmem>>, %arg9: memref<32x288xbf16, #tpu.memory_space<vmem>>, %arg10: memref<32x288xbf16, #tpu.memory_space<vmem>>, %arg11: memref<32x288xbf16, #tpu.memory_space<vmem>>, %arg12: memref<8x1xf32, #tpu.memory_space<vmem>>, %arg13: memref<8x1xf32, #tpu.memory_space<vmem>>, %arg14: memref<16x1xf32, #tpu.memory_space<vmem>>, %arg15: memref<16x1xf32, #tpu.memory_space<vmem>>, %arg16: memref<16x1xf32, #tpu.memory_space<vmem>>, %arg17: memref<32x1xf32, #tpu.memory_space<vmem>>, %arg18: memref<32x1xf32, #tpu.memory_space<vmem>>, %arg19: memref<32x1xf32, #tpu.memory_space<vmem>>, %arg20: memref<32x1xf32, #tpu.memory_space<vmem>>, %arg21: memref<1x16x512xf32, #tpu.memory_space<vmem>>, %arg22: memref<1x32x512xf32, #tpu.memory_space<vmem>>, %arg23: memref<1x32x512xf32, #tpu.memory_space<vmem>>, %arg24: memref<288x512xbf16, #tpu.memory_space<vmem>>) attributes {dimension_semantics = [#tpu.dimension_semantics<parallel>], iteration_bounds = array<i64: 1>, scalar_prefetch = 0 : i64, scratch_operands = 1 : i64, tpu.core_type = #tpu.core_type<tc>, window_params = [{transform_indices = @transform_0, window_bounds = array<i64: 1, 8, 512>}, {pipeline_mode = #tpu.pipeline_mode<synchronous>, transform_indices = @transform_1, window_bounds = array<i64: 9, 1, 512>}, {pipeline_mode = #tpu.pipeline_mode<synchronous>, transform_indices = @transform_2, window_bounds = array<i64: 8, 72>}, {pipeline_mode = #tpu.pipeline_mode<synchronous>, transform_indices = @transform_3, window_bounds = array<i64: 8, 72>}, {pipeline_mode = #tpu.pipeline_mode<synchronous>, transform_indices = @transform_4, window_bounds = array<i64: 16, 72>}, {pipeline_mode = #tpu.pipeline_mode<synchronous>, transform_indices = @transform_5, window_bounds = array<i64: 16, 144>}, {pipeline_mode = #tpu.pipeline_mode<synchronous>, transform_indices = @transform_6, window_bounds = array<i64: 16, 144>}, {pipeline_mode = #tpu.pipeline_mode<synchronous>, transform_indices = @transform_7, window_bounds = array<i64: 32, 144>}, {pipeline_mode = #tpu.pipeline_mode<synchronous>, transform_indices = @transform_8, window_bounds = array<i64: 32, 288>}, {pipeline_mode = #tpu.pipeline_mode<synchronous>, transform_indices = @transform_9, window_bounds = array<i64: 32, 288>}, {pipeline_mode = #tpu.pipeline_mode<synchronous>, transform_indices = @transform_10, window_bounds = array<i64: 32, 288>}, {pipeline_mode = #tpu.pipeline_mode<synchronous>, transform_indices = @transform_11, window_bounds = array<i64: 8, 1>}, {pipeline_mode = #tpu.pipeline_mode<synchronous>, transform_indices = @transform_12, window_bounds = array<i64: 8, 1>}, {pipeline_mode = #tpu.pipeline_mode<synchronous>, transform_indices = @transform_13, window_bounds = array<i64: 16, 1>}, {pipeline_mode = #tpu.pipeline_mode<synchronous>, transform_indices = @transform_14, window_bounds = array<i64: 16, 1>}, {pipeline_mode = #tpu.pipeline_mode<synchronous>, transform_indices = @transform_15, window_bounds = array<i64: 16, 1>}, {pipeline_mode = #tpu.pipeline_mode<synchronous>, transform_indices = @transform_16, window_bounds = array<i64: 32, 1>}, {pipeline_mode = #tpu.pipeline_mode<synchronous>, transform_indices = @transform_17, window_bounds = array<i64: 32, 1>}, {pipeline_mode = #tpu.pipeline_mode<synchronous>, transform_indices = @transform_18, window_bounds = array<i64: 32, 1>}, {pipeline_mode = #tpu.pipeline_mode<synchronous>, transform_indices = @transform_19, window_bounds = array<i64: 32, 1>}, {transform_indices = @transform_20, window_bounds = array<i64: 1, 16, 512>}, {transform_indices = @transform_21, window_bounds = array<i64: 1, 32, 512>}, {transform_indices = @transform_22, window_bounds = array<i64: 1, 32, 512>}]} {
    %c0 = arith.constant 0 : index
    %c0_0 = arith.constant 0 : index
    %c0_1 = arith.constant 0 : index
    %0 = vector.load %arg1[%c0, %c0_0, %c0_1] : memref<1x8x512xf32, #tpu.memory_space<vmem>>, vector<1x8x512xf32>
    %1 = vector.shape_cast %0 : vector<1x8x512xf32> to vector<8x512xf32>
    %c17_i32 = arith.constant 17 : i32
    %2 = tpu.dynamic_rotate %1 by %c17_i32 dim 1 : vector<8x512xf32>, i32 -> vector<8x512xf32>
    %c0_2 = arith.constant 0 : index
    %c0_3 = arith.constant 0 : index
    %c0_4 = arith.constant 0 : index
    %3 = vector.load %arg2[%c0_2, %c0_3, %c0_4] : memref<9x1x512xf32, #tpu.memory_space<vmem>>, vector<1x1x512xf32>
    %4 = vector.shape_cast %3 : vector<1x1x512xf32> to vector<1x512xf32>
    %5 = vector.broadcast %4 : vector<1x512xf32> to vector<8x512xf32>
    %6 = arith.mulf %2, %5 : vector<8x512xf32>
    %7 = arith.truncf %6 : vector<8x512xf32> to vector<8x512xbf16>
    %c0_5 = arith.constant 0 : index
    %c0_6 = arith.constant 0 : index
    %8 = vector.load %arg24[%c0_5, %c0_6] : memref<288x512xbf16, #tpu.memory_space<vmem>>, vector<8x512xbf16>
    tpu.vector_store %arg24[%c0_5, %c0_6], %7 {strides = array<i32>} : memref<288x512xbf16, #tpu.memory_space<vmem>>, vector<8x512xbf16>,
    %c16_i32 = arith.constant 16 : i32
    %9 = tpu.dynamic_rotate %1 by %c16_i32 dim 1 : vector<8x512xf32>, i32 -> vector<8x512xf32>
    %c1 = arith.constant 1 : index
    %c0_7 = arith.constant 0 : index
    %c0_8 = arith.constant 0 : index
    %10 = vector.load %arg2[%c1, %c0_7, %c0_8] : memref<9x1x512xf32, #tpu.memory_space<vmem>>, vector<1x1x512xf32>
    %11 = vector.shape_cast %10 : vector<1x1x512xf32> to vector<1x512xf32>
    %12 = vector.broadcast %11 : vector<1x512xf32> to vector<8x512xf32>
    %13 = arith.mulf %9, %12 : vector<8x512xf32>
    %14 = arith.truncf %13 : vector<8x512xf32> to vector<8x512xbf16>
    %c8 = arith.constant 8 : index
    %c0_9 = arith.constant 0 : index
    %15 = vector.load %arg24[%c8, %c0_9] : memref<288x512xbf16, #tpu.memory_space<vmem>>, vector<8x512xbf16>
    tpu.vector_store %arg24[%c8, %c0_9], %14 {strides = array<i32>} : memref<288x512xbf16, #tpu.memory_space<vmem>>, vector<8x512xbf16>,
    %c15_i32 = arith.constant 15 : i32
    %16 = tpu.dynamic_rotate %1 by %c15_i32 dim 1 : vector<8x512xf32>, i32 -> vector<8x512xf32>
    %c2 = arith.constant 2 : index
    %c0_10 = arith.constant 0 : index
    %c0_11 = arith.constant 0 : index
    %17 = vector.load %arg2[%c2, %c0_10, %c0_11] : memref<9x1x512xf32, #tpu.memory_space<vmem>>, vector<1x1x512xf32>
    %18 = vector.shape_cast %17 : vector<1x1x512xf32> to vector<1x512xf32>
    %19 = vector.broadcast %18 : vector<1x512xf32> to vector<8x512xf32>
    %20 = arith.mulf %16, %19 : vector<8x512xf32>
    %21 = arith.truncf %20 : vector<8x512xf32> to vector<8x512xbf16>
    %c16 = arith.constant 16 : index
    %c0_12 = arith.constant 0 : index
    %22 = vector.load %arg24[%c16, %c0_12] : memref<288x512xbf16, #tpu.memory_space<vmem>>, vector<8x512xbf16>
    tpu.vector_store %arg24[%c16, %c0_12], %21 {strides = array<i32>} : memref<288x512xbf16, #tpu.memory_space<vmem>>, vector<8x512xbf16>,
    %c1_i32 = arith.constant 1 : i32
    %23 = tpu.dynamic_rotate %1 by %c1_i32 dim 1 : vector<8x512xf32>, i32 -> vector<8x512xf32>
    %c3 = arith.constant 3 : index
    %c0_13 = arith.constant 0 : index
    %c0_14 = arith.constant 0 : index
    %24 = vector.load %arg2[%c3, %c0_13, %c0_14] : memref<9x1x512xf32, #tpu.memory_space<vmem>>, vector<1x1x512xf32>
    %25 = vector.shape_cast %24 : vector<1x1x512xf32> to vector<1x512xf32>
    %26 = vector.broadcast %25 : vector<1x512xf32> to vector<8x512xf32>
    %27 = arith.mulf %23, %26 : vector<8x512xf32>
    %28 = arith.truncf %27 : vector<8x512xf32> to vector<8x512xbf16>
    %c24 = arith.constant 24 : index
    %c0_15 = arith.constant 0 : index
    %29 = vector.load %arg24[%c24, %c0_15] : memref<288x512xbf16, #tpu.memory_space<vmem>>, vector<8x512xbf16>
    tpu.vector_store %arg24[%c24, %c0_15], %28 {strides = array<i32>} : memref<288x512xbf16, #tpu.memory_space<vmem>>, vector<8x512xbf16>,
    %30 = arith.truncf %1 : vector<8x512xf32> to vector<8x512xbf16>
    %c32 = arith.constant 32 : index
    %c0_16 = arith.constant 0 : index
    %31 = vector.load %arg24[%c32, %c0_16] : memref<288x512xbf16, #tpu.memory_space<vmem>>, vector<8x512xbf16>
    tpu.vector_store %arg24[%c32, %c0_16], %30 {strides = array<i32>} : memref<288x512xbf16, #tpu.memory_space<vmem>>, vector<8x512xbf16>,
    %c511_i32 = arith.constant 511 : i32
    %32 = tpu.dynamic_rotate %1 by %c511_i32 dim 1 : vector<8x512xf32>, i32 -> vector<8x512xf32>
    %c5 = arith.constant 5 : index
    %c0_17 = arith.constant 0 : index
    %c0_18 = arith.constant 0 : index
    %33 = vector.load %arg2[%c5, %c0_17, %c0_18] : memref<9x1x512xf32, #tpu.memory_space<vmem>>, vector<1x1x512xf32>
    %34 = vector.shape_cast %33 : vector<1x1x512xf32> to vector<1x512xf32>
    %35 = vector.broadcast %34 : vector<1x512xf32> to vector<8x512xf32>
    %36 = arith.mulf %32, %35 : vector<8x512xf32>
    %37 = arith.truncf %36 : vector<8x512xf32> to vector<8x512xbf16>
    %c40 = arith.constant 40 : index
    %c0_19 = arith.constant 0 : index
    %38 = vector.load %arg24[%c40, %c0_19] : memref<288x512xbf16, #tpu.memory_space<vmem>>, vector<8x512xbf16>
    tpu.vector_store %arg24[%c40, %c0_19], %37 {strides = array<i32>} : memref<288x512xbf16, #tpu.memory_space<vmem>>, vector<8x512xbf16>,
    %c497_i32 = arith.constant 497 : i32
    %39 = tpu.dynamic_rotate %1 by %c497_i32 dim 1 : vector<8x512xf32>, i32 -> vector<8x512xf32>
    %c6 = arith.constant 6 : index
    %c0_20 = arith.constant 0 : index
    %c0_21 = arith.constant 0 : index
    %40 = vector.load %arg2[%c6, %c0_20, %c0_21] : memref<9x1x512xf32, #tpu.memory_space<vmem>>, vector<1x1x512xf32>
    %41 = vector.shape_cast %40 : vector<1x1x512xf32> to vector<1x512xf32>
    %42 = vector.broadcast %41 : vector<1x512xf32> to vector<8x512xf32>
    %43 = arith.mulf %39, %42 : vector<8x512xf32>
    %44 = arith.truncf %43 : vector<8x512xf32> to vector<8x512xbf16>
    %c48 = arith.constant 48 : index
    %c0_22 = arith.constant 0 : index
    %45 = vector.load %arg24[%c48, %c0_22] : memref<288x512xbf16, #tpu.memory_space<vmem>>, vector<8x512xbf16>
    tpu.vector_store %arg24[%c48, %c0_22], %44 {strides = array<i32>} : memref<288x512xbf16, #tpu.memory_space<vmem>>, vector<8x512xbf16>,
    %c496_i32 = arith.constant 496 : i32
    %46 = tpu.dynamic_rotate %1 by %c496_i32 dim 1 : vector<8x512xf32>, i32 -> vector<8x512xf32>
    %c7 = arith.constant 7 : index
    %c0_23 = arith.constant 0 : index
    %c0_24 = arith.constant 0 : index
    %47 = vector.load %arg2[%c7, %c0_23, %c0_24] : memref<9x1x512xf32, #tpu.memory_space<vmem>>, vector<1x1x512xf32>
    %48 = vector.shape_cast %47 : vector<1x1x512xf32> to vector<1x512xf32>
    %49 = vector.broadcast %48 : vector<1x512xf32> to vector<8x512xf32>
    %50 = arith.mulf %46, %49 : vector<8x512xf32>
    %51 = arith.truncf %50 : vector<8x512xf32> to vector<8x512xbf16>
    %c56 = arith.constant 56 : index
    %c0_25 = arith.constant 0 : index
    %52 = vector.load %arg24[%c56, %c0_25] : memref<288x512xbf16, #tpu.memory_space<vmem>>, vector<8x512xbf16>
    tpu.vector_store %arg24[%c56, %c0_25], %51 {strides = array<i32>} : memref<288x512xbf16, #tpu.memory_space<vmem>>, vector<8x512xbf16>,
    %c495_i32 = arith.constant 495 : i32
    %53 = tpu.dynamic_rotate %1 by %c495_i32 dim 1 : vector<8x512xf32>, i32 -> vector<8x512xf32>
    %c8_26 = arith.constant 8 : index
    %c0_27 = arith.constant 0 : index
    %c0_28 = arith.constant 0 : index
    %54 = vector.load %arg2[%c8_26, %c0_27, %c0_28] : memref<9x1x512xf32, #tpu.memory_space<vmem>>, vector<1x1x512xf32>
    %55 = vector.shape_cast %54 : vector<1x1x512xf32> to vector<1x512xf32>
    %56 = vector.broadcast %55 : vector<1x512xf32> to vector<8x512xf32>
    %57 = arith.mulf %53, %56 : vector<8x512xf32>
    %58 = arith.truncf %57 : vector<8x512xf32> to vector<8x512xbf16>
    %c64 = arith.constant 64 : index
    %c0_29 = arith.constant 0 : index
    %59 = vector.load %arg24[%c64, %c0_29] : memref<288x512xbf16, #tpu.memory_space<vmem>>, vector<8x512xbf16>
    tpu.vector_store %arg24[%c64, %c0_29], %58 {strides = array<i32>} : memref<288x512xbf16, #tpu.memory_space<vmem>>, vector<8x512xbf16>,
    %c0_30 = arith.constant 0 : index
    %c0_31 = arith.constant 0 : index
    %60 = vector.load %arg3[%c0_30, %c0_31] : memref<8x72xbf16, #tpu.memory_space<vmem>>, vector<8x72xbf16>
    %c0_32 = arith.constant 0 : index
    %c0_33 = arith.constant 0 : index
    %61 = vector.load %arg24[%c0_32, %c0_33] : memref<288x512xbf16, #tpu.memory_space<vmem>>, vector<72x512xbf16>
    %cst = arith.constant dense<0.000000e+00> : vector<8x512xf32>
    %62 = tpu.matmul %60, %61, %cst {dimension_numbers = #tpu.dot_dimension_numbers<[1], [0], [0], [1], [0, 0, 1, 1], [], []>} : vector<8x72xbf16>, vector<72x512xbf16>, vector<8x512xf32> -> vector<8x512xf32>
    %c0_34 = arith.constant 0 : index
    %c0_35 = arith.constant 0 : index
    %63 = vector.load %arg12[%c0_34, %c0_35] : memref<8x1xf32, #tpu.memory_space<vmem>>, vector<8x1xf32>
    %64 = vector.broadcast %63 : vector<8x1xf32> to vector<8x512xf32>
    %65 = arith.addf %62, %64 : vector<8x512xf32>
    %cst_36 = arith.constant 0.000000e+00 : f32
    %66 = vector.broadcast %cst_36 : f32 to vector<8x512xf32>
    %67 = arith.maximumf %65, %66 : vector<8x512xf32>
    %c17_i32_37 = arith.constant 17 : i32
    %68 = tpu.dynamic_rotate %67 by %c17_i32_37 dim 1 : vector<8x512xf32>, i32 -> vector<8x512xf32>
    %c0_38 = arith.constant 0 : index
    %c0_39 = arith.constant 0 : index
    %c0_40 = arith.constant 0 : index
    %69 = vector.load %arg2[%c0_38, %c0_39, %c0_40] : memref<9x1x512xf32, #tpu.memory_space<vmem>>, vector<1x1x512xf32>
    %70 = vector.shape_cast %69 : vector<1x1x512xf32> to vector<1x512xf32>
    %71 = vector.broadcast %70 : vector<1x512xf32> to vector<8x512xf32>
    %72 = arith.mulf %68, %71 : vector<8x512xf32>
    %73 = arith.truncf %72 : vector<8x512xf32> to vector<8x512xbf16>
    %c0_41 = arith.constant 0 : index
    %c0_42 = arith.constant 0 : index
    %74 = vector.load %arg24[%c0_41, %c0_42] : memref<288x512xbf16, #tpu.memory_space<vmem>>, vector<8x512xbf16>
    tpu.vector_store %arg24[%c0_41, %c0_42], %73 {strides = array<i32>} : memref<288x512xbf16, #tpu.memory_space<vmem>>, vector<8x512xbf16>,
    %c16_i32_43 = arith.constant 16 : i32
    %75 = tpu.dynamic_rotate %67 by %c16_i32_43 dim 1 : vector<8x512xf32>, i32 -> vector<8x512xf32>
    %c1_44 = arith.constant 1 : index
    %c0_45 = arith.constant 0 : index
    %c0_46 = arith.constant 0 : index
    %76 = vector.load %arg2[%c1_44, %c0_45, %c0_46] : memref<9x1x512xf32, #tpu.memory_space<vmem>>, vector<1x1x512xf32>
    %77 = vector.shape_cast %76 : vector<1x1x512xf32> to vector<1x512xf32>
    %78 = vector.broadcast %77 : vector<1x512xf32> to vector<8x512xf32>
    %79 = arith.mulf %75, %78 : vector<8x512xf32>
    %80 = arith.truncf %79 : vector<8x512xf32> to vector<8x512xbf16>
    %c8_47 = arith.constant 8 : index
    %c0_48 = arith.constant 0 : index
    %81 = vector.load %arg24[%c8_47, %c0_48] : memref<288x512xbf16, #tpu.memory_space<vmem>>, vector<8x512xbf16>
    tpu.vector_store %arg24[%c8_47, %c0_48], %80 {strides = array<i32>} : memref<288x512xbf16, #tpu.memory_space<vmem>>, vector<8x512xbf16>,
    %c15_i32_49 = arith.constant 15 : i32
    %82 = tpu.dynamic_rotate %67 by %c15_i32_49 dim 1 : vector<8x512xf32>, i32 -> vector<8x512xf32>
    %c2_50 = arith.constant 2 : index
    %c0_51 = arith.constant 0 : index
    %c0_52 = arith.constant 0 : index
    %83 = vector.load %arg2[%c2_50, %c0_51, %c0_52] : memref<9x1x512xf32, #tpu.memory_space<vmem>>, vector<1x1x512xf32>
    %84 = vector.shape_cast %83 : vector<1x1x512xf32> to vector<1x512xf32>
    %85 = vector.broadcast %84 : vector<1x512xf32> to vector<8x512xf32>
    %86 = arith.mulf %82, %85 : vector<8x512xf32>
    %87 = arith.truncf %86 : vector<8x512xf32> to vector<8x512xbf16>
    %c16_53 = arith.constant 16 : index
    %c0_54 = arith.constant 0 : index
    %88 = vector.load %arg24[%c16_53, %c0_54] : memref<288x512xbf16, #tpu.memory_space<vmem>>, vector<8x512xbf16>
    tpu.vector_store %arg24[%c16_53, %c0_54], %87 {strides = array<i32>} : memref<288x512xbf16, #tpu.memory_space<vmem>>, vector<8x512xbf16>,
    %c1_i32_55 = arith.constant 1 : i32
    %89 = tpu.dynamic_rotate %67 by %c1_i32_55 dim 1 : vector<8x512xf32>, i32 -> vector<8x512xf32>
    %c3_56 = arith.constant 3 : index
    %c0_57 = arith.constant 0 : index
    %c0_58 = arith.constant 0 : index
    %90 = vector.load %arg2[%c3_56, %c0_57, %c0_58] : memref<9x1x512xf32, #tpu.memory_space<vmem>>, vector<1x1x512xf32>
    %91 = vector.shape_cast %90 : vector<1x1x512xf32> to vector<1x512xf32>
    %92 = vector.broadcast %91 : vector<1x512xf32> to vector<8x512xf32>
    %93 = arith.mulf %89, %92 : vector<8x512xf32>
    %94 = arith.truncf %93 : vector<8x512xf32> to vector<8x512xbf16>
    %c24_59 = arith.constant 24 : index
    %c0_60 = arith.constant 0 : index
    %95 = vector.load %arg24[%c24_59, %c0_60] : memref<288x512xbf16, #tpu.memory_space<vmem>>, vector<8x512xbf16>
    tpu.vector_store %arg24[%c24_59, %c0_60], %94 {strides = array<i32>} : memref<288x512xbf16, #tpu.memory_space<vmem>>, vector<8x512xbf16>,
    %96 = arith.truncf %67 : vector<8x512xf32> to vector<8x512xbf16>
    %c32_61 = arith.constant 32 : index
    %c0_62 = arith.constant 0 : index
    %97 = vector.load %arg24[%c32_61, %c0_62] : memref<288x512xbf16, #tpu.memory_space<vmem>>, vector<8x512xbf16>
    tpu.vector_store %arg24[%c32_61, %c0_62], %96 {strides = array<i32>} : memref<288x512xbf16, #tpu.memory_space<vmem>>, vector<8x512xbf16>,
    %c511_i32_63 = arith.constant 511 : i32
    %98 = tpu.dynamic_rotate %67 by %c511_i32_63 dim 1 : vector<8x512xf32>, i32 -> vector<8x512xf32>
    %c5_64 = arith.constant 5 : index
    %c0_65 = arith.constant 0 : index
    %c0_66 = arith.constant 0 : index
    %99 = vector.load %arg2[%c5_64, %c0_65, %c0_66] : memref<9x1x512xf32, #tpu.memory_space<vmem>>, vector<1x1x512xf32>
    %100 = vector.shape_cast %99 : vector<1x1x512xf32> to vector<1x512xf32>
    %101 = vector.broadcast %100 : vector<1x512xf32> to vector<8x512xf32>
    %102 = arith.mulf %98, %101 : vector<8x512xf32>
    %103 = arith.truncf %102 : vector<8x512xf32> to vector<8x512xbf16>
    %c40_67 = arith.constant 40 : index
    %c0_68 = arith.constant 0 : index
    %104 = vector.load %arg24[%c40_67, %c0_68] : memref<288x512xbf16, #tpu.memory_space<vmem>>, vector<8x512xbf16>
    tpu.vector_store %arg24[%c40_67, %c0_68], %103 {strides = array<i32>} : memref<288x512xbf16, #tpu.memory_space<vmem>>, vector<8x512xbf16>,
    %c497_i32_69 = arith.constant 497 : i32
    %105 = tpu.dynamic_rotate %67 by %c497_i32_69 dim 1 : vector<8x512xf32>, i32 -> vector<8x512xf32>
    %c6_70 = arith.constant 6 : index
    %c0_71 = arith.constant 0 : index
    %c0_72 = arith.constant 0 : index
    %106 = vector.load %arg2[%c6_70, %c0_71, %c0_72] : memref<9x1x512xf32, #tpu.memory_space<vmem>>, vector<1x1x512xf32>
    %107 = vector.shape_cast %106 : vector<1x1x512xf32> to vector<1x512xf32>
    %108 = vector.broadcast %107 : vector<1x512xf32> to vector<8x512xf32>
    %109 = arith.mulf %105, %108 : vector<8x512xf32>
    %110 = arith.truncf %109 : vector<8x512xf32> to vector<8x512xbf16>
    %c48_73 = arith.constant 48 : index
    %c0_74 = arith.constant 0 : index
    %111 = vector.load %arg24[%c48_73, %c0_74] : memref<288x512xbf16, #tpu.memory_space<vmem>>, vector<8x512xbf16>
    tpu.vector_store %arg24[%c48_73, %c0_74], %110 {strides = array<i32>} : memref<288x512xbf16, #tpu.memory_space<vmem>>, vector<8x512xbf16>,
    %c496_i32_75 = arith.constant 496 : i32
    %112 = tpu.dynamic_rotate %67 by %c496_i32_75 dim 1 : vector<8x512xf32>, i32 -> vector<8x512xf32>
    %c7_76 = arith.constant 7 : index
    %c0_77 = arith.constant 0 : index
    %c0_78 = arith.constant 0 : index
    %113 = vector.load %arg2[%c7_76, %c0_77, %c0_78] : memref<9x1x512xf32, #tpu.memory_space<vmem>>, vector<1x1x512xf32>
    %114 = vector.shape_cast %113 : vector<1x1x512xf32> to vector<1x512xf32>
    %115 = vector.broadcast %114 : vector<1x512xf32> to vector<8x512xf32>
    %116 = arith.mulf %112, %115 : vector<8x512xf32>
    %117 = arith.truncf %116 : vector<8x512xf32> to vector<8x512xbf16>
    %c56_79 = arith.constant 56 : index
    %c0_80 = arith.constant 0 : index
    %118 = vector.load %arg24[%c56_79, %c0_80] : memref<288x512xbf16, #tpu.memory_space<vmem>>, vector<8x512xbf16>
    tpu.vector_store %arg24[%c56_79, %c0_80], %117 {strides = array<i32>} : memref<288x512xbf16, #tpu.memory_space<vmem>>, vector<8x512xbf16>,
    %c495_i32_81 = arith.constant 495 : i32
    %119 = tpu.dynamic_rotate %67 by %c495_i32_81 dim 1 : vector<8x512xf32>, i32 -> vector<8x512xf32>
    %c8_82 = arith.constant 8 : index
    %c0_83 = arith.constant 0 : index
    %c0_84 = arith.constant 0 : index
    %120 = vector.load %arg2[%c8_82, %c0_83, %c0_84] : memref<9x1x512xf32, #tpu.memory_space<vmem>>, vector<1x1x512xf32>
    %121 = vector.shape_cast %120 : vector<1x1x512xf32> to vector<1x512xf32>
    %122 = vector.broadcast %121 : vector<1x512xf32> to vector<8x512xf32>
    %123 = arith.mulf %119, %122 : vector<8x512xf32>
    %124 = arith.truncf %123 : vector<8x512xf32> to vector<8x512xbf16>
    %c64_85 = arith.constant 64 : index
    %c0_86 = arith.constant 0 : index
    %125 = vector.load %arg24[%c64_85, %c0_86] : memref<288x512xbf16, #tpu.memory_space<vmem>>, vector<8x512xbf16>
    tpu.vector_store %arg24[%c64_85, %c0_86], %124 {strides = array<i32>} : memref<288x512xbf16, #tpu.memory_space<vmem>>, vector<8x512xbf16>,
    %c0_87 = arith.constant 0 : index
    %c0_88 = arith.constant 0 : index
    %126 = vector.load %arg4[%c0_87, %c0_88] : memref<8x72xbf16, #tpu.memory_space<vmem>>, vector<8x72xbf16>
    %c0_89 = arith.constant 0 : index
    %c0_90 = arith.constant 0 : index
    %127 = vector.load %arg24[%c0_89, %c0_90] : memref<288x512xbf16, #tpu.memory_space<vmem>>, vector<72x512xbf16>
    %cst_91 = arith.constant dense<0.000000e+00> : vector<8x512xf32>
    %128 = tpu.matmul %126, %127, %cst_91 {dimension_numbers = #tpu.dot_dimension_numbers<[1], [0], [0], [1], [0, 0, 1, 1], [], []>} : vector<8x72xbf16>, vector<72x512xbf16>, vector<8x512xf32> -> vector<8x512xf32>
    %c0_92 = arith.constant 0 : index
    %c0_93 = arith.constant 0 : index
    %129 = vector.load %arg13[%c0_92, %c0_93] : memref<8x1xf32, #tpu.memory_space<vmem>>, vector<8x1xf32>
    %130 = vector.broadcast %129 : vector<8x1xf32> to vector<8x512xf32>
    %131 = arith.addf %128, %130 : vector<8x512xf32>
    %cst_94 = arith.constant 0.000000e+00 : f32
    %132 = vector.broadcast %cst_94 : f32 to vector<8x512xf32>
    %133 = arith.maximumf %131, %132 : vector<8x512xf32>
    %c17_i32_95 = arith.constant 17 : i32
    %134 = tpu.dynamic_rotate %133 by %c17_i32_95 dim 1 : vector<8x512xf32>, i32 -> vector<8x512xf32>
    %c0_96 = arith.constant 0 : index
    %c0_97 = arith.constant 0 : index
    %c0_98 = arith.constant 0 : index
    %135 = vector.load %arg2[%c0_96, %c0_97, %c0_98] : memref<9x1x512xf32, #tpu.memory_space<vmem>>, vector<1x1x512xf32>
    %136 = vector.shape_cast %135 : vector<1x1x512xf32> to vector<1x512xf32>
    %137 = vector.broadcast %136 : vector<1x512xf32> to vector<8x512xf32>
    %138 = arith.mulf %134, %137 : vector<8x512xf32>
    %139 = arith.truncf %138 : vector<8x512xf32> to vector<8x512xbf16>
    %c0_99 = arith.constant 0 : index
    %c0_100 = arith.constant 0 : index
    %140 = vector.load %arg24[%c0_99, %c0_100] : memref<288x512xbf16, #tpu.memory_space<vmem>>, vector<8x512xbf16>
    tpu.vector_store %arg24[%c0_99, %c0_100], %139 {strides = array<i32>} : memref<288x512xbf16, #tpu.memory_space<vmem>>, vector<8x512xbf16>,
    %c16_i32_101 = arith.constant 16 : i32
    %141 = tpu.dynamic_rotate %133 by %c16_i32_101 dim 1 : vector<8x512xf32>, i32 -> vector<8x512xf32>
    %c1_102 = arith.constant 1 : index
    %c0_103 = arith.constant 0 : index
    %c0_104 = arith.constant 0 : index
    %142 = vector.load %arg2[%c1_102, %c0_103, %c0_104] : memref<9x1x512xf32, #tpu.memory_space<vmem>>, vector<1x1x512xf32>
    %143 = vector.shape_cast %142 : vector<1x1x512xf32> to vector<1x512xf32>
    %144 = vector.broadcast %143 : vector<1x512xf32> to vector<8x512xf32>
    %145 = arith.mulf %141, %144 : vector<8x512xf32>
    %146 = arith.truncf %145 : vector<8x512xf32> to vector<8x512xbf16>
    %c8_105 = arith.constant 8 : index
    %c0_106 = arith.constant 0 : index
    %147 = vector.load %arg24[%c8_105, %c0_106] : memref<288x512xbf16, #tpu.memory_space<vmem>>, vector<8x512xbf16>
    tpu.vector_store %arg24[%c8_105, %c0_106], %146 {strides = array<i32>} : memref<288x512xbf16, #tpu.memory_space<vmem>>, vector<8x512xbf16>,
    %c15_i32_107 = arith.constant 15 : i32
    %148 = tpu.dynamic_rotate %133 by %c15_i32_107 dim 1 : vector<8x512xf32>, i32 -> vector<8x512xf32>
    %c2_108 = arith.constant 2 : index
    %c0_109 = arith.constant 0 : index
    %c0_110 = arith.constant 0 : index
    %149 = vector.load %arg2[%c2_108, %c0_109, %c0_110] : memref<9x1x512xf32, #tpu.memory_space<vmem>>, vector<1x1x512xf32>
    %150 = vector.shape_cast %149 : vector<1x1x512xf32> to vector<1x512xf32>
    %151 = vector.broadcast %150 : vector<1x512xf32> to vector<8x512xf32>
    %152 = arith.mulf %148, %151 : vector<8x512xf32>
    %153 = arith.truncf %152 : vector<8x512xf32> to vector<8x512xbf16>
    %c16_111 = arith.constant 16 : index
    %c0_112 = arith.constant 0 : index
    %154 = vector.load %arg24[%c16_111, %c0_112] : memref<288x512xbf16, #tpu.memory_space<vmem>>, vector<8x512xbf16>
    tpu.vector_store %arg24[%c16_111, %c0_112], %153 {strides = array<i32>} : memref<288x512xbf16, #tpu.memory_space<vmem>>, vector<8x512xbf16>,
    %c1_i32_113 = arith.constant 1 : i32
    %155 = tpu.dynamic_rotate %133 by %c1_i32_113 dim 1 : vector<8x512xf32>, i32 -> vector<8x512xf32>
    %c3_114 = arith.constant 3 : index
    %c0_115 = arith.constant 0 : index
    %c0_116 = arith.constant 0 : index
    %156 = vector.load %arg2[%c3_114, %c0_115, %c0_116] : memref<9x1x512xf32, #tpu.memory_space<vmem>>, vector<1x1x512xf32>
    %157 = vector.shape_cast %156 : vector<1x1x512xf32> to vector<1x512xf32>
    %158 = vector.broadcast %157 : vector<1x512xf32> to vector<8x512xf32>
    %159 = arith.mulf %155, %158 : vector<8x512xf32>
    %160 = arith.truncf %159 : vector<8x512xf32> to vector<8x512xbf16>
    %c24_117 = arith.constant 24 : index
    %c0_118 = arith.constant 0 : index
    %161 = vector.load %arg24[%c24_117, %c0_118] : memref<288x512xbf16, #tpu.memory_space<vmem>>, vector<8x512xbf16>
    tpu.vector_store %arg24[%c24_117, %c0_118], %160 {strides = array<i32>} : memref<288x512xbf16, #tpu.memory_space<vmem>>, vector<8x512xbf16>,
    %162 = arith.truncf %133 : vector<8x512xf32> to vector<8x512xbf16>
    %c32_119 = arith.constant 32 : index
    %c0_120 = arith.constant 0 : index
    %163 = vector.load %arg24[%c32_119, %c0_120] : memref<288x512xbf16, #tpu.memory_space<vmem>>, vector<8x512xbf16>
    tpu.vector_store %arg24[%c32_119, %c0_120], %162 {strides = array<i32>} : memref<288x512xbf16, #tpu.memory_space<vmem>>, vector<8x512xbf16>,
    %c511_i32_121 = arith.constant 511 : i32
    %164 = tpu.dynamic_rotate %133 by %c511_i32_121 dim 1 : vector<8x512xf32>, i32 -> vector<8x512xf32>
    %c5_122 = arith.constant 5 : index
    %c0_123 = arith.constant 0 : index
    %c0_124 = arith.constant 0 : index
    %165 = vector.load %arg2[%c5_122, %c0_123, %c0_124] : memref<9x1x512xf32, #tpu.memory_space<vmem>>, vector<1x1x512xf32>
    %166 = vector.shape_cast %165 : vector<1x1x512xf32> to vector<1x512xf32>
    %167 = vector.broadcast %166 : vector<1x512xf32> to vector<8x512xf32>
    %168 = arith.mulf %164, %167 : vector<8x512xf32>
    %169 = arith.truncf %168 : vector<8x512xf32> to vector<8x512xbf16>
    %c40_125 = arith.constant 40 : index
    %c0_126 = arith.constant 0 : index
    %170 = vector.load %arg24[%c40_125, %c0_126] : memref<288x512xbf16, #tpu.memory_space<vmem>>, vector<8x512xbf16>
    tpu.vector_store %arg24[%c40_125, %c0_126], %169 {strides = array<i32>} : memref<288x512xbf16, #tpu.memory_space<vmem>>, vector<8x512xbf16>,
    %c497_i32_127 = arith.constant 497 : i32
    %171 = tpu.dynamic_rotate %133 by %c497_i32_127 dim 1 : vector<8x512xf32>, i32 -> vector<8x512xf32>
    %c6_128 = arith.constant 6 : index
    %c0_129 = arith.constant 0 : index
    %c0_130 = arith.constant 0 : index
    %172 = vector.load %arg2[%c6_128, %c0_129, %c0_130] : memref<9x1x512xf32, #tpu.memory_space<vmem>>, vector<1x1x512xf32>
    %173 = vector.shape_cast %172 : vector<1x1x512xf32> to vector<1x512xf32>
    %174 = vector.broadcast %173 : vector<1x512xf32> to vector<8x512xf32>
    %175 = arith.mulf %171, %174 : vector<8x512xf32>
    %176 = arith.truncf %175 : vector<8x512xf32> to vector<8x512xbf16>
    %c48_131 = arith.constant 48 : index
    %c0_132 = arith.constant 0 : index
    %177 = vector.load %arg24[%c48_131, %c0_132] : memref<288x512xbf16, #tpu.memory_space<vmem>>, vector<8x512xbf16>
    tpu.vector_store %arg24[%c48_131, %c0_132], %176 {strides = array<i32>} : memref<288x512xbf16, #tpu.memory_space<vmem>>, vector<8x512xbf16>,
    %c496_i32_133 = arith.constant 496 : i32
    %178 = tpu.dynamic_rotate %133 by %c496_i32_133 dim 1 : vector<8x512xf32>, i32 -> vector<8x512xf32>
    %c7_134 = arith.constant 7 : index
    %c0_135 = arith.constant 0 : index
    %c0_136 = arith.constant 0 : index
    %179 = vector.load %arg2[%c7_134, %c0_135, %c0_136] : memref<9x1x512xf32, #tpu.memory_space<vmem>>, vector<1x1x512xf32>
    %180 = vector.shape_cast %179 : vector<1x1x512xf32> to vector<1x512xf32>
    %181 = vector.broadcast %180 : vector<1x512xf32> to vector<8x512xf32>
    %182 = arith.mulf %178, %181 : vector<8x512xf32>
    %183 = arith.truncf %182 : vector<8x512xf32> to vector<8x512xbf16>
    %c56_137 = arith.constant 56 : index
    %c0_138 = arith.constant 0 : index
    %184 = vector.load %arg24[%c56_137, %c0_138] : memref<288x512xbf16, #tpu.memory_space<vmem>>, vector<8x512xbf16>
    tpu.vector_store %arg24[%c56_137, %c0_138], %183 {strides = array<i32>} : memref<288x512xbf16, #tpu.memory_space<vmem>>, vector<8x512xbf16>,
    %c495_i32_139 = arith.constant 495 : i32
    %185 = tpu.dynamic_rotate %133 by %c495_i32_139 dim 1 : vector<8x512xf32>, i32 -> vector<8x512xf32>
    %c8_140 = arith.constant 8 : index
    %c0_141 = arith.constant 0 : index
    %c0_142 = arith.constant 0 : index
    %186 = vector.load %arg2[%c8_140, %c0_141, %c0_142] : memref<9x1x512xf32, #tpu.memory_space<vmem>>, vector<1x1x512xf32>
    %187 = vector.shape_cast %186 : vector<1x1x512xf32> to vector<1x512xf32>
    %188 = vector.broadcast %187 : vector<1x512xf32> to vector<8x512xf32>
    %189 = arith.mulf %185, %188 : vector<8x512xf32>
    %190 = arith.truncf %189 : vector<8x512xf32> to vector<8x512xbf16>
    %c64_143 = arith.constant 64 : index
    %c0_144 = arith.constant 0 : index
    %191 = vector.load %arg24[%c64_143, %c0_144] : memref<288x512xbf16, #tpu.memory_space<vmem>>, vector<8x512xbf16>
    tpu.vector_store %arg24[%c64_143, %c0_144], %190 {strides = array<i32>} : memref<288x512xbf16, #tpu.memory_space<vmem>>, vector<8x512xbf16>,
    %c0_145 = arith.constant 0 : index
    %c0_146 = arith.constant 0 : index
    %192 = vector.load %arg5[%c0_145, %c0_146] : memref<16x72xbf16, #tpu.memory_space<vmem>>, vector<16x72xbf16>
    %c0_147 = arith.constant 0 : index
    %c0_148 = arith.constant 0 : index
    %193 = vector.load %arg24[%c0_147, %c0_148] : memref<288x512xbf16, #tpu.memory_space<vmem>>, vector<72x512xbf16>
    %cst_149 = arith.constant dense<0.000000e+00> : vector<16x512xf32>
    %194 = tpu.matmul %192, %193, %cst_149 {dimension_numbers = #tpu.dot_dimension_numbers<[1], [0], [0], [1], [0, 0, 1, 1], [], []>} : vector<16x72xbf16>, vector<72x512xbf16>, vector<16x512xf32> -> vector<16x512xf32>
    %c0_150 = arith.constant 0 : index
    %c0_151 = arith.constant 0 : index
    %195 = vector.load %arg14[%c0_150, %c0_151] : memref<16x1xf32, #tpu.memory_space<vmem>>, vector<16x1xf32>
    %196 = vector.broadcast %195 : vector<16x1xf32> to vector<16x512xf32>
    %197 = arith.addf %194, %196 : vector<16x512xf32>
    %cst_152 = arith.constant 0.000000e+00 : f32
    %198 = vector.broadcast %cst_152 : f32 to vector<16x512xf32>
    %199 = arith.maximumf %197, %198 : vector<16x512xf32>
    %c17_i32_153 = arith.constant 17 : i32
    %200 = tpu.dynamic_rotate %199 by %c17_i32_153 dim 1 : vector<16x512xf32>, i32 -> vector<16x512xf32>
    %c0_154 = arith.constant 0 : index
    %c0_155 = arith.constant 0 : index
    %c0_156 = arith.constant 0 : index
    %201 = vector.load %arg2[%c0_154, %c0_155, %c0_156] : memref<9x1x512xf32, #tpu.memory_space<vmem>>, vector<1x1x512xf32>
    %202 = vector.shape_cast %201 : vector<1x1x512xf32> to vector<1x512xf32>
    %203 = vector.broadcast %202 : vector<1x512xf32> to vector<16x512xf32>
    %204 = arith.mulf %200, %203 : vector<16x512xf32>
    %205 = arith.truncf %204 : vector<16x512xf32> to vector<16x512xbf16>
    %c0_157 = arith.constant 0 : index
    %c0_158 = arith.constant 0 : index
    %206 = vector.load %arg24[%c0_157, %c0_158] : memref<288x512xbf16, #tpu.memory_space<vmem>>, vector<16x512xbf16>
    tpu.vector_store %arg24[%c0_157, %c0_158], %205 {strides = array<i32>} : memref<288x512xbf16, #tpu.memory_space<vmem>>, vector<16x512xbf16>,
    %c16_i32_159 = arith.constant 16 : i32
    %207 = tpu.dynamic_rotate %199 by %c16_i32_159 dim 1 : vector<16x512xf32>, i32 -> vector<16x512xf32>
    %c1_160 = arith.constant 1 : index
    %c0_161 = arith.constant 0 : index
    %c0_162 = arith.constant 0 : index
    %208 = vector.load %arg2[%c1_160, %c0_161, %c0_162] : memref<9x1x512xf32, #tpu.memory_space<vmem>>, vector<1x1x512xf32>
    %209 = vector.shape_cast %208 : vector<1x1x512xf32> to vector<1x512xf32>
    %210 = vector.broadcast %209 : vector<1x512xf32> to vector<16x512xf32>
    %211 = arith.mulf %207, %210 : vector<16x512xf32>
    %212 = arith.truncf %211 : vector<16x512xf32> to vector<16x512xbf16>
    %c16_163 = arith.constant 16 : index
    %c0_164 = arith.constant 0 : index
    %213 = vector.load %arg24[%c16_163, %c0_164] : memref<288x512xbf16, #tpu.memory_space<vmem>>, vector<16x512xbf16>
    tpu.vector_store %arg24[%c16_163, %c0_164], %212 {strides = array<i32>} : memref<288x512xbf16, #tpu.memory_space<vmem>>, vector<16x512xbf16>,
    %c15_i32_165 = arith.constant 15 : i32
    %214 = tpu.dynamic_rotate %199 by %c15_i32_165 dim 1 : vector<16x512xf32>, i32 -> vector<16x512xf32>
    %c2_166 = arith.constant 2 : index
    %c0_167 = arith.constant 0 : index
    %c0_168 = arith.constant 0 : index
    %215 = vector.load %arg2[%c2_166, %c0_167, %c0_168] : memref<9x1x512xf32, #tpu.memory_space<vmem>>, vector<1x1x512xf32>
    %216 = vector.shape_cast %215 : vector<1x1x512xf32> to vector<1x512xf32>
    %217 = vector.broadcast %216 : vector<1x512xf32> to vector<16x512xf32>
    %218 = arith.mulf %214, %217 : vector<16x512xf32>
    %219 = arith.truncf %218 : vector<16x512xf32> to vector<16x512xbf16>
    %c32_169 = arith.constant 32 : index
    %c0_170 = arith.constant 0 : index
    %220 = vector.load %arg24[%c32_169, %c0_170] : memref<288x512xbf16, #tpu.memory_space<vmem>>, vector<16x512xbf16>
    tpu.vector_store %arg24[%c32_169, %c0_170], %219 {strides = array<i32>} : memref<288x512xbf16, #tpu.memory_space<vmem>>, vector<16x512xbf16>,
    %c1_i32_171 = arith.constant 1 : i32
    %221 = tpu.dynamic_rotate %199 by %c1_i32_171 dim 1 : vector<16x512xf32>, i32 -> vector<16x512xf32>
    %c3_172 = arith.constant 3 : index
    %c0_173 = arith.constant 0 : index
    %c0_174 = arith.constant 0 : index
    %222 = vector.load %arg2[%c3_172, %c0_173, %c0_174] : memref<9x1x512xf32, #tpu.memory_space<vmem>>, vector<1x1x512xf32>
    %223 = vector.shape_cast %222 : vector<1x1x512xf32> to vector<1x512xf32>
    %224 = vector.broadcast %223 : vector<1x512xf32> to vector<16x512xf32>
    %225 = arith.mulf %221, %224 : vector<16x512xf32>
    %226 = arith.truncf %225 : vector<16x512xf32> to vector<16x512xbf16>
    %c48_175 = arith.constant 48 : index
    %c0_176 = arith.constant 0 : index
    %227 = vector.load %arg24[%c48_175, %c0_176] : memref<288x512xbf16, #tpu.memory_space<vmem>>, vector<16x512xbf16>
    tpu.vector_store %arg24[%c48_175, %c0_176], %226 {strides = array<i32>} : memref<288x512xbf16, #tpu.memory_space<vmem>>, vector<16x512xbf16>,
    %228 = arith.truncf %199 : vector<16x512xf32> to vector<16x512xbf16>
    %c64_177 = arith.constant 64 : index
    %c0_178 = arith.constant 0 : index
    %229 = vector.load %arg24[%c64_177, %c0_178] : memref<288x512xbf16, #tpu.memory_space<vmem>>, vector<16x512xbf16>
    tpu.vector_store %arg24[%c64_177, %c0_178], %228 {strides = array<i32>} : memref<288x512xbf16, #tpu.memory_space<vmem>>, vector<16x512xbf16>,
    %c511_i32_179 = arith.constant 511 : i32
    %230 = tpu.dynamic_rotate %199 by %c511_i32_179 dim 1 : vector<16x512xf32>, i32 -> vector<16x512xf32>
    %c5_180 = arith.constant 5 : index
    %c0_181 = arith.constant 0 : index
    %c0_182 = arith.constant 0 : index
    %231 = vector.load %arg2[%c5_180, %c0_181, %c0_182] : memref<9x1x512xf32, #tpu.memory_space<vmem>>, vector<1x1x512xf32>
    %232 = vector.shape_cast %231 : vector<1x1x512xf32> to vector<1x512xf32>
    %233 = vector.broadcast %232 : vector<1x512xf32> to vector<16x512xf32>
    %234 = arith.mulf %230, %233 : vector<16x512xf32>
    %235 = arith.truncf %234 : vector<16x512xf32> to vector<16x512xbf16>
    %c80 = arith.constant 80 : index
    %c0_183 = arith.constant 0 : index
    %236 = vector.load %arg24[%c80, %c0_183] : memref<288x512xbf16, #tpu.memory_space<vmem>>, vector<16x512xbf16>
    tpu.vector_store %arg24[%c80, %c0_183], %235 {strides = array<i32>} : memref<288x512xbf16, #tpu.memory_space<vmem>>, vector<16x512xbf16>,
    %c497_i32_184 = arith.constant 497 : i32
    %237 = tpu.dynamic_rotate %199 by %c497_i32_184 dim 1 : vector<16x512xf32>, i32 -> vector<16x512xf32>
    %c6_185 = arith.constant 6 : index
    %c0_186 = arith.constant 0 : index
    %c0_187 = arith.constant 0 : index
    %238 = vector.load %arg2[%c6_185, %c0_186, %c0_187] : memref<9x1x512xf32, #tpu.memory_space<vmem>>, vector<1x1x512xf32>
    %239 = vector.shape_cast %238 : vector<1x1x512xf32> to vector<1x512xf32>
    %240 = vector.broadcast %239 : vector<1x512xf32> to vector<16x512xf32>
    %241 = arith.mulf %237, %240 : vector<16x512xf32>
    %242 = arith.truncf %241 : vector<16x512xf32> to vector<16x512xbf16>
    %c96 = arith.constant 96 : index
    %c0_188 = arith.constant 0 : index
    %243 = vector.load %arg24[%c96, %c0_188] : memref<288x512xbf16, #tpu.memory_space<vmem>>, vector<16x512xbf16>
    tpu.vector_store %arg24[%c96, %c0_188], %242 {strides = array<i32>} : memref<288x512xbf16, #tpu.memory_space<vmem>>, vector<16x512xbf16>,
    %c496_i32_189 = arith.constant 496 : i32
    %244 = tpu.dynamic_rotate %199 by %c496_i32_189 dim 1 : vector<16x512xf32>, i32 -> vector<16x512xf32>
    %c7_190 = arith.constant 7 : index
    %c0_191 = arith.constant 0 : index
    %c0_192 = arith.constant 0 : index
    %245 = vector.load %arg2[%c7_190, %c0_191, %c0_192] : memref<9x1x512xf32, #tpu.memory_space<vmem>>, vector<1x1x512xf32>
    %246 = vector.shape_cast %245 : vector<1x1x512xf32> to vector<1x512xf32>
    %247 = vector.broadcast %246 : vector<1x512xf32> to vector<16x512xf32>
    %248 = arith.mulf %244, %247 : vector<16x512xf32>
    %249 = arith.truncf %248 : vector<16x512xf32> to vector<16x512xbf16>
    %c112 = arith.constant 112 : index
    %c0_193 = arith.constant 0 : index
    %250 = vector.load %arg24[%c112, %c0_193] : memref<288x512xbf16, #tpu.memory_space<vmem>>, vector<16x512xbf16>
    tpu.vector_store %arg24[%c112, %c0_193], %249 {strides = array<i32>} : memref<288x512xbf16, #tpu.memory_space<vmem>>, vector<16x512xbf16>,
    %c495_i32_194 = arith.constant 495 : i32
    %251 = tpu.dynamic_rotate %199 by %c495_i32_194 dim 1 : vector<16x512xf32>, i32 -> vector<16x512xf32>
    %c8_195 = arith.constant 8 : index
    %c0_196 = arith.constant 0 : index
    %c0_197 = arith.constant 0 : index
    %252 = vector.load %arg2[%c8_195, %c0_196, %c0_197] : memref<9x1x512xf32, #tpu.memory_space<vmem>>, vector<1x1x512xf32>
    %253 = vector.shape_cast %252 : vector<1x1x512xf32> to vector<1x512xf32>
    %254 = vector.broadcast %253 : vector<1x512xf32> to vector<16x512xf32>
    %255 = arith.mulf %251, %254 : vector<16x512xf32>
    %256 = arith.truncf %255 : vector<16x512xf32> to vector<16x512xbf16>
    %c128 = arith.constant 128 : index
    %c0_198 = arith.constant 0 : index
    %257 = vector.load %arg24[%c128, %c0_198] : memref<288x512xbf16, #tpu.memory_space<vmem>>, vector<16x512xbf16>
    tpu.vector_store %arg24[%c128, %c0_198], %256 {strides = array<i32>} : memref<288x512xbf16, #tpu.memory_space<vmem>>, vector<16x512xbf16>,
    %c0_199 = arith.constant 0 : index
    %c0_200 = arith.constant 0 : index
    %258 = vector.load %arg6[%c0_199, %c0_200] : memref<16x144xbf16, #tpu.memory_space<vmem>>, vector<16x144xbf16>
    %c0_201 = arith.constant 0 : index
    %c0_202 = arith.constant 0 : index
    %259 = vector.load %arg24[%c0_201, %c0_202] : memref<288x512xbf16, #tpu.memory_space<vmem>>, vector<144x512xbf16>
    %cst_203 = arith.constant dense<0.000000e+00> : vector<16x512xf32>
    %260 = tpu.matmul %258, %259, %cst_203 {dimension_numbers = #tpu.dot_dimension_numbers<[1], [0], [0], [1], [0, 0, 1, 1], [], []>} : vector<16x144xbf16>, vector<144x512xbf16>, vector<16x512xf32> -> vector<16x512xf32>
    %c0_204 = arith.constant 0 : index
    %c0_205 = arith.constant 0 : index
    %261 = vector.load %arg15[%c0_204, %c0_205] : memref<16x1xf32, #tpu.memory_space<vmem>>, vector<16x1xf32>
    %262 = vector.broadcast %261 : vector<16x1xf32> to vector<16x512xf32>
    %263 = arith.addf %260, %262 : vector<16x512xf32>
    %cst_206 = arith.constant 0.000000e+00 : f32
    %264 = vector.broadcast %cst_206 : f32 to vector<16x512xf32>
    %265 = arith.maximumf %263, %264 : vector<16x512xf32>
    %c17_i32_207 = arith.constant 17 : i32
    %266 = tpu.dynamic_rotate %265 by %c17_i32_207 dim 1 : vector<16x512xf32>, i32 -> vector<16x512xf32>
    %c0_208 = arith.constant 0 : index
    %c0_209 = arith.constant 0 : index
    %c0_210 = arith.constant 0 : index
    %267 = vector.load %arg2[%c0_208, %c0_209, %c0_210] : memref<9x1x512xf32, #tpu.memory_space<vmem>>, vector<1x1x512xf32>
    %268 = vector.shape_cast %267 : vector<1x1x512xf32> to vector<1x512xf32>
    %269 = vector.broadcast %268 : vector<1x512xf32> to vector<16x512xf32>
    %270 = arith.mulf %266, %269 : vector<16x512xf32>
    %271 = arith.truncf %270 : vector<16x512xf32> to vector<16x512xbf16>
    %c0_211 = arith.constant 0 : index
    %c0_212 = arith.constant 0 : index
    %272 = vector.load %arg24[%c0_211, %c0_212] : memref<288x512xbf16, #tpu.memory_space<vmem>>, vector<16x512xbf16>
    tpu.vector_store %arg24[%c0_211, %c0_212], %271 {strides = array<i32>} : memref<288x512xbf16, #tpu.memory_space<vmem>>, vector<16x512xbf16>,
    %c16_i32_213 = arith.constant 16 : i32
    %273 = tpu.dynamic_rotate %265 by %c16_i32_213 dim 1 : vector<16x512xf32>, i32 -> vector<16x512xf32>
    %c1_214 = arith.constant 1 : index
    %c0_215 = arith.constant 0 : index
    %c0_216 = arith.constant 0 : index
    %274 = vector.load %arg2[%c1_214, %c0_215, %c0_216] : memref<9x1x512xf32, #tpu.memory_space<vmem>>, vector<1x1x512xf32>
    %275 = vector.shape_cast %274 : vector<1x1x512xf32> to vector<1x512xf32>
    %276 = vector.broadcast %275 : vector<1x512xf32> to vector<16x512xf32>
    %277 = arith.mulf %273, %276 : vector<16x512xf32>
    %278 = arith.truncf %277 : vector<16x512xf32> to vector<16x512xbf16>
    %c16_217 = arith.constant 16 : index
    %c0_218 = arith.constant 0 : index
    %279 = vector.load %arg24[%c16_217, %c0_218] : memref<288x512xbf16, #tpu.memory_space<vmem>>, vector<16x512xbf16>
    tpu.vector_store %arg24[%c16_217, %c0_218], %278 {strides = array<i32>} : memref<288x512xbf16, #tpu.memory_space<vmem>>, vector<16x512xbf16>,
    %c15_i32_219 = arith.constant 15 : i32
    %280 = tpu.dynamic_rotate %265 by %c15_i32_219 dim 1 : vector<16x512xf32>, i32 -> vector<16x512xf32>
    %c2_220 = arith.constant 2 : index
    %c0_221 = arith.constant 0 : index
    %c0_222 = arith.constant 0 : index
    %281 = vector.load %arg2[%c2_220, %c0_221, %c0_222] : memref<9x1x512xf32, #tpu.memory_space<vmem>>, vector<1x1x512xf32>
    %282 = vector.shape_cast %281 : vector<1x1x512xf32> to vector<1x512xf32>
    %283 = vector.broadcast %282 : vector<1x512xf32> to vector<16x512xf32>
    %284 = arith.mulf %280, %283 : vector<16x512xf32>
    %285 = arith.truncf %284 : vector<16x512xf32> to vector<16x512xbf16>
    %c32_223 = arith.constant 32 : index
    %c0_224 = arith.constant 0 : index
    %286 = vector.load %arg24[%c32_223, %c0_224] : memref<288x512xbf16, #tpu.memory_space<vmem>>, vector<16x512xbf16>
    tpu.vector_store %arg24[%c32_223, %c0_224], %285 {strides = array<i32>} : memref<288x512xbf16, #tpu.memory_space<vmem>>, vector<16x512xbf16>,
    %c1_i32_225 = arith.constant 1 : i32
    %287 = tpu.dynamic_rotate %265 by %c1_i32_225 dim 1 : vector<16x512xf32>, i32 -> vector<16x512xf32>
    %c3_226 = arith.constant 3 : index
    %c0_227 = arith.constant 0 : index
    %c0_228 = arith.constant 0 : index
    %288 = vector.load %arg2[%c3_226, %c0_227, %c0_228] : memref<9x1x512xf32, #tpu.memory_space<vmem>>, vector<1x1x512xf32>
    %289 = vector.shape_cast %288 : vector<1x1x512xf32> to vector<1x512xf32>
    %290 = vector.broadcast %289 : vector<1x512xf32> to vector<16x512xf32>
    %291 = arith.mulf %287, %290 : vector<16x512xf32>
    %292 = arith.truncf %291 : vector<16x512xf32> to vector<16x512xbf16>
    %c48_229 = arith.constant 48 : index
    %c0_230 = arith.constant 0 : index
    %293 = vector.load %arg24[%c48_229, %c0_230] : memref<288x512xbf16, #tpu.memory_space<vmem>>, vector<16x512xbf16>
    tpu.vector_store %arg24[%c48_229, %c0_230], %292 {strides = array<i32>} : memref<288x512xbf16, #tpu.memory_space<vmem>>, vector<16x512xbf16>,
    %294 = arith.truncf %265 : vector<16x512xf32> to vector<16x512xbf16>
    %c64_231 = arith.constant 64 : index
    %c0_232 = arith.constant 0 : index
    %295 = vector.load %arg24[%c64_231, %c0_232] : memref<288x512xbf16, #tpu.memory_space<vmem>>, vector<16x512xbf16>
    tpu.vector_store %arg24[%c64_231, %c0_232], %294 {strides = array<i32>} : memref<288x512xbf16, #tpu.memory_space<vmem>>, vector<16x512xbf16>,
    %c511_i32_233 = arith.constant 511 : i32
    %296 = tpu.dynamic_rotate %265 by %c511_i32_233 dim 1 : vector<16x512xf32>, i32 -> vector<16x512xf32>
    %c5_234 = arith.constant 5 : index
    %c0_235 = arith.constant 0 : index
    %c0_236 = arith.constant 0 : index
    %297 = vector.load %arg2[%c5_234, %c0_235, %c0_236] : memref<9x1x512xf32, #tpu.memory_space<vmem>>, vector<1x1x512xf32>
    %298 = vector.shape_cast %297 : vector<1x1x512xf32> to vector<1x512xf32>
    %299 = vector.broadcast %298 : vector<1x512xf32> to vector<16x512xf32>
    %300 = arith.mulf %296, %299 : vector<16x512xf32>
    %301 = arith.truncf %300 : vector<16x512xf32> to vector<16x512xbf16>
    %c80_237 = arith.constant 80 : index
    %c0_238 = arith.constant 0 : index
    %302 = vector.load %arg24[%c80_237, %c0_238] : memref<288x512xbf16, #tpu.memory_space<vmem>>, vector<16x512xbf16>
    tpu.vector_store %arg24[%c80_237, %c0_238], %301 {strides = array<i32>} : memref<288x512xbf16, #tpu.memory_space<vmem>>, vector<16x512xbf16>,
    %c497_i32_239 = arith.constant 497 : i32
    %303 = tpu.dynamic_rotate %265 by %c497_i32_239 dim 1 : vector<16x512xf32>, i32 -> vector<16x512xf32>
    %c6_240 = arith.constant 6 : index
    %c0_241 = arith.constant 0 : index
    %c0_242 = arith.constant 0 : index
    %304 = vector.load %arg2[%c6_240, %c0_241, %c0_242] : memref<9x1x512xf32, #tpu.memory_space<vmem>>, vector<1x1x512xf32>
    %305 = vector.shape_cast %304 : vector<1x1x512xf32> to vector<1x512xf32>
    %306 = vector.broadcast %305 : vector<1x512xf32> to vector<16x512xf32>
    %307 = arith.mulf %303, %306 : vector<16x512xf32>
    %308 = arith.truncf %307 : vector<16x512xf32> to vector<16x512xbf16>
    %c96_243 = arith.constant 96 : index
    %c0_244 = arith.constant 0 : index
    %309 = vector.load %arg24[%c96_243, %c0_244] : memref<288x512xbf16, #tpu.memory_space<vmem>>, vector<16x512xbf16>
    tpu.vector_store %arg24[%c96_243, %c0_244], %308 {strides = array<i32>} : memref<288x512xbf16, #tpu.memory_space<vmem>>, vector<16x512xbf16>,
    %c496_i32_245 = arith.constant 496 : i32
    %310 = tpu.dynamic_rotate %265 by %c496_i32_245 dim 1 : vector<16x512xf32>, i32 -> vector<16x512xf32>
    %c7_246 = arith.constant 7 : index
    %c0_247 = arith.constant 0 : index
    %c0_248 = arith.constant 0 : index
    %311 = vector.load %arg2[%c7_246, %c0_247, %c0_248] : memref<9x1x512xf32, #tpu.memory_space<vmem>>, vector<1x1x512xf32>
    %312 = vector.shape_cast %311 : vector<1x1x512xf32> to vector<1x512xf32>
    %313 = vector.broadcast %312 : vector<1x512xf32> to vector<16x512xf32>
    %314 = arith.mulf %310, %313 : vector<16x512xf32>
    %315 = arith.truncf %314 : vector<16x512xf32> to vector<16x512xbf16>
    %c112_249 = arith.constant 112 : index
    %c0_250 = arith.constant 0 : index
    %316 = vector.load %arg24[%c112_249, %c0_250] : memref<288x512xbf16, #tpu.memory_space<vmem>>, vector<16x512xbf16>
    tpu.vector_store %arg24[%c112_249, %c0_250], %315 {strides = array<i32>} : memref<288x512xbf16, #tpu.memory_space<vmem>>, vector<16x512xbf16>,
    %c495_i32_251 = arith.constant 495 : i32
    %317 = tpu.dynamic_rotate %265 by %c495_i32_251 dim 1 : vector<16x512xf32>, i32 -> vector<16x512xf32>
    %c8_252 = arith.constant 8 : index
    %c0_253 = arith.constant 0 : index
    %c0_254 = arith.constant 0 : index
    %318 = vector.load %arg2[%c8_252, %c0_253, %c0_254] : memref<9x1x512xf32, #tpu.memory_space<vmem>>, vector<1x1x512xf32>
    %319 = vector.shape_cast %318 : vector<1x1x512xf32> to vector<1x512xf32>
    %320 = vector.broadcast %319 : vector<1x512xf32> to vector<16x512xf32>
    %321 = arith.mulf %317, %320 : vector<16x512xf32>
    %322 = arith.truncf %321 : vector<16x512xf32> to vector<16x512xbf16>
    %c128_255 = arith.constant 128 : index
    %c0_256 = arith.constant 0 : index
    %323 = vector.load %arg24[%c128_255, %c0_256] : memref<288x512xbf16, #tpu.memory_space<vmem>>, vector<16x512xbf16>
    tpu.vector_store %arg24[%c128_255, %c0_256], %322 {strides = array<i32>} : memref<288x512xbf16, #tpu.memory_space<vmem>>, vector<16x512xbf16>,
    %c0_257 = arith.constant 0 : index
    %c0_258 = arith.constant 0 : index
    %324 = vector.load %arg7[%c0_257, %c0_258] : memref<16x144xbf16, #tpu.memory_space<vmem>>, vector<16x144xbf16>
    %c0_259 = arith.constant 0 : index
    %c0_260 = arith.constant 0 : index
    %325 = vector.load %arg24[%c0_259, %c0_260] : memref<288x512xbf16, #tpu.memory_space<vmem>>, vector<144x512xbf16>
    %cst_261 = arith.constant dense<0.000000e+00> : vector<16x512xf32>
    %326 = tpu.matmul %324, %325, %cst_261 {dimension_numbers = #tpu.dot_dimension_numbers<[1], [0], [0], [1], [0, 0, 1, 1], [], []>} : vector<16x144xbf16>, vector<144x512xbf16>, vector<16x512xf32> -> vector<16x512xf32>
    %c0_262 = arith.constant 0 : index
    %c0_263 = arith.constant 0 : index
    %327 = vector.load %arg16[%c0_262, %c0_263] : memref<16x1xf32, #tpu.memory_space<vmem>>, vector<16x1xf32>
    %328 = vector.broadcast %327 : vector<16x1xf32> to vector<16x512xf32>
    %329 = arith.addf %326, %328 : vector<16x512xf32>
    %cst_264 = arith.constant 0.000000e+00 : f32
    %330 = vector.broadcast %cst_264 : f32 to vector<16x512xf32>
    %331 = arith.maximumf %329, %330 : vector<16x512xf32>
    %c0_265 = arith.constant 0 : index
    %c0_266 = arith.constant 0 : index
    %c0_267 = arith.constant 0 : index
    %332 = vector.load %arg21[%c0_265, %c0_266, %c0_267] : memref<1x16x512xf32, #tpu.memory_space<vmem>>, vector<1x16x512xf32>
    %333 = vector.shape_cast %332 : vector<1x16x512xf32> to vector<16x512xf32>
    %334 = vector.shape_cast %331 : vector<16x512xf32> to vector<1x16x512xf32>
    tpu.vector_store %arg21[%c0_265, %c0_266, %c0_267], %334 {strides = array<i32>} : memref<1x16x512xf32, #tpu.memory_space<vmem>>, vector<1x16x512xf32>,
    %c17_i32_268 = arith.constant 17 : i32
    %335 = tpu.dynamic_rotate %331 by %c17_i32_268 dim 1 : vector<16x512xf32>, i32 -> vector<16x512xf32>
    %c0_269 = arith.constant 0 : index
    %c0_270 = arith.constant 0 : index
    %c0_271 = arith.constant 0 : index
    %336 = vector.load %arg2[%c0_269, %c0_270, %c0_271] : memref<9x1x512xf32, #tpu.memory_space<vmem>>, vector<1x1x512xf32>
    %337 = vector.shape_cast %336 : vector<1x1x512xf32> to vector<1x512xf32>
    %338 = vector.broadcast %337 : vector<1x512xf32> to vector<16x512xf32>
    %339 = arith.mulf %335, %338 : vector<16x512xf32>
    %340 = arith.truncf %339 : vector<16x512xf32> to vector<16x512xbf16>
    %c0_272 = arith.constant 0 : index
    %c0_273 = arith.constant 0 : index
    %341 = vector.load %arg24[%c0_272, %c0_273] : memref<288x512xbf16, #tpu.memory_space<vmem>>, vector<16x512xbf16>
    tpu.vector_store %arg24[%c0_272, %c0_273], %340 {strides = array<i32>} : memref<288x512xbf16, #tpu.memory_space<vmem>>, vector<16x512xbf16>,
    %c16_i32_274 = arith.constant 16 : i32
    %342 = tpu.dynamic_rotate %331 by %c16_i32_274 dim 1 : vector<16x512xf32>, i32 -> vector<16x512xf32>
    %c1_275 = arith.constant 1 : index
    %c0_276 = arith.constant 0 : index
    %c0_277 = arith.constant 0 : index
    %343 = vector.load %arg2[%c1_275, %c0_276, %c0_277] : memref<9x1x512xf32, #tpu.memory_space<vmem>>, vector<1x1x512xf32>
    %344 = vector.shape_cast %343 : vector<1x1x512xf32> to vector<1x512xf32>
    %345 = vector.broadcast %344 : vector<1x512xf32> to vector<16x512xf32>
    %346 = arith.mulf %342, %345 : vector<16x512xf32>
    %347 = arith.truncf %346 : vector<16x512xf32> to vector<16x512xbf16>
    %c16_278 = arith.constant 16 : index
    %c0_279 = arith.constant 0 : index
    %348 = vector.load %arg24[%c16_278, %c0_279] : memref<288x512xbf16, #tpu.memory_space<vmem>>, vector<16x512xbf16>
    tpu.vector_store %arg24[%c16_278, %c0_279], %347 {strides = array<i32>} : memref<288x512xbf16, #tpu.memory_space<vmem>>, vector<16x512xbf16>,
    %c15_i32_280 = arith.constant 15 : i32
    %349 = tpu.dynamic_rotate %331 by %c15_i32_280 dim 1 : vector<16x512xf32>, i32 -> vector<16x512xf32>
    %c2_281 = arith.constant 2 : index
    %c0_282 = arith.constant 0 : index
    %c0_283 = arith.constant 0 : index
    %350 = vector.load %arg2[%c2_281, %c0_282, %c0_283] : memref<9x1x512xf32, #tpu.memory_space<vmem>>, vector<1x1x512xf32>
    %351 = vector.shape_cast %350 : vector<1x1x512xf32> to vector<1x512xf32>
    %352 = vector.broadcast %351 : vector<1x512xf32> to vector<16x512xf32>
    %353 = arith.mulf %349, %352 : vector<16x512xf32>
    %354 = arith.truncf %353 : vector<16x512xf32> to vector<16x512xbf16>
    %c32_284 = arith.constant 32 : index
    %c0_285 = arith.constant 0 : index
    %355 = vector.load %arg24[%c32_284, %c0_285] : memref<288x512xbf16, #tpu.memory_space<vmem>>, vector<16x512xbf16>
    tpu.vector_store %arg24[%c32_284, %c0_285], %354 {strides = array<i32>} : memref<288x512xbf16, #tpu.memory_space<vmem>>, vector<16x512xbf16>,
    %c1_i32_286 = arith.constant 1 : i32
    %356 = tpu.dynamic_rotate %331 by %c1_i32_286 dim 1 : vector<16x512xf32>, i32 -> vector<16x512xf32>
    %c3_287 = arith.constant 3 : index
    %c0_288 = arith.constant 0 : index
    %c0_289 = arith.constant 0 : index
    %357 = vector.load %arg2[%c3_287, %c0_288, %c0_289] : memref<9x1x512xf32, #tpu.memory_space<vmem>>, vector<1x1x512xf32>
    %358 = vector.shape_cast %357 : vector<1x1x512xf32> to vector<1x512xf32>
    %359 = vector.broadcast %358 : vector<1x512xf32> to vector<16x512xf32>
    %360 = arith.mulf %356, %359 : vector<16x512xf32>
    %361 = arith.truncf %360 : vector<16x512xf32> to vector<16x512xbf16>
    %c48_290 = arith.constant 48 : index
    %c0_291 = arith.constant 0 : index
    %362 = vector.load %arg24[%c48_290, %c0_291] : memref<288x512xbf16, #tpu.memory_space<vmem>>, vector<16x512xbf16>
    tpu.vector_store %arg24[%c48_290, %c0_291], %361 {strides = array<i32>} : memref<288x512xbf16, #tpu.memory_space<vmem>>, vector<16x512xbf16>,
    %363 = arith.truncf %331 : vector<16x512xf32> to vector<16x512xbf16>
    %c64_292 = arith.constant 64 : index
    %c0_293 = arith.constant 0 : index
    %364 = vector.load %arg24[%c64_292, %c0_293] : memref<288x512xbf16, #tpu.memory_space<vmem>>, vector<16x512xbf16>
    tpu.vector_store %arg24[%c64_292, %c0_293], %363 {strides = array<i32>} : memref<288x512xbf16, #tpu.memory_space<vmem>>, vector<16x512xbf16>,
    %c511_i32_294 = arith.constant 511 : i32
    %365 = tpu.dynamic_rotate %331 by %c511_i32_294 dim 1 : vector<16x512xf32>, i32 -> vector<16x512xf32>
    %c5_295 = arith.constant 5 : index
    %c0_296 = arith.constant 0 : index
    %c0_297 = arith.constant 0 : index
    %366 = vector.load %arg2[%c5_295, %c0_296, %c0_297] : memref<9x1x512xf32, #tpu.memory_space<vmem>>, vector<1x1x512xf32>
    %367 = vector.shape_cast %366 : vector<1x1x512xf32> to vector<1x512xf32>
    %368 = vector.broadcast %367 : vector<1x512xf32> to vector<16x512xf32>
    %369 = arith.mulf %365, %368 : vector<16x512xf32>
    %370 = arith.truncf %369 : vector<16x512xf32> to vector<16x512xbf16>
    %c80_298 = arith.constant 80 : index
    %c0_299 = arith.constant 0 : index
    %371 = vector.load %arg24[%c80_298, %c0_299] : memref<288x512xbf16, #tpu.memory_space<vmem>>, vector<16x512xbf16>
    tpu.vector_store %arg24[%c80_298, %c0_299], %370 {strides = array<i32>} : memref<288x512xbf16, #tpu.memory_space<vmem>>, vector<16x512xbf16>,
    %c497_i32_300 = arith.constant 497 : i32
    %372 = tpu.dynamic_rotate %331 by %c497_i32_300 dim 1 : vector<16x512xf32>, i32 -> vector<16x512xf32>
    %c6_301 = arith.constant 6 : index
    %c0_302 = arith.constant 0 : index
    %c0_303 = arith.constant 0 : index
    %373 = vector.load %arg2[%c6_301, %c0_302, %c0_303] : memref<9x1x512xf32, #tpu.memory_space<vmem>>, vector<1x1x512xf32>
    %374 = vector.shape_cast %373 : vector<1x1x512xf32> to vector<1x512xf32>
    %375 = vector.broadcast %374 : vector<1x512xf32> to vector<16x512xf32>
    %376 = arith.mulf %372, %375 : vector<16x512xf32>
    %377 = arith.truncf %376 : vector<16x512xf32> to vector<16x512xbf16>
    %c96_304 = arith.constant 96 : index
    %c0_305 = arith.constant 0 : index
    %378 = vector.load %arg24[%c96_304, %c0_305] : memref<288x512xbf16, #tpu.memory_space<vmem>>, vector<16x512xbf16>
    tpu.vector_store %arg24[%c96_304, %c0_305], %377 {strides = array<i32>} : memref<288x512xbf16, #tpu.memory_space<vmem>>, vector<16x512xbf16>,
    %c496_i32_306 = arith.constant 496 : i32
    %379 = tpu.dynamic_rotate %331 by %c496_i32_306 dim 1 : vector<16x512xf32>, i32 -> vector<16x512xf32>
    %c7_307 = arith.constant 7 : index
    %c0_308 = arith.constant 0 : index
    %c0_309 = arith.constant 0 : index
    %380 = vector.load %arg2[%c7_307, %c0_308, %c0_309] : memref<9x1x512xf32, #tpu.memory_space<vmem>>, vector<1x1x512xf32>
    %381 = vector.shape_cast %380 : vector<1x1x512xf32> to vector<1x512xf32>
    %382 = vector.broadcast %381 : vector<1x512xf32> to vector<16x512xf32>
    %383 = arith.mulf %379, %382 : vector<16x512xf32>
    %384 = arith.truncf %383 : vector<16x512xf32> to vector<16x512xbf16>
    %c112_310 = arith.constant 112 : index
    %c0_311 = arith.constant 0 : index
    %385 = vector.load %arg24[%c112_310, %c0_311] : memref<288x512xbf16, #tpu.memory_space<vmem>>, vector<16x512xbf16>
    tpu.vector_store %arg24[%c112_310, %c0_311], %384 {strides = array<i32>} : memref<288x512xbf16, #tpu.memory_space<vmem>>, vector<16x512xbf16>,
    %c495_i32_312 = arith.constant 495 : i32
    %386 = tpu.dynamic_rotate %331 by %c495_i32_312 dim 1 : vector<16x512xf32>, i32 -> vector<16x512xf32>
    %c8_313 = arith.constant 8 : index
    %c0_314 = arith.constant 0 : index
    %c0_315 = arith.constant 0 : index
    %387 = vector.load %arg2[%c8_313, %c0_314, %c0_315] : memref<9x1x512xf32, #tpu.memory_space<vmem>>, vector<1x1x512xf32>
    %388 = vector.shape_cast %387 : vector<1x1x512xf32> to vector<1x512xf32>
    %389 = vector.broadcast %388 : vector<1x512xf32> to vector<16x512xf32>
    %390 = arith.mulf %386, %389 : vector<16x512xf32>
    %391 = arith.truncf %390 : vector<16x512xf32> to vector<16x512xbf16>
    %c128_316 = arith.constant 128 : index
    %c0_317 = arith.constant 0 : index
    %392 = vector.load %arg24[%c128_316, %c0_317] : memref<288x512xbf16, #tpu.memory_space<vmem>>, vector<16x512xbf16>
    tpu.vector_store %arg24[%c128_316, %c0_317], %391 {strides = array<i32>} : memref<288x512xbf16, #tpu.memory_space<vmem>>, vector<16x512xbf16>,
    %c0_318 = arith.constant 0 : index
    %c0_319 = arith.constant 0 : index
    %393 = vector.load %arg8[%c0_318, %c0_319] : memref<32x144xbf16, #tpu.memory_space<vmem>>, vector<32x144xbf16>
    %c0_320 = arith.constant 0 : index
    %c0_321 = arith.constant 0 : index
    %394 = vector.load %arg24[%c0_320, %c0_321] : memref<288x512xbf16, #tpu.memory_space<vmem>>, vector<144x512xbf16>
    %cst_322 = arith.constant dense<0.000000e+00> : vector<32x512xf32>
    %395 = tpu.matmul %393, %394, %cst_322 {dimension_numbers = #tpu.dot_dimension_numbers<[1], [0], [0], [1], [0, 0, 1, 1], [], []>} : vector<32x144xbf16>, vector<144x512xbf16>, vector<32x512xf32> -> vector<32x512xf32>
    %c0_323 = arith.constant 0 : index
    %c0_324 = arith.constant 0 : index
    %396 = vector.load %arg17[%c0_323, %c0_324] : memref<32x1xf32, #tpu.memory_space<vmem>>, vector<32x1xf32>
    %397 = vector.broadcast %396 : vector<32x1xf32> to vector<32x512xf32>
    %398 = arith.addf %395, %397 : vector<32x512xf32>
    %cst_325 = arith.constant 0.000000e+00 : f32
    %399 = vector.broadcast %cst_325 : f32 to vector<32x512xf32>
    %400 = arith.maximumf %398, %399 : vector<32x512xf32>
    %c17_i32_326 = arith.constant 17 : i32
    %401 = tpu.dynamic_rotate %400 by %c17_i32_326 dim 1 : vector<32x512xf32>, i32 -> vector<32x512xf32>
    %c0_327 = arith.constant 0 : index
    %c0_328 = arith.constant 0 : index
    %c0_329 = arith.constant 0 : index
    %402 = vector.load %arg2[%c0_327, %c0_328, %c0_329] : memref<9x1x512xf32, #tpu.memory_space<vmem>>, vector<1x1x512xf32>
    %403 = vector.shape_cast %402 : vector<1x1x512xf32> to vector<1x512xf32>
    %404 = vector.broadcast %403 : vector<1x512xf32> to vector<32x512xf32>
    %405 = arith.mulf %401, %404 : vector<32x512xf32>
    %406 = arith.truncf %405 : vector<32x512xf32> to vector<32x512xbf16>
    %c0_330 = arith.constant 0 : index
    %c0_331 = arith.constant 0 : index
    %407 = vector.load %arg24[%c0_330, %c0_331] : memref<288x512xbf16, #tpu.memory_space<vmem>>, vector<32x512xbf16>
    tpu.vector_store %arg24[%c0_330, %c0_331], %406 {strides = array<i32>} : memref<288x512xbf16, #tpu.memory_space<vmem>>, vector<32x512xbf16>,
    %c16_i32_332 = arith.constant 16 : i32
    %408 = tpu.dynamic_rotate %400 by %c16_i32_332 dim 1 : vector<32x512xf32>, i32 -> vector<32x512xf32>
    %c1_333 = arith.constant 1 : index
    %c0_334 = arith.constant 0 : index
    %c0_335 = arith.constant 0 : index
    %409 = vector.load %arg2[%c1_333, %c0_334, %c0_335] : memref<9x1x512xf32, #tpu.memory_space<vmem>>, vector<1x1x512xf32>
    %410 = vector.shape_cast %409 : vector<1x1x512xf32> to vector<1x512xf32>
    %411 = vector.broadcast %410 : vector<1x512xf32> to vector<32x512xf32>
    %412 = arith.mulf %408, %411 : vector<32x512xf32>
    %413 = arith.truncf %412 : vector<32x512xf32> to vector<32x512xbf16>
    %c32_336 = arith.constant 32 : index
    %c0_337 = arith.constant 0 : index
    %414 = vector.load %arg24[%c32_336, %c0_337] : memref<288x512xbf16, #tpu.memory_space<vmem>>, vector<32x512xbf16>
    tpu.vector_store %arg24[%c32_336, %c0_337], %413 {strides = array<i32>} : memref<288x512xbf16, #tpu.memory_space<vmem>>, vector<32x512xbf16>,
    %c15_i32_338 = arith.constant 15 : i32
    %415 = tpu.dynamic_rotate %400 by %c15_i32_338 dim 1 : vector<32x512xf32>, i32 -> vector<32x512xf32>
    %c2_339 = arith.constant 2 : index
    %c0_340 = arith.constant 0 : index
    %c0_341 = arith.constant 0 : index
    %416 = vector.load %arg2[%c2_339, %c0_340, %c0_341] : memref<9x1x512xf32, #tpu.memory_space<vmem>>, vector<1x1x512xf32>
    %417 = vector.shape_cast %416 : vector<1x1x512xf32> to vector<1x512xf32>
    %418 = vector.broadcast %417 : vector<1x512xf32> to vector<32x512xf32>
    %419 = arith.mulf %415, %418 : vector<32x512xf32>
    %420 = arith.truncf %419 : vector<32x512xf32> to vector<32x512xbf16>
    %c64_342 = arith.constant 64 : index
    %c0_343 = arith.constant 0 : index
    %421 = vector.load %arg24[%c64_342, %c0_343] : memref<288x512xbf16, #tpu.memory_space<vmem>>, vector<32x512xbf16>
    tpu.vector_store %arg24[%c64_342, %c0_343], %420 {strides = array<i32>} : memref<288x512xbf16, #tpu.memory_space<vmem>>, vector<32x512xbf16>,
    %c1_i32_344 = arith.constant 1 : i32
    %422 = tpu.dynamic_rotate %400 by %c1_i32_344 dim 1 : vector<32x512xf32>, i32 -> vector<32x512xf32>
    %c3_345 = arith.constant 3 : index
    %c0_346 = arith.constant 0 : index
    %c0_347 = arith.constant 0 : index
    %423 = vector.load %arg2[%c3_345, %c0_346, %c0_347] : memref<9x1x512xf32, #tpu.memory_space<vmem>>, vector<1x1x512xf32>
    %424 = vector.shape_cast %423 : vector<1x1x512xf32> to vector<1x512xf32>
    %425 = vector.broadcast %424 : vector<1x512xf32> to vector<32x512xf32>
    %426 = arith.mulf %422, %425 : vector<32x512xf32>
    %427 = arith.truncf %426 : vector<32x512xf32> to vector<32x512xbf16>
    %c96_348 = arith.constant 96 : index
    %c0_349 = arith.constant 0 : index
    %428 = vector.load %arg24[%c96_348, %c0_349] : memref<288x512xbf16, #tpu.memory_space<vmem>>, vector<32x512xbf16>
    tpu.vector_store %arg24[%c96_348, %c0_349], %427 {strides = array<i32>} : memref<288x512xbf16, #tpu.memory_space<vmem>>, vector<32x512xbf16>,
    %429 = arith.truncf %400 : vector<32x512xf32> to vector<32x512xbf16>
    %c128_350 = arith.constant 128 : index
    %c0_351 = arith.constant 0 : index
    %430 = vector.load %arg24[%c128_350, %c0_351] : memref<288x512xbf16, #tpu.memory_space<vmem>>, vector<32x512xbf16>
    tpu.vector_store %arg24[%c128_350, %c0_351], %429 {strides = array<i32>} : memref<288x512xbf16, #tpu.memory_space<vmem>>, vector<32x512xbf16>,
    %c511_i32_352 = arith.constant 511 : i32
    %431 = tpu.dynamic_rotate %400 by %c511_i32_352 dim 1 : vector<32x512xf32>, i32 -> vector<32x512xf32>
    %c5_353 = arith.constant 5 : index
    %c0_354 = arith.constant 0 : index
    %c0_355 = arith.constant 0 : index
    %432 = vector.load %arg2[%c5_353, %c0_354, %c0_355] : memref<9x1x512xf32, #tpu.memory_space<vmem>>, vector<1x1x512xf32>
    %433 = vector.shape_cast %432 : vector<1x1x512xf32> to vector<1x512xf32>
    %434 = vector.broadcast %433 : vector<1x512xf32> to vector<32x512xf32>
    %435 = arith.mulf %431, %434 : vector<32x512xf32>
    %436 = arith.truncf %435 : vector<32x512xf32> to vector<32x512xbf16>
    %c160 = arith.constant 160 : index
    %c0_356 = arith.constant 0 : index
    %437 = vector.load %arg24[%c160, %c0_356] : memref<288x512xbf16, #tpu.memory_space<vmem>>, vector<32x512xbf16>
    tpu.vector_store %arg24[%c160, %c0_356], %436 {strides = array<i32>} : memref<288x512xbf16, #tpu.memory_space<vmem>>, vector<32x512xbf16>,
    %c497_i32_357 = arith.constant 497 : i32
    %438 = tpu.dynamic_rotate %400 by %c497_i32_357 dim 1 : vector<32x512xf32>, i32 -> vector<32x512xf32>
    %c6_358 = arith.constant 6 : index
    %c0_359 = arith.constant 0 : index
    %c0_360 = arith.constant 0 : index
    %439 = vector.load %arg2[%c6_358, %c0_359, %c0_360] : memref<9x1x512xf32, #tpu.memory_space<vmem>>, vector<1x1x512xf32>
    %440 = vector.shape_cast %439 : vector<1x1x512xf32> to vector<1x512xf32>
    %441 = vector.broadcast %440 : vector<1x512xf32> to vector<32x512xf32>
    %442 = arith.mulf %438, %441 : vector<32x512xf32>
    %443 = arith.truncf %442 : vector<32x512xf32> to vector<32x512xbf16>
    %c192 = arith.constant 192 : index
    %c0_361 = arith.constant 0 : index
    %444 = vector.load %arg24[%c192, %c0_361] : memref<288x512xbf16, #tpu.memory_space<vmem>>, vector<32x512xbf16>
    tpu.vector_store %arg24[%c192, %c0_361], %443 {strides = array<i32>} : memref<288x512xbf16, #tpu.memory_space<vmem>>, vector<32x512xbf16>,
    %c496_i32_362 = arith.constant 496 : i32
    %445 = tpu.dynamic_rotate %400 by %c496_i32_362 dim 1 : vector<32x512xf32>, i32 -> vector<32x512xf32>
    %c7_363 = arith.constant 7 : index
    %c0_364 = arith.constant 0 : index
    %c0_365 = arith.constant 0 : index
    %446 = vector.load %arg2[%c7_363, %c0_364, %c0_365] : memref<9x1x512xf32, #tpu.memory_space<vmem>>, vector<1x1x512xf32>
    %447 = vector.shape_cast %446 : vector<1x1x512xf32> to vector<1x512xf32>
    %448 = vector.broadcast %447 : vector<1x512xf32> to vector<32x512xf32>
    %449 = arith.mulf %445, %448 : vector<32x512xf32>
    %450 = arith.truncf %449 : vector<32x512xf32> to vector<32x512xbf16>
    %c224 = arith.constant 224 : index
    %c0_366 = arith.constant 0 : index
    %451 = vector.load %arg24[%c224, %c0_366] : memref<288x512xbf16, #tpu.memory_space<vmem>>, vector<32x512xbf16>
    tpu.vector_store %arg24[%c224, %c0_366], %450 {strides = array<i32>} : memref<288x512xbf16, #tpu.memory_space<vmem>>, vector<32x512xbf16>,
    %c495_i32_367 = arith.constant 495 : i32
    %452 = tpu.dynamic_rotate %400 by %c495_i32_367 dim 1 : vector<32x512xf32>, i32 -> vector<32x512xf32>
    %c8_368 = arith.constant 8 : index
    %c0_369 = arith.constant 0 : index
    %c0_370 = arith.constant 0 : index
    %453 = vector.load %arg2[%c8_368, %c0_369, %c0_370] : memref<9x1x512xf32, #tpu.memory_space<vmem>>, vector<1x1x512xf32>
    %454 = vector.shape_cast %453 : vector<1x1x512xf32> to vector<1x512xf32>
    %455 = vector.broadcast %454 : vector<1x512xf32> to vector<32x512xf32>
    %456 = arith.mulf %452, %455 : vector<32x512xf32>
    %457 = arith.truncf %456 : vector<32x512xf32> to vector<32x512xbf16>
    %c256 = arith.constant 256 : index
    %c0_371 = arith.constant 0 : index
    %458 = vector.load %arg24[%c256, %c0_371] : memref<288x512xbf16, #tpu.memory_space<vmem>>, vector<32x512xbf16>
    tpu.vector_store %arg24[%c256, %c0_371], %457 {strides = array<i32>} : memref<288x512xbf16, #tpu.memory_space<vmem>>, vector<32x512xbf16>,
    %c0_372 = arith.constant 0 : index
    %c0_373 = arith.constant 0 : index
    %459 = vector.load %arg9[%c0_372, %c0_373] : memref<32x288xbf16, #tpu.memory_space<vmem>>, vector<32x288xbf16>
    %c0_374 = arith.constant 0 : index
    %c0_375 = arith.constant 0 : index
    %460 = vector.load %arg24[%c0_374, %c0_375] : memref<288x512xbf16, #tpu.memory_space<vmem>>, vector<288x512xbf16>
    %cst_376 = arith.constant dense<0.000000e+00> : vector<32x512xf32>
    %461 = tpu.matmul %459, %460, %cst_376 {dimension_numbers = #tpu.dot_dimension_numbers<[1], [0], [0], [1], [0, 0, 1, 1], [], []>} : vector<32x288xbf16>, vector<288x512xbf16>, vector<32x512xf32> -> vector<32x512xf32>
    %c0_377 = arith.constant 0 : index
    %c0_378 = arith.constant 0 : index
    %462 = vector.load %arg18[%c0_377, %c0_378] : memref<32x1xf32, #tpu.memory_space<vmem>>, vector<32x1xf32>
    %463 = vector.broadcast %462 : vector<32x1xf32> to vector<32x512xf32>
    %464 = arith.addf %461, %463 : vector<32x512xf32>
    %cst_379 = arith.constant 0.000000e+00 : f32
    %465 = vector.broadcast %cst_379 : f32 to vector<32x512xf32>
    %466 = arith.maximumf %464, %465 : vector<32x512xf32>
    %c0_380 = arith.constant 0 : index
    %c0_381 = arith.constant 0 : index
    %c0_382 = arith.constant 0 : index
    %467 = vector.load %arg22[%c0_380, %c0_381, %c0_382] : memref<1x32x512xf32, #tpu.memory_space<vmem>>, vector<1x32x512xf32>
    %468 = vector.shape_cast %467 : vector<1x32x512xf32> to vector<32x512xf32>
    %469 = vector.shape_cast %466 : vector<32x512xf32> to vector<1x32x512xf32>
    tpu.vector_store %arg22[%c0_380, %c0_381, %c0_382], %469 {strides = array<i32>} : memref<1x32x512xf32, #tpu.memory_space<vmem>>, vector<1x32x512xf32>,
    %c17_i32_383 = arith.constant 17 : i32
    %470 = tpu.dynamic_rotate %466 by %c17_i32_383 dim 1 : vector<32x512xf32>, i32 -> vector<32x512xf32>
    %c0_384 = arith.constant 0 : index
    %c0_385 = arith.constant 0 : index
    %c0_386 = arith.constant 0 : index
    %471 = vector.load %arg2[%c0_384, %c0_385, %c0_386] : memref<9x1x512xf32, #tpu.memory_space<vmem>>, vector<1x1x512xf32>
    %472 = vector.shape_cast %471 : vector<1x1x512xf32> to vector<1x512xf32>
    %473 = vector.broadcast %472 : vector<1x512xf32> to vector<32x512xf32>
    %474 = arith.mulf %470, %473 : vector<32x512xf32>
    %475 = arith.truncf %474 : vector<32x512xf32> to vector<32x512xbf16>
    %c0_387 = arith.constant 0 : index
    %c0_388 = arith.constant 0 : index
    %476 = vector.load %arg24[%c0_387, %c0_388] : memref<288x512xbf16, #tpu.memory_space<vmem>>, vector<32x512xbf16>
    tpu.vector_store %arg24[%c0_387, %c0_388], %475 {strides = array<i32>} : memref<288x512xbf16, #tpu.memory_space<vmem>>, vector<32x512xbf16>,
    %c16_i32_389 = arith.constant 16 : i32
    %477 = tpu.dynamic_rotate %466 by %c16_i32_389 dim 1 : vector<32x512xf32>, i32 -> vector<32x512xf32>
    %c1_390 = arith.constant 1 : index
    %c0_391 = arith.constant 0 : index
    %c0_392 = arith.constant 0 : index
    %478 = vector.load %arg2[%c1_390, %c0_391, %c0_392] : memref<9x1x512xf32, #tpu.memory_space<vmem>>, vector<1x1x512xf32>
    %479 = vector.shape_cast %478 : vector<1x1x512xf32> to vector<1x512xf32>
    %480 = vector.broadcast %479 : vector<1x512xf32> to vector<32x512xf32>
    %481 = arith.mulf %477, %480 : vector<32x512xf32>
    %482 = arith.truncf %481 : vector<32x512xf32> to vector<32x512xbf16>
    %c32_393 = arith.constant 32 : index
    %c0_394 = arith.constant 0 : index
    %483 = vector.load %arg24[%c32_393, %c0_394] : memref<288x512xbf16, #tpu.memory_space<vmem>>, vector<32x512xbf16>
    tpu.vector_store %arg24[%c32_393, %c0_394], %482 {strides = array<i32>} : memref<288x512xbf16, #tpu.memory_space<vmem>>, vector<32x512xbf16>,
    %c15_i32_395 = arith.constant 15 : i32
    %484 = tpu.dynamic_rotate %466 by %c15_i32_395 dim 1 : vector<32x512xf32>, i32 -> vector<32x512xf32>
    %c2_396 = arith.constant 2 : index
    %c0_397 = arith.constant 0 : index
    %c0_398 = arith.constant 0 : index
    %485 = vector.load %arg2[%c2_396, %c0_397, %c0_398] : memref<9x1x512xf32, #tpu.memory_space<vmem>>, vector<1x1x512xf32>
    %486 = vector.shape_cast %485 : vector<1x1x512xf32> to vector<1x512xf32>
    %487 = vector.broadcast %486 : vector<1x512xf32> to vector<32x512xf32>
    %488 = arith.mulf %484, %487 : vector<32x512xf32>
    %489 = arith.truncf %488 : vector<32x512xf32> to vector<32x512xbf16>
    %c64_399 = arith.constant 64 : index
    %c0_400 = arith.constant 0 : index
    %490 = vector.load %arg24[%c64_399, %c0_400] : memref<288x512xbf16, #tpu.memory_space<vmem>>, vector<32x512xbf16>
    tpu.vector_store %arg24[%c64_399, %c0_400], %489 {strides = array<i32>} : memref<288x512xbf16, #tpu.memory_space<vmem>>, vector<32x512xbf16>,
    %c1_i32_401 = arith.constant 1 : i32
    %491 = tpu.dynamic_rotate %466 by %c1_i32_401 dim 1 : vector<32x512xf32>, i32 -> vector<32x512xf32>
    %c3_402 = arith.constant 3 : index
    %c0_403 = arith.constant 0 : index
    %c0_404 = arith.constant 0 : index
    %492 = vector.load %arg2[%c3_402, %c0_403, %c0_404] : memref<9x1x512xf32, #tpu.memory_space<vmem>>, vector<1x1x512xf32>
    %493 = vector.shape_cast %492 : vector<1x1x512xf32> to vector<1x512xf32>
    %494 = vector.broadcast %493 : vector<1x512xf32> to vector<32x512xf32>
    %495 = arith.mulf %491, %494 : vector<32x512xf32>
    %496 = arith.truncf %495 : vector<32x512xf32> to vector<32x512xbf16>
    %c96_405 = arith.constant 96 : index
    %c0_406 = arith.constant 0 : index
    %497 = vector.load %arg24[%c96_405, %c0_406] : memref<288x512xbf16, #tpu.memory_space<vmem>>, vector<32x512xbf16>
    tpu.vector_store %arg24[%c96_405, %c0_406], %496 {strides = array<i32>} : memref<288x512xbf16, #tpu.memory_space<vmem>>, vector<32x512xbf16>,
    %498 = arith.truncf %466 : vector<32x512xf32> to vector<32x512xbf16>
    %c128_407 = arith.constant 128 : index
    %c0_408 = arith.constant 0 : index
    %499 = vector.load %arg24[%c128_407, %c0_408] : memref<288x512xbf16, #tpu.memory_space<vmem>>, vector<32x512xbf16>
    tpu.vector_store %arg24[%c128_407, %c0_408], %498 {strides = array<i32>} : memref<288x512xbf16, #tpu.memory_space<vmem>>, vector<32x512xbf16>,
    %c511_i32_409 = arith.constant 511 : i32
    %500 = tpu.dynamic_rotate %466 by %c511_i32_409 dim 1 : vector<32x512xf32>, i32 -> vector<32x512xf32>
    %c5_410 = arith.constant 5 : index
    %c0_411 = arith.constant 0 : index
    %c0_412 = arith.constant 0 : index
    %501 = vector.load %arg2[%c5_410, %c0_411, %c0_412] : memref<9x1x512xf32, #tpu.memory_space<vmem>>, vector<1x1x512xf32>
    %502 = vector.shape_cast %501 : vector<1x1x512xf32> to vector<1x512xf32>
    %503 = vector.broadcast %502 : vector<1x512xf32> to vector<32x512xf32>
    %504 = arith.mulf %500, %503 : vector<32x512xf32>
    %505 = arith.truncf %504 : vector<32x512xf32> to vector<32x512xbf16>
    %c160_413 = arith.constant 160 : index
    %c0_414 = arith.constant 0 : index
    %506 = vector.load %arg24[%c160_413, %c0_414] : memref<288x512xbf16, #tpu.memory_space<vmem>>, vector<32x512xbf16>
    tpu.vector_store %arg24[%c160_413, %c0_414], %505 {strides = array<i32>} : memref<288x512xbf16, #tpu.memory_space<vmem>>, vector<32x512xbf16>,
    %c497_i32_415 = arith.constant 497 : i32
    %507 = tpu.dynamic_rotate %466 by %c497_i32_415 dim 1 : vector<32x512xf32>, i32 -> vector<32x512xf32>
    %c6_416 = arith.constant 6 : index
    %c0_417 = arith.constant 0 : index
    %c0_418 = arith.constant 0 : index
    %508 = vector.load %arg2[%c6_416, %c0_417, %c0_418] : memref<9x1x512xf32, #tpu.memory_space<vmem>>, vector<1x1x512xf32>
    %509 = vector.shape_cast %508 : vector<1x1x512xf32> to vector<1x512xf32>
    %510 = vector.broadcast %509 : vector<1x512xf32> to vector<32x512xf32>
    %511 = arith.mulf %507, %510 : vector<32x512xf32>
    %512 = arith.truncf %511 : vector<32x512xf32> to vector<32x512xbf16>
    %c192_419 = arith.constant 192 : index
    %c0_420 = arith.constant 0 : index
    %513 = vector.load %arg24[%c192_419, %c0_420] : memref<288x512xbf16, #tpu.memory_space<vmem>>, vector<32x512xbf16>
    tpu.vector_store %arg24[%c192_419, %c0_420], %512 {strides = array<i32>} : memref<288x512xbf16, #tpu.memory_space<vmem>>, vector<32x512xbf16>,
    %c496_i32_421 = arith.constant 496 : i32
    %514 = tpu.dynamic_rotate %466 by %c496_i32_421 dim 1 : vector<32x512xf32>, i32 -> vector<32x512xf32>
    %c7_422 = arith.constant 7 : index
    %c0_423 = arith.constant 0 : index
    %c0_424 = arith.constant 0 : index
    %515 = vector.load %arg2[%c7_422, %c0_423, %c0_424] : memref<9x1x512xf32, #tpu.memory_space<vmem>>, vector<1x1x512xf32>
    %516 = vector.shape_cast %515 : vector<1x1x512xf32> to vector<1x512xf32>
    %517 = vector.broadcast %516 : vector<1x512xf32> to vector<32x512xf32>
    %518 = arith.mulf %514, %517 : vector<32x512xf32>
    %519 = arith.truncf %518 : vector<32x512xf32> to vector<32x512xbf16>
    %c224_425 = arith.constant 224 : index
    %c0_426 = arith.constant 0 : index
    %520 = vector.load %arg24[%c224_425, %c0_426] : memref<288x512xbf16, #tpu.memory_space<vmem>>, vector<32x512xbf16>
    tpu.vector_store %arg24[%c224_425, %c0_426], %519 {strides = array<i32>} : memref<288x512xbf16, #tpu.memory_space<vmem>>, vector<32x512xbf16>,
    %c495_i32_427 = arith.constant 495 : i32
    %521 = tpu.dynamic_rotate %466 by %c495_i32_427 dim 1 : vector<32x512xf32>, i32 -> vector<32x512xf32>
    %c8_428 = arith.constant 8 : index
    %c0_429 = arith.constant 0 : index
    %c0_430 = arith.constant 0 : index
    %522 = vector.load %arg2[%c8_428, %c0_429, %c0_430] : memref<9x1x512xf32, #tpu.memory_space<vmem>>, vector<1x1x512xf32>
    %523 = vector.shape_cast %522 : vector<1x1x512xf32> to vector<1x512xf32>
    %524 = vector.broadcast %523 : vector<1x512xf32> to vector<32x512xf32>
    %525 = arith.mulf %521, %524 : vector<32x512xf32>
    %526 = arith.truncf %525 : vector<32x512xf32> to vector<32x512xbf16>
    %c256_431 = arith.constant 256 : index
    %c0_432 = arith.constant 0 : index
    %527 = vector.load %arg24[%c256_431, %c0_432] : memref<288x512xbf16, #tpu.memory_space<vmem>>, vector<32x512xbf16>
    tpu.vector_store %arg24[%c256_431, %c0_432], %526 {strides = array<i32>} : memref<288x512xbf16, #tpu.memory_space<vmem>>, vector<32x512xbf16>,
    %c0_433 = arith.constant 0 : index
    %c0_434 = arith.constant 0 : index
    %528 = vector.load %arg10[%c0_433, %c0_434] : memref<32x288xbf16, #tpu.memory_space<vmem>>, vector<32x288xbf16>
    %c0_435 = arith.constant 0 : index
    %c0_436 = arith.constant 0 : index
    %529 = vector.load %arg24[%c0_435, %c0_436] : memref<288x512xbf16, #tpu.memory_space<vmem>>, vector<288x512xbf16>
    %cst_437 = arith.constant dense<0.000000e+00> : vector<32x512xf32>
    %530 = tpu.matmul %528, %529, %cst_437 {dimension_numbers = #tpu.dot_dimension_numbers<[1], [0], [0], [1], [0, 0, 1, 1], [], []>} : vector<32x288xbf16>, vector<288x512xbf16>, vector<32x512xf32> -> vector<32x512xf32>
    %c0_438 = arith.constant 0 : index
    %c0_439 = arith.constant 0 : index
    %531 = vector.load %arg19[%c0_438, %c0_439] : memref<32x1xf32, #tpu.memory_space<vmem>>, vector<32x1xf32>
    %532 = vector.broadcast %531 : vector<32x1xf32> to vector<32x512xf32>
    %533 = arith.addf %530, %532 : vector<32x512xf32>
    %cst_440 = arith.constant 0.000000e+00 : f32
    %534 = vector.broadcast %cst_440 : f32 to vector<32x512xf32>
    %535 = arith.maximumf %533, %534 : vector<32x512xf32>
    %c17_i32_441 = arith.constant 17 : i32
    %536 = tpu.dynamic_rotate %535 by %c17_i32_441 dim 1 : vector<32x512xf32>, i32 -> vector<32x512xf32>
    %c0_442 = arith.constant 0 : index
    %c0_443 = arith.constant 0 : index
    %c0_444 = arith.constant 0 : index
    %537 = vector.load %arg2[%c0_442, %c0_443, %c0_444] : memref<9x1x512xf32, #tpu.memory_space<vmem>>, vector<1x1x512xf32>
    %538 = vector.shape_cast %537 : vector<1x1x512xf32> to vector<1x512xf32>
    %539 = vector.broadcast %538 : vector<1x512xf32> to vector<32x512xf32>
    %540 = arith.mulf %536, %539 : vector<32x512xf32>
    %541 = arith.truncf %540 : vector<32x512xf32> to vector<32x512xbf16>
    %c0_445 = arith.constant 0 : index
    %c0_446 = arith.constant 0 : index
    %542 = vector.load %arg24[%c0_445, %c0_446] : memref<288x512xbf16, #tpu.memory_space<vmem>>, vector<32x512xbf16>
    tpu.vector_store %arg24[%c0_445, %c0_446], %541 {strides = array<i32>} : memref<288x512xbf16, #tpu.memory_space<vmem>>, vector<32x512xbf16>,
    %c16_i32_447 = arith.constant 16 : i32
    %543 = tpu.dynamic_rotate %535 by %c16_i32_447 dim 1 : vector<32x512xf32>, i32 -> vector<32x512xf32>
    %c1_448 = arith.constant 1 : index
    %c0_449 = arith.constant 0 : index
    %c0_450 = arith.constant 0 : index
    %544 = vector.load %arg2[%c1_448, %c0_449, %c0_450] : memref<9x1x512xf32, #tpu.memory_space<vmem>>, vector<1x1x512xf32>
    %545 = vector.shape_cast %544 : vector<1x1x512xf32> to vector<1x512xf32>
    %546 = vector.broadcast %545 : vector<1x512xf32> to vector<32x512xf32>
    %547 = arith.mulf %543, %546 : vector<32x512xf32>
    %548 = arith.truncf %547 : vector<32x512xf32> to vector<32x512xbf16>
    %c32_451 = arith.constant 32 : index
    %c0_452 = arith.constant 0 : index
    %549 = vector.load %arg24[%c32_451, %c0_452] : memref<288x512xbf16, #tpu.memory_space<vmem>>, vector<32x512xbf16>
    tpu.vector_store %arg24[%c32_451, %c0_452], %548 {strides = array<i32>} : memref<288x512xbf16, #tpu.memory_space<vmem>>, vector<32x512xbf16>,
    %c15_i32_453 = arith.constant 15 : i32
    %550 = tpu.dynamic_rotate %535 by %c15_i32_453 dim 1 : vector<32x512xf32>, i32 -> vector<32x512xf32>
    %c2_454 = arith.constant 2 : index
    %c0_455 = arith.constant 0 : index
    %c0_456 = arith.constant 0 : index
    %551 = vector.load %arg2[%c2_454, %c0_455, %c0_456] : memref<9x1x512xf32, #tpu.memory_space<vmem>>, vector<1x1x512xf32>
    %552 = vector.shape_cast %551 : vector<1x1x512xf32> to vector<1x512xf32>
    %553 = vector.broadcast %552 : vector<1x512xf32> to vector<32x512xf32>
    %554 = arith.mulf %550, %553 : vector<32x512xf32>
    %555 = arith.truncf %554 : vector<32x512xf32> to vector<32x512xbf16>
    %c64_457 = arith.constant 64 : index
    %c0_458 = arith.constant 0 : index
    %556 = vector.load %arg24[%c64_457, %c0_458] : memref<288x512xbf16, #tpu.memory_space<vmem>>, vector<32x512xbf16>
    tpu.vector_store %arg24[%c64_457, %c0_458], %555 {strides = array<i32>} : memref<288x512xbf16, #tpu.memory_space<vmem>>, vector<32x512xbf16>,
    %c1_i32_459 = arith.constant 1 : i32
    %557 = tpu.dynamic_rotate %535 by %c1_i32_459 dim 1 : vector<32x512xf32>, i32 -> vector<32x512xf32>
    %c3_460 = arith.constant 3 : index
    %c0_461 = arith.constant 0 : index
    %c0_462 = arith.constant 0 : index
    %558 = vector.load %arg2[%c3_460, %c0_461, %c0_462] : memref<9x1x512xf32, #tpu.memory_space<vmem>>, vector<1x1x512xf32>
    %559 = vector.shape_cast %558 : vector<1x1x512xf32> to vector<1x512xf32>
    %560 = vector.broadcast %559 : vector<1x512xf32> to vector<32x512xf32>
    %561 = arith.mulf %557, %560 : vector<32x512xf32>
    %562 = arith.truncf %561 : vector<32x512xf32> to vector<32x512xbf16>
    %c96_463 = arith.constant 96 : index
    %c0_464 = arith.constant 0 : index
    %563 = vector.load %arg24[%c96_463, %c0_464] : memref<288x512xbf16, #tpu.memory_space<vmem>>, vector<32x512xbf16>
    tpu.vector_store %arg24[%c96_463, %c0_464], %562 {strides = array<i32>} : memref<288x512xbf16, #tpu.memory_space<vmem>>, vector<32x512xbf16>,
    %564 = arith.truncf %535 : vector<32x512xf32> to vector<32x512xbf16>
    %c128_465 = arith.constant 128 : index
    %c0_466 = arith.constant 0 : index
    %565 = vector.load %arg24[%c128_465, %c0_466] : memref<288x512xbf16, #tpu.memory_space<vmem>>, vector<32x512xbf16>
    tpu.vector_store %arg24[%c128_465, %c0_466], %564 {strides = array<i32>} : memref<288x512xbf16, #tpu.memory_space<vmem>>, vector<32x512xbf16>,
    %c511_i32_467 = arith.constant 511 : i32
    %566 = tpu.dynamic_rotate %535 by %c511_i32_467 dim 1 : vector<32x512xf32>, i32 -> vector<32x512xf32>
    %c5_468 = arith.constant 5 : index
    %c0_469 = arith.constant 0 : index
    %c0_470 = arith.constant 0 : index
    %567 = vector.load %arg2[%c5_468, %c0_469, %c0_470] : memref<9x1x512xf32, #tpu.memory_space<vmem>>, vector<1x1x512xf32>
    %568 = vector.shape_cast %567 : vector<1x1x512xf32> to vector<1x512xf32>
    %569 = vector.broadcast %568 : vector<1x512xf32> to vector<32x512xf32>
    %570 = arith.mulf %566, %569 : vector<32x512xf32>
    %571 = arith.truncf %570 : vector<32x512xf32> to vector<32x512xbf16>
    %c160_471 = arith.constant 160 : index
    %c0_472 = arith.constant 0 : index
    %572 = vector.load %arg24[%c160_471, %c0_472] : memref<288x512xbf16, #tpu.memory_space<vmem>>, vector<32x512xbf16>
    tpu.vector_store %arg24[%c160_471, %c0_472], %571 {strides = array<i32>} : memref<288x512xbf16, #tpu.memory_space<vmem>>, vector<32x512xbf16>,
    %c497_i32_473 = arith.constant 497 : i32
    %573 = tpu.dynamic_rotate %535 by %c497_i32_473 dim 1 : vector<32x512xf32>, i32 -> vector<32x512xf32>
    %c6_474 = arith.constant 6 : index
    %c0_475 = arith.constant 0 : index
    %c0_476 = arith.constant 0 : index
    %574 = vector.load %arg2[%c6_474, %c0_475, %c0_476] : memref<9x1x512xf32, #tpu.memory_space<vmem>>, vector<1x1x512xf32>
    %575 = vector.shape_cast %574 : vector<1x1x512xf32> to vector<1x512xf32>
    %576 = vector.broadcast %575 : vector<1x512xf32> to vector<32x512xf32>
    %577 = arith.mulf %573, %576 : vector<32x512xf32>
    %578 = arith.truncf %577 : vector<32x512xf32> to vector<32x512xbf16>
    %c192_477 = arith.constant 192 : index
    %c0_478 = arith.constant 0 : index
    %579 = vector.load %arg24[%c192_477, %c0_478] : memref<288x512xbf16, #tpu.memory_space<vmem>>, vector<32x512xbf16>
    tpu.vector_store %arg24[%c192_477, %c0_478], %578 {strides = array<i32>} : memref<288x512xbf16, #tpu.memory_space<vmem>>, vector<32x512xbf16>,
    %c496_i32_479 = arith.constant 496 : i32
    %580 = tpu.dynamic_rotate %535 by %c496_i32_479 dim 1 : vector<32x512xf32>, i32 -> vector<32x512xf32>
    %c7_480 = arith.constant 7 : index
    %c0_481 = arith.constant 0 : index
    %c0_482 = arith.constant 0 : index
    %581 = vector.load %arg2[%c7_480, %c0_481, %c0_482] : memref<9x1x512xf32, #tpu.memory_space<vmem>>, vector<1x1x512xf32>
    %582 = vector.shape_cast %581 : vector<1x1x512xf32> to vector<1x512xf32>
    %583 = vector.broadcast %582 : vector<1x512xf32> to vector<32x512xf32>
    %584 = arith.mulf %580, %583 : vector<32x512xf32>
    %585 = arith.truncf %584 : vector<32x512xf32> to vector<32x512xbf16>
    %c224_483 = arith.constant 224 : index
    %c0_484 = arith.constant 0 : index
    %586 = vector.load %arg24[%c224_483, %c0_484] : memref<288x512xbf16, #tpu.memory_space<vmem>>, vector<32x512xbf16>
    tpu.vector_store %arg24[%c224_483, %c0_484], %585 {strides = array<i32>} : memref<288x512xbf16, #tpu.memory_space<vmem>>, vector<32x512xbf16>,
    %c495_i32_485 = arith.constant 495 : i32
    %587 = tpu.dynamic_rotate %535 by %c495_i32_485 dim 1 : vector<32x512xf32>, i32 -> vector<32x512xf32>
    %c8_486 = arith.constant 8 : index
    %c0_487 = arith.constant 0 : index
    %c0_488 = arith.constant 0 : index
    %588 = vector.load %arg2[%c8_486, %c0_487, %c0_488] : memref<9x1x512xf32, #tpu.memory_space<vmem>>, vector<1x1x512xf32>
    %589 = vector.shape_cast %588 : vector<1x1x512xf32> to vector<1x512xf32>
    %590 = vector.broadcast %589 : vector<1x512xf32> to vector<32x512xf32>
    %591 = arith.mulf %587, %590 : vector<32x512xf32>
    %592 = arith.truncf %591 : vector<32x512xf32> to vector<32x512xbf16>
    %c256_489 = arith.constant 256 : index
    %c0_490 = arith.constant 0 : index
    %593 = vector.load %arg24[%c256_489, %c0_490] : memref<288x512xbf16, #tpu.memory_space<vmem>>, vector<32x512xbf16>
    tpu.vector_store %arg24[%c256_489, %c0_490], %592 {strides = array<i32>} : memref<288x512xbf16, #tpu.memory_space<vmem>>, vector<32x512xbf16>,
    %c0_491 = arith.constant 0 : index
    %c0_492 = arith.constant 0 : index
    %594 = vector.load %arg11[%c0_491, %c0_492] : memref<32x288xbf16, #tpu.memory_space<vmem>>, vector<32x288xbf16>
    %c0_493 = arith.constant 0 : index
    %c0_494 = arith.constant 0 : index
    %595 = vector.load %arg24[%c0_493, %c0_494] : memref<288x512xbf16, #tpu.memory_space<vmem>>, vector<288x512xbf16>
    %cst_495 = arith.constant dense<0.000000e+00> : vector<32x512xf32>
    %596 = tpu.matmul %594, %595, %cst_495 {dimension_numbers = #tpu.dot_dimension_numbers<[1], [0], [0], [1], [0, 0, 1, 1], [], []>} : vector<32x288xbf16>, vector<288x512xbf16>, vector<32x512xf32> -> vector<32x512xf32>
    %c0_496 = arith.constant 0 : index
    %c0_497 = arith.constant 0 : index
    %597 = vector.load %arg20[%c0_496, %c0_497] : memref<32x1xf32, #tpu.memory_space<vmem>>, vector<32x1xf32>
    %598 = vector.broadcast %597 : vector<32x1xf32> to vector<32x512xf32>
    %599 = arith.addf %596, %598 : vector<32x512xf32>
    %cst_498 = arith.constant 0.000000e+00 : f32
    %600 = vector.broadcast %cst_498 : f32 to vector<32x512xf32>
    %601 = arith.maximumf %599, %600 : vector<32x512xf32>
    %c0_499 = arith.constant 0 : index
    %c0_500 = arith.constant 0 : index
    %c0_501 = arith.constant 0 : index
    %602 = vector.load %arg23[%c0_499, %c0_500, %c0_501] : memref<1x32x512xf32, #tpu.memory_space<vmem>>, vector<1x32x512xf32>
    %603 = vector.shape_cast %602 : vector<1x32x512xf32> to vector<32x512xf32>
    %604 = vector.shape_cast %601 : vector<32x512xf32> to vector<1x32x512xf32>
    tpu.vector_store %arg23[%c0_499, %c0_500, %c0_501], %604 {strides = array<i32>} : memref<1x32x512xf32, #tpu.memory_space<vmem>>, vector<1x32x512xf32>,
    return
  }
  func.func @transform_0(%arg0: i32) -> (i32, i32, i32) {
    %c0_i32 = arith.constant 0 : i32
    %c0_i32_0 = arith.constant 0 : i32
    %c0_i32_1 = arith.constant 0 : i32
    return %arg0, %c0_i32, %c0_i32_0 : i32, i32, i32
  }
  func.func @transform_1(%arg0: i32) -> (i32, i32, i32) {
    %c0_i32 = arith.constant 0 : i32
    %c0_i32_0 = arith.constant 0 : i32
    %c0_i32_1 = arith.constant 0 : i32
    %c0_i32_2 = arith.constant 0 : i32
    return %c0_i32, %c0_i32_0, %c0_i32_1 : i32, i32, i32
  }
  func.func @transform_2(%arg0: i32) -> (i32, i32) {
    %c0_i32 = arith.constant 0 : i32
    %c0_i32_0 = arith.constant 0 : i32
    %c0_i32_1 = arith.constant 0 : i32
    return %c0_i32, %c0_i32_0 : i32, i32
  }
  func.func @transform_3(%arg0: i32) -> (i32, i32) {
    %c0_i32 = arith.constant 0 : i32
    %c0_i32_0 = arith.constant 0 : i32
    %c0_i32_1 = arith.constant 0 : i32
    return %c0_i32, %c0_i32_0 : i32, i32
  }
  func.func @transform_4(%arg0: i32) -> (i32, i32) {
    %c0_i32 = arith.constant 0 : i32
    %c0_i32_0 = arith.constant 0 : i32
    %c0_i32_1 = arith.constant 0 : i32
    return %c0_i32, %c0_i32_0 : i32, i32
  }
  func.func @transform_5(%arg0: i32) -> (i32, i32) {
    %c0_i32 = arith.constant 0 : i32
    %c0_i32_0 = arith.constant 0 : i32
    %c0_i32_1 = arith.constant 0 : i32
    return %c0_i32, %c0_i32_0 : i32, i32
  }
  func.func @transform_6(%arg0: i32) -> (i32, i32) {
    %c0_i32 = arith.constant 0 : i32
    %c0_i32_0 = arith.constant 0 : i32
    %c0_i32_1 = arith.constant 0 : i32
    return %c0_i32, %c0_i32_0 : i32, i32
  }
  func.func @transform_7(%arg0: i32) -> (i32, i32) {
    %c0_i32 = arith.constant 0 : i32
    %c0_i32_0 = arith.constant 0 : i32
    %c0_i32_1 = arith.constant 0 : i32
    return %c0_i32, %c0_i32_0 : i32, i32
  }
  func.func @transform_8(%arg0: i32) -> (i32, i32) {
    %c0_i32 = arith.constant 0 : i32
    %c0_i32_0 = arith.constant 0 : i32
    %c0_i32_1 = arith.constant 0 : i32
    return %c0_i32, %c0_i32_0 : i32, i32
  }
  func.func @transform_9(%arg0: i32) -> (i32, i32) {
    %c0_i32 = arith.constant 0 : i32
    %c0_i32_0 = arith.constant 0 : i32
    %c0_i32_1 = arith.constant 0 : i32
    return %c0_i32, %c0_i32_0 : i32, i32
  }
  func.func @transform_10(%arg0: i32) -> (i32, i32) {
    %c0_i32 = arith.constant 0 : i32
    %c0_i32_0 = arith.constant 0 : i32
    %c0_i32_1 = arith.constant 0 : i32
    return %c0_i32, %c0_i32_0 : i32, i32
  }
  func.func @transform_11(%arg0: i32) -> (i32, i32) {
    %c0_i32 = arith.constant 0 : i32
    %c0_i32_0 = arith.constant 0 : i32
    %c0_i32_1 = arith.constant 0 : i32
    return %c0_i32, %c0_i32_0 : i32, i32
  }
  func.func @transform_12(%arg0: i32) -> (i32, i32) {
    %c0_i32 = arith.constant 0 : i32
    %c0_i32_0 = arith.constant 0 : i32
    %c0_i32_1 = arith.constant 0 : i32
    return %c0_i32, %c0_i32_0 : i32, i32
  }
  func.func @transform_13(%arg0: i32) -> (i32, i32) {
    %c0_i32 = arith.constant 0 : i32
    %c0_i32_0 = arith.constant 0 : i32
    %c0_i32_1 = arith.constant 0 : i32
    return %c0_i32, %c0_i32_0 : i32, i32
  }
  func.func @transform_14(%arg0: i32) -> (i32, i32) {
    %c0_i32 = arith.constant 0 : i32
    %c0_i32_0 = arith.constant 0 : i32
    %c0_i32_1 = arith.constant 0 : i32
    return %c0_i32, %c0_i32_0 : i32, i32
  }
  func.func @transform_15(%arg0: i32) -> (i32, i32) {
    %c0_i32 = arith.constant 0 : i32
    %c0_i32_0 = arith.constant 0 : i32
    %c0_i32_1 = arith.constant 0 : i32
    return %c0_i32, %c0_i32_0 : i32, i32
  }
  func.func @transform_16(%arg0: i32) -> (i32, i32) {
    %c0_i32 = arith.constant 0 : i32
    %c0_i32_0 = arith.constant 0 : i32
    %c0_i32_1 = arith.constant 0 : i32
    return %c0_i32, %c0_i32_0 : i32, i32
  }
  func.func @transform_17(%arg0: i32) -> (i32, i32) {
    %c0_i32 = arith.constant 0 : i32
    %c0_i32_0 = arith.constant 0 : i32
    %c0_i32_1 = arith.constant 0 : i32
    return %c0_i32, %c0_i32_0 : i32, i32
  }
  func.func @transform_18(%arg0: i32) -> (i32, i32) {
    %c0_i32 = arith.constant 0 : i32
    %c0_i32_0 = arith.constant 0 : i32
    %c0_i32_1 = arith.constant 0 : i32
    return %c0_i32, %c0_i32_0 : i32, i32
  }
  func.func @transform_19(%arg0: i32) -> (i32, i32) {
    %c0_i32 = arith.constant 0 : i32
    %c0_i32_0 = arith.constant 0 : i32
    %c0_i32_1 = arith.constant 0 : i32
    return %c0_i32, %c0_i32_0 : i32, i32
  }
  func.func @transform_20(%arg0: i32) -> (i32, i32, i32) {
    %c0_i32 = arith.constant 0 : i32
    %c0_i32_0 = arith.constant 0 : i32
    %c0_i32_1 = arith.constant 0 : i32
    return %arg0, %c0_i32, %c0_i32_0 : i32, i32, i32
  }
  func.func @transform_21(%arg0: i32) -> (i32, i32, i32) {
    %c0_i32 = arith.constant 0 : i32
    %c0_i32_0 = arith.constant 0 : i32
    %c0_i32_1 = arith.constant 0 : i32
    return %arg0, %c0_i32, %c0_i32_0 : i32, i32, i32
  }
  func.func @transform_22(%arg0: i32) -> (i32, i32, i32) {
    %c0_i32 = arith.constant 0 : i32
    %c0_i32_0 = arith.constant 0 : i32
    %c0_i32_1 = arith.constant 0 : i32
    return %arg0, %c0_i32, %c0_i32_0 : i32, i32, i32
  }
}

</mosaic_0001>

<bundles_post_ra>
// kernel: custom_backbone_pallas.1
= control target key start
LH: loop header
LB: loop body
LE: loop exit
PB: predicated region body
PF: predicated region fallthrough
CT: control target
= control target key end

     0   :  { %s7730_s23 = smov 16   ;;  %s7732_s25 = smov 1   ;;  %v14151_v8 = vmov 0   ;;  %v81_v10 = vlaneseq  ;;  %vm545_vm8 = vcmask 1043456   ;;  %vm541_vm9 = vcmask 588800   ;;  %s14123_s0 = inlined_call_operand.vmem [shape: f32[1,8,512], index: 0, kind: input, shape index: {}]   ;;  %s14124_s11 = inlined_call_operand.vmem [shape: f32[8,1], index: 11, kind: input, shape index: {}]   ;;  %s14125_s1 = inlined_call_operand.vmem [shape: f32[9,1,512], index: 1, kind: input, shape index: {}]   ;;  %s14126_s2 = inlined_call_operand.vmem [shape: bf16[8,72], index: 2, kind: input, shape index: {}]   ;;  %s14127_s12 = inlined_call_operand.vmem [shape: f32[8,1], index: 12, kind: input, shape index: {}]   ;;  %s14128_s3 = inlined_call_operand.vmem [shape: bf16[8,72], index: 3, kind: input, shape index: {}]   ;;  %s14129_s13 = inlined_call_operand.vmem [shape: f32[16,1], index: 13, kind: input, shape index: {}]   ;;  %s14130_s4 = inlined_call_operand.vmem [shape: bf16[16,72], index: 4, kind: input, shape index: {}]   ;;  %s14131_s5 = inlined_call_operand.vmem [shape: bf16[16,144], index: 5, kind: input, shape index: {}]   ;;  %s14132_s14 = inlined_call_operand.vmem [shape: f32[16,1], index: 14, kind: input, shape index: {}]   ;;  %s14133_s6 = inlined_call_operand.vmem [shape: bf16[16,144], index: 6, kind: input, shape index: {}]   ;;  %s14134_s15 = inlined_call_operand.vmem [shape: f32[16,1], index: 15, kind: input, shape index: {}]   ;;  %s14135_s20 = inlined_call_operand.vmem [shape: f32[1,16,512], index: 20, kind: output, shape index: {0}]   ;;  %s14136_s7 = inlined_call_operand.vmem [shape: bf16[32,144], index: 7, kind: input, shape index: {}]   ;;  %s14137_s16 = inlined_call_operand.vmem [shape: f32[32,1], index: 16, kind: input, shape index: {}]   ;;  %s14138_s8 = inlined_call_operand.vmem [shape: bf16[32,288], index: 8, kind: input, shape index: {}]   ;;  %s14139_s17 = inlined_call_operand.vmem [shape: f32[32,1], index: 17, kind: input, shape index: {}]   ;;  %s14140_s21 = inlined_call_operand.vmem [shape: f32[1,32,512], index: 21, kind: output, shape index: {1}]   ;;  %s14141_s9 = inlined_call_operand.vmem [shape: bf16[32,288], index: 9, kind: input, shape index: {}]   ;;  %s14142_s18 = inlined_call_operand.vmem [shape: f32[32,1], index: 18, kind: input, shape index: {}]   ;;  %s14143_s10 = inlined_call_operand.vmem [shape: bf16[32,288], index: 10, kind: input, shape index: {}]   ;;  %s14144_s19 = inlined_call_operand.vmem [shape: f32[32,1], index: 19, kind: input, shape index: {}]   ;;  %s14145_s22 = inlined_call_operand.vmem [shape: f32[1,32,512], index: 22, kind: output, shape index: {2}]  }
   0x1   :  { %14409 = sst [smem:[#allocation88_spill]] %s14123_s0  ;;  %s7733_s26 = smov 15   ;;  %590 = vmatprep.mubr.bf16.mxu0 %v14151_v8  ;;  %631 = vmatprep.mubr.bf16.mxu1 %v14151_v8  ;;  %vm2331_vm10 = vcmask 130048   ;;  %vm4777_vm11 = vcmask 261120  }
   0x2   :  { %14410 = sst [smem:[#allocation89_spill]] %s14124_s11  ;;  %s14416_s29 = sld [smem:[#allocation88_spill]]  ;;  %7683 = vset.pattern.permute.xlu0 %v14151_v8  ;;  %7684 = vset.pattern.permute.xlu1 %v14151_v8  ;;  %v91_v11 = vshrl.u32 %v81_v10, 7  ;;  %v7905_v12 = vand.u32 127, %v81_v10 }
   0x3   :  { %14411 = sst [smem:[#allocation90_spill]] %s14125_s1  ;;  %s7734_s1 = smov 127  }
   0x4   :  { %14412 = sst [smem:[#allocation91_spill]] %s14126_s2  ;;  %s14149_s27 = smov 112   ;;  %v7907_v13 = vsub.s32 0, %v91_v11  ;;  %v7909_v14 = vsub.s32 3, %v91_v11  ;;  %v7911_v15 = vsub.s32 1, %v91_v11  ;;  %v7913_v16 = vsub.s32 2, %v91_v11 }
   0x5   :  { %14413 = sst [smem:[#allocation92_spill]] %s14127_s12  ;;  %s7736_s2 = smov 113   ;;  %vm130_vm0 = vcmp.lt.s32.totalorder %v7905_v12, 16  ;;  %vm83_vm1 = vcmp.lt.s32.totalorder %v7905_v12, 17  ;;  %vm238_vm2 = vcmp.lt.s32.totalorder %v7905_v12, 1  ;;  %vm190_vm3 = vcmp.lt.s32.totalorder %v7905_v12, 15 }
   0x6   :  { %14414 = sst [smem:[#allocation93_spill]] %s14128_s3  ;;  %s7737_s28 = smov 111   ;;  %14418 = vst [vmem:[#allocation3_spill] sm:$0xff] %v7907_v13  ;;  %14419 = vst [vmem:[#allocation4_spill] sm:$0xff] %v7909_v14  ;;  %vm306_vm4 = vcmp.lt.s32.totalorder %v7905_v12, 127  ;;  %vm414_vm5 = vcmp.lt.s32.totalorder %v7905_v12, 112 }
   0x7   :  { %14415 = sst [smem:[#allocation94_spill]] %s14129_s13  ;;  %s7731_s13 = smov 17   ;;  %14420 = vst [vmem:[#allocation5_spill] sm:$0xff] %v7911_v15  ;;  %14421 = vst [vmem:[#allocation6_spill] sm:$0xff] %v7913_v16  ;;  %vm366_vm6 = vcmp.lt.s32.totalorder %v7905_v12, 113  ;;  %vm474_vm7 = vcmp.lt.s32.totalorder %v7905_v12, 111 }
   0x8   :  { %v71_v0 = vld [vmem:[%s14416_s29 + $0x10] sm:$0xff]  ;;  %v69_v1 = vld [vmem:[%s14416_s29] sm:$0xff]  ;;  %v72_v2 = vld [vmem:[%s14416_s29 + $0x18] sm:$0xff]  ;;  %s14417_s12 = sld [smem:[#allocation89_spill]]  ;;  %s14422_s11 = sld [smem:[#allocation90_spill]] }
   0x9   :  { %126 = vrot.lane.b32.xlu1 %v71_v0, %s7730_s23  ;;  %v292_v3 = vpack.c.bf16 %v71_v0, %v71_v0  ;;  %122 = vrot.lane.b32.xlu0 %v69_v1, %s7730_s23  ;;  %v290_v4 = vpack.c.bf16 %v69_v1, %v69_v1  ;;  %v293_v5 = vpack.c.bf16 %v72_v2, %v72_v2  ;;  %v70_v6 = vld [vmem:[%s14416_s29 + $0x8] sm:$0xff]  ;;  %s14423_s0 = sld [smem:[#allocation91_spill]]  ;;  %s14424_s29 = sld [smem:[#allocation92_spill]] }
   0xa   :  { %v291_v7 = vpack.c.bf16 %v70_v6, %v70_v6  ;;  %s14425_s30 = sld [smem:[#allocation93_spill]]  ;;  %s14426_s3 = sld [smem:[#allocation94_spill]]  ;;  %v7720_v12 = vld [vmem:[%s14143_s10 + $0x8] ss:$12 sps:$4 sm:$0xff]  }
   0xb   :  { %296 = vst [vmem:[#allocation2 + $0x50] sm:$0xf] %v292_v3  ;;  %294 = vst [vmem:[#allocation2 + $0x40] sm:$0xf] %v290_v4 }
   0xc   :  { %297 = vst [vmem:[#allocation2 + $0x58] sm:$0xf] %v293_v5  ;;  %295 = vst [vmem:[#allocation2 + $0x48] sm:$0xf] %v291_v7 }
   0xd   :  { %128 = vrot.lane.b32.xlu1 %v72_v2, %s7730_s23  ;;  %124 = vrot.lane.b32.xlu0 %v70_v6, %s7730_s23 }
   0xe   :  { %v535_v9 = vld [vmem:[%s14417_s12] sm:$0xff]  ;;  %v7458_v51 = vld [vmem:[%s14422_s11 + $0xc] sm:$0xf] }
   0xf   :  { %v7456_v17 = vld [vmem:[%s14422_s11 + $0x4] sm:$0xf]  ;;  %v88_v26 = vld [vmem:[%s14422_s11] sm:$0xf]  ;;  %v253_v61 = vrot.slane %v7458_v51, %v7911_v15  ;;  %v249_v5 = vrot.slane %v7458_v51, %v7907_v13  ;;  %v261_v7 = vrot.slane %v7458_v51, %v7909_v14 }
  0x10   :  { %v141_v20 = vrot.slane %v7456_v17, %v7907_v13  ;;  %v153_v21 = vrot.slane %v7456_v17, %v7909_v14  ;;  %v145_v22 = vrot.slane %v7456_v17, %v7911_v15  ;;  %v149_v23 = vrot.slane %v7456_v17, %v7913_v16 }
  0x11   :  { %75 = vrot.lane.b32.xlu1 %v70_v6, %s7731_s13  ;;  %73 = vrot.lane.b32.xlu0 %v69_v1, %s7731_s13  ;;  %v97_v35 = vrot.slane %v88_v26, %v7911_v15  ;;  %v93_v43 = vrot.slane %v88_v26, %v7907_v13  ;;  %v101_v44 = vrot.slane %v88_v26, %v7913_v16 }
  0x12   :  { %v105_v45 = vrot.slane %v88_v26, %v7909_v14 }
  0x15   :  { %79 = vrot.lane.b32.xlu1 %v72_v2, %s7731_s13  ;;  %77 = vrot.lane.b32.xlu0 %v71_v0, %s7731_s13 }
  0x19   :  { %232 = vrot.lane.b32.xlu1 %v70_v6, %s7732_s25  ;;  %230 = vrot.lane.b32.xlu0 %v69_v1, %s7732_s25 }
  0x1d   :  { %236 = vrot.lane.b32.xlu1 %v72_v2, %s7732_s25  ;;  %234 = vrot.lane.b32.xlu0 %v71_v0, %s7732_s25 }
  0x21   :  { %184 = vrot.lane.b32.xlu1 %v70_v6, %s7733_s26  ;;  %182 = vrot.lane.b32.xlu0 %v69_v1, %s7733_s26 }
  0x25   :  { %188 = vrot.lane.b32.xlu1 %v72_v2, %s7733_s26  ;;  %186 = vrot.lane.b32.xlu0 %v71_v0, %s7733_s26 }
  0x29   :  { %300 = vrot.lane.b32.xlu1 %v70_v6, %s7734_s1  ;;  %298 = vrot.lane.b32.xlu0 %v69_v1, %s7734_s1 }
  0x2d   :  { %304 = vrot.lane.b32.xlu1 %v72_v2, %s7734_s1  ;;  %302 = vrot.lane.b32.xlu0 %v71_v0, %s7734_s1 }
  0x31   :  { %408 = vrot.lane.b32.xlu1 %v70_v6, %s14149_s27  ;;  %406 = vrot.lane.b32.xlu0 %v69_v1, %s14149_s27 }
  0x35   :  { %412 = vrot.lane.b32.xlu1 %v72_v2, %s14149_s27  ;;  %410 = vrot.lane.b32.xlu0 %v71_v0, %s14149_s27 }
  0x39   :  { %360 = vrot.lane.b32.xlu1 %v70_v6, %s7736_s2  ;;  %358 = vrot.lane.b32.xlu0 %v69_v1, %s7736_s2 }
  0x3d   :  { %364 = vrot.lane.b32.xlu1 %v72_v2, %s7736_s2  ;;  %362 = vrot.lane.b32.xlu0 %v71_v0, %s7736_s2 }
  0x41   :  { %468 = vrot.lane.b32.xlu1 %v70_v6, %s7737_s28  ;;  %466 = vrot.lane.b32.xlu0 %v69_v1, %s7737_s28  ;;  %v257_v6 = vrot.slane %v7458_v51, %v7913_v16 }
  0x45   :  { %472 = vrot.lane.b32.xlu1 %v72_v2, %s7737_s28  ;;  %470 = vrot.lane.b32.xlu0 %v71_v0, %s7737_s28 }
  0x49   :  { %538 = vperm.xlu0 %7683, %v535_v9   ;;  %v7457_v9 = vld [vmem:[%s14422_s11 + $0x8] sm:$0xf] }
  0x7b   :  { %v127_v18 = vpop.permute.xlu1 %126  ;;  %v123_v19 = vpop.permute.xlu0 %122 }
  0x7f   :  { %v129_v24 = vpop.permute.xlu1 %128  ;;  %v125_v25 = vpop.permute.xlu0 %124 }
  0x80   :  { %v131_v27 = vsel %vm130_vm0, %v127_v18, %v129_v24  ;;  %v134_v28 = vsel %vm130_vm0, %v129_v24, %v123_v19  ;;  %v132_v29 = vsel %vm130_vm0, %v125_v25, %v127_v18  ;;  %v133_v30 = vsel %vm130_vm0, %v123_v19, %v125_v25 }
  0x81   :  { %v158_v31 = vmul.f32 %v141_v20, %v134_v28  ;;  %v161_v32 = vmul.f32 %v153_v21, %v131_v27  ;;  %v159_v33 = vmul.f32 %v145_v22, %v133_v30  ;;  %v160_v34 = vmul.f32 %v149_v23, %v132_v29 }
  0x82   :  { %v205_v21 = vrot.slane %v7457_v9, %v7911_v15 }
  0x83   :  { %v162_v36 = vpack.c.bf16 %v158_v31, %v158_v31  ;;  %v165_v37 = vpack.c.bf16 %v161_v32, %v161_v32  ;;  %v163_v38 = vpack.c.bf16 %v159_v33, %v159_v33  ;;  %v164_v39 = vpack.c.bf16 %v160_v34, %v160_v34  ;;  %v76_v40 = vpop.permute.xlu1 %75  ;;  %v74_v41 = vpop.permute.xlu0 %73 }
  0x84   :  { %v86_v42 = vsel %vm83_vm1, %v74_v41, %v76_v40 }
  0x85   :  { %v170_v46 = vrot.slane %v162_v36, 4  ;;  %v173_v47 = vrot.slane %v165_v37, 4  ;;  %v171_v48 = vrot.slane %v163_v38, 4  ;;  %v172_v49 = vrot.slane %v164_v39, 4 }
  0x86   :  { %v111_v50 = vmul.f32 %v97_v35, %v86_v42  ;;  %v201_v36 = vrot.slane %v7457_v9, %v7907_v13  ;;  %v209_v37 = vrot.slane %v7457_v9, %v7913_v16  ;;  %v213_v38 = vrot.slane %v7457_v9, %v7909_v14 }
  0x87   :  { %178 = vst [vmem:[#allocation2] sm:$0xf0] %v170_v46  ;;  %181 = vst [vmem:[#allocation2 + $0x18] sm:$0xf0] %v173_v47  ;;  %v80_v52 = vpop.permute.xlu1 %79  ;;  %v78_v53 = vpop.permute.xlu0 %77 }
  0x88   :  { %179 = vst [vmem:[#allocation2 + $0x8] sm:$0xf0] %v171_v48  ;;  %180 = vst [vmem:[#allocation2 + $0x10] sm:$0xf0] %v172_v49  ;;  %v115_v54 = vpack.c.bf16 %v111_v50, %v111_v50  ;;  %v87_v55 = vsel %vm83_vm1, %v80_v52, %v74_v41  ;;  %v84_v56 = vsel %vm83_vm1, %v78_v53, %v80_v52 }
  0x89   :  { %v85_v57 = vsel %vm83_vm1, %v76_v40, %v78_v53  ;;  %v110_v58 = vmul.f32 %v93_v43, %v87_v55  ;;  %v113_v60 = vmul.f32 %v105_v45, %v84_v56  ;;  %v7459_v43 = vld [vmem:[%s14422_s11 + $0x14] sm:$0xf] }
  0x8a   :  { %v112_v59 = vmul.f32 %v101_v44, %v85_v57  ;;  %119 = vst [vmem:[#allocation2 + $0x8] sm:$0xf] %v115_v54  ;;  %v317_v53 = vrot.slane %v7459_v43, %v7907_v13 }
  0x8b   :  { %v114_v62 = vpack.c.bf16 %v110_v58, %v110_v58  ;;  %v117_v0 = vpack.c.bf16 %v113_v60, %v113_v60  ;;  %v233_v1 = vpop.permute.xlu1 %232  ;;  %v231_v2 = vpop.permute.xlu0 %230 }
  0x8c   :  { %v116_v63 = vpack.c.bf16 %v112_v59, %v112_v59  ;;  %v241_v3 = vsel %vm238_vm2, %v231_v2, %v233_v1 }
  0x8d   :  { %118 = vst [vmem:[#allocation2] sm:$0xf] %v114_v62  ;;  %121 = vst [vmem:[#allocation2 + $0x18] sm:$0xf] %v117_v0  ;;  %v267_v4 = vmul.f32 %v253_v61, %v241_v3  ;;  %v329_v61 = vrot.slane %v7459_v43, %v7909_v14  ;;  %v321_v62 = vrot.slane %v7459_v43, %v7911_v15  ;;  %v7461_v0 = vld [vmem:[%s14422_s11 + $0x1c] sm:$0xf] }
  0x8e   :  { %120 = vst [vmem:[#allocation2 + $0x10] sm:$0xf] %v116_v63  ;;  %v325_v63 = vrot.slane %v7459_v43, %v7913_v16  ;;  %v425_v9 = vrot.slane %v7461_v0, %v7907_v13 }
  0x8f   :  { %v271_v10 = vpack.c.bf16 %v267_v4, %v267_v4  ;;  %v237_v11 = vpop.permute.xlu1 %236  ;;  %v235_v17 = vpop.permute.xlu0 %234 }
  0x90   :  { %v242_v18 = vsel %vm238_vm2, %v237_v11, %v231_v2  ;;  %v239_v19 = vsel %vm238_vm2, %v235_v17, %v237_v11  ;;  %v240_v20 = vsel %vm238_vm2, %v233_v1, %v235_v17 }
  0x91   :  { %v279_v22 = vrot.slane %v271_v10, 4  ;;  %v266_v23 = vmul.f32 %v249_v5, %v242_v18  ;;  %v268_v24 = vmul.f32 %v257_v6, %v240_v20  ;;  %v269_v25 = vmul.f32 %v261_v7, %v239_v19  ;;  %v516_v26 = vld [vmem:[#allocation2 + $0x8] sm:$0xff] }
  0x92   :  { %558 = vmatprep.subr.bf16.mxu0 %v516_v26 }
  0x93   :  { %287 = vst [vmem:[#allocation2 + $0x28] sm:$0xf0] %v279_v22  ;;  %v270_v27 = vpack.c.bf16 %v266_v23, %v266_v23  ;;  %v272_v28 = vpack.c.bf16 %v268_v24, %v268_v24  ;;  %v273_v29 = vpack.c.bf16 %v269_v25, %v269_v25  ;;  %v185_v30 = vpop.permute.xlu1 %184  ;;  %v183_v31 = vpop.permute.xlu0 %182 }
  0x94   :  { %v193_v32 = vsel %vm190_vm3, %v183_v31, %v185_v30  ;;  %v515_v33 = vld [vmem:[#allocation2] sm:$0xff]  ;;  %v518_v34 = vld [vmem:[#allocation2 + $0x18] sm:$0xff] }
  0x95   :  { %v517_v35 = vld [vmem:[#allocation2 + $0x10] sm:$0xff]  ;;  %v278_v39 = vrot.slane %v270_v27, 4  ;;  %v280_v40 = vrot.slane %v272_v28, 4  ;;  %v281_v41 = vrot.slane %v273_v29, 4  ;;  %v219_v42 = vmul.f32 %v205_v21, %v193_v32  ;;  %559 = vmatpush1.bf16.msra.mxu0 %v515_v33  ;;  %599 = vmatprep.subr.bf16.mxu1 %v518_v34 }
  0x96   :  { %600 = vmatpush1.bf16.msra.mxu1 %v517_v35  ;;  %v437_v28 = vrot.slane %v7461_v0, %v7909_v14  ;;  %v429_v29 = vrot.slane %v7461_v0, %v7911_v15  ;;  %v7460_v35 = vld [vmem:[%s14422_s11 + $0x18] sm:$0xf] }
  0x97   :  { %286 = vst [vmem:[#allocation2 + $0x20] sm:$0xf0] %v278_v39  ;;  %288 = vst [vmem:[#allocation2 + $0x30] sm:$0xf0] %v280_v40  ;;  %v223_v44 = vpack.c.bf16 %v219_v42, %v219_v42  ;;  %v189_v45 = vpop.permute.xlu1 %188  ;;  %v187_v46 = vpop.permute.xlu0 %186  ;;  %v377_v42 = vrot.slane %v7460_v35, %v7907_v13 }
  0x98   :  { %289 = vst [vmem:[#allocation2 + $0x38] sm:$0xf0] %v281_v41  ;;  %v194_v47 = vsel %vm190_vm3, %v189_v45, %v183_v31  ;;  %v191_v48 = vsel %vm190_vm3, %v187_v46, %v189_v45  ;;  %v192_v49 = vsel %vm190_vm3, %v185_v30, %v187_v46  ;;  %v433_v30 = vrot.slane %v7461_v0, %v7913_v16 }
  0x99   :  { %227 = vst [vmem:[#allocation2 + $0x28] sm:$0xf] %v223_v44  ;;  %v218_v50 = vmul.f32 %v201_v36, %v194_v47  ;;  %v220_v51 = vmul.f32 %v209_v37, %v192_v49  ;;  %v221_v52 = vmul.f32 %v213_v38, %v191_v48 }
  0x9b   :  { %v222_v54 = vpack.c.bf16 %v218_v50, %v218_v50  ;;  %v224_v55 = vpack.c.bf16 %v220_v51, %v220_v51  ;;  %v225_v56 = vpack.c.bf16 %v221_v52, %v221_v52  ;;  %v301_v57 = vpop.permute.xlu1 %300  ;;  %v299_v58 = vpop.permute.xlu0 %298 }
  0x9c   :  { %v309_v59 = vsel %vm306_vm4, %v299_v58, %v301_v57 }
  0x9d   :  { %226 = vst [vmem:[#allocation2 + $0x20] sm:$0xf] %v222_v54  ;;  %228 = vst [vmem:[#allocation2 + $0x30] sm:$0xf] %v224_v55  ;;  %v334_v60 = vmul.f32 %v317_v53, %v309_v59  ;;  %v389_v53 = vrot.slane %v7460_v35, %v7909_v14  ;;  %v381_v54 = vrot.slane %v7460_v35, %v7911_v15 }
  0x9e   :  { %229 = vst [vmem:[#allocation2 + $0x38] sm:$0xf] %v225_v56  ;;  %v385_v55 = vrot.slane %v7460_v35, %v7913_v16 }
  0x9f   :  { %v338_v1 = vpack.c.bf16 %v334_v60, %v334_v60  ;;  %v305_v2 = vpop.permute.xlu1 %304  ;;  %v303_v3 = vpop.permute.xlu0 %302  ;;  %v7462_v60 = vld [vmem:[%s14422_s11 + $0x20] sm:$0xf] }
  0xa0   :  { %v310_v4 = vsel %vm306_vm4, %v305_v2, %v299_v58  ;;  %v307_v5 = vsel %vm306_vm4, %v303_v3, %v305_v2  ;;  %v308_v6 = vsel %vm306_vm4, %v301_v57, %v303_v3  ;;  %v520_v7 = vld [vmem:[#allocation2 + $0x28] sm:$0xff] }
  0xa1   :  { %v346_v10 = vrot.slane %v338_v1, 4  ;;  %v337_v11 = vmul.f32 %v329_v61, %v310_v4  ;;  %v335_v17 = vmul.f32 %v321_v62, %v308_v6  ;;  %v336_v18 = vmul.f32 %v325_v63, %v307_v5  ;;  %560 = vmatprep.subr.bf16.mxu0 %v520_v7 }
  0xa3   :  { %354 = vst [vmem:[#allocation2 + $0x40] sm:$0xf0] %v346_v10  ;;  %v341_v19 = vpack.c.bf16 %v337_v11, %v337_v11  ;;  %v339_v20 = vpack.c.bf16 %v335_v17, %v335_v17  ;;  %v340_v21 = vpack.c.bf16 %v336_v18, %v336_v18  ;;  %v409_v22 = vpop.permute.xlu1 %408  ;;  %v407_v23 = vpop.permute.xlu0 %406  ;;  %v485_v11 = vrot.slane %v7462_v60, %v7907_v13 }
  0xa4   :  { %v417_v24 = vsel %vm414_vm5, %v407_v23, %v409_v22  ;;  %v519_v25 = vld [vmem:[#allocation2 + $0x20] sm:$0xff]  ;;  %v521_v27 = vld [vmem:[#allocation2 + $0x30] sm:$0xff] }
  0xa5   :  { %v522_v26 = vld [vmem:[#allocation2 + $0x38] sm:$0xff]  ;;  %v349_v31 = vrot.slane %v341_v19, 4  ;;  %v347_v32 = vrot.slane %v339_v20, 4  ;;  %v348_v33 = vrot.slane %v340_v21, 4  ;;  %v442_v34 = vmul.f32 %v425_v9, %v417_v24  ;;  %561 = vmatpush1.bf16.msra.mxu0 %v519_v25 }
  0xa6   :  { %601 = vmatprep.subr.bf16.mxu1 %v522_v26  ;;  %v497_v24 = vrot.slane %v7462_v60, %v7909_v14  ;;  %v489_v25 = vrot.slane %v7462_v60, %v7911_v15  ;;  %v493_v26 = vrot.slane %v7462_v60, %v7913_v16 }
  0xa7   :  { %602 = vmatpush1.bf16.msra.mxu1 %v521_v27  ;;  %357 = vst [vmem:[#allocation2 + $0x58] sm:$0xf0] %v349_v31  ;;  %355 = vst [vmem:[#allocation2 + $0x48] sm:$0xf0] %v347_v32  ;;  %v446_v36 = vpack.c.bf16 %v442_v34, %v442_v34  ;;  %v413_v37 = vpop.permute.xlu1 %412  ;;  %v411_v38 = vpop.permute.xlu0 %410 }
  0xa8   :  { %356 = vst [vmem:[#allocation2 + $0x50] sm:$0xf0] %v348_v33  ;;  %v418_v39 = vsel %vm414_vm5, %v413_v37, %v407_v23  ;;  %v415_v40 = vsel %vm414_vm5, %v411_v38, %v413_v37  ;;  %v416_v41 = vsel %vm414_vm5, %v409_v22, %v411_v38 }
  0xa9   :  { %v454_v43 = vrot.slane %v446_v36, 4  ;;  %v445_v44 = vmul.f32 %v437_v28, %v418_v39  ;;  %v443_v45 = vmul.f32 %v429_v29, %v416_v41  ;;  %v444_v46 = vmul.f32 %v433_v30, %v415_v40 }
  0xaa   :  { %v523_v3 = vld [vmem:[#allocation2 + $0x40] sm:$0xff] }
  0xab   :  { %462 = vst [vmem:[#allocation2 + $0x60] sm:$0xf0] %v454_v43  ;;  %v449_v47 = vpack.c.bf16 %v445_v44, %v445_v44  ;;  %v447_v48 = vpack.c.bf16 %v443_v45, %v443_v45  ;;  %v448_v49 = vpack.c.bf16 %v444_v46, %v444_v46  ;;  %v361_v50 = vpop.permute.xlu1 %360  ;;  %v359_v51 = vpop.permute.xlu0 %358 }
  0xac   :  { %v369_v52 = vsel %vm366_vm6, %v359_v51, %v361_v50 }
  0xad   :  { %v457_v56 = vrot.slane %v449_v47, 4  ;;  %v455_v57 = vrot.slane %v447_v48, 4  ;;  %v456_v58 = vrot.slane %v448_v49, 4  ;;  %v394_v59 = vmul.f32 %v377_v42, %v369_v52  ;;  %v514_v49 = vld [vmem:[%s14423_s0] sm:$0xf] }
  0xae   :  { %v524_v61 = vld [vmem:[#allocation2 + $0x48] sm:$0xff]  ;;  %v526_v62 = vld [vmem:[#allocation2 + $0x58] sm:$0xff] }
  0xaf   :  { %v525_v63 = vld [vmem:[#allocation2 + $0x50] sm:$0xff]  ;;  %465 = vst [vmem:[#allocation2 + $0x78] sm:$0xf0] %v457_v56  ;;  %463 = vst [vmem:[#allocation2 + $0x68] sm:$0xf0] %v455_v57  ;;  %v398_v0 = vpack.c.bf16 %v394_v59, %v394_v59  ;;  %v365_v1 = vpop.permute.xlu1 %364  ;;  %562 = vmatprep.subr.bf16.mxu0 %v524_v61  ;;  %603 = vmatprep.subr.bf16.mxu1 %v526_v62  ;;  %v363_v2 = vpop.permute.xlu0 %362 }
  0xb0   :  { %464 = vst [vmem:[#allocation2 + $0x70] sm:$0xf0] %v456_v58  ;;  %v370_v4 = vsel %vm366_vm6, %v365_v1, %v359_v51  ;;  %v367_v5 = vsel %vm366_vm6, %v363_v2, %v365_v1  ;;  %v368_v6 = vsel %vm366_vm6, %v361_v50, %v363_v2  ;;  %563 = vmatpush1.bf16.msra.mxu0 %v523_v3 }
  0xb1   :  { %604 = vmatpush1.bf16.msra.mxu1 %v525_v63  ;;  %402 = vst [vmem:[#allocation2 + $0x60] sm:$0xf] %v398_v0  ;;  %v397_v7 = vmul.f32 %v389_v53, %v370_v4  ;;  %v395_v9 = vmul.f32 %v381_v54, %v368_v6  ;;  %v396_v10 = vmul.f32 %v385_v55, %v367_v5 }
  0xb3   :  { %v401_v17 = vpack.c.bf16 %v397_v7, %v397_v7  ;;  %v399_v18 = vpack.c.bf16 %v395_v9, %v395_v9  ;;  %v400_v19 = vpack.c.bf16 %v396_v10, %v396_v10  ;;  %v469_v20 = vpop.permute.xlu1 %468  ;;  %v467_v21 = vpop.permute.xlu0 %466  ;;  %v1089_v7 = vld [vmem:[%s14424_s29] sm:$0xff] }
  0xb4   :  { %v477_v22 = vsel %vm474_vm7, %v467_v21, %v469_v20  ;;  %v7467_v9 = vld [vmem:[%s14422_s11 + $0x4] sm:$0xf] }
  0xb5   :  { %405 = vst [vmem:[#allocation2 + $0x78] sm:$0xf] %v401_v17  ;;  %403 = vst [vmem:[#allocation2 + $0x68] sm:$0xf] %v399_v18  ;;  %v502_v23 = vmul.f32 %v485_v11, %v477_v22  ;;  %v711_v17 = vrot.slane %v7467_v9, %v7911_v15  ;;  %v715_v18 = vrot.slane %v7467_v9, %v7913_v16 }
  0xb6   :  { %404 = vst [vmem:[#allocation2 + $0x70] sm:$0xf] %v400_v19 }
  0xb7   :  { %v506_v27 = vpack.c.bf16 %v502_v23, %v502_v23  ;;  %v473_v28 = vpop.permute.xlu1 %472  ;;  %v471_v29 = vpop.permute.xlu0 %470 }
  0xb8   :  { %v478_v30 = vsel %vm474_vm7, %v473_v28, %v467_v21  ;;  %v475_v31 = vsel %vm474_vm7, %v471_v29, %v473_v28  ;;  %v476_v32 = vsel %vm474_vm7, %v469_v20, %v471_v29  ;;  %v527_v42 = vld [vmem:[#allocation2 + $0x60] sm:$0xff] }
  0xb9   :  { %510 = vst [vmem:[#allocation2 + $0x80] sm:$0xf] %v506_v27  ;;  %v505_v33 = vmul.f32 %v497_v24, %v478_v30  ;;  %v503_v34 = vmul.f32 %v489_v25, %v476_v32  ;;  %v504_v35 = vmul.f32 %v493_v26, %v475_v31  ;;  %v707_v25 = vrot.slane %v7467_v9, %v7907_v13  ;;  %v656_v27 = vld [vmem:[%s14422_s11] sm:$0xf] }
  0xba   :  { %v719_v26 = vrot.slane %v7467_v9, %v7909_v14 }
  0xbb   :  { %v509_v36 = vpack.c.bf16 %v505_v33, %v505_v33  ;;  %v507_v37 = vpack.c.bf16 %v503_v34, %v503_v34  ;;  %v508_v38 = vpack.c.bf16 %v504_v35, %v504_v35  ;;  %v665_v34 = vrot.slane %v656_v27, %v7911_v15 }
  0xbc   :  { %v528_v39 = vld [vmem:[#allocation2 + $0x68] sm:$0xff]  ;;  %v530_v40 = vld [vmem:[#allocation2 + $0x78] sm:$0xff]  ;;  %v669_v35 = vrot.slane %v656_v27, %v7913_v16 }
  0xbd   :  { %v529_v41 = vld [vmem:[#allocation2 + $0x70] sm:$0xff]  ;;  %513 = vst [vmem:[#allocation2 + $0x98] sm:$0xf] %v509_v36  ;;  %511 = vst [vmem:[#allocation2 + $0x88] sm:$0xf] %v507_v37  ;;  %564 = vmatprep.subr.bf16.mxu0 %v528_v39  ;;  %605 = vmatprep.subr.bf16.mxu1 %v530_v40 }
  0xbe   :  { %512 = vst [vmem:[#allocation2 + $0x90] sm:$0xf] %v508_v38  ;;  %565 = vmatpush1.bf16.msra.mxu0 %v527_v42  ;;  %606 = vmatpush1.bf16.msra.mxu1 %v529_v41 }
  0xc0   :  { %v531_v43 = vld [vmem:[#allocation2 + $0x80] sm:$0xf] }
  0xc1   :  { %v547_v47 = vsel %vm545_vm8, %v531_v43, 0 }
  0xc4   :  { %v532_v44 = vld [vmem:[#allocation2 + $0x88] sm:$0xf]  ;;  %v534_v45 = vld [vmem:[#allocation2 + $0x98] sm:$0xf] }
  0xc5   :  { %v533_v46 = vld [vmem:[#allocation2 + $0x90] sm:$0xf]  ;;  %7463 = vmatprep.subr.msk.bf16.mxu0 %vm545_vm8, %v532_v44  ;;  %7465 = vmatprep.subr.msk.bf16.mxu1 %vm545_vm8, %v534_v45 }
  0xc6   :  { %v553_v48 = vsel %vm545_vm8, %v533_v46, 0  ;;  %567 = vmatpush1.bf16.msra.mxu0 %v547_v47  ;;  %v661_v46 = vrot.slane %v656_v27, %v7907_v13  ;;  %v673_v47 = vrot.slane %v656_v27, %v7909_v14 }
  0xc7   :  { %608 = vmatpush1.bf16.msra.mxu1 %v553_v48 }
  0xc8   :  { %v539_v50 = vpop.permute.xlu0 %538 }
  0xc9   :  { %7464 = vmatmul.mubr.msk.bf16.vlgmr.msra.gmra.mrb[0].mxu0 %vm541_vm9, %v514_v49 }
  0xca   :  { %7466 = vmatmul.mubr.msk.bf16.vlgmr.msra.gmra.mrb[0].mxu1 %vm541_vm9, %v514_v49  ;;  %1142 = vmatprep.mubr.bf16.mxu0 %v14151_v8 }
  0xcb   :  { %1183 = vmatprep.mubr.bf16.mxu1 %v14151_v8 }
 0x19c   :  { %v592_v52 = vpop.f32.mrb[0].mxu0 }
 0x19d   :  { %v633_v51 = vpop.f32.mrb[0].mxu1  ;;  %v593_v54 = vadd.f32 %v592_v52, %v539_v50  ;;  %v594_v55 = vpop.f32.mrb[1].mxu0  ;;  %v7469_v52 = vld [vmem:[%s14422_s11 + $0xc] sm:$0xf] }
 0x19e   :  { %v634_v53 = vadd.f32 %v633_v51, %v539_v50  ;;  %v635_v56 = vpop.f32.mrb[1].mxu1  ;;  %v595_v57 = vadd.f32 %v594_v55, %v539_v50  ;;  %v596_v59 = vpop.f32.mrb[2].mxu0  ;;  %v823_v9 = vrot.slane %v7469_v52, %v7909_v14 }
 0x19f   :  { %v636_v58 = vadd.f32 %v635_v56, %v539_v50  ;;  %v637_v60 = vpop.f32.mrb[2].mxu1  ;;  %v640_v62 = vmax.f32 %v593_v54, 0.0  ;;  %v597_v63 = vpop.f32.mrb[3].mxu0 }
 0x1a0   :  { %v642_v61 = vmax.f32 %v634_v53, 0.0  ;;  %v638_v0 = vpop.f32.mrb[3].mxu1  ;;  %v641_v1 = vmax.f32 %v595_v57, 0.0 }
 0x1a1   :  { %v643_v2 = vmax.f32 %v636_v58, 0.0  ;;  %690 = vrot.lane.b32.xlu1 %v640_v62, %s7730_s23  ;;  %v852_v3 = vpack.c.bf16 %v640_v62, %v640_v62 }
 0x1a2   :  { %694 = vrot.lane.b32.xlu0 %v642_v61, %s7730_s23  ;;  %v854_v4 = vpack.c.bf16 %v642_v61, %v642_v61  ;;  %v853_v5 = vpack.c.bf16 %v641_v1, %v641_v1 }
 0x1a3   :  { %v855_v6 = vpack.c.bf16 %v643_v2, %v643_v2  ;;  %856 = vst [vmem:[#allocation2 + $0x40] sm:$0xf] %v852_v3 }
 0x1a4   :  { %858 = vst [vmem:[#allocation2 + $0x50] sm:$0xf] %v854_v4  ;;  %857 = vst [vmem:[#allocation2 + $0x48] sm:$0xf] %v853_v5 }
 0x1a5   :  { %859 = vst [vmem:[#allocation2 + $0x58] sm:$0xf] %v855_v6  ;;  %692 = vrot.lane.b32.xlu1 %v641_v1, %s7730_s23 }
 0x1a6   :  { %644 = vrot.lane.b32.xlu0 %v640_v62, %s7731_s13 }
 0x1a9   :  { %696 = vrot.lane.b32.xlu1 %v643_v2, %s7730_s23 }
 0x1aa   :  { %648 = vrot.lane.b32.xlu0 %v642_v61, %s7731_s13 }
 0x1ad   :  { %646 = vrot.lane.b32.xlu1 %v641_v1, %s7731_s13 }
 0x1ae   :  { %794 = vrot.lane.b32.xlu0 %v640_v62, %s7732_s25 }
 0x1b1   :  { %650 = vrot.lane.b32.xlu1 %v643_v2, %s7731_s13 }
 0x1b2   :  { %798 = vrot.lane.b32.xlu0 %v642_v61, %s7732_s25 }
 0x1b5   :  { %796 = vrot.lane.b32.xlu1 %v641_v1, %s7732_s25 }
 0x1b6   :  { %748 = vrot.lane.b32.xlu0 %v640_v62, %s7733_s26 }
 0x1b9   :  { %800 = vrot.lane.b32.xlu1 %v643_v2, %s7732_s25 }
 0x1ba   :  { %752 = vrot.lane.b32.xlu0 %v642_v61, %s7733_s26 }
 0x1bd   :  { %750 = vrot.lane.b32.xlu1 %v641_v1, %s7733_s26 }
 0x1be   :  { %860 = vrot.lane.b32.xlu0 %v640_v62, %s7734_s1 }
 0x1c1   :  { %754 = vrot.lane.b32.xlu1 %v643_v2, %s7733_s26 }
 0x1c2   :  { %864 = vrot.lane.b32.xlu0 %v642_v61, %s7734_s1 }
 0x1c5   :  { %862 = vrot.lane.b32.xlu1 %v641_v1, %s7734_s1 }
 0x1c6   :  { %964 = vrot.lane.b32.xlu0 %v640_v62, %s14149_s27 }
 0x1c9   :  { %866 = vrot.lane.b32.xlu1 %v643_v2, %s7734_s1 }
 0x1ca   :  { %968 = vrot.lane.b32.xlu0 %v642_v61, %s14149_s27 }
 0x1cd   :  { %966 = vrot.lane.b32.xlu1 %v641_v1, %s14149_s27 }
 0x1ce   :  { %918 = vrot.lane.b32.xlu0 %v640_v62, %s7736_s2 }
 0x1d1   :  { %970 = vrot.lane.b32.xlu1 %v643_v2, %s14149_s27 }
 0x1d2   :  { %922 = vrot.lane.b32.xlu0 %v642_v61, %s7736_s2 }
 0x1d5   :  { %920 = vrot.lane.b32.xlu1 %v641_v1, %s7736_s2 }
 0x1d6   :  { %1022 = vrot.lane.b32.xlu0 %v640_v62, %s7737_s28  ;;  %v819_v62 = vrot.slane %v7469_v52, %v7913_v16 }
 0x1d9   :  { %924 = vrot.lane.b32.xlu1 %v643_v2, %s7736_s2 }
 0x1da   :  { %1026 = vrot.lane.b32.xlu0 %v642_v61, %s7737_s28  ;;  %v815_v61 = vrot.slane %v7469_v52, %v7911_v15 }
 0x1dd   :  { %1024 = vrot.lane.b32.xlu1 %v641_v1, %s7737_s28 }
 0x1de   :  { %1092 = vperm.xlu0 %7683, %v1089_v7   ;;  %v811_v7 = vrot.slane %v7469_v52, %v7907_v13 }
 0x1e1   :  { %1028 = vrot.lane.b32.xlu1 %v643_v2, %s7737_s28 }
 0x213   :  { %v691_v11 = vpop.permute.xlu1 %690 }
 0x214   :  { %v695_v10 = vpop.permute.xlu0 %694 }
 0x217   :  { %v693_v20 = vpop.permute.xlu1 %692 }
 0x218   :  { %v645_v19 = vpop.permute.xlu0 %644  ;;  %v699_v21 = vsel %vm130_vm0, %v693_v20, %v695_v10  ;;  %v700_v22 = vsel %vm130_vm0, %v691_v11, %v693_v20 }
 0x219   :  { %v725_v23 = vmul.f32 %v711_v17, %v700_v22  ;;  %v726_v24 = vmul.f32 %v715_v18, %v699_v21 }
 0x21b   :  { %v729_v28 = vpack.c.bf16 %v725_v23, %v725_v23  ;;  %v730_v29 = vpack.c.bf16 %v726_v24, %v726_v24  ;;  %v697_v31 = vpop.permute.xlu1 %696 }
 0x21c   :  { %v649_v30 = vpop.permute.xlu0 %648  ;;  %v698_v32 = vsel %vm130_vm0, %v695_v10, %v697_v31  ;;  %v701_v33 = vsel %vm130_vm0, %v697_v31, %v691_v11  ;;  %v7468_v10 = vld [vmem:[%s14422_s11 + $0x8] sm:$0xf] }
 0x21d   :  { %v737_v36 = vrot.slane %v729_v28, 4  ;;  %v738_v37 = vrot.slane %v730_v29, 4  ;;  %v724_v38 = vmul.f32 %v707_v25, %v701_v33  ;;  %v727_v39 = vmul.f32 %v719_v26, %v698_v32 }
 0x21e   :  { %v769_v23 = vrot.slane %v7468_v10, %v7911_v15  ;;  %v773_v24 = vrot.slane %v7468_v10, %v7913_v16 }
 0x21f   :  { %745 = vst [vmem:[#allocation2 + $0x8] sm:$0xf0] %v737_v36  ;;  %746 = vst [vmem:[#allocation2 + $0x10] sm:$0xf0] %v738_v37  ;;  %v728_v40 = vpack.c.bf16 %v724_v38, %v724_v38  ;;  %v731_v41 = vpack.c.bf16 %v727_v39, %v727_v39  ;;  %v647_v43 = vpop.permute.xlu1 %646  ;;  %v765_v37 = vrot.slane %v7468_v10, %v7907_v13 }
 0x220   :  { %v795_v42 = vpop.permute.xlu0 %794  ;;  %v653_v44 = vsel %vm83_vm1, %v647_v43, %v649_v30  ;;  %v654_v45 = vsel %vm83_vm1, %v645_v19, %v647_v43  ;;  %v777_v38 = vrot.slane %v7468_v10, %v7909_v14 }
 0x221   :  { %v736_v48 = vrot.slane %v728_v40, 4  ;;  %v739_v49 = vrot.slane %v731_v41, 4  ;;  %v679_v50 = vmul.f32 %v665_v34, %v654_v45  ;;  %v680_v51 = vmul.f32 %v669_v35, %v653_v44  ;;  %v7470_v44 = vld [vmem:[%s14422_s11 + $0x14] sm:$0xf] }
 0x223   :  { %744 = vst [vmem:[#allocation2] sm:$0xf0] %v736_v48  ;;  %747 = vst [vmem:[#allocation2 + $0x18] sm:$0xf0] %v739_v49  ;;  %v683_v53 = vpack.c.bf16 %v679_v50, %v679_v50  ;;  %v684_v54 = vpack.c.bf16 %v680_v51, %v680_v51  ;;  %v651_v56 = vpop.permute.xlu1 %650 }
 0x224   :  { %v799_v55 = vpop.permute.xlu0 %798  ;;  %v652_v57 = vsel %vm83_vm1, %v649_v30, %v651_v56  ;;  %v655_v58 = vsel %vm83_vm1, %v651_v56, %v645_v19 }
 0x225   :  { %687 = vst [vmem:[#allocation2 + $0x8] sm:$0xf] %v683_v53  ;;  %688 = vst [vmem:[#allocation2 + $0x10] sm:$0xf] %v684_v54  ;;  %v678_v59 = vmul.f32 %v661_v46, %v655_v58  ;;  %v681_v60 = vmul.f32 %v673_v47, %v652_v57  ;;  %v877_v53 = vrot.slane %v7470_v44, %v7907_v13 }
 0x226   :  { %v881_v54 = vrot.slane %v7470_v44, %v7911_v15 }
 0x227   :  { %v682_v63 = vpack.c.bf16 %v678_v59, %v678_v59  ;;  %v685_v0 = vpack.c.bf16 %v681_v60, %v681_v60  ;;  %v797_v2 = vpop.permute.xlu1 %796 }
 0x228   :  { %v749_v1 = vpop.permute.xlu0 %748  ;;  %v803_v3 = vsel %vm238_vm2, %v797_v2, %v799_v55  ;;  %v804_v4 = vsel %vm238_vm2, %v795_v42, %v797_v2 }
 0x229   :  { %686 = vst [vmem:[#allocation2] sm:$0xf] %v682_v63  ;;  %689 = vst [vmem:[#allocation2 + $0x18] sm:$0xf] %v685_v0  ;;  %v829_v5 = vmul.f32 %v815_v61, %v804_v4  ;;  %v830_v6 = vmul.f32 %v819_v62, %v803_v3  ;;  %v885_v63 = vrot.slane %v7470_v44, %v7913_v16 }
 0x22a   :  { %v889_v0 = vrot.slane %v7470_v44, %v7909_v14 }
 0x22b   :  { %v833_v11 = vpack.c.bf16 %v829_v5, %v829_v5  ;;  %v834_v17 = vpack.c.bf16 %v830_v6, %v830_v6  ;;  %v801_v19 = vpop.permute.xlu1 %800 }
 0x22c   :  { %v753_v18 = vpop.permute.xlu0 %752  ;;  %v802_v20 = vsel %vm238_vm2, %v799_v55, %v801_v19  ;;  %v805_v21 = vsel %vm238_vm2, %v801_v19, %v795_v42  ;;  %v1070_v22 = vld [vmem:[#allocation2 + $0x8] sm:$0xff]  ;;  %v1071_v43 = vld [vmem:[#allocation2 + $0x10] sm:$0xff] }
 0x22d   :  { %v841_v25 = vrot.slane %v833_v11, 4  ;;  %v842_v26 = vrot.slane %v834_v17, 4  ;;  %v828_v27 = vmul.f32 %v811_v7, %v805_v21  ;;  %v831_v28 = vmul.f32 %v823_v9, %v802_v20  ;;  %1110 = vmatprep.subr.bf16.mxu0 %v1070_v22 }
 0x22f   :  { %849 = vst [vmem:[#allocation2 + $0x28] sm:$0xf0] %v841_v25  ;;  %850 = vst [vmem:[#allocation2 + $0x30] sm:$0xf0] %v842_v26  ;;  %v832_v29 = vpack.c.bf16 %v828_v27, %v828_v27  ;;  %v835_v30 = vpack.c.bf16 %v831_v28, %v831_v28  ;;  %v751_v32 = vpop.permute.xlu1 %750 }
 0x230   :  { %v861_v31 = vpop.permute.xlu0 %860  ;;  %v757_v33 = vsel %vm190_vm3, %v751_v32, %v753_v18  ;;  %v758_v34 = vsel %vm190_vm3, %v749_v1, %v751_v32  ;;  %v1069_v35 = vld [vmem:[#allocation2] sm:$0xff]  ;;  %v1072_v36 = vld [vmem:[#allocation2 + $0x18] sm:$0xff] }
 0x231   :  { %v840_v39 = vrot.slane %v832_v29, 4  ;;  %v843_v40 = vrot.slane %v835_v30, 4  ;;  %v783_v41 = vmul.f32 %v769_v23, %v758_v34  ;;  %v784_v42 = vmul.f32 %v773_v24, %v757_v33  ;;  %1111 = vmatpush1.bf16.msra.mxu0 %v1069_v35  ;;  %1151 = vmatprep.subr.bf16.mxu1 %v1072_v36  ;;  %v7471_v36 = vld [vmem:[%s14422_s11 + $0x18] sm:$0xf] }
 0x232   :  { %1152 = vmatpush1.bf16.msra.mxu1 %v1071_v43  ;;  %v935_v43 = vrot.slane %v7471_v36, %v7907_v13  ;;  %v939_v44 = vrot.slane %v7471_v36, %v7911_v15 }
 0x233   :  { %848 = vst [vmem:[#allocation2 + $0x20] sm:$0xf0] %v840_v39  ;;  %851 = vst [vmem:[#allocation2 + $0x38] sm:$0xf0] %v843_v40  ;;  %v787_v45 = vpack.c.bf16 %v783_v41, %v783_v41  ;;  %v788_v46 = vpack.c.bf16 %v784_v42, %v784_v42  ;;  %v755_v48 = vpop.permute.xlu1 %754 }
 0x234   :  { %v865_v47 = vpop.permute.xlu0 %864  ;;  %v756_v49 = vsel %vm190_vm3, %v753_v18, %v755_v48  ;;  %v759_v50 = vsel %vm190_vm3, %v755_v48, %v749_v1  ;;  %v7472_v1 = vld [vmem:[%s14422_s11 + $0x1c] sm:$0xf] }
 0x235   :  { %791 = vst [vmem:[#allocation2 + $0x28] sm:$0xf] %v787_v45  ;;  %792 = vst [vmem:[#allocation2 + $0x30] sm:$0xf] %v788_v46  ;;  %v782_v51 = vmul.f32 %v765_v37, %v759_v50  ;;  %v785_v52 = vmul.f32 %v777_v38, %v756_v49  ;;  %v981_v10 = vrot.slane %v7472_v1, %v7907_v13 }
 0x236   :  { %v985_v11 = vrot.slane %v7472_v1, %v7911_v15  ;;  %v989_v29 = vrot.slane %v7472_v1, %v7913_v16  ;;  %v993_v30 = vrot.slane %v7472_v1, %v7909_v14  ;;  %v7473_v1 = vld [vmem:[%s14422_s11 + $0x20] sm:$0xf] }
 0x237   :  { %v786_v55 = vpack.c.bf16 %v782_v51, %v782_v51  ;;  %v789_v56 = vpack.c.bf16 %v785_v52, %v785_v52  ;;  %v863_v58 = vpop.permute.xlu1 %862 }
 0x238   :  { %v965_v57 = vpop.permute.xlu0 %964  ;;  %v869_v59 = vsel %vm306_vm4, %v863_v58, %v865_v47  ;;  %v870_v60 = vsel %vm306_vm4, %v861_v31, %v863_v58 }
 0x239   :  { %790 = vst [vmem:[#allocation2 + $0x20] sm:$0xf] %v786_v55  ;;  %793 = vst [vmem:[#allocation2 + $0x38] sm:$0xf] %v789_v56  ;;  %v894_v61 = vmul.f32 %v877_v53, %v870_v60  ;;  %v895_v62 = vmul.f32 %v881_v54, %v869_v59  ;;  %v943_v56 = vrot.slane %v7471_v36, %v7913_v16 }
 0x23b   :  { %v898_v2 = vpack.c.bf16 %v894_v61, %v894_v61  ;;  %v899_v3 = vpack.c.bf16 %v895_v62, %v895_v62  ;;  %v867_v5 = vpop.permute.xlu1 %866 }
 0x23c   :  { %v969_v4 = vpop.permute.xlu0 %968  ;;  %v868_v6 = vsel %vm306_vm4, %v865_v47, %v867_v5  ;;  %v871_v7 = vsel %vm306_vm4, %v867_v5, %v861_v31  ;;  %v1074_v9 = vld [vmem:[#allocation2 + $0x28] sm:$0xff]  ;;  %v1075_v35 = vld [vmem:[#allocation2 + $0x30] sm:$0xff] }
 0x23d   :  { %v906_v17 = vrot.slane %v898_v2, 4  ;;  %v907_v18 = vrot.slane %v899_v3, 4  ;;  %v896_v19 = vmul.f32 %v885_v63, %v868_v6  ;;  %v897_v20 = vmul.f32 %v889_v0, %v871_v7  ;;  %1112 = vmatprep.subr.bf16.mxu0 %v1074_v9 }
 0x23f   :  { %914 = vst [vmem:[#allocation2 + $0x40] sm:$0xf0] %v906_v17  ;;  %915 = vst [vmem:[#allocation2 + $0x48] sm:$0xf0] %v907_v18  ;;  %v900_v21 = vpack.c.bf16 %v896_v19, %v896_v19  ;;  %v901_v22 = vpack.c.bf16 %v897_v20, %v897_v20  ;;  %v967_v24 = vpop.permute.xlu1 %966 }
 0x240   :  { %v919_v23 = vpop.permute.xlu0 %918  ;;  %v973_v25 = vsel %vm414_vm5, %v967_v24, %v969_v4  ;;  %v974_v26 = vsel %vm414_vm5, %v965_v57, %v967_v24  ;;  %v1073_v27 = vld [vmem:[#allocation2 + $0x20] sm:$0xff]  ;;  %v1076_v28 = vld [vmem:[#allocation2 + $0x38] sm:$0xff] }
 0x241   :  { %v908_v31 = vrot.slane %v900_v21, 4  ;;  %v909_v32 = vrot.slane %v901_v22, 4  ;;  %v998_v33 = vmul.f32 %v981_v10, %v974_v26  ;;  %v999_v34 = vmul.f32 %v985_v11, %v973_v25  ;;  %1113 = vmatpush1.bf16.msra.mxu0 %v1073_v27  ;;  %1153 = vmatprep.subr.bf16.mxu1 %v1076_v28 }
 0x242   :  { %1154 = vmatpush1.bf16.msra.mxu1 %v1075_v35  ;;  %v1039_v10 = vrot.slane %v7473_v1, %v7907_v13  ;;  %v1043_v11 = vrot.slane %v7473_v1, %v7911_v15  ;;  %v1047_v25 = vrot.slane %v7473_v1, %v7913_v16  ;;  %v1051_v26 = vrot.slane %v7473_v1, %v7909_v14 }
 0x243   :  { %916 = vst [vmem:[#allocation2 + $0x50] sm:$0xf0] %v908_v31  ;;  %917 = vst [vmem:[#allocation2 + $0x58] sm:$0xf0] %v909_v32  ;;  %v1002_v37 = vpack.c.bf16 %v998_v33, %v998_v33  ;;  %v1003_v38 = vpack.c.bf16 %v999_v34, %v999_v34  ;;  %v971_v40 = vpop.permute.xlu1 %970 }
 0x244   :  { %v923_v39 = vpop.permute.xlu0 %922  ;;  %v972_v41 = vsel %vm414_vm5, %v969_v4, %v971_v40  ;;  %v975_v42 = vsel %vm414_vm5, %v971_v40, %v965_v57  ;;  %v947_v57 = vrot.slane %v7471_v36, %v7909_v14 }
 0x245   :  { %v1010_v45 = vrot.slane %v1002_v37, 4  ;;  %v1011_v46 = vrot.slane %v1003_v38, 4  ;;  %v1000_v47 = vmul.f32 %v989_v29, %v972_v41  ;;  %v1001_v48 = vmul.f32 %v993_v30, %v975_v42 }
 0x246   :  { %v1078_v49 = vld [vmem:[#allocation2 + $0x48] sm:$0xff]  ;;  %v1077_v50 = vld [vmem:[#allocation2 + $0x40] sm:$0xff] }
 0x247   :  { %1018 = vst [vmem:[#allocation2 + $0x60] sm:$0xf0] %v1010_v45  ;;  %1019 = vst [vmem:[#allocation2 + $0x68] sm:$0xf0] %v1011_v46  ;;  %v1004_v51 = vpack.c.bf16 %v1000_v47, %v1000_v47  ;;  %v1005_v52 = vpack.c.bf16 %v1001_v48, %v1001_v48  ;;  %1114 = vmatprep.subr.bf16.mxu0 %v1078_v49  ;;  %v921_v53 = vpop.permute.xlu1 %920 }
 0x248   :  { %v927_v54 = vsel %vm366_vm6, %v921_v53, %v923_v39  ;;  %v928_v55 = vsel %vm366_vm6, %v919_v23, %v921_v53  ;;  %1115 = vmatpush1.bf16.msra.mxu0 %v1077_v50  ;;  %v1023_v60 = vpop.permute.xlu0 %1022 }
 0x249   :  { %v1012_v58 = vrot.slane %v1004_v51, 4  ;;  %v1013_v59 = vrot.slane %v1005_v52, 4  ;;  %v952_v61 = vmul.f32 %v935_v43, %v928_v55  ;;  %v953_v62 = vmul.f32 %v939_v44, %v927_v54  ;;  %v1068_v43 = vld [vmem:[%s14425_s30] sm:$0xf] }
 0x24a   :  { %v1080_v63 = vld [vmem:[#allocation2 + $0x58] sm:$0xff]  ;;  %v1079_v0 = vld [vmem:[#allocation2 + $0x50] sm:$0xff] }
 0x24b   :  { %1020 = vst [vmem:[#allocation2 + $0x70] sm:$0xf0] %v1012_v58  ;;  %1021 = vst [vmem:[#allocation2 + $0x78] sm:$0xf0] %v1013_v59  ;;  %v956_v2 = vpack.c.bf16 %v952_v61, %v952_v61  ;;  %v957_v3 = vpack.c.bf16 %v953_v62, %v953_v62  ;;  %1155 = vmatprep.subr.bf16.mxu1 %v1080_v63  ;;  %v925_v4 = vpop.permute.xlu1 %924 }
 0x24c   :  { %v926_v5 = vsel %vm366_vm6, %v923_v39, %v925_v4  ;;  %v929_v6 = vsel %vm366_vm6, %v925_v4, %v919_v23  ;;  %1156 = vmatpush1.bf16.msra.mxu1 %v1079_v0  ;;  %v1027_v17 = vpop.permute.xlu0 %1026  ;;  %v1643_v4 = vld [vmem:[%s14426_s3 + $0x8] sm:$0xff] }
 0x24d   :  { %960 = vst [vmem:[#allocation2 + $0x60] sm:$0xf] %v956_v2  ;;  %961 = vst [vmem:[#allocation2 + $0x68] sm:$0xf] %v957_v3  ;;  %v954_v7 = vmul.f32 %v943_v56, %v926_v5  ;;  %v955_v9 = vmul.f32 %v947_v57, %v929_v6  ;;  %v1642_v5 = vld [vmem:[%s14426_s3] sm:$0xff] }
 0x24e   :  { %v7478_v6 = vld [vmem:[%s14422_s11 + $0x4] sm:$0xf] }
 0x24f   :  { %v958_v18 = vpack.c.bf16 %v954_v7, %v954_v7  ;;  %v959_v19 = vpack.c.bf16 %v955_v9, %v955_v9  ;;  %v1025_v20 = vpop.permute.xlu1 %1024  ;;  %v1263_v7 = vrot.slane %v7478_v6, %v7911_v15 }
 0x250   :  { %v1031_v21 = vsel %vm474_vm7, %v1025_v20, %v1027_v17  ;;  %v1032_v22 = vsel %vm474_vm7, %v1023_v60, %v1025_v20  ;;  %v1271_v20 = vrot.slane %v7478_v6, %v7909_v14 }
 0x251   :  { %962 = vst [vmem:[#allocation2 + $0x70] sm:$0xf] %v958_v18  ;;  %963 = vst [vmem:[#allocation2 + $0x78] sm:$0xf] %v959_v19  ;;  %v1056_v23 = vmul.f32 %v1039_v10, %v1032_v22  ;;  %v1057_v24 = vmul.f32 %v1043_v11, %v1031_v21  ;;  %v1259_v19 = vrot.slane %v7478_v6, %v7907_v13  ;;  %v1208_v22 = vld [vmem:[%s14422_s11] sm:$0xf] }
 0x253   :  { %v1060_v27 = vpack.c.bf16 %v1056_v23, %v1056_v23  ;;  %v1061_v28 = vpack.c.bf16 %v1057_v24, %v1057_v24  ;;  %v1029_v29 = vpop.permute.xlu1 %1028 }
 0x254   :  { %v1030_v30 = vsel %vm474_vm7, %v1027_v17, %v1029_v29  ;;  %v1033_v31 = vsel %vm474_vm7, %v1029_v29, %v1023_v60  ;;  %v1082_v32 = vld [vmem:[#allocation2 + $0x68] sm:$0xff]  ;;  %v1081_v33 = vld [vmem:[#allocation2 + $0x60] sm:$0xff]  ;;  %v1267_v17 = vrot.slane %v7478_v6, %v7913_v16 }
 0x255   :  { %1064 = vst [vmem:[#allocation2 + $0x80] sm:$0xf] %v1060_v27  ;;  %1065 = vst [vmem:[#allocation2 + $0x88] sm:$0xf] %v1061_v28  ;;  %v1058_v34 = vmul.f32 %v1047_v25, %v1030_v30  ;;  %v1059_v35 = vmul.f32 %v1051_v26, %v1033_v31  ;;  %1116 = vmatprep.subr.bf16.mxu0 %v1082_v32  ;;  %v1217_v32 = vrot.slane %v1208_v22, %v7911_v15 }
 0x256   :  { %1117 = vmatpush1.bf16.msra.mxu0 %v1081_v33 }
 0x257   :  { %v1062_v36 = vpack.c.bf16 %v1058_v34, %v1058_v34  ;;  %v1063_v37 = vpack.c.bf16 %v1059_v35, %v1059_v35 }
 0x258   :  { %v1084_v38 = vld [vmem:[#allocation2 + $0x78] sm:$0xff]  ;;  %v1083_v39 = vld [vmem:[#allocation2 + $0x70] sm:$0xff] }
 0x259   :  { %1066 = vst [vmem:[#allocation2 + $0x90] sm:$0xf] %v1062_v36  ;;  %1067 = vst [vmem:[#allocation2 + $0x98] sm:$0xf] %v1063_v37  ;;  %1157 = vmatprep.subr.bf16.mxu1 %v1084_v38 }
 0x25a   :  { %1158 = vmatpush1.bf16.msra.mxu1 %v1083_v39 }
 0x25c   :  { %v1086_v40 = vld [vmem:[#allocation2 + $0x88] sm:$0xf]  ;;  %v1085_v41 = vld [vmem:[#allocation2 + $0x80] sm:$0xf] }
 0x25d   :  { %7474 = vmatprep.subr.msk.bf16.mxu0 %vm545_vm8, %v1086_v40  ;;  %v1099_v42 = vsel %vm545_vm8, %v1085_v41, 0  ;;  %v1093_v47 = vpop.permute.xlu0 %1092  ;;  %v1221_v40 = vrot.slane %v1208_v22, %v7913_v16  ;;  %v1213_v41 = vrot.slane %v1208_v22, %v7907_v13 }
 0x25e   :  { %1119 = vmatpush1.bf16.msra.mxu0 %v1099_v42 }
 0x260   :  { %v1088_v44 = vld [vmem:[#allocation2 + $0x98] sm:$0xf]  ;;  %v1087_v45 = vld [vmem:[#allocation2 + $0x90] sm:$0xf] }
 0x261   :  { %7475 = vmatmul.mubr.msk.bf16.vlgmr.msra.gmra.mrb[4].mxu0 %vm541_vm9, %v1068_v43  ;;  %7476 = vmatprep.subr.msk.bf16.mxu1 %vm545_vm8, %v1088_v44  ;;  %v1105_v46 = vsel %vm545_vm8, %v1087_v45, 0  ;;  %v1225_v45 = vrot.slane %v1208_v22, %v7909_v14 }
 0x262   :  { %1160 = vmatpush1.bf16.msra.mxu1 %v1105_v46  ;;  %1706 = vmatprep.mubr.bf16.mxu0 %v14151_v8 }
 0x265   :  { %7477 = vmatmul.mubr.msk.bf16.vlgmr.msra.gmra.mrb[4].mxu1 %vm541_vm9, %v1068_v43 }
 0x266   :  { %1749 = vmatprep.mubr.bf16.mxu1 %v14151_v8 }
 0x334   :  { %v1144_v48 = vpop.f32.mrb[4].mxu0 }
 0x335   :  { %v1145_v49 = vadd.f32 %v1144_v48, %v1093_v47  ;;  %v1146_v50 = vpop.f32.mrb[5].mxu0 }
 0x336   :  { %v1147_v51 = vadd.f32 %v1146_v50, %v1093_v47  ;;  %v1148_v52 = vpop.f32.mrb[6].mxu0 }
 0x337   :  { %v1192_v53 = vmax.f32 %v1145_v49, 0.0  ;;  %v1149_v54 = vpop.f32.mrb[7].mxu0 }
 0x338   :  { %v1193_v55 = vmax.f32 %v1147_v51, 0.0  ;;  %v1185_v56 = vpop.f32.mrb[4].mxu1 }
 0x339   :  { %v1404_v57 = vpack.c.bf16 %v1192_v53, %v1192_v53  ;;  %v1186_v58 = vadd.f32 %v1185_v56, %v1093_v47  ;;  %v1187_v59 = vpop.f32.mrb[5].mxu1  ;;  %1242 = vrot.lane.b32.xlu1 %v1192_v53, %s7730_s23 }
 0x33a   :  { %v1405_v60 = vpack.c.bf16 %v1193_v55, %v1193_v55  ;;  %v1188_v61 = vadd.f32 %v1187_v59, %v1093_v47  ;;  %v1189_v62 = vpop.f32.mrb[6].mxu1  ;;  %1244 = vrot.lane.b32.xlu0 %v1193_v55, %s7730_s23  ;;  %v7480_v47 = vld [vmem:[%s14422_s11 + $0xc] sm:$0xf] }
 0x33b   :  { %1408 = vst [vmem:[#allocation2 + $0x40] sm:$0xf] %v1404_v57  ;;  %v1194_v63 = vmax.f32 %v1186_v58, 0.0  ;;  %v1190_v0 = vpop.f32.mrb[7].mxu1  ;;  %v1367_v56 = vrot.slane %v7480_v47, %v7911_v15 }
 0x33c   :  { %1409 = vst [vmem:[#allocation2 + $0x48] sm:$0xf] %v1405_v60  ;;  %v1195_v1 = vmax.f32 %v1188_v61, 0.0 }
 0x33d   :  { %v1406_v2 = vpack.c.bf16 %v1194_v63, %v1194_v63  ;;  %1246 = vrot.lane.b32.xlu1 %v1194_v63, %s7730_s23 }
 0x33e   :  { %v1407_v3 = vpack.c.bf16 %v1195_v1, %v1195_v1  ;;  %1248 = vrot.lane.b32.xlu0 %v1195_v1, %s7730_s23 }
 0x33f   :  { %1410 = vst [vmem:[#allocation2 + $0x50] sm:$0xf] %v1406_v2  ;;  %v1375_v2 = vrot.slane %v7480_v47, %v7909_v14 }
 0x340   :  { %1411 = vst [vmem:[#allocation2 + $0x58] sm:$0xf] %v1407_v3 }
 0x341   :  { %1196 = vrot.lane.b32.xlu1 %v1192_v53, %s7731_s13 }
 0x342   :  { %1198 = vrot.lane.b32.xlu0 %v1193_v55, %s7731_s13 }
 0x345   :  { %1200 = vrot.lane.b32.xlu1 %v1194_v63, %s7731_s13 }
 0x346   :  { %1202 = vrot.lane.b32.xlu0 %v1195_v1, %s7731_s13 }
 0x349   :  { %1346 = vrot.lane.b32.xlu1 %v1192_v53, %s7732_s25 }
 0x34a   :  { %1348 = vrot.lane.b32.xlu0 %v1193_v55, %s7732_s25 }
 0x34d   :  { %1350 = vrot.lane.b32.xlu1 %v1194_v63, %s7732_s25 }
 0x34e   :  { %1352 = vrot.lane.b32.xlu0 %v1195_v1, %s7732_s25 }
 0x351   :  { %1300 = vrot.lane.b32.xlu1 %v1192_v53, %s7733_s26 }
 0x352   :  { %1302 = vrot.lane.b32.xlu0 %v1193_v55, %s7733_s26 }
 0x355   :  { %1304 = vrot.lane.b32.xlu1 %v1194_v63, %s7733_s26 }
 0x356   :  { %1306 = vrot.lane.b32.xlu0 %v1195_v1, %s7733_s26 }
 0x359   :  { %1412 = vrot.lane.b32.xlu1 %v1192_v53, %s7734_s1 }
 0x35a   :  { %1414 = vrot.lane.b32.xlu0 %v1193_v55, %s7734_s1 }
 0x35d   :  { %1416 = vrot.lane.b32.xlu1 %v1194_v63, %s7734_s1 }
 0x35e   :  { %1418 = vrot.lane.b32.xlu0 %v1195_v1, %s7734_s1 }
 0x361   :  { %1516 = vrot.lane.b32.xlu1 %v1192_v53, %s14149_s27 }
 0x362   :  { %1518 = vrot.lane.b32.xlu0 %v1193_v55, %s14149_s27 }
 0x365   :  { %1520 = vrot.lane.b32.xlu1 %v1194_v63, %s14149_s27 }
 0x366   :  { %1522 = vrot.lane.b32.xlu0 %v1195_v1, %s14149_s27 }
 0x369   :  { %1470 = vrot.lane.b32.xlu1 %v1192_v53, %s7736_s2 }
 0x36a   :  { %1472 = vrot.lane.b32.xlu0 %v1193_v55, %s7736_s2 }
 0x36d   :  { %1474 = vrot.lane.b32.xlu1 %v1194_v63, %s7736_s2 }
 0x36e   :  { %1476 = vrot.lane.b32.xlu0 %v1195_v1, %s7736_s2 }
 0x371   :  { %1574 = vrot.lane.b32.xlu1 %v1192_v53, %s7737_s28 }
 0x372   :  { %1576 = vrot.lane.b32.xlu0 %v1193_v55, %s7737_s28 }
 0x375   :  { %1578 = vrot.lane.b32.xlu1 %v1194_v63, %s7737_s28  ;;  %v1371_v63 = vrot.slane %v7480_v47, %v7913_v16 }
 0x376   :  { %1580 = vrot.lane.b32.xlu0 %v1195_v1, %s7737_s28  ;;  %v1363_v1 = vrot.slane %v7480_v47, %v7907_v13 }
 0x379   :  { %1646 = vperm.xlu1 %7684, %v1642_v5  }
 0x37a   :  { %1651 = vperm.xlu0 %7683, %v1643_v4   ;;  %v7479_v4 = vld [vmem:[%s14422_s11 + $0x8] sm:$0xf] }
 0x3ab   :  { %v1243_v9 = vpop.permute.xlu1 %1242 }
 0x3ac   :  { %v1245_v10 = vpop.permute.xlu0 %1244 }
 0x3ad   :  { %v1252_v11 = vsel %vm130_vm0, %v1243_v9, %v1245_v10 }
 0x3ae   :  { %v1277_v18 = vmul.f32 %v1263_v7, %v1252_v11 }
 0x3af   :  { %v1247_v21 = vpop.permute.xlu1 %1246 }
 0x3b0   :  { %v1281_v23 = vpack.c.bf16 %v1277_v18, %v1277_v18  ;;  %v1251_v24 = vsel %vm130_vm0, %v1245_v10, %v1247_v21  ;;  %v1249_v25 = vpop.permute.xlu0 %1248 }
 0x3b1   :  { %v1278_v26 = vmul.f32 %v1267_v17, %v1251_v24  ;;  %v1250_v27 = vsel %vm130_vm0, %v1247_v21, %v1249_v25  ;;  %v1253_v28 = vsel %vm130_vm0, %v1249_v25, %v1243_v9  ;;  %v1321_v21 = vrot.slane %v7479_v4, %v7911_v15 }
 0x3b2   :  { %v1289_v29 = vrot.slane %v1281_v23, 4  ;;  %v1276_v30 = vmul.f32 %v1259_v19, %v1253_v28  ;;  %v1279_v31 = vmul.f32 %v1271_v20, %v1250_v27 }
 0x3b3   :  { %v1282_v33 = vpack.c.bf16 %v1278_v26, %v1278_v26  ;;  %v1197_v34 = vpop.permute.xlu1 %1196 }
 0x3b4   :  { %1297 = vst [vmem:[#allocation2 + $0x8] sm:$0xf0] %v1289_v29  ;;  %v1280_v35 = vpack.c.bf16 %v1276_v30, %v1276_v30  ;;  %v1283_v36 = vpack.c.bf16 %v1279_v31, %v1279_v31  ;;  %v1199_v37 = vpop.permute.xlu0 %1198  ;;  %v1325_v31 = vrot.slane %v7479_v4, %v7913_v16 }
 0x3b5   :  { %v1290_v38 = vrot.slane %v1282_v33, 4  ;;  %v1206_v39 = vsel %vm83_vm1, %v1197_v34, %v1199_v37 }
 0x3b6   :  { %v1288_v42 = vrot.slane %v1280_v35, 4  ;;  %v1291_v43 = vrot.slane %v1283_v36, 4  ;;  %v1231_v44 = vmul.f32 %v1217_v32, %v1206_v39  ;;  %v1317_v32 = vrot.slane %v7479_v4, %v7907_v13  ;;  %v7481_v39 = vld [vmem:[%s14422_s11 + $0x14] sm:$0xf] }
 0x3b7   :  { %1298 = vst [vmem:[#allocation2 + $0x10] sm:$0xf0] %v1290_v38  ;;  %v1201_v46 = vpop.permute.xlu1 %1200 }
 0x3b8   :  { %1296 = vst [vmem:[#allocation2] sm:$0xf0] %v1288_v42  ;;  %1299 = vst [vmem:[#allocation2 + $0x18] sm:$0xf0] %v1291_v43  ;;  %v1235_v48 = vpack.c.bf16 %v1231_v44, %v1231_v44  ;;  %v1205_v49 = vsel %vm83_vm1, %v1199_v37, %v1201_v46  ;;  %v1203_v50 = vpop.permute.xlu0 %1202  ;;  %v1329_v37 = vrot.slane %v7479_v4, %v7909_v14 }
 0x3b9   :  { %v1232_v51 = vmul.f32 %v1221_v40, %v1205_v49  ;;  %v1204_v52 = vsel %vm83_vm1, %v1201_v46, %v1203_v50  ;;  %v1207_v53 = vsel %vm83_vm1, %v1203_v50, %v1197_v34 }
 0x3ba   :  { %1239 = vst [vmem:[#allocation2 + $0x8] sm:$0xf] %v1235_v48  ;;  %v1230_v54 = vmul.f32 %v1213_v41, %v1207_v53  ;;  %v1233_v55 = vmul.f32 %v1225_v45, %v1204_v52  ;;  %v1429_v48 = vrot.slane %v7481_v39, %v7907_v13 }
 0x3bb   :  { %v1236_v57 = vpack.c.bf16 %v1232_v51, %v1232_v51  ;;  %v1347_v58 = vpop.permute.xlu1 %1346 }
 0x3bc   :  { %v1234_v59 = vpack.c.bf16 %v1230_v54, %v1230_v54  ;;  %v1237_v60 = vpack.c.bf16 %v1233_v55, %v1233_v55  ;;  %v1349_v61 = vpop.permute.xlu0 %1348  ;;  %v1433_v55 = vrot.slane %v7481_v39, %v7911_v15 }
 0x3bd   :  { %1240 = vst [vmem:[#allocation2 + $0x10] sm:$0xf] %v1236_v57  ;;  %v1356_v62 = vsel %vm238_vm2, %v1347_v58, %v1349_v61  ;;  %v1437_v57 = vrot.slane %v7481_v39, %v7913_v16 }
 0x3be   :  { %1238 = vst [vmem:[#allocation2] sm:$0xf] %v1234_v59  ;;  %1241 = vst [vmem:[#allocation2 + $0x18] sm:$0xf] %v1237_v60  ;;  %v1381_v0 = vmul.f32 %v1367_v56, %v1356_v62  ;;  %v7483_v60 = vld [vmem:[%s14422_s11 + $0x1c] sm:$0xf] }
 0x3bf   :  { %v1351_v3 = vpop.permute.xlu1 %1350 }
 0x3c0   :  { %v1385_v5 = vpack.c.bf16 %v1381_v0, %v1381_v0  ;;  %v1355_v6 = vsel %vm238_vm2, %v1349_v61, %v1351_v3  ;;  %v1353_v7 = vpop.permute.xlu0 %1352 }
 0x3c1   :  { %v1382_v9 = vmul.f32 %v1371_v63, %v1355_v6  ;;  %v1354_v10 = vsel %vm238_vm2, %v1351_v3, %v1353_v7  ;;  %v1357_v11 = vsel %vm238_vm2, %v1353_v7, %v1347_v58  ;;  %v1623_v17 = vld [vmem:[#allocation2 + $0x8] sm:$0xff]  ;;  %v1441_v58 = vrot.slane %v7481_v39, %v7909_v14 }
 0x3c2   :  { %v1393_v18 = vrot.slane %v1385_v5, 4  ;;  %v1380_v19 = vmul.f32 %v1363_v1, %v1357_v11  ;;  %v1383_v20 = vmul.f32 %v1375_v2, %v1354_v10  ;;  %1674 = vmatprep.subr.bf16.mxu0 %v1623_v17  ;;  %v1533_v7 = vrot.slane %v7483_v60, %v7907_v13 }
 0x3c3   :  { %v1386_v22 = vpack.c.bf16 %v1382_v9, %v1382_v9  ;;  %v1301_v23 = vpop.permute.xlu1 %1300 }
 0x3c4   :  { %1401 = vst [vmem:[#allocation2 + $0x28] sm:$0xf0] %v1393_v18  ;;  %v1384_v24 = vpack.c.bf16 %v1380_v19, %v1380_v19  ;;  %v1387_v25 = vpack.c.bf16 %v1383_v20, %v1383_v20  ;;  %v1303_v26 = vpop.permute.xlu0 %1302  ;;  %v1624_v36 = vld [vmem:[#allocation2 + $0x10] sm:$0xff] }
 0x3c5   :  { %v1394_v27 = vrot.slane %v1386_v22, 4  ;;  %v1310_v28 = vsel %vm190_vm3, %v1301_v23, %v1303_v26  ;;  %v1622_v29 = vld [vmem:[#allocation2] sm:$0xff]  ;;  %v1625_v30 = vld [vmem:[#allocation2 + $0x18] sm:$0xff] }
 0x3c6   :  { %v1392_v33 = vrot.slane %v1384_v24, 4  ;;  %v1395_v34 = vrot.slane %v1387_v25, 4  ;;  %v1335_v35 = vmul.f32 %v1321_v21, %v1310_v28  ;;  %1675 = vmatpush1.bf16.msra.mxu0 %v1622_v29  ;;  %1717 = vmatprep.subr.bf16.mxu1 %v1625_v30  ;;  %v1541_v24 = vrot.slane %v7483_v60, %v7913_v16 }
 0x3c7   :  { %1402 = vst [vmem:[#allocation2 + $0x30] sm:$0xf0] %v1394_v27  ;;  %1718 = vmatpush1.bf16.msra.mxu1 %v1624_v36  ;;  %v1305_v38 = vpop.permute.xlu1 %1304  ;;  %v1545_v29 = vrot.slane %v7483_v60, %v7909_v14 }
 0x3c8   :  { %1400 = vst [vmem:[#allocation2 + $0x20] sm:$0xf0] %v1392_v33  ;;  %1403 = vst [vmem:[#allocation2 + $0x38] sm:$0xf0] %v1395_v34  ;;  %v1339_v40 = vpack.c.bf16 %v1335_v35, %v1335_v35  ;;  %v1309_v41 = vsel %vm190_vm3, %v1303_v26, %v1305_v38  ;;  %v1307_v42 = vpop.permute.xlu0 %1306 }
 0x3c9   :  { %v1336_v43 = vmul.f32 %v1325_v31, %v1309_v41  ;;  %v1308_v44 = vsel %vm190_vm3, %v1305_v38, %v1307_v42  ;;  %v1311_v45 = vsel %vm190_vm3, %v1307_v42, %v1301_v23  ;;  %v1537_v23 = vrot.slane %v7483_v60, %v7911_v15  ;;  %v7482_v31 = vld [vmem:[%s14422_s11 + $0x18] sm:$0xf] }
 0x3ca   :  { %1343 = vst [vmem:[#allocation2 + $0x28] sm:$0xf] %v1339_v40  ;;  %v1334_v46 = vmul.f32 %v1317_v32, %v1311_v45  ;;  %v1337_v47 = vmul.f32 %v1329_v37, %v1308_v44  ;;  %v1487_v41 = vrot.slane %v7482_v31, %v7907_v13 }
 0x3cb   :  { %v1340_v49 = vpack.c.bf16 %v1336_v43, %v1336_v43  ;;  %v1413_v50 = vpop.permute.xlu1 %1412 }
 0x3cc   :  { %v1338_v51 = vpack.c.bf16 %v1334_v46, %v1334_v46  ;;  %v1341_v52 = vpack.c.bf16 %v1337_v47, %v1337_v47  ;;  %v1415_v53 = vpop.permute.xlu0 %1414 }
 0x3cd   :  { %1344 = vst [vmem:[#allocation2 + $0x30] sm:$0xf] %v1340_v49  ;;  %v1422_v54 = vsel %vm306_vm4, %v1413_v50, %v1415_v53  ;;  %v1491_v49 = vrot.slane %v7482_v31, %v7911_v15 }
 0x3ce   :  { %1342 = vst [vmem:[#allocation2 + $0x20] sm:$0xf] %v1338_v51  ;;  %1345 = vst [vmem:[#allocation2 + $0x38] sm:$0xf] %v1341_v52  ;;  %v1446_v56 = vmul.f32 %v1429_v48, %v1422_v54 }
 0x3cf   :  { %v1417_v59 = vpop.permute.xlu1 %1416 }
 0x3d0   :  { %v1450_v61 = vpack.c.bf16 %v1446_v56, %v1446_v56  ;;  %v1421_v62 = vsel %vm306_vm4, %v1415_v53, %v1417_v59  ;;  %v1419_v63 = vpop.permute.xlu0 %1418  ;;  %v7484_v56 = vld [vmem:[%s14422_s11 + $0x20] sm:$0xf] }
 0x3d1   :  { %v1447_v0 = vmul.f32 %v1433_v55, %v1421_v62  ;;  %v1420_v1 = vsel %vm306_vm4, %v1417_v59, %v1419_v63  ;;  %v1423_v2 = vsel %vm306_vm4, %v1419_v63, %v1413_v50  ;;  %v1627_v3 = vld [vmem:[#allocation2 + $0x28] sm:$0xff]  ;;  %v1495_v50 = vrot.slane %v7482_v31, %v7913_v16 }
 0x3d2   :  { %v1458_v4 = vrot.slane %v1450_v61, 4  ;;  %v1448_v5 = vmul.f32 %v1437_v57, %v1420_v1  ;;  %v1449_v6 = vmul.f32 %v1441_v58, %v1423_v2  ;;  %1676 = vmatprep.subr.bf16.mxu0 %v1627_v3  ;;  %v1499_v55 = vrot.slane %v7482_v31, %v7909_v14 }
 0x3d3   :  { %v1451_v9 = vpack.c.bf16 %v1447_v0, %v1447_v0  ;;  %v1517_v10 = vpop.permute.xlu1 %1516 }
 0x3d4   :  { %1466 = vst [vmem:[#allocation2 + $0x40] sm:$0xf0] %v1458_v4  ;;  %v1452_v11 = vpack.c.bf16 %v1448_v5, %v1448_v5  ;;  %v1453_v17 = vpack.c.bf16 %v1449_v6, %v1449_v6  ;;  %v1519_v18 = vpop.permute.xlu0 %1518  ;;  %v1628_v28 = vld [vmem:[#allocation2 + $0x30] sm:$0xff]  ;;  %v1591_v5 = vrot.slane %v7484_v56, %v7907_v13 }
 0x3d5   :  { %v1459_v19 = vrot.slane %v1451_v9, 4  ;;  %v1526_v20 = vsel %vm414_vm5, %v1517_v10, %v1519_v18  ;;  %v1626_v21 = vld [vmem:[#allocation2 + $0x20] sm:$0xff]  ;;  %v1629_v22 = vld [vmem:[#allocation2 + $0x38] sm:$0xff] }
 0x3d6   :  { %v1460_v25 = vrot.slane %v1452_v11, 4  ;;  %v1461_v26 = vrot.slane %v1453_v17, 4  ;;  %v1550_v27 = vmul.f32 %v1533_v7, %v1526_v20  ;;  %1677 = vmatpush1.bf16.msra.mxu0 %v1626_v21  ;;  %1719 = vmatprep.subr.bf16.mxu1 %v1629_v22  ;;  %v1599_v20 = vrot.slane %v7484_v56, %v7913_v16 }
 0x3d7   :  { %1467 = vst [vmem:[#allocation2 + $0x48] sm:$0xf0] %v1459_v19  ;;  %1720 = vmatpush1.bf16.msra.mxu1 %v1628_v28  ;;  %v1521_v30 = vpop.permute.xlu1 %1520  ;;  %v1603_v21 = vrot.slane %v7484_v56, %v7909_v14 }
 0x3d8   :  { %1468 = vst [vmem:[#allocation2 + $0x50] sm:$0xf0] %v1460_v25  ;;  %1469 = vst [vmem:[#allocation2 + $0x58] sm:$0xf0] %v1461_v26  ;;  %v1554_v32 = vpack.c.bf16 %v1550_v27, %v1550_v27  ;;  %v1525_v33 = vsel %vm414_vm5, %v1519_v18, %v1521_v30  ;;  %v1523_v34 = vpop.permute.xlu0 %1522  ;;  %v1595_v18 = vrot.slane %v7484_v56, %v7911_v15 }
 0x3d9   :  { %v1551_v35 = vmul.f32 %v1537_v23, %v1525_v33  ;;  %v1524_v36 = vsel %vm414_vm5, %v1521_v30, %v1523_v34  ;;  %v1527_v37 = vsel %vm414_vm5, %v1523_v34, %v1517_v10 }
 0x3da   :  { %v1562_v38 = vrot.slane %v1554_v32, 4  ;;  %v1552_v39 = vmul.f32 %v1541_v24, %v1524_v36  ;;  %v1553_v40 = vmul.f32 %v1545_v29, %v1527_v37 }
 0x3db   :  { %v1555_v42 = vpack.c.bf16 %v1551_v35, %v1551_v35  ;;  %v1471_v43 = vpop.permute.xlu1 %1470  ;;  %v1630_v58 = vld [vmem:[#allocation2 + $0x40] sm:$0xff] }
 0x3dc   :  { %1570 = vst [vmem:[#allocation2 + $0x60] sm:$0xf0] %v1562_v38  ;;  %v1556_v44 = vpack.c.bf16 %v1552_v39, %v1552_v39  ;;  %v1557_v45 = vpack.c.bf16 %v1553_v40, %v1553_v40  ;;  %v1473_v46 = vpop.permute.xlu0 %1472 }
 0x3dd   :  { %v1563_v47 = vrot.slane %v1555_v42, 4  ;;  %v1480_v48 = vsel %vm366_vm6, %v1471_v43, %v1473_v46 }
 0x3de   :  { %v1564_v51 = vrot.slane %v1556_v44, 4  ;;  %v1565_v52 = vrot.slane %v1557_v45, 4  ;;  %v1504_v53 = vmul.f32 %v1487_v41, %v1480_v48  ;;  %v1631_v54 = vld [vmem:[#allocation2 + $0x48] sm:$0xff] }
 0x3df   :  { %1571 = vst [vmem:[#allocation2 + $0x68] sm:$0xf0] %v1563_v47  ;;  %1678 = vmatprep.subr.bf16.mxu0 %v1631_v54  ;;  %v1475_v57 = vpop.permute.xlu1 %1474  ;;  %v1633_v59 = vld [vmem:[#allocation2 + $0x58] sm:$0xff]  ;;  %v1632_v60 = vld [vmem:[#allocation2 + $0x50] sm:$0xff] }
 0x3e0   :  { %1572 = vst [vmem:[#allocation2 + $0x70] sm:$0xf0] %v1564_v51  ;;  %1573 = vst [vmem:[#allocation2 + $0x78] sm:$0xf0] %v1565_v52  ;;  %v1508_v61 = vpack.c.bf16 %v1504_v53, %v1504_v53  ;;  %v1479_v62 = vsel %vm366_vm6, %v1473_v46, %v1475_v57  ;;  %v1477_v63 = vpop.permute.xlu0 %1476  ;;  %1679 = vmatpush1.bf16.msra.mxu0 %v1630_v58  ;;  %1721 = vmatprep.subr.bf16.mxu1 %v1633_v59 }
 0x3e1   :  { %v1505_v0 = vmul.f32 %v1491_v49, %v1479_v62  ;;  %v1478_v1 = vsel %vm366_vm6, %v1475_v57, %v1477_v63  ;;  %v1481_v2 = vsel %vm366_vm6, %v1477_v63, %v1471_v43  ;;  %1722 = vmatpush1.bf16.msra.mxu1 %v1632_v60  ;;  %v7685_v43 = vld [vmem:[%s14130_s4] sm:$0xff]   ;;  %s14427_s4 = smov 112  }
 0x3e2   :  { %1512 = vst [vmem:[#allocation2 + $0x60] sm:$0xf] %v1508_v61  ;;  %v1506_v3 = vmul.f32 %v1495_v50, %v1478_v1  ;;  %v1507_v4 = vmul.f32 %v1499_v55, %v1481_v2 }
 0x3e3   :  { %v1509_v6 = vpack.c.bf16 %v1505_v0, %v1505_v0  ;;  %v1575_v7 = vpop.permute.xlu1 %1574 }
 0x3e4   :  { %v1510_v9 = vpack.c.bf16 %v1506_v3, %v1506_v3  ;;  %v1511_v10 = vpack.c.bf16 %v1507_v4, %v1507_v4  ;;  %v1577_v11 = vpop.permute.xlu0 %1576 }
 0x3e5   :  { %1513 = vst [vmem:[#allocation2 + $0x68] sm:$0xf] %v1509_v6  ;;  %v1584_v17 = vsel %vm474_vm7, %v1575_v7, %v1577_v11 }
 0x3e6   :  { %1514 = vst [vmem:[#allocation2 + $0x70] sm:$0xf] %v1510_v9  ;;  %1515 = vst [vmem:[#allocation2 + $0x78] sm:$0xf] %v1511_v10  ;;  %v1608_v19 = vmul.f32 %v1591_v5, %v1584_v17  ;;  %v7686_v17 = vld [vmem:[%s14131_s5 + $0x4] ss:$8 sps:$4 sm:$0xff]  }
 0x3e7   :  { %v1579_v22 = vpop.permute.xlu1 %1578 }
 0x3e8   :  { %v1612_v23 = vpack.c.bf16 %v1608_v19, %v1608_v19  ;;  %v1583_v24 = vsel %vm474_vm7, %v1577_v11, %v1579_v22  ;;  %v1581_v25 = vpop.permute.xlu0 %1580 }
 0x3e9   :  { %v1609_v26 = vmul.f32 %v1595_v18, %v1583_v24  ;;  %v1582_v27 = vsel %vm474_vm7, %v1579_v22, %v1581_v25  ;;  %v1585_v28 = vsel %vm474_vm7, %v1581_v25, %v1575_v7  ;;  %v1634_v35 = vld [vmem:[#allocation2 + $0x60] sm:$0xff]  ;;  %v2311_v24 = vld [vmem:[%s14132_s14 + $0x8] sm:$0xff] }
 0x3ea   :  { %1616 = vst [vmem:[#allocation2 + $0x80] sm:$0xf] %v1612_v23  ;;  %v1610_v29 = vmul.f32 %v1599_v20, %v1582_v27  ;;  %v1611_v30 = vmul.f32 %v1603_v21, %v1585_v28  ;;  %v2310_v22 = vld [vmem:[%s14132_s14] sm:$0xff] }
 0x3eb   :  { %v1613_v31 = vpack.c.bf16 %v1609_v26, %v1609_v26 }
 0x3ec   :  { %v1614_v32 = vpack.c.bf16 %v1610_v29, %v1610_v29  ;;  %v1615_v33 = vpack.c.bf16 %v1611_v30, %v1611_v30  ;;  %v1635_v34 = vld [vmem:[#allocation2 + $0x68] sm:$0xff] }
 0x3ed   :  { %1617 = vst [vmem:[#allocation2 + $0x88] sm:$0xf] %v1613_v31  ;;  %1680 = vmatprep.subr.bf16.mxu0 %v1635_v34  ;;  %v1637_v36 = vld [vmem:[#allocation2 + $0x78] sm:$0xff]  ;;  %v1636_v37 = vld [vmem:[#allocation2 + $0x70] sm:$0xff] }
 0x3ee   :  { %1618 = vst [vmem:[#allocation2 + $0x90] sm:$0xf] %v1614_v32  ;;  %1619 = vst [vmem:[#allocation2 + $0x98] sm:$0xf] %v1615_v33  ;;  %1681 = vmatpush1.bf16.msra.mxu0 %v1634_v35  ;;  %1723 = vmatprep.subr.bf16.mxu1 %v1637_v36 }
 0x3ef   :  { %1724 = vmatpush1.bf16.msra.mxu1 %v1636_v37 }
 0x3f1   :  { %v1638_v38 = vld [vmem:[#allocation2 + $0x80] sm:$0xf] }
 0x3f2   :  { %v1663_v40 = vsel %vm545_vm8, %v1638_v38, 0 }
 0x3f4   :  { %v1639_v39 = vld [vmem:[#allocation2 + $0x88] sm:$0xf] }
 0x3f5   :  { %7486 = vmatprep.subr.msk.bf16.mxu0 %vm545_vm8, %v1639_v39  ;;  %v1641_v41 = vld [vmem:[#allocation2 + $0x98] sm:$0xf]  ;;  %v1640_v42 = vld [vmem:[#allocation2 + $0x90] sm:$0xf] }
 0x3f6   :  { %1683 = vmatpush1.bf16.msra.mxu0 %v1663_v40  ;;  %7488 = vmatprep.subr.msk.bf16.mxu1 %vm545_vm8, %v1641_v41  ;;  %v1669_v44 = vsel %vm545_vm8, %v1640_v42, 0 }
 0x3f7   :  { %1726 = vmatpush1.bf16.msra.mxu1 %v1669_v44 }
 0x3f8   :  { %v1647_v45 = vpop.permute.xlu1 %1646 }
 0x3f9   :  { %7487 = vmatmul.mubr.msk.bf16.vlgmr.msra.gmra.mrb[8].mxu0 %vm541_vm9, %v7685_v43  ;;  %v1652_v46 = vpop.permute.xlu0 %1651 }
 0x3fa   :  { %7489 = vmatmul.mubr.msk.bf16.vlgmr.msra.gmra.mrb[8].mxu1 %vm541_vm9, %v7685_v43  ;;  %7499 = vmatprep.mubr.msk.bf16.mxu0 %vm2331_vm10, %v7686_v17 }
 0x3fb   :  { %7500 = vmatprep.mubr.msk.bf16.mxu1 %vm2331_vm10, %v7686_v17 }
 0x4cc   :  { %v1708_v47 = vpop.f32.mrb[8].mxu0 }
 0x4cd   :  { %v1709_v48 = vadd.f32 %v1708_v47, %v1647_v45  ;;  %v1710_v49 = vpop.f32.mrb[9].mxu0  ;;  %v1751_v50 = vpop.f32.mrb[8].mxu1 }
 0x4ce   :  { %v1752_v51 = vadd.f32 %v1751_v50, %v1647_v45  ;;  %v1712_v52 = vpop.f32.mrb[10].mxu0  ;;  %v1753_v53 = vpop.f32.mrb[9].mxu1  ;;  %v1711_v1 = vadd.f32 %v1710_v49, %v1647_v45  ;;  %v1792_v49 = vld [vmem:[%s14422_s11] sm:$0xf] }
 0x4cf   :  { %v8387_v54 = vmax.f32 %v1709_v48, 0.0  ;;  %v1713_v55 = vadd.f32 %v1712_v52, %v1652_v46  ;;  %v1714_v56 = vpop.f32.mrb[11].mxu0  ;;  %v1755_v57 = vpop.f32.mrb[10].mxu1  ;;  %v1754_v4 = vadd.f32 %v1753_v53, %v1647_v45  ;;  %v1805_v17 = vrot.slane %v1792_v49, %v7913_v16 }
 0x4d0   :  { %v8389_v58 = vmax.f32 %v1752_v51, 0.0  ;;  %v1756_v59 = vadd.f32 %v1755_v57, %v1652_v46  ;;  %v1757_v60 = vpop.f32.mrb[11].mxu1  ;;  %v1715_v2 = vadd.f32 %v1714_v56, %v1652_v46  ;;  %v8461_v3 = vmax.f32 %v1711_v1, 0.0 }
 0x4d1   :  { %v8391_v61 = vmax.f32 %v1713_v55, 0.0  ;;  %1768 = vrot.lane.b32.xlu1 %v8387_v54, %s7731_s13  ;;  %v1758_v6 = vadd.f32 %v1757_v60, %v1652_v46  ;;  %v8469_v7 = vmax.f32 %v1754_v4, 0.0  ;;  %v1801_v51 = vrot.slane %v1792_v49, %v7911_v15 }
 0x4d2   :  { %v8395_v62 = vmax.f32 %v1756_v59, 0.0  ;;  %v8465_v5 = vmax.f32 %v1715_v2, 0.0  ;;  %v1797_v57 = vrot.slane %v1792_v49, %v7907_v13  ;;  %v1809_v2 = vrot.slane %v1792_v49, %v7909_v14 }
 0x4d3   :  { %1770 = vrot.lane.b32.xlu0 %v8391_v61, %s7731_s13  ;;  %v8473_v9 = vmax.f32 %v1758_v6, 0.0  ;;  %v7490_v6 = vld [vmem:[%s14422_s11 + $0x4] sm:$0xf] }
 0x4d4   :  { %v1863_v0 = vrot.slane %v7490_v6, %v7911_v15 }
 0x4d5   :  { %1776 = vrot.lane.b32.xlu1 %v8389_v58, %s7731_s13 }
 0x4d7   :  { %1778 = vrot.lane.b32.xlu0 %v8395_v62, %s7731_s13 }
 0x4d9   :  { %1830 = vrot.lane.b32.xlu1 %v8387_v54, %s7730_s23 }
 0x4db   :  { %1832 = vrot.lane.b32.xlu0 %v8391_v61, %s7730_s23 }
 0x4dd   :  { %1838 = vrot.lane.b32.xlu1 %v8389_v58, %s7730_s23 }
 0x4df   :  { %1840 = vrot.lane.b32.xlu0 %v8395_v62, %s7730_s23 }
 0x4e1   :  { %1892 = vrot.lane.b32.xlu1 %v8387_v54, %s7733_s26 }
 0x4e3   :  { %1894 = vrot.lane.b32.xlu0 %v8391_v61, %s7733_s26 }
 0x4e5   :  { %1900 = vrot.lane.b32.xlu1 %v8389_v58, %s7733_s26 }
 0x4e7   :  { %1902 = vrot.lane.b32.xlu0 %v8395_v62, %s7733_s26 }
 0x4e9   :  { %1954 = vrot.lane.b32.xlu1 %v8387_v54, %s7732_s25 }
 0x4eb   :  { %1956 = vrot.lane.b32.xlu0 %v8391_v61, %s7732_s25 }
 0x4ed   :  { %1962 = vrot.lane.b32.xlu1 %v8389_v58, %s7732_s25 }
 0x4ef   :  { %1964 = vrot.lane.b32.xlu0 %v8395_v62, %s7732_s25 }
 0x4f1   :  { %2024 = vrot.lane.b32.xlu1 %v8387_v54, %s7734_s1 }
 0x4f3   :  { %2026 = vrot.lane.b32.xlu0 %v8391_v61, %s7734_s1 }
 0x4f5   :  { %2032 = vrot.lane.b32.xlu1 %v8389_v58, %s7734_s1 }
 0x4f7   :  { %2034 = vrot.lane.b32.xlu0 %v8395_v62, %s7734_s1 }
 0x4f9   :  { %2086 = vrot.lane.b32.xlu1 %v8387_v54, %s7736_s2 }
 0x4fb   :  { %2088 = vrot.lane.b32.xlu0 %v8391_v61, %s7736_s2 }
 0x4fd   :  { %2094 = vrot.lane.b32.xlu1 %v8389_v58, %s7736_s2 }
 0x4ff   :  { %2096 = vrot.lane.b32.xlu0 %v8395_v62, %s7736_s2 }
 0x501   :  { %2148 = vrot.lane.b32.xlu1 %v8387_v54, %s14427_s4 }
 0x503   :  { %2150 = vrot.lane.b32.xlu0 %v8391_v61, %s14427_s4 }
 0x505   :  { %2156 = vrot.lane.b32.xlu1 %v8389_v58, %s14427_s4 }
 0x507   :  { %2158 = vrot.lane.b32.xlu0 %v8395_v62, %s14427_s4 }
 0x509   :  { %2210 = vrot.lane.b32.xlu1 %v8387_v54, %s7737_s28 }
 0x50b   :  { %2212 = vrot.lane.b32.xlu0 %v8391_v61, %s7737_s28 }
 0x50d   :  { %2218 = vrot.lane.b32.xlu1 %v8389_v58, %s7737_s28 }
 0x50f   :  { %2220 = vrot.lane.b32.xlu0 %v8395_v62, %s7737_s28 }
 0x511   :  { %1772 = vrot.lane.b32.xlu1 %v8461_v3, %s7731_s13 }
 0x513   :  { %1774 = vrot.lane.b32.xlu0 %v8465_v5, %s7731_s13 }
 0x515   :  { %1780 = vrot.lane.b32.xlu1 %v8469_v7, %s7731_s13 }
 0x517   :  { %1782 = vrot.lane.b32.xlu0 %v8473_v9, %s7731_s13 }
 0x519   :  { %1834 = vrot.lane.b32.xlu1 %v8461_v3, %s7730_s23 }
 0x51b   :  { %1836 = vrot.lane.b32.xlu0 %v8465_v5, %s7730_s23 }
 0x51d   :  { %1842 = vrot.lane.b32.xlu1 %v8469_v7, %s7730_s23 }
 0x51f   :  { %1844 = vrot.lane.b32.xlu0 %v8473_v9, %s7730_s23 }
 0x521   :  { %1896 = vrot.lane.b32.xlu1 %v8461_v3, %s7733_s26 }
 0x523   :  { %1898 = vrot.lane.b32.xlu0 %v8465_v5, %s7733_s26 }
 0x525   :  { %1904 = vrot.lane.b32.xlu1 %v8469_v7, %s7733_s26 }
 0x527   :  { %1906 = vrot.lane.b32.xlu0 %v8473_v9, %s7733_s26 }
 0x529   :  { %1958 = vrot.lane.b32.xlu1 %v8461_v3, %s7732_s25 }
 0x52b   :  { %1960 = vrot.lane.b32.xlu0 %v8465_v5, %s7732_s25 }
 0x52d   :  { %1966 = vrot.lane.b32.xlu1 %v8469_v7, %s7732_s25 }
 0x52f   :  { %1968 = vrot.lane.b32.xlu0 %v8473_v9, %s7732_s25 }
 0x531   :  { %2028 = vrot.lane.b32.xlu1 %v8461_v3, %s7734_s1 }
 0x533   :  { %2030 = vrot.lane.b32.xlu0 %v8465_v5, %s7734_s1 }
 0x535   :  { %2036 = vrot.lane.b32.xlu1 %v8469_v7, %s7734_s1 }
 0x537   :  { %2038 = vrot.lane.b32.xlu0 %v8473_v9, %s7734_s1 }
 0x539   :  { %2090 = vrot.lane.b32.xlu1 %v8461_v3, %s7736_s2 }
 0x53b   :  { %2092 = vrot.lane.b32.xlu0 %v8465_v5, %s7736_s2 }
 0x53d   :  { %2098 = vrot.lane.b32.xlu1 %v8469_v7, %s7736_s2 }
 0x53f   :  { %2100 = vrot.lane.b32.xlu0 %v8473_v9, %s7736_s2 }
 0x541   :  { %2152 = vrot.lane.b32.xlu1 %v8461_v3, %s14427_s4 }
 0x543   :  { %2154 = vrot.lane.b32.xlu0 %v8465_v5, %s14427_s4  ;;  %v8523_v10 = vpop.permute.xlu1 %1768 }
 0x545   :  { %v8525_v11 = vpop.permute.xlu0 %1770  ;;  %2160 = vrot.lane.b32.xlu1 %v8469_v7, %s14427_s4 }
 0x547   :  { %2162 = vrot.lane.b32.xlu0 %v8473_v9, %s14427_s4  ;;  %v1777_v18 = vpop.permute.xlu1 %1776 }
 0x549   :  { %v1779_v19 = vpop.permute.xlu0 %1778  ;;  %2214 = vrot.lane.b32.xlu1 %v8461_v3, %s7737_s28 }
 0x54b   :  { %2216 = vrot.lane.b32.xlu0 %v8465_v5, %s7737_s28  ;;  %v8540_v20 = vpop.permute.xlu1 %1830 }
 0x54d   :  { %v8542_v21 = vpop.permute.xlu0 %1832  ;;  %2222 = vrot.lane.b32.xlu1 %v8469_v7, %s7737_s28 }
 0x54f   :  { %2224 = vrot.lane.b32.xlu0 %v8473_v9, %s7737_s28  ;;  %v8551_v23 = vpop.permute.xlu1 %1838 }
 0x551   :  { %v8556_v25 = vpop.permute.xlu0 %1840  ;;  %2314 = vperm.xlu1 %7684, %v2310_v22  }
 0x553   :  { %2319 = vperm.xlu0 %7683, %v2311_v24   ;;  %v8558_v26 = vpop.permute.xlu1 %1892 }
 0x555   :  { %v8560_v27 = vpop.permute.xlu0 %1894 }
 0x557   :  { %v8562_v28 = vpop.permute.xlu1 %1900 }
 0x559   :  { %v8564_v29 = vpop.permute.xlu0 %1902 }
 0x55b   :  { %v8566_v30 = vpop.permute.xlu1 %1954 }
 0x55d   :  { %v8568_v31 = vpop.permute.xlu0 %1956 }
 0x55f   :  { %v8570_v32 = vpop.permute.xlu1 %1962 }
 0x561   :  { %v8572_v33 = vpop.permute.xlu0 %1964 }
 0x563   :  { %v8574_v34 = vpop.permute.xlu1 %2024 }
 0x565   :  { %v8576_v35 = vpop.permute.xlu0 %2026 }
 0x567   :  { %v8578_v36 = vpop.permute.xlu1 %2032 }
 0x569   :  { %v8580_v37 = vpop.permute.xlu0 %2034 }
 0x56b   :  { %v8582_v38 = vpop.permute.xlu1 %2086 }
 0x56d   :  { %v8584_v39 = vpop.permute.xlu0 %2088 }
 0x56f   :  { %v8586_v40 = vpop.permute.xlu1 %2094 }
 0x571   :  { %v8588_v41 = vpop.permute.xlu0 %2096 }
 0x573   :  { %v8590_v42 = vpop.permute.xlu1 %2148 }
 0x575   :  { %v8592_v43 = vpop.permute.xlu0 %2150 }
 0x577   :  { %v8594_v44 = vpop.permute.xlu1 %2156 }
 0x579   :  { %v8596_v45 = vpop.permute.xlu0 %2158 }
 0x57b   :  { %v8598_v46 = vpop.permute.xlu1 %2210 }
 0x57c   :  { %14428 = vst [vmem:[#allocation7_spill] sm:$0xff] %v8598_v46 }
 0x57d   :  { %v8600_v47 = vpop.permute.xlu0 %2212 }
 0x57e   :  { %14429 = vst [vmem:[#allocation8_spill] sm:$0xff] %v8600_v47 }
 0x57f   :  { %v8602_v48 = vpop.permute.xlu1 %2218 }
 0x581   :  { %v8607_v50 = vpop.permute.xlu0 %2220 }
 0x582   :  { %14430 = vst [vmem:[#allocation9_spill] sm:$0xff] %v8607_v50 }
 0x583   :  { %v1773_v52 = vpop.permute.xlu1 %1772 }
 0x584   :  { %v1788_v53 = vsel %vm83_vm1, %v8523_v10, %v1773_v52 }
 0x585   :  { %v1775_v55 = vpop.permute.xlu0 %1774  ;;  %v1815_v59 = vmul.f32 %v1801_v51, %v1788_v53  ;;  %v1786_v53 = vsel %vm83_vm1, %v1773_v52, %v1777_v18 }
 0x586   :  { %v1789_v56 = vsel %vm83_vm1, %v8525_v11, %v1775_v55  ;;  %v1787_v60 = vsel %vm83_vm1, %v1775_v55, %v1779_v19 }
 0x587   :  { %v1819_v1 = vmul.f32 %v1801_v51, %v1789_v56  ;;  %v1781_v4 = vpop.permute.xlu1 %1780  ;;  %v1820_v56 = vmul.f32 %v1805_v17, %v1787_v60 }
 0x588   :  { %v1784_v22 = vsel %vm83_vm1, %v1777_v18, %v1781_v4  ;;  %v1790_v24 = vsel %vm83_vm1, %v1781_v4, %v8523_v10  ;;  %v1816_v4 = vmul.f32 %v1805_v17, %v1786_v53 }
 0x589   :  { %v1823_v51 = vpack.c.bf16 %v1819_v1, %v1815_v59  ;;  %v1783_v55 = vpop.permute.xlu0 %1782  ;;  %v1814_v63 = vmul.f32 %v1797_v57, %v1790_v24  ;;  %v1817_v47 = vmul.f32 %v1809_v2, %v1784_v22  ;;  %v1859_v1 = vrot.slane %v7490_v6, %v7907_v13 }
 0x58a   :  { %v1785_v8 = vsel %vm83_vm1, %v1779_v19, %v1783_v55  ;;  %v1791_v49 = vsel %vm83_vm1, %v1783_v55, %v8525_v11  ;;  %v1824_v60 = vpack.c.bf16 %v1820_v56, %v1816_v4 }
 0x58b   :  { %v1818_v50 = vmul.f32 %v1797_v57, %v1791_v49  ;;  %v1821_v46 = vmul.f32 %v1809_v2, %v1785_v8  ;;  %v1835_v10 = vpop.permute.xlu1 %1834  ;;  %2335 = vmatprep.subr.bf16.mxu0 %v1823_v51  ;;  %v1871_v57 = vrot.slane %v7490_v6, %v7909_v14 }
 0x58c   :  { %v1850_v18 = vsel %vm130_vm0, %v8540_v20, %v1835_v10 }
 0x58d   :  { %v1822_v52 = vpack.c.bf16 %v1818_v50, %v1814_v63  ;;  %v1825_v59 = vpack.c.bf16 %v1821_v46, %v1817_v47  ;;  %v1837_v19 = vpop.permute.xlu0 %1836  ;;  %v1877_v8 = vmul.f32 %v1863_v0, %v1850_v18  ;;  %v7491_v63 = vld [vmem:[%s14422_s11 + $0x8] sm:$0xf]  ;;  %v1867_v46 = vrot.slane %v7490_v6, %v7913_v16 }
 0x58e   :  { %v1851_v11 = vsel %vm130_vm0, %v8542_v21, %v1837_v19  ;;  %v1849_v2 = vsel %vm130_vm0, %v1837_v19, %v8556_v25  ;;  %v1925_v56 = vrot.slane %v7491_v63, %v7911_v15 }
 0x58f   :  { %v1881_v17 = vmul.f32 %v1863_v0, %v1851_v11  ;;  %v1843_v22 = vpop.permute.xlu1 %1842  ;;  %2336 = vmatpush1.bf16.msra.mxu0 %v1822_v52  ;;  %2378 = vmatprep.subr.bf16.mxu1 %v1825_v59  ;;  %v1848_v0 = vsel %vm130_vm0, %v1835_v10, %v8551_v23  ;;  %v1882_v51 = vmul.f32 %v1867_v46, %v1849_v2 }
 0x590   :  { %v1846_v47 = vsel %vm130_vm0, %v8551_v23, %v1843_v22  ;;  %v1852_v50 = vsel %vm130_vm0, %v1843_v22, %v8540_v20  ;;  %2379 = vmatpush1.bf16.msra.mxu1 %v1824_v60  ;;  %v1878_v23 = vmul.f32 %v1867_v46, %v1848_v0  ;;  %v1921_v11 = vrot.slane %v7491_v63, %v7907_v13  ;;  %v7492_v22 = vld [vmem:[%s14422_s11 + $0xc] sm:$0xf] }
 0x591   :  { %v1885_v24 = vpack.c.bf16 %v1881_v17, %v1877_v8  ;;  %v1845_v53 = vpop.permute.xlu0 %1844  ;;  %v1876_v49 = vmul.f32 %v1859_v1, %v1852_v50  ;;  %v1879_v20 = vmul.f32 %v1871_v57, %v1846_v47  ;;  %v1929_v46 = vrot.slane %v7491_v63, %v7913_v16 }
 0x592   :  { %v1847_v6 = vsel %vm130_vm0, %v8556_v25, %v1845_v53  ;;  %v1853_v55 = vsel %vm130_vm0, %v1845_v53, %v8542_v21  ;;  %v1886_v60 = vpack.c.bf16 %v1882_v51, %v1878_v23 }
 0x593   :  { %v1880_v4 = vmul.f32 %v1859_v1, %v1853_v55  ;;  %v1883_v18 = vmul.f32 %v1871_v57, %v1847_v6  ;;  %v1897_v52 = vpop.permute.xlu1 %1896  ;;  %2337 = vmatprep.subr.bf16.mxu0 %v1885_v24  ;;  %v1933_v1 = vrot.slane %v7491_v63, %v7909_v14  ;;  %v1987_v55 = vrot.slane %v7492_v22, %v7911_v15 }
 0x594   :  { %v1912_v10 = vsel %vm190_vm3, %v8558_v26, %v1897_v52  ;;  %v1910_v0 = vsel %vm190_vm3, %v1897_v52, %v8562_v28 }
 0x595   :  { %v1884_v59 = vpack.c.bf16 %v1880_v4, %v1876_v49  ;;  %v1887_v19 = vpack.c.bf16 %v1883_v18, %v1879_v20  ;;  %v1899_v25 = vpop.permute.xlu0 %1898  ;;  %v1939_v57 = vmul.f32 %v1925_v56, %v1912_v10 }
 0x596   :  { %v1913_v21 = vsel %vm190_vm3, %v8560_v27, %v1899_v25  ;;  %v1911_v8 = vsel %vm190_vm3, %v1899_v25, %v8564_v29 }
 0x597   :  { %v1943_v2 = vmul.f32 %v1925_v56, %v1913_v21  ;;  %v1905_v17 = vpop.permute.xlu1 %1904  ;;  %2338 = vmatpush1.bf16.msra.mxu0 %v1884_v59  ;;  %2380 = vmatprep.subr.bf16.mxu1 %v1887_v19  ;;  %v1944_v51 = vmul.f32 %v1929_v46, %v1911_v8  ;;  %v1983_v59 = vrot.slane %v7492_v22, %v7907_v13 }
 0x598   :  { %v1908_v47 = vsel %vm190_vm3, %v8562_v28, %v1905_v17  ;;  %v1914_v50 = vsel %vm190_vm3, %v1905_v17, %v8558_v26  ;;  %2381 = vmatpush1.bf16.msra.mxu1 %v1886_v60  ;;  %v1940_v28 = vmul.f32 %v1929_v46, %v1910_v0  ;;  %v1995_v19 = vrot.slane %v7492_v22, %v7909_v14 }
 0x599   :  { %v1947_v24 = vpack.c.bf16 %v1943_v2, %v1939_v57  ;;  %v1907_v53 = vpop.permute.xlu0 %1906  ;;  %v1938_v56 = vmul.f32 %v1921_v11, %v1914_v50  ;;  %v1941_v26 = vmul.f32 %v1933_v1, %v1908_v47  ;;  %v1991_v57 = vrot.slane %v7492_v22, %v7913_v16 }
 0x59a   :  { %v1909_v63 = vsel %vm190_vm3, %v8564_v29, %v1907_v53  ;;  %v1915_v6 = vsel %vm190_vm3, %v1907_v53, %v8560_v27  ;;  %v1948_v10 = vpack.c.bf16 %v1944_v51, %v1940_v28 }
 0x59b   :  { %v1942_v49 = vmul.f32 %v1921_v11, %v1915_v6  ;;  %v1945_v20 = vmul.f32 %v1933_v1, %v1909_v63  ;;  %v1959_v4 = vpop.permute.xlu1 %1958  ;;  %2339 = vmatprep.subr.bf16.mxu0 %v1947_v24  ;;  %v7493_v1 = vld [vmem:[%s14422_s11 + $0x14] sm:$0xf] }
 0x59c   :  { %v1974_v18 = vsel %vm238_vm2, %v8566_v30, %v1959_v4  ;;  %v1972_v17 = vsel %vm238_vm2, %v1959_v4, %v8570_v32  ;;  %v2057_v24 = vrot.slane %v7493_v1, %v7911_v15  ;;  %v2061_v4 = vrot.slane %v7493_v1, %v7913_v16 }
 0x59d   :  { %v1946_v52 = vpack.c.bf16 %v1942_v49, %v1938_v56  ;;  %v1949_v23 = vpack.c.bf16 %v1945_v20, %v1941_v26  ;;  %v1961_v29 = vpop.permute.xlu0 %1960  ;;  %v2001_v25 = vmul.f32 %v1987_v55, %v1974_v18  ;;  %v2002_v56 = vmul.f32 %v1991_v57, %v1972_v17 }
 0x59e   :  { %v1975_v27 = vsel %vm238_vm2, %v8568_v31, %v1961_v29  ;;  %v1973_v60 = vsel %vm238_vm2, %v1961_v29, %v8572_v33  ;;  %v2053_v49 = vrot.slane %v7493_v1, %v7907_v13 }
 0x59f   :  { %v2005_v21 = vmul.f32 %v1987_v55, %v1975_v27  ;;  %v1967_v11 = vpop.permute.xlu1 %1966  ;;  %2340 = vmatpush1.bf16.msra.mxu0 %v1946_v52  ;;  %2382 = vmatprep.subr.bf16.mxu1 %v1949_v23  ;;  %v2006_v50 = vmul.f32 %v1991_v57, %v1973_v60  ;;  %v2019_v55 = vpack.c.bf16 %v8473_v9, %v8469_v7  ;;  %v7494_v9 = vld [vmem:[%s14422_s11 + $0x18] sm:$0xf] }
 0x5a0   :  { %v1970_v8 = vsel %vm238_vm2, %v8570_v32, %v1967_v11  ;;  %v1976_v2 = vsel %vm238_vm2, %v1967_v11, %v8566_v30  ;;  %2383 = vmatpush1.bf16.msra.mxu1 %v1948_v10  ;;  %v2017_v32 = vpack.c.bf16 %v8465_v5, %v8461_v3  ;;  %v2065_v7 = vrot.slane %v7493_v1, %v7909_v14 }
 0x5a1   :  { %v2009_v46 = vpack.c.bf16 %v2005_v21, %v2001_v25  ;;  %v1969_v47 = vpop.permute.xlu0 %1968  ;;  %v2000_v53 = vmul.f32 %v1983_v59, %v1976_v2  ;;  %v2003_v30 = vmul.f32 %v1995_v19, %v1970_v8  ;;  %v2010_v28 = vpack.c.bf16 %v2006_v50, %v2002_v56 }
 0x5a2   :  { %v1971_v22 = vsel %vm238_vm2, %v8572_v33, %v1969_v47  ;;  %v1977_v0 = vsel %vm238_vm2, %v1969_v47, %v8568_v31  ;;  %v2115_v60 = vrot.slane %v7494_v9, %v7907_v13  ;;  %v2119_v1 = vrot.slane %v7494_v9, %v7911_v15 }
 0x5a3   :  { %v2004_v51 = vmul.f32 %v1983_v59, %v1977_v0  ;;  %v2007_v63 = vmul.f32 %v1995_v19, %v1971_v22  ;;  %v2029_v6 = vpop.permute.xlu1 %2028  ;;  %2341 = vmatprep.subr.bf16.mxu0 %v2009_v46  ;;  %v14431_v46 = vpack.c.bf16 %v8391_v61, %v8387_v54  ;;  %v2123_v54 = vrot.slane %v7494_v9, %v7913_v16 }
 0x5a4   :  { %v2042_v33 = vsel %vm306_vm4, %v2029_v6, %v8578_v36  ;;  %v2044_v18 = vsel %vm306_vm4, %v8574_v34, %v2029_v6 }
 0x5a5   :  { %v2008_v31 = vpack.c.bf16 %v2004_v51, %v2000_v53  ;;  %v2011_v26 = vpack.c.bf16 %v2007_v63, %v2003_v30  ;;  %v2031_v20 = vpop.permute.xlu0 %2030  ;;  %v2071_v52 = vmul.f32 %v2057_v24, %v2042_v33  ;;  %v2070_v21 = vmul.f32 %v2053_v49, %v2044_v18 }
 0x5a6   :  { %v2043_v3 = vsel %vm306_vm4, %v2031_v20, %v8580_v37  ;;  %v2045_v5 = vsel %vm306_vm4, %v8576_v35, %v2031_v20  ;;  %v2127_v51 = vrot.slane %v7494_v9, %v7909_v14 }
 0x5a7   :  { %v2075_v23 = vmul.f32 %v2057_v24, %v2043_v3  ;;  %v2037_v29 = vpop.permute.xlu1 %2036  ;;  %2342 = vmatpush1.bf16.msra.mxu0 %v2008_v31  ;;  %2384 = vmatprep.subr.bf16.mxu1 %v2011_v26  ;;  %v2074_v59 = vmul.f32 %v2053_v49, %v2045_v5 }
 0x5a8   :  { %v2040_v10 = vsel %vm306_vm4, %v8578_v36, %v2037_v29  ;;  %v2046_v27 = vsel %vm306_vm4, %v2037_v29, %v8574_v34  ;;  %2343 = vmatprep.subr.bf16.mxu0 %v2017_v32  ;;  %2385 = vmatpush1.bf16.msra.mxu1 %v2010_v28  ;;  %v7495_v32 = vld [vmem:[%s14422_s11 + $0x1c] sm:$0xf] }
 0x5a9   :  { %v2079_v19 = vpack.c.bf16 %v2075_v23, %v2071_v52  ;;  %v2039_v25 = vpop.permute.xlu0 %2038  ;;  %2386 = vmatprep.subr.bf16.mxu1 %v2019_v55  ;;  %v2072_v34 = vmul.f32 %v2061_v4, %v2040_v10  ;;  %v2073_v57 = vmul.f32 %v2065_v7, %v2046_v27  ;;  %v2078_v50 = vpack.c.bf16 %v2074_v59, %v2070_v21 }
 0x5aa   :  { %v2041_v11 = vsel %vm306_vm4, %v8580_v37, %v2039_v25  ;;  %v2047_v36 = vsel %vm306_vm4, %v2039_v25, %v8576_v35  ;;  %v14432_v35 = vpack.c.bf16 %v8395_v62, %v8389_v58  ;;  %v2185_v10 = vrot.slane %v7495_v32, %v7913_v16 }
 0x5ab   :  { %v2076_v8 = vmul.f32 %v2061_v4, %v2041_v11  ;;  %v2077_v2 = vmul.f32 %v2065_v7, %v2047_v36  ;;  %v2091_v17 = vpop.permute.xlu1 %2090  ;;  %2344 = vmatpush1.bf16.msra.mxu0 %v14431_v46  ;;  %v2177_v4 = vrot.slane %v7495_v32, %v7907_v13  ;;  %v2189_v27 = vrot.slane %v7495_v32, %v7909_v14  ;;  %v7496_v11 = vld [vmem:[%s14422_s11 + $0x20] sm:$0xf] }
 0x5ac   :  { %v2104_v47 = vsel %vm366_vm6, %v2091_v17, %v8586_v40  ;;  %v2106_v37 = vsel %vm366_vm6, %v8582_v38, %v2091_v17  ;;  %2345 = vmatprep.subr.bf16.mxu0 %v2079_v19  ;;  %2387 = vmatpush1.bf16.msra.mxu1 %v14432_v35  ;;  %v2239_v46 = vrot.slane %v7496_v11, %v7907_v13 }
 0x5ad   :  { %v2080_v22 = vpack.c.bf16 %v2076_v8, %v2072_v34  ;;  %v2081_v0 = vpack.c.bf16 %v2077_v2, %v2073_v57  ;;  %v2093_v24 = vpop.permute.xlu0 %2092  ;;  %v2132_v61 = vmul.f32 %v2115_v60, %v2106_v37  ;;  %v2133_v63 = vmul.f32 %v2119_v1, %v2104_v47 }
 0x5ae   :  { %v2105_v53 = vsel %vm366_vm6, %v2093_v24, %v8588_v41  ;;  %v2107_v30 = vsel %vm366_vm6, %v8584_v39, %v2093_v24 }
 0x5af   :  { %v2136_v58 = vmul.f32 %v2115_v60, %v2107_v30  ;;  %v2137_v62 = vmul.f32 %v2119_v1, %v2105_v53  ;;  %v2099_v6 = vpop.permute.xlu1 %2098  ;;  %2388 = vmatprep.subr.bf16.mxu1 %v2081_v0  ;;  %2346 = vmatpush1.bf16.msra.mxu0 %v2078_v50  ;;  %v14433_v0 = vld [vmem:[#allocation7_spill] sm:$0xff]  ;;  %v14435_v30 = vld [vmem:[#allocation8_spill] sm:$0xff] }
 0x5b0   :  { %v2102_v55 = vsel %vm366_vm6, %v8586_v40, %v2099_v6  ;;  %v2108_v56 = vsel %vm366_vm6, %v2099_v6, %v8582_v38  ;;  %2389 = vmatpush1.bf16.msra.mxu1 %v2080_v22  ;;  %v2181_v40 = vrot.slane %v7495_v32, %v7911_v15 }
 0x5b1   :  { %v2140_v33 = vpack.c.bf16 %v2136_v58, %v2132_v61  ;;  %v2141_v31 = vpack.c.bf16 %v2137_v62, %v2133_v63  ;;  %v2101_v26 = vpop.permute.xlu0 %2100  ;;  %v2134_v28 = vmul.f32 %v2123_v54, %v2102_v55  ;;  %v2135_v3 = vmul.f32 %v2127_v51, %v2108_v56  ;;  %v14434_v61 = vld [vmem:[#allocation9_spill] sm:$0xff] }
 0x5b2   :  { %v2103_v49 = vsel %vm366_vm6, %v8588_v41, %v2101_v26  ;;  %v2109_v20 = vsel %vm366_vm6, %v2101_v26, %v8584_v39  ;;  %v2247_v63 = vrot.slane %v7496_v11, %v7913_v16  ;;  %v2251_v58 = vrot.slane %v7496_v11, %v7909_v14 }
 0x5b3   :  { %v2138_v5 = vmul.f32 %v2123_v54, %v2103_v49  ;;  %v2139_v38 = vmul.f32 %v2127_v51, %v2109_v20  ;;  %v2153_v7 = vpop.permute.xlu1 %2152  ;;  %2347 = vmatprep.subr.bf16.mxu0 %v2141_v31 }
 0x5b4   :  { %v2166_v9 = vsel %vm414_vm5, %v2153_v7, %v8594_v44  ;;  %v2168_v41 = vsel %vm414_vm5, %v8590_v42, %v2153_v7  ;;  %2348 = vmatpush1.bf16.msra.mxu0 %v2140_v33 }
 0x5b5   :  { %v2142_v39 = vpack.c.bf16 %v2138_v5, %v2134_v28  ;;  %v2143_v18 = vpack.c.bf16 %v2139_v38, %v2135_v3  ;;  %v2155_v52 = vpop.permute.xlu0 %2154  ;;  %v2194_v59 = vmul.f32 %v2177_v4, %v2168_v41  ;;  %v2195_v19 = vmul.f32 %v2181_v40, %v2166_v9  ;;  %v7688_v38 = vld [vmem:[%s14131_s5] ss:$8 sps:$4 sm:$0xff]  }
 0x5b6   :  { %v2167_v23 = vsel %vm414_vm5, %v2155_v52, %v8596_v45  ;;  %v2169_v29 = vsel %vm414_vm5, %v8592_v43, %v2155_v52 }
 0x5b7   :  { %v2198_v25 = vmul.f32 %v2177_v4, %v2169_v29  ;;  %v2199_v60 = vmul.f32 %v2181_v40, %v2167_v23  ;;  %v2161_v21 = vpop.permute.xlu1 %2160  ;;  %2390 = vmatprep.subr.bf16.mxu1 %v2143_v18 }
 0x5b8   :  { %v2164_v36 = vsel %vm414_vm5, %v8594_v44, %v2161_v21  ;;  %v2170_v1 = vsel %vm414_vm5, %v2161_v21, %v8590_v42  ;;  %2391 = vmatpush1.bf16.msra.mxu1 %v2142_v39  ;;  %v2243_v44 = vrot.slane %v7496_v11, %v7911_v15 }
 0x5b9   :  { %v2202_v34 = vpack.c.bf16 %v2198_v25, %v2194_v59  ;;  %v2203_v57 = vpack.c.bf16 %v2199_v60, %v2195_v19  ;;  %v2163_v8 = vpop.permute.xlu0 %2162  ;;  %v2196_v47 = vmul.f32 %v2185_v10, %v2164_v36  ;;  %v2197_v37 = vmul.f32 %v2189_v27, %v2170_v1 }
 0x5ba   :  { %v2165_v2 = vsel %vm414_vm5, %v8596_v45, %v2163_v8  ;;  %v2171_v17 = vsel %vm414_vm5, %v2163_v8, %v8592_v43 }
 0x5bb   :  { %v2200_v35 = vmul.f32 %v2185_v10, %v2165_v2  ;;  %v2201_v42 = vmul.f32 %v2189_v27, %v2171_v17  ;;  %v2215_v50 = vpop.permute.xlu1 %2214  ;;  %2349 = vmatprep.subr.bf16.mxu0 %v2203_v57 }
 0x5bc   :  { %v2228_v22 = vsel %vm474_vm7, %v2215_v50, %v8602_v48  ;;  %v2230_v45 = vsel %vm474_vm7, %v14433_v0, %v2215_v50  ;;  %2350 = vmatpush1.bf16.msra.mxu0 %v2202_v34 }
 0x5bd   :  { %v2204_v43 = vpack.c.bf16 %v2200_v35, %v2196_v47  ;;  %v2205_v24 = vpack.c.bf16 %v2201_v42, %v2197_v37  ;;  %v2217_v54 = vpop.permute.xlu0 %2216  ;;  %v2256_v62 = vmul.f32 %v2239_v46, %v2230_v45  ;;  %v2257_v6 = vmul.f32 %v2243_v44, %v2228_v22  ;;  %v7689_v45 = vld [vmem:[%s14133_s6 + $0x4] ss:$8 sps:$4 sm:$0xff]  }
 0x5be   :  { %v2229_v53 = vsel %vm474_vm7, %v2217_v54, %v14434_v61  ;;  %v2231_v51 = vsel %vm474_vm7, %v14435_v30, %v2217_v54 }
 0x5bf   :  { %v2260_v32 = vmul.f32 %v2239_v46, %v2231_v51  ;;  %v2261_v55 = vmul.f32 %v2243_v44, %v2229_v53  ;;  %v2223_v56 = vpop.permute.xlu1 %2222  ;;  %2392 = vmatprep.subr.bf16.mxu1 %v2205_v24  ;;  %v2971_v53 = vld [vmem:[%s14134_s15] sm:$0xff]  ;;  %v2972_v51 = vld [vmem:[%s14134_s15 + $0x8] sm:$0xff] }
 0x5c0   :  { %v2226_v33 = vsel %vm474_vm7, %v8602_v48, %v2223_v56  ;;  %v2232_v31 = vsel %vm474_vm7, %v2223_v56, %v14433_v0  ;;  %2393 = vmatpush1.bf16.msra.mxu1 %v2204_v43 }
 0x5c1   :  { %v2264_v26 = vpack.c.bf16 %v2260_v32, %v2256_v62  ;;  %v2265_v49 = vpack.c.bf16 %v2261_v55, %v2257_v6  ;;  %v2225_v20 = vpop.permute.xlu0 %2224  ;;  %v2258_v28 = vmul.f32 %v2247_v63, %v2226_v33  ;;  %v2259_v3 = vmul.f32 %v2251_v58, %v2232_v31 }
 0x5c2   :  { %v2227_v4 = vsel %vm474_vm7, %v14434_v61, %v2225_v20  ;;  %v2233_v40 = vsel %vm474_vm7, %v2225_v20, %v14435_v30 }
 0x5c3   :  { %v2262_v5 = vmul.f32 %v2247_v63, %v2227_v4  ;;  %v2263_v48 = vmul.f32 %v2251_v58, %v2233_v40  ;;  %2351 = vmatprep.subr.bf16.mxu0 %v2265_v49 }
 0x5c4   :  { %2352 = vmatpush1.bf16.msra.mxu0 %v2264_v26 }
 0x5c5   :  { %v2266_v7 = vpack.c.bf16 %v2262_v5, %v2258_v28  ;;  %v2267_v9 = vpack.c.bf16 %v2263_v48, %v2259_v3 }
 0x5c7   :  { %2368 = vmatmul.mubr.bf16.vlgmr.msra.gmra.mrb[12].mxu0 %v7688_v38  ;;  %2394 = vmatprep.subr.bf16.mxu1 %v2267_v9 }
 0x5c8   :  { %2395 = vmatpush1.bf16.msra.mxu1 %v2266_v7  ;;  %7510 = vmatprep.mubr.msk.bf16.mxu0 %vm2331_vm10, %v7689_v45 }
 0x5cb   :  { %2411 = vmatmul.mubr.bf16.vlgmr.msra.gmra.mrb[12].mxu1 %v7688_v38 }
 0x5cc   :  { %7511 = vmatprep.mubr.msk.bf16.mxu1 %vm2331_vm10, %v7689_v45 }
 0x5d0   :  { %v2315_v41 = vpop.permute.xlu1 %2314 }
 0x5d2   :  { %v2320_v23 = vpop.permute.xlu0 %2319 }
 0x69a   :  { %v2369_v39 = vpop.f32.mrb[12].mxu0 }
 0x69b   :  { %v2370_v18 = vadd.f32 %v2369_v39, %v2315_v41  ;;  %v2371_v52 = vpop.f32.mrb[13].mxu0 }
 0x69c   :  { %v2373_v29 = vpop.f32.mrb[14].mxu0  ;;  %v2372_v17 = vadd.f32 %v2371_v52, %v2315_v41  ;;  %v2453_v52 = vld [vmem:[%s14422_s11] sm:$0xf] }
 0x69d   :  { %v8863_v10 = vmax.f32 %v2370_v18, 0.0  ;;  %v2374_v27 = vadd.f32 %v2373_v29, %v2320_v23  ;;  %v2375_v59 = vpop.f32.mrb[15].mxu0  ;;  %v2462_v29 = vrot.slane %v2453_v52, %v7911_v15 }
 0x69e   :  { %v2412_v19 = vpop.f32.mrb[12].mxu1  ;;  %v2376_v46 = vadd.f32 %v2375_v59, %v2320_v23  ;;  %v8937_v44 = vmax.f32 %v2372_v17, 0.0  ;;  %v2470_v17 = vrot.slane %v2453_v52, %v7909_v14 }
 0x69f   :  { %v8865_v25 = vmax.f32 %v2374_v27, 0.0  ;;  %v2413_v60 = vadd.f32 %v2412_v19, %v2315_v41  ;;  %v2414_v21 = vpop.f32.mrb[13].mxu1  ;;  %2429 = vrot.lane.b32.xlu1 %v8863_v10, %s7731_s13 }
 0x6a0   :  { %v2416_v11 = vpop.f32.mrb[14].mxu1  ;;  %v2415_v47 = vadd.f32 %v2414_v21, %v2315_v41  ;;  %v8941_v37 = vmax.f32 %v2376_v46, 0.0  ;;  %v2458_v21 = vrot.slane %v2453_v52, %v7907_v13 }
 0x6a1   :  { %v8869_v36 = vmax.f32 %v2413_v60, 0.0  ;;  %v2417_v1 = vadd.f32 %v2416_v11, %v2320_v23  ;;  %v2418_v34 = vpop.f32.mrb[15].mxu1  ;;  %2431 = vrot.lane.b32.xlu0 %v8865_v25, %s7731_s13 }
 0x6a2   :  { %v2419_v35 = vadd.f32 %v2418_v34, %v2320_v23  ;;  %v8945_v42 = vmax.f32 %v2415_v47, 0.0  ;;  %v7501_v47 = vld [vmem:[%s14422_s11 + $0x4] sm:$0xf] }
 0x6a3   :  { %v8875_v8 = vmax.f32 %v2417_v1, 0.0  ;;  %2437 = vrot.lane.b32.xlu1 %v8869_v36, %s7731_s13  ;;  %v2524_v2 = vrot.slane %v7501_v47, %v7911_v15 }
 0x6a4   :  { %v8949_v50 = vmax.f32 %v2419_v35, 0.0  ;;  %v2466_v35 = vrot.slane %v2453_v52, %v7913_v16 }
 0x6a5   :  { %2439 = vrot.lane.b32.xlu0 %v8875_v8, %s7731_s13 }
 0x6a7   :  { %2491 = vrot.lane.b32.xlu1 %v8863_v10, %s7730_s23 }
 0x6a9   :  { %2493 = vrot.lane.b32.xlu0 %v8865_v25, %s7730_s23 }
 0x6ab   :  { %2499 = vrot.lane.b32.xlu1 %v8869_v36, %s7730_s23 }
 0x6ad   :  { %2501 = vrot.lane.b32.xlu0 %v8875_v8, %s7730_s23 }
 0x6af   :  { %2553 = vrot.lane.b32.xlu1 %v8863_v10, %s7733_s26 }
 0x6b1   :  { %2555 = vrot.lane.b32.xlu0 %v8865_v25, %s7733_s26 }
 0x6b3   :  { %2561 = vrot.lane.b32.xlu1 %v8869_v36, %s7733_s26 }
 0x6b5   :  { %2563 = vrot.lane.b32.xlu0 %v8875_v8, %s7733_s26 }
 0x6b7   :  { %2615 = vrot.lane.b32.xlu1 %v8863_v10, %s7732_s25 }
 0x6b9   :  { %2617 = vrot.lane.b32.xlu0 %v8865_v25, %s7732_s25 }
 0x6bb   :  { %2623 = vrot.lane.b32.xlu1 %v8869_v36, %s7732_s25 }
 0x6bd   :  { %2625 = vrot.lane.b32.xlu0 %v8875_v8, %s7732_s25 }
 0x6bf   :  { %2685 = vrot.lane.b32.xlu1 %v8863_v10, %s7734_s1 }
 0x6c1   :  { %2687 = vrot.lane.b32.xlu0 %v8865_v25, %s7734_s1 }
 0x6c3   :  { %2693 = vrot.lane.b32.xlu1 %v8869_v36, %s7734_s1 }
 0x6c5   :  { %2695 = vrot.lane.b32.xlu0 %v8875_v8, %s7734_s1 }
 0x6c7   :  { %2747 = vrot.lane.b32.xlu1 %v8863_v10, %s7736_s2 }
 0x6c9   :  { %2749 = vrot.lane.b32.xlu0 %v8865_v25, %s7736_s2 }
 0x6cb   :  { %2755 = vrot.lane.b32.xlu1 %v8869_v36, %s7736_s2 }
 0x6cd   :  { %2757 = vrot.lane.b32.xlu0 %v8875_v8, %s7736_s2 }
 0x6cf   :  { %2809 = vrot.lane.b32.xlu1 %v8863_v10, %s14427_s4 }
 0x6d1   :  { %2811 = vrot.lane.b32.xlu0 %v8865_v25, %s14427_s4 }
 0x6d3   :  { %2817 = vrot.lane.b32.xlu1 %v8869_v36, %s14427_s4 }
 0x6d5   :  { %2819 = vrot.lane.b32.xlu0 %v8875_v8, %s14427_s4 }
 0x6d7   :  { %2871 = vrot.lane.b32.xlu1 %v8863_v10, %s7737_s28 }
 0x6d9   :  { %2873 = vrot.lane.b32.xlu0 %v8865_v25, %s7737_s28 }
 0x6db   :  { %2879 = vrot.lane.b32.xlu1 %v8869_v36, %s7737_s28 }
 0x6dd   :  { %2881 = vrot.lane.b32.xlu0 %v8875_v8, %s7737_s28 }
 0x6df   :  { %2433 = vrot.lane.b32.xlu1 %v8937_v44, %s7731_s13 }
 0x6e1   :  { %2435 = vrot.lane.b32.xlu0 %v8941_v37, %s7731_s13 }
 0x6e3   :  { %2441 = vrot.lane.b32.xlu1 %v8945_v42, %s7731_s13 }
 0x6e5   :  { %2443 = vrot.lane.b32.xlu0 %v8949_v50, %s7731_s13 }
 0x6e7   :  { %2495 = vrot.lane.b32.xlu1 %v8937_v44, %s7730_s23 }
 0x6e9   :  { %2497 = vrot.lane.b32.xlu0 %v8941_v37, %s7730_s23 }
 0x6eb   :  { %2503 = vrot.lane.b32.xlu1 %v8945_v42, %s7730_s23 }
 0x6ed   :  { %2505 = vrot.lane.b32.xlu0 %v8949_v50, %s7730_s23 }
 0x6ef   :  { %2557 = vrot.lane.b32.xlu1 %v8937_v44, %s7733_s26 }
 0x6f1   :  { %2559 = vrot.lane.b32.xlu0 %v8941_v37, %s7733_s26 }
 0x6f3   :  { %2565 = vrot.lane.b32.xlu1 %v8945_v42, %s7733_s26 }
 0x6f5   :  { %2567 = vrot.lane.b32.xlu0 %v8949_v50, %s7733_s26 }
 0x6f7   :  { %2619 = vrot.lane.b32.xlu1 %v8937_v44, %s7732_s25 }
 0x6f9   :  { %2621 = vrot.lane.b32.xlu0 %v8941_v37, %s7732_s25 }
 0x6fb   :  { %2627 = vrot.lane.b32.xlu1 %v8945_v42, %s7732_s25 }
 0x6fd   :  { %2629 = vrot.lane.b32.xlu0 %v8949_v50, %s7732_s25 }
 0x6ff   :  { %2689 = vrot.lane.b32.xlu1 %v8937_v44, %s7734_s1 }
 0x701   :  { %2691 = vrot.lane.b32.xlu0 %v8941_v37, %s7734_s1 }
 0x703   :  { %2697 = vrot.lane.b32.xlu1 %v8945_v42, %s7734_s1 }
 0x705   :  { %2699 = vrot.lane.b32.xlu0 %v8949_v50, %s7734_s1 }
 0x707   :  { %2751 = vrot.lane.b32.xlu1 %v8937_v44, %s7736_s2 }
 0x709   :  { %2753 = vrot.lane.b32.xlu0 %v8941_v37, %s7736_s2 }
 0x70b   :  { %2759 = vrot.lane.b32.xlu1 %v8945_v42, %s7736_s2 }
 0x70d   :  { %2761 = vrot.lane.b32.xlu0 %v8949_v50, %s7736_s2 }
 0x70f   :  { %2813 = vrot.lane.b32.xlu1 %v8937_v44, %s14427_s4 }
 0x711   :  { %2815 = vrot.lane.b32.xlu0 %v8941_v37, %s14427_s4  ;;  %v8999_v22 = vpop.permute.xlu1 %2429 }
 0x713   :  { %v9001_v0 = vpop.permute.xlu0 %2431  ;;  %2821 = vrot.lane.b32.xlu1 %v8945_v42, %s14427_s4 }
 0x715   :  { %2823 = vrot.lane.b32.xlu0 %v8949_v50, %s14427_s4  ;;  %v2438_v43 = vpop.permute.xlu1 %2437 }
 0x717   :  { %v2440_v24 = vpop.permute.xlu0 %2439  ;;  %2875 = vrot.lane.b32.xlu1 %v8937_v44, %s7737_s28 }
 0x719   :  { %2877 = vrot.lane.b32.xlu0 %v8941_v37, %s7737_s28  ;;  %v9016_v54 = vpop.permute.xlu1 %2491 }
 0x71b   :  { %v9018_v61 = vpop.permute.xlu0 %2493  ;;  %2883 = vrot.lane.b32.xlu1 %v8945_v42, %s7737_s28 }
 0x71d   :  { %2885 = vrot.lane.b32.xlu0 %v8949_v50, %s7737_s28  ;;  %v9027_v30 = vpop.permute.xlu1 %2499 }
 0x71f   :  { %v9032_v63 = vpop.permute.xlu0 %2501  ;;  %2975 = vperm.xlu1 %7684, %v2971_v53  }
 0x721   :  { %2980 = vperm.xlu0 %7683, %v2972_v51   ;;  %v9034_v58 = vpop.permute.xlu1 %2553 }
 0x723   :  { %v9036_v62 = vpop.permute.xlu0 %2555 }
 0x725   :  { %v9038_v6 = vpop.permute.xlu1 %2561 }
 0x727   :  { %v9040_v32 = vpop.permute.xlu0 %2563 }
 0x729   :  { %v9042_v55 = vpop.permute.xlu1 %2615 }
 0x72b   :  { %v9044_v56 = vpop.permute.xlu0 %2617 }
 0x72d   :  { %v9046_v33 = vpop.permute.xlu1 %2623 }
 0x72f   :  { %v9048_v31 = vpop.permute.xlu0 %2625 }
 0x731   :  { %v9050_v26 = vpop.permute.xlu1 %2685 }
 0x733   :  { %v9052_v49 = vpop.permute.xlu0 %2687 }
 0x735   :  { %v9054_v20 = vpop.permute.xlu1 %2693 }
 0x737   :  { %v9056_v4 = vpop.permute.xlu0 %2695 }
 0x739   :  { %v9058_v40 = vpop.permute.xlu1 %2747 }
 0x73b   :  { %v9060_v28 = vpop.permute.xlu0 %2749 }
 0x73d   :  { %v9062_v3 = vpop.permute.xlu1 %2755 }
 0x73f   :  { %v9064_v5 = vpop.permute.xlu0 %2757 }
 0x741   :  { %v9066_v48 = vpop.permute.xlu1 %2809 }
 0x743   :  { %v9068_v38 = vpop.permute.xlu0 %2811 }
 0x745   :  { %v9070_v7 = vpop.permute.xlu1 %2817 }
 0x747   :  { %v9072_v9 = vpop.permute.xlu0 %2819 }
 0x749   :  { %v9074_v41 = vpop.permute.xlu1 %2871 }
 0x74a   :  { %14436 = vst [vmem:[#allocation7_spill] sm:$0xff] %v9074_v41 }
 0x74b   :  { %v9076_v39 = vpop.permute.xlu0 %2873 }
 0x74c   :  { %14437 = vst [vmem:[#allocation9_spill] sm:$0xff] %v9076_v39 }
 0x74d   :  { %v9078_v18 = vpop.permute.xlu1 %2879 }
 0x74f   :  { %v9083_v23 = vpop.permute.xlu0 %2881 }
 0x750   :  { %14438 = vst [vmem:[#allocation8_spill] sm:$0xff] %v9083_v23 }
 0x751   :  { %v2434_v27 = vpop.permute.xlu1 %2433 }
 0x752   :  { %v2449_v59 = vsel %vm83_vm1, %v8999_v22, %v2434_v27  ;;  %v2447_v51 = vsel %vm83_vm1, %v2434_v27, %v2438_v43 }
 0x753   :  { %v2436_v19 = vpop.permute.xlu0 %2435  ;;  %v2476_v11 = vmul.f32 %v2462_v29, %v2449_v59 }
 0x754   :  { %v2450_v60 = vsel %vm83_vm1, %v9001_v0, %v2436_v19  ;;  %v2448_v1 = vsel %vm83_vm1, %v2436_v19, %v2440_v24 }
 0x755   :  { %v2480_v34 = vmul.f32 %v2462_v29, %v2450_v60  ;;  %v2442_v46 = vpop.permute.xlu1 %2441  ;;  %v2481_v19 = vmul.f32 %v2466_v35, %v2448_v1 }
 0x756   :  { %v2445_v45 = vsel %vm83_vm1, %v2438_v43, %v2442_v46  ;;  %v2451_v53 = vsel %vm83_vm1, %v2442_v46, %v8999_v22  ;;  %v2477_v46 = vmul.f32 %v2466_v35, %v2447_v51 }
 0x757   :  { %v2484_v29 = vpack.c.bf16 %v2480_v34, %v2476_v11  ;;  %v2444_v59 = vpop.permute.xlu0 %2443  ;;  %v2475_v57 = vmul.f32 %v2458_v21, %v2451_v53  ;;  %v2478_v39 = vmul.f32 %v2470_v17, %v2445_v45  ;;  %v2520_v34 = vrot.slane %v7501_v47, %v7907_v13 }
 0x758   :  { %v2446_v60 = vsel %vm83_vm1, %v2440_v24, %v2444_v59  ;;  %v2452_v52 = vsel %vm83_vm1, %v2444_v59, %v9001_v0  ;;  %v2485_v1 = vpack.c.bf16 %v2481_v19, %v2477_v46 }
 0x759   :  { %v2479_v23 = vmul.f32 %v2458_v21, %v2452_v52  ;;  %v2482_v41 = vmul.f32 %v2470_v17, %v2446_v60  ;;  %v2496_v22 = vpop.permute.xlu1 %2495  ;;  %2995 = vmatprep.subr.bf16.mxu0 %v2484_v29  ;;  %v2532_v21 = vrot.slane %v7501_v47, %v7909_v14 }
 0x75a   :  { %v2511_v43 = vsel %vm130_vm0, %v9016_v54, %v2496_v22 }
 0x75b   :  { %v2483_v27 = vpack.c.bf16 %v2479_v23, %v2475_v57  ;;  %v2486_v11 = vpack.c.bf16 %v2482_v41, %v2478_v39  ;;  %v2498_v24 = vpop.permute.xlu0 %2497  ;;  %v2538_v17 = vmul.f32 %v2524_v2, %v2511_v43  ;;  %v7502_v57 = vld [vmem:[%s14422_s11 + $0x8] sm:$0xf]  ;;  %v2528_v41 = vrot.slane %v7501_v47, %v7913_v16 }
 0x75c   :  { %v2512_v0 = vsel %vm130_vm0, %v9018_v61, %v2498_v24  ;;  %v2510_v35 = vsel %vm130_vm0, %v2498_v24, %v9032_v63  ;;  %v2586_v60 = vrot.slane %v7502_v57, %v7911_v15 }
 0x75d   :  { %v2542_v45 = vmul.f32 %v2524_v2, %v2512_v0  ;;  %v2504_v53 = vpop.permute.xlu1 %2503  ;;  %2996 = vmatpush1.bf16.msra.mxu0 %v2483_v27  ;;  %3038 = vmatprep.subr.bf16.mxu1 %v2486_v11  ;;  %v2509_v2 = vsel %vm130_vm0, %v2496_v22, %v9027_v30  ;;  %v2543_v59 = vmul.f32 %v2528_v41, %v2510_v35 }
 0x75e   :  { %v2507_v39 = vsel %vm130_vm0, %v9027_v30, %v2504_v53  ;;  %v2513_v23 = vsel %vm130_vm0, %v2504_v53, %v9016_v54  ;;  %3039 = vmatpush1.bf16.msra.mxu1 %v2485_v1  ;;  %v2539_v30 = vmul.f32 %v2528_v41, %v2509_v2  ;;  %v2582_v0 = vrot.slane %v7502_v57, %v7907_v13  ;;  %v7503_v53 = vld [vmem:[%s14422_s11 + $0xc] sm:$0xf] }
 0x75f   :  { %v2546_v51 = vpack.c.bf16 %v2542_v45, %v2538_v17  ;;  %v2506_v29 = vpop.permute.xlu0 %2505  ;;  %v2537_v52 = vmul.f32 %v2520_v34, %v2513_v23  ;;  %v2540_v54 = vmul.f32 %v2532_v21, %v2507_v39  ;;  %v2590_v41 = vrot.slane %v7502_v57, %v7913_v16 }
 0x760   :  { %v2508_v47 = vsel %vm130_vm0, %v9032_v63, %v2506_v29  ;;  %v2514_v19 = vsel %vm130_vm0, %v2506_v29, %v9018_v61  ;;  %v2547_v1 = vpack.c.bf16 %v2543_v59, %v2539_v30 }
 0x761   :  { %v2541_v46 = vmul.f32 %v2520_v34, %v2514_v19  ;;  %v2544_v43 = vmul.f32 %v2532_v21, %v2508_v47  ;;  %v2558_v27 = vpop.permute.xlu1 %2557  ;;  %2997 = vmatprep.subr.bf16.mxu0 %v2546_v51  ;;  %v2594_v34 = vrot.slane %v7502_v57, %v7909_v14  ;;  %v2648_v19 = vrot.slane %v7503_v53, %v7911_v15 }
 0x762   :  { %v2573_v22 = vsel %vm190_vm3, %v9034_v58, %v2558_v27  ;;  %v2571_v2 = vsel %vm190_vm3, %v2558_v27, %v9038_v6 }
 0x763   :  { %v2545_v11 = vpack.c.bf16 %v2541_v46, %v2537_v52  ;;  %v2548_v24 = vpack.c.bf16 %v2544_v43, %v2540_v54  ;;  %v2560_v63 = vpop.permute.xlu0 %2559  ;;  %v2600_v21 = vmul.f32 %v2586_v60, %v2573_v22 }
 0x764   :  { %v2574_v61 = vsel %vm190_vm3, %v9036_v62, %v2560_v63  ;;  %v2572_v17 = vsel %vm190_vm3, %v2560_v63, %v9040_v32 }
 0x765   :  { %v2604_v35 = vmul.f32 %v2586_v60, %v2574_v61  ;;  %v2566_v45 = vpop.permute.xlu1 %2565  ;;  %2998 = vmatpush1.bf16.msra.mxu0 %v2545_v11  ;;  %3040 = vmatprep.subr.bf16.mxu1 %v2548_v24  ;;  %v2605_v59 = vmul.f32 %v2590_v41, %v2572_v17  ;;  %v2644_v11 = vrot.slane %v7503_v53, %v7907_v13 }
 0x766   :  { %v2569_v39 = vsel %vm190_vm3, %v9038_v6, %v2566_v45  ;;  %v2575_v23 = vsel %vm190_vm3, %v2566_v45, %v9034_v58  ;;  %3041 = vmatpush1.bf16.msra.mxu1 %v2547_v1  ;;  %v2601_v6 = vmul.f32 %v2590_v41, %v2571_v2  ;;  %v2656_v24 = vrot.slane %v7503_v53, %v7909_v14 }
 0x767   :  { %v2608_v51 = vpack.c.bf16 %v2604_v35, %v2600_v21  ;;  %v2568_v29 = vpop.permute.xlu0 %2567  ;;  %v2599_v60 = vmul.f32 %v2582_v0, %v2575_v23  ;;  %v2602_v58 = vmul.f32 %v2594_v34, %v2569_v39  ;;  %v2652_v21 = vrot.slane %v7503_v53, %v7913_v16 }
 0x768   :  { %v2570_v57 = vsel %vm190_vm3, %v9040_v32, %v2568_v29  ;;  %v2576_v47 = vsel %vm190_vm3, %v2568_v29, %v9036_v62  ;;  %v2609_v22 = vpack.c.bf16 %v2605_v59, %v2601_v6 }
 0x769   :  { %v2603_v52 = vmul.f32 %v2582_v0, %v2576_v47  ;;  %v2606_v54 = vmul.f32 %v2594_v34, %v2570_v57  ;;  %v2620_v46 = vpop.permute.xlu1 %2619  ;;  %2999 = vmatprep.subr.bf16.mxu0 %v2608_v51  ;;  %v7504_v34 = vld [vmem:[%s14422_s11 + $0x14] sm:$0xf] }
 0x76a   :  { %v2635_v43 = vsel %vm238_vm2, %v9042_v55, %v2620_v46  ;;  %v2633_v45 = vsel %vm238_vm2, %v2620_v46, %v9046_v33  ;;  %v2718_v51 = vrot.slane %v7504_v34, %v7911_v15  ;;  %v2722_v46 = vrot.slane %v7504_v34, %v7913_v16 }
 0x76b   :  { %v2607_v27 = vpack.c.bf16 %v2603_v52, %v2599_v60  ;;  %v2610_v30 = vpack.c.bf16 %v2606_v54, %v2602_v58  ;;  %v2622_v32 = vpop.permute.xlu0 %2621  ;;  %v2662_v63 = vmul.f32 %v2648_v19, %v2635_v43  ;;  %v2680_v60 = vpack.c.bf16 %v8949_v50, %v8945_v42 }
 0x76c   :  { %v2636_v62 = vsel %vm238_vm2, %v9044_v56, %v2622_v32  ;;  %v2634_v1 = vsel %vm238_vm2, %v2622_v32, %v9048_v31  ;;  %v2714_v52 = vrot.slane %v7504_v34, %v7907_v13 }
 0x76d   :  { %v2666_v61 = vmul.f32 %v2648_v19, %v2636_v62  ;;  %v2628_v0 = vpop.permute.xlu1 %2627  ;;  %3000 = vmatpush1.bf16.msra.mxu0 %v2607_v27  ;;  %3042 = vmatprep.subr.bf16.mxu1 %v2610_v30  ;;  %v2667_v23 = vmul.f32 %v2652_v21, %v2634_v1 }
 0x76e   :  { %v2631_v17 = vsel %vm238_vm2, %v9046_v33, %v2628_v0  ;;  %v2637_v35 = vsel %vm238_vm2, %v2628_v0, %v9042_v55  ;;  %3043 = vmatpush1.bf16.msra.mxu1 %v2609_v22  ;;  %v2663_v33 = vmul.f32 %v2652_v21, %v2633_v45 }
 0x76f   :  { %v2670_v41 = vpack.c.bf16 %v2666_v61, %v2662_v63  ;;  %v2630_v39 = vpop.permute.xlu0 %2629  ;;  %v2661_v29 = vmul.f32 %v2644_v11, %v2637_v35  ;;  %v2664_v55 = vmul.f32 %v2656_v24, %v2631_v17 }
 0x770   :  { %v2632_v53 = vsel %vm238_vm2, %v9048_v31, %v2630_v39  ;;  %v2638_v2 = vsel %vm238_vm2, %v2630_v39, %v9044_v56  ;;  %v2678_v31 = vpack.c.bf16 %v8941_v37, %v8937_v44  ;;  %v2671_v6 = vpack.c.bf16 %v2667_v23, %v2663_v33  ;;  %v7505_v37 = vld [vmem:[%s14422_s11 + $0x18] sm:$0xf]  ;;  %v7506_v33 = vld [vmem:[%s14422_s11 + $0x1c] sm:$0xf] }
 0x771   :  { %v2665_v59 = vmul.f32 %v2644_v11, %v2638_v2  ;;  %v2668_v57 = vmul.f32 %v2656_v24, %v2632_v53  ;;  %v2690_v47 = vpop.permute.xlu1 %2689  ;;  %3001 = vmatprep.subr.bf16.mxu0 %v2670_v41  ;;  %v2726_v44 = vrot.slane %v7504_v34, %v7909_v14  ;;  %v2776_v1 = vrot.slane %v7505_v37, %v7907_v13 }
 0x772   :  { %v2703_v19 = vsel %vm306_vm4, %v2690_v47, %v9054_v20  ;;  %v2705_v42 = vsel %vm306_vm4, %v9050_v26, %v2690_v47  ;;  %v2780_v34 = vrot.slane %v7505_v37, %v7911_v15  ;;  %v14439_v41 = vpack.c.bf16 %v8865_v25, %v8863_v10 }
 0x773   :  { %v2669_v56 = vpack.c.bf16 %v2665_v59, %v2661_v29  ;;  %v2672_v58 = vpack.c.bf16 %v2668_v57, %v2664_v55  ;;  %v2692_v54 = vpop.permute.xlu0 %2691  ;;  %v2732_v50 = vmul.f32 %v2718_v51, %v2703_v19  ;;  %v2731_v61 = vmul.f32 %v2714_v52, %v2705_v42 }
 0x774   :  { %v2704_v43 = vsel %vm306_vm4, %v2692_v54, %v9056_v4  ;;  %v2706_v27 = vsel %vm306_vm4, %v9052_v49, %v2692_v54  ;;  %v2784_v10 = vrot.slane %v7505_v37, %v7913_v16  ;;  %v2788_v59 = vrot.slane %v7505_v37, %v7909_v14 }
 0x775   :  { %v2736_v30 = vmul.f32 %v2718_v51, %v2704_v43  ;;  %v2698_v32 = vpop.permute.xlu1 %2697  ;;  %3002 = vmatpush1.bf16.msra.mxu0 %v2669_v56  ;;  %3044 = vmatprep.subr.bf16.mxu1 %v2672_v58  ;;  %v2735_v11 = vmul.f32 %v2714_v52, %v2706_v27 }
 0x776   :  { %v2701_v22 = vsel %vm306_vm4, %v9054_v20, %v2698_v32  ;;  %v2707_v62 = vsel %vm306_vm4, %v2698_v32, %v9050_v26  ;;  %3003 = vmatprep.subr.bf16.mxu0 %v2678_v31  ;;  %3045 = vmatpush1.bf16.msra.mxu1 %v2671_v6 }
 0x777   :  { %v2740_v24 = vpack.c.bf16 %v2736_v30, %v2732_v50  ;;  %v2700_v63 = vpop.permute.xlu0 %2699  ;;  %3046 = vmatprep.subr.bf16.mxu1 %v2680_v60  ;;  %v2733_v26 = vmul.f32 %v2722_v46, %v2701_v22  ;;  %v2734_v21 = vmul.f32 %v2726_v44, %v2707_v62  ;;  %v2739_v23 = vpack.c.bf16 %v2735_v11, %v2731_v61 }
 0x778   :  { %v2702_v0 = vsel %vm306_vm4, %v9056_v4, %v2700_v63  ;;  %v2708_v20 = vsel %vm306_vm4, %v2700_v63, %v9052_v49  ;;  %v14440_v49 = vpack.c.bf16 %v8875_v8, %v8869_v36  ;;  %v2846_v22 = vrot.slane %v7506_v33, %v7913_v16 }
 0x779   :  { %v2737_v17 = vmul.f32 %v2722_v46, %v2702_v0  ;;  %v2738_v35 = vmul.f32 %v2726_v44, %v2708_v20  ;;  %v2752_v45 = vpop.permute.xlu1 %2751  ;;  %3004 = vmatpush1.bf16.msra.mxu0 %v14439_v41  ;;  %v2838_v46 = vrot.slane %v7506_v33, %v7907_v13  ;;  %v2850_v62 = vrot.slane %v7506_v33, %v7909_v14  ;;  %v7507_v0 = vld [vmem:[%s14422_s11 + $0x20] sm:$0xf] }
 0x77a   :  { %v2765_v39 = vsel %vm366_vm6, %v2752_v45, %v9062_v3  ;;  %v2767_v4 = vsel %vm366_vm6, %v9058_v40, %v2752_v45  ;;  %3005 = vmatprep.subr.bf16.mxu0 %v2740_v24  ;;  %3047 = vmatpush1.bf16.msra.mxu1 %v14440_v49  ;;  %v2900_v41 = vrot.slane %v7507_v0, %v7907_v13 }
 0x77b   :  { %v2741_v53 = vpack.c.bf16 %v2737_v17, %v2733_v26  ;;  %v2742_v2 = vpack.c.bf16 %v2738_v35, %v2734_v21  ;;  %v2754_v51 = vpop.permute.xlu0 %2753  ;;  %v2793_v25 = vmul.f32 %v2776_v1, %v2767_v4  ;;  %v2794_v57 = vmul.f32 %v2780_v34, %v2765_v39 }
 0x77c   :  { %v2766_v29 = vsel %vm366_vm6, %v2754_v51, %v9064_v5  ;;  %v2768_v55 = vsel %vm366_vm6, %v9060_v28, %v2754_v51 }
 0x77d   :  { %v2797_v36 = vmul.f32 %v2776_v1, %v2768_v55  ;;  %v2798_v8 = vmul.f32 %v2780_v34, %v2766_v29  ;;  %v2760_v47 = vpop.permute.xlu1 %2759  ;;  %3048 = vmatprep.subr.bf16.mxu1 %v2742_v2  ;;  %3006 = vmatpush1.bf16.msra.mxu0 %v2739_v23  ;;  %v14441_v2 = vld [vmem:[#allocation7_spill] sm:$0xff]  ;;  %v14443_v55 = vld [vmem:[#allocation9_spill] sm:$0xff] }
 0x77e   :  { %v2763_v19 = vsel %vm366_vm6, %v9062_v3, %v2760_v47  ;;  %v2769_v31 = vsel %vm366_vm6, %v2760_v47, %v9058_v40  ;;  %3049 = vmatpush1.bf16.msra.mxu1 %v2741_v53  ;;  %v2842_v3 = vrot.slane %v7506_v33, %v7911_v15 }
 0x77f   :  { %v2801_v60 = vpack.c.bf16 %v2797_v36, %v2793_v25  ;;  %v2802_v56 = vpack.c.bf16 %v2798_v8, %v2794_v57  ;;  %v2762_v58 = vpop.permute.xlu0 %2761  ;;  %v2795_v6 = vmul.f32 %v2784_v10, %v2763_v19  ;;  %v2796_v43 = vmul.f32 %v2788_v59, %v2769_v31  ;;  %v14442_v25 = vld [vmem:[#allocation8_spill] sm:$0xff] }
 0x780   :  { %v2764_v52 = vsel %vm366_vm6, %v9064_v5, %v2762_v58  ;;  %v2770_v54 = vsel %vm366_vm6, %v2762_v58, %v9060_v28  ;;  %v2908_v57 = vrot.slane %v7507_v0, %v7913_v16  ;;  %v2912_v36 = vrot.slane %v7507_v0, %v7909_v14 }
 0x781   :  { %v2799_v27 = vmul.f32 %v2784_v10, %v2764_v52  ;;  %v2800_v40 = vmul.f32 %v2788_v59, %v2770_v54  ;;  %v2814_v44 = vpop.permute.xlu1 %2813  ;;  %3007 = vmatprep.subr.bf16.mxu0 %v2802_v56 }
 0x782   :  { %v2827_v37 = vsel %vm414_vm5, %v2814_v44, %v9070_v7  ;;  %v2829_v5 = vsel %vm414_vm5, %v9066_v48, %v2814_v44  ;;  %3008 = vmatpush1.bf16.msra.mxu0 %v2801_v60 }
 0x783   :  { %v2803_v28 = vpack.c.bf16 %v2799_v27, %v2795_v6  ;;  %v2804_v42 = vpack.c.bf16 %v2800_v40, %v2796_v43  ;;  %v2816_v50 = vpop.permute.xlu0 %2815  ;;  %v2855_v11 = vmul.f32 %v2838_v46, %v2829_v5  ;;  %v2856_v24 = vmul.f32 %v2842_v3, %v2827_v37  ;;  %v7691_v40 = vld [vmem:[%s14133_s6] ss:$8 sps:$4 sm:$0xff]  }
 0x784   :  { %v2828_v30 = vsel %vm414_vm5, %v2816_v50, %v9072_v9  ;;  %v2830_v32 = vsel %vm414_vm5, %v9068_v38, %v2816_v50 }
 0x785   :  { %v2859_v63 = vmul.f32 %v2838_v46, %v2830_v32  ;;  %v2860_v1 = vmul.f32 %v2842_v3, %v2828_v30  ;;  %v2822_v61 = vpop.permute.xlu1 %2821  ;;  %3050 = vmatprep.subr.bf16.mxu1 %v2804_v42 }
 0x786   :  { %v2825_v20 = vsel %vm414_vm5, %v9070_v7, %v2822_v61  ;;  %v2831_v34 = vsel %vm414_vm5, %v2822_v61, %v9066_v48  ;;  %3051 = vmatpush1.bf16.msra.mxu1 %v2803_v28  ;;  %v2904_v7 = vrot.slane %v7507_v0, %v7911_v15 }
 0x787   :  { %v2863_v26 = vpack.c.bf16 %v2859_v63, %v2855_v11  ;;  %v2864_v21 = vpack.c.bf16 %v2860_v1, %v2856_v24  ;;  %v2824_v17 = vpop.permute.xlu0 %2823  ;;  %v2857_v39 = vmul.f32 %v2846_v22, %v2825_v20  ;;  %v2858_v4 = vmul.f32 %v2850_v62, %v2831_v34 }
 0x788   :  { %v2826_v35 = vsel %vm414_vm5, %v9072_v9, %v2824_v17  ;;  %v2832_v45 = vsel %vm414_vm5, %v2824_v17, %v9068_v38 }
 0x789   :  { %v2861_v49 = vmul.f32 %v2846_v22, %v2826_v35  ;;  %v2862_v48 = vmul.f32 %v2850_v62, %v2832_v45  ;;  %v2876_v23 = vpop.permute.xlu1 %2875  ;;  %3009 = vmatprep.subr.bf16.mxu0 %v2864_v21 }
 0x78a   :  { %v2889_v53 = vsel %vm474_vm7, %v2876_v23, %v9078_v18  ;;  %v2891_v9 = vsel %vm474_vm7, %v14441_v2, %v2876_v23  ;;  %3010 = vmatpush1.bf16.msra.mxu0 %v2863_v26 }
 0x78b   :  { %v2865_v38 = vpack.c.bf16 %v2861_v49, %v2857_v39  ;;  %v2866_v51 = vpack.c.bf16 %v2862_v48, %v2858_v4  ;;  %v2878_v10 = vpop.permute.xlu0 %2877  ;;  %v2917_v8 = vmul.f32 %v2900_v41, %v2891_v9  ;;  %v2918_v47 = vmul.f32 %v2904_v7, %v2889_v53  ;;  %v7692_v9 = vld [vmem:[%s14136_s7 + $0x4] ss:$8 sps:$4 sm:$0xff]  }
 0x78c   :  { %v2890_v29 = vsel %vm474_vm7, %v2878_v10, %v14442_v25  ;;  %v2892_v59 = vsel %vm474_vm7, %v14443_v55, %v2878_v10 }
 0x78d   :  { %v2921_v33 = vmul.f32 %v2900_v41, %v2892_v59  ;;  %v2922_v19 = vmul.f32 %v2904_v7, %v2890_v29  ;;  %v2884_v31 = vpop.permute.xlu1 %2883  ;;  %3052 = vmatprep.subr.bf16.mxu1 %v2866_v51  ;;  %v3641_v29 = vld [vmem:[%s14137_s16] sm:$0xff]  ;;  %v3642_v59 = vld [vmem:[%s14137_s16 + $0x8] sm:$0xff] }
 0x78e   :  { %v2887_v60 = vsel %vm474_vm7, %v9078_v18, %v2884_v31  ;;  %v2893_v56 = vsel %vm474_vm7, %v2884_v31, %v14441_v2  ;;  %3053 = vmatpush1.bf16.msra.mxu1 %v2865_v38 }
 0x78f   :  { %v2925_v58 = vpack.c.bf16 %v2921_v33, %v2917_v8  ;;  %v2926_v52 = vpack.c.bf16 %v2922_v19, %v2918_v47  ;;  %v2886_v54 = vpop.permute.xlu0 %2885  ;;  %v2919_v6 = vmul.f32 %v2908_v57, %v2887_v60  ;;  %v2920_v43 = vmul.f32 %v2912_v36, %v2893_v56  ;;  %v3644_v47 = vld [vmem:[%s14137_s16 + $0x18] sm:$0xff] }
 0x790   :  { %v2888_v46 = vsel %vm474_vm7, %v14442_v25, %v2886_v54  ;;  %v2894_v3 = vsel %vm474_vm7, %v2886_v54, %v14443_v55 }
 0x791   :  { %v2923_v27 = vmul.f32 %v2908_v57, %v2888_v46  ;;  %v2924_v18 = vmul.f32 %v2912_v36, %v2894_v3  ;;  %3011 = vmatprep.subr.bf16.mxu0 %v2926_v52  ;;  %v3643_v36 = vld [vmem:[%s14137_s16 + $0x10] sm:$0xff] }
 0x792   :  { %3012 = vmatpush1.bf16.msra.mxu0 %v2925_v58 }
 0x793   :  { %v2927_v44 = vpack.c.bf16 %v2923_v27, %v2919_v6  ;;  %v2928_v37 = vpack.c.bf16 %v2924_v18, %v2920_v43 }
 0x795   :  { %3028 = vmatmul.mubr.bf16.vlgmr.msra.gmra.mrb[16].mxu0 %v7691_v40  ;;  %3054 = vmatprep.subr.bf16.mxu1 %v2928_v37 }
 0x796   :  { %3055 = vmatpush1.bf16.msra.mxu1 %v2927_v44  ;;  %7523 = vmatprep.mubr.msk.bf16.mxu0 %vm2331_vm10, %v7692_v9 }
 0x799   :  { %3071 = vmatmul.mubr.bf16.vlgmr.msra.gmra.mrb[16].mxu1 %v7691_v40 }
 0x79a   :  { %7525 = vmatprep.mubr.msk.bf16.mxu1 %vm2331_vm10, %v7692_v9  ;;  %v7512_v9 = vld [vmem:[%s14422_s11 + $0x4] sm:$0xf] }
 0x79b   :  { %v3192_v23 = vrot.slane %v7512_v9, %v7911_v15 }
 0x79e   :  { %v2976_v5 = vpop.permute.xlu1 %2975 }
 0x7a0   :  { %v2981_v30 = vpop.permute.xlu0 %2980 }
 0x868   :  { %v3029_v28 = vpop.f32.mrb[16].mxu0 }
 0x869   :  { %v3030_v42 = vadd.f32 %v3029_v28, %v2976_v5  ;;  %v3031_v50 = vpop.f32.mrb[17].mxu0 }
 0x86a   :  { %v3032_v32 = vadd.f32 %v3031_v50, %v2976_v5  ;;  %v3033_v22 = vpop.f32.mrb[18].mxu0 }
 0x86b   :  { %v9339_v62 = vmax.f32 %v3030_v42, 0.0  ;;  %v3034_v11 = vadd.f32 %v3033_v22, %v2981_v30  ;;  %v3035_v24 = vpop.f32.mrb[19].mxu0 }
 0x86c   :  { %v9341_v63 = vmax.f32 %v3032_v32, 0.0  ;;  %v3036_v1 = vadd.f32 %v3035_v24, %v2981_v30  ;;  %v3072_v61 = vpop.f32.mrb[16].mxu1  ;;  %v3121_v32 = vld [vmem:[%s14422_s11] sm:$0xf] }
 0x86d   :  { %3089 = vst [vmem:[%s14135_s20] sm:$0xff] %v9339_v62  ;;  %v9347_v0 = vmax.f32 %v3034_v11, 0.0  ;;  %v3073_v20 = vadd.f32 %v3072_v61, %v2976_v5  ;;  %v3074_v34 = vpop.f32.mrb[17].mxu1  ;;  %3097 = vrot.lane.b32.xlu1 %v9339_v62, %s7731_s13  ;;  %v3130_v11 = vrot.slane %v3121_v32, %v7911_v15 }
 0x86e   :  { %3090 = vst [vmem:[%s14135_s20 + $0x8] sm:$0xff] %v9341_v63  ;;  %v9355_v26 = vmax.f32 %v3036_v1, 0.0  ;;  %v3075_v21 = vadd.f32 %v3074_v34, %v2976_v5  ;;  %v3076_v17 = vpop.f32.mrb[18].mxu1  ;;  %v3126_v34 = vrot.slane %v3121_v32, %v7907_v13 }
 0x86f   :  { %3093 = vst [vmem:[%s14135_s20 + $0x20] sm:$0xff] %v9347_v0  ;;  %v9361_v35 = vmax.f32 %v3073_v20, 0.0  ;;  %v3077_v45 = vadd.f32 %v3076_v17, %v2981_v30  ;;  %v3078_v41 = vpop.f32.mrb[19].mxu1  ;;  %3099 = vrot.lane.b32.xlu0 %v9347_v0, %s7731_s13 }
 0x870   :  { %3094 = vst [vmem:[%s14135_s20 + $0x28] sm:$0xff] %v9355_v26  ;;  %v9371_v39 = vmax.f32 %v3075_v21, 0.0  ;;  %v3079_v4 = vadd.f32 %v3078_v41, %v2981_v30  ;;  %v3138_v41 = vrot.slane %v3121_v32, %v7909_v14 }
 0x871   :  { %3091 = vst [vmem:[%s14135_s20 + $0x10] sm:$0xff] %v9361_v35  ;;  %v9377_v49 = vmax.f32 %v3077_v45, 0.0  ;;  %3105 = vrot.lane.b32.xlu1 %v9361_v35, %s7731_s13 }
 0x872   :  { %3092 = vst [vmem:[%s14135_s20 + $0x18] sm:$0xff] %v9371_v39  ;;  %v9385_v48 = vmax.f32 %v3079_v4, 0.0 }
 0x873   :  { %3095 = vst [vmem:[%s14135_s20 + $0x30] sm:$0xff] %v9377_v49  ;;  %3107 = vrot.lane.b32.xlu0 %v9377_v49, %s7731_s13 }
 0x874   :  { %3096 = vst [vmem:[%s14135_s20 + $0x38] sm:$0xff] %v9385_v48 }
 0x875   :  { %3159 = vrot.lane.b32.xlu1 %v9339_v62, %s7730_s23 }
 0x877   :  { %3161 = vrot.lane.b32.xlu0 %v9347_v0, %s7730_s23 }
 0x879   :  { %3167 = vrot.lane.b32.xlu1 %v9361_v35, %s7730_s23 }
 0x87b   :  { %3169 = vrot.lane.b32.xlu0 %v9377_v49, %s7730_s23 }
 0x87d   :  { %3221 = vrot.lane.b32.xlu1 %v9339_v62, %s7733_s26 }
 0x87f   :  { %3223 = vrot.lane.b32.xlu0 %v9347_v0, %s7733_s26 }
 0x881   :  { %3229 = vrot.lane.b32.xlu1 %v9361_v35, %s7733_s26 }
 0x883   :  { %3231 = vrot.lane.b32.xlu0 %v9377_v49, %s7733_s26 }
 0x885   :  { %3283 = vrot.lane.b32.xlu1 %v9339_v62, %s7732_s25 }
 0x887   :  { %3285 = vrot.lane.b32.xlu0 %v9347_v0, %s7732_s25 }
 0x889   :  { %3291 = vrot.lane.b32.xlu1 %v9361_v35, %s7732_s25 }
 0x88b   :  { %3293 = vrot.lane.b32.xlu0 %v9377_v49, %s7732_s25 }
 0x88d   :  { %3353 = vrot.lane.b32.xlu1 %v9339_v62, %s7734_s1 }
 0x88f   :  { %3355 = vrot.lane.b32.xlu0 %v9347_v0, %s7734_s1 }
 0x891   :  { %3361 = vrot.lane.b32.xlu1 %v9361_v35, %s7734_s1 }
 0x893   :  { %3363 = vrot.lane.b32.xlu0 %v9377_v49, %s7734_s1 }
 0x895   :  { %3415 = vrot.lane.b32.xlu1 %v9339_v62, %s7736_s2 }
 0x897   :  { %3417 = vrot.lane.b32.xlu0 %v9347_v0, %s7736_s2 }
 0x899   :  { %3423 = vrot.lane.b32.xlu1 %v9361_v35, %s7736_s2 }
 0x89b   :  { %3425 = vrot.lane.b32.xlu0 %v9377_v49, %s7736_s2 }
 0x89d   :  { %3477 = vrot.lane.b32.xlu1 %v9339_v62, %s14427_s4 }
 0x89f   :  { %3479 = vrot.lane.b32.xlu0 %v9347_v0, %s14427_s4 }
 0x8a1   :  { %3485 = vrot.lane.b32.xlu1 %v9361_v35, %s14427_s4 }
 0x8a3   :  { %3487 = vrot.lane.b32.xlu0 %v9377_v49, %s14427_s4 }
 0x8a5   :  { %3539 = vrot.lane.b32.xlu1 %v9339_v62, %s7737_s28 }
 0x8a7   :  { %3541 = vrot.lane.b32.xlu0 %v9347_v0, %s7737_s28 }
 0x8a9   :  { %3547 = vrot.lane.b32.xlu1 %v9361_v35, %s7737_s28 }
 0x8ab   :  { %3549 = vrot.lane.b32.xlu0 %v9377_v49, %s7737_s28 }
 0x8ad   :  { %3101 = vrot.lane.b32.xlu1 %v9341_v63, %s7731_s13 }
 0x8af   :  { %3103 = vrot.lane.b32.xlu0 %v9355_v26, %s7731_s13 }
 0x8b1   :  { %3109 = vrot.lane.b32.xlu1 %v9371_v39, %s7731_s13 }
 0x8b3   :  { %3111 = vrot.lane.b32.xlu0 %v9385_v48, %s7731_s13 }
 0x8b5   :  { %3163 = vrot.lane.b32.xlu1 %v9341_v63, %s7730_s23 }
 0x8b7   :  { %3165 = vrot.lane.b32.xlu0 %v9355_v26, %s7730_s23 }
 0x8b9   :  { %3171 = vrot.lane.b32.xlu1 %v9371_v39, %s7730_s23 }
 0x8bb   :  { %3173 = vrot.lane.b32.xlu0 %v9385_v48, %s7730_s23 }
 0x8bd   :  { %3225 = vrot.lane.b32.xlu1 %v9341_v63, %s7733_s26 }
 0x8bf   :  { %3227 = vrot.lane.b32.xlu0 %v9355_v26, %s7733_s26 }
 0x8c1   :  { %3233 = vrot.lane.b32.xlu1 %v9371_v39, %s7733_s26 }
 0x8c3   :  { %3235 = vrot.lane.b32.xlu0 %v9385_v48, %s7733_s26 }
 0x8c5   :  { %3287 = vrot.lane.b32.xlu1 %v9341_v63, %s7732_s25 }
 0x8c7   :  { %3289 = vrot.lane.b32.xlu0 %v9355_v26, %s7732_s25 }
 0x8c9   :  { %3295 = vrot.lane.b32.xlu1 %v9371_v39, %s7732_s25 }
 0x8cb   :  { %3297 = vrot.lane.b32.xlu0 %v9385_v48, %s7732_s25 }
 0x8cd   :  { %3357 = vrot.lane.b32.xlu1 %v9341_v63, %s7734_s1 }
 0x8cf   :  { %3359 = vrot.lane.b32.xlu0 %v9355_v26, %s7734_s1 }
 0x8d1   :  { %3365 = vrot.lane.b32.xlu1 %v9371_v39, %s7734_s1 }
 0x8d3   :  { %3367 = vrot.lane.b32.xlu0 %v9385_v48, %s7734_s1 }
 0x8d5   :  { %3419 = vrot.lane.b32.xlu1 %v9341_v63, %s7736_s2 }
 0x8d7   :  { %3421 = vrot.lane.b32.xlu0 %v9355_v26, %s7736_s2 }
 0x8d9   :  { %3427 = vrot.lane.b32.xlu1 %v9371_v39, %s7736_s2 }
 0x8db   :  { %3429 = vrot.lane.b32.xlu0 %v9385_v48, %s7736_s2 }
 0x8dd   :  { %3481 = vrot.lane.b32.xlu1 %v9341_v63, %s14427_s4 }
 0x8df   :  { %3483 = vrot.lane.b32.xlu0 %v9355_v26, %s14427_s4  ;;  %v9507_v53 = vpop.permute.xlu1 %3097 }
 0x8e1   :  { %v9509_v2 = vpop.permute.xlu0 %3099  ;;  %3489 = vrot.lane.b32.xlu1 %v9371_v39, %s14427_s4 }
 0x8e3   :  { %3491 = vrot.lane.b32.xlu0 %v9385_v48, %s14427_s4  ;;  %v3106_v38 = vpop.permute.xlu1 %3105 }
 0x8e5   :  { %v9520_v51 = vpop.permute.xlu0 %3107  ;;  %3543 = vrot.lane.b32.xlu1 %v9341_v63, %s7737_s28 }
 0x8e7   :  { %3545 = vrot.lane.b32.xlu0 %v9355_v26, %s7737_s28  ;;  %v9526_v10 = vpop.permute.xlu1 %3159 }
 0x8e9   :  { %v9528_v25 = vpop.permute.xlu0 %3161  ;;  %3551 = vrot.lane.b32.xlu1 %v9371_v39, %s7737_s28 }
 0x8eb   :  { %3553 = vrot.lane.b32.xlu0 %v9385_v48, %s7737_s28  ;;  %v9537_v55 = vpop.permute.xlu1 %3167 }
 0x8ed   :  { %v9542_v57 = vpop.permute.xlu0 %3169  ;;  %3647 = vperm.xlu1 %7684, %v3641_v29   ;;  %v3134_v29 = vrot.slane %v3121_v32, %v7913_v16 }
 0x8ef   :  { %3652 = vperm.xlu0 %7683, %v3642_v59   ;;  %v9547_v8 = vpop.permute.xlu1 %3221 }
 0x8f1   :  { %v9552_v33 = vpop.permute.xlu0 %3223  ;;  %3657 = vperm.xlu1 %7684, %v3643_v36  }
 0x8f3   :  { %3662 = vperm.xlu0 %7683, %v3644_v47   ;;  %v9554_v19 = vpop.permute.xlu1 %3229 }
 0x8f5   :  { %v9556_v31 = vpop.permute.xlu0 %3231 }
 0x8f7   :  { %v9558_v60 = vpop.permute.xlu1 %3283 }
 0x8f9   :  { %v9560_v56 = vpop.permute.xlu0 %3285 }
 0x8fb   :  { %v9562_v58 = vpop.permute.xlu1 %3291 }
 0x8fd   :  { %v9564_v52 = vpop.permute.xlu0 %3293 }
 0x8ff   :  { %v9566_v54 = vpop.permute.xlu1 %3353 }
 0x901   :  { %v9568_v46 = vpop.permute.xlu0 %3355 }
 0x903   :  { %v9570_v3 = vpop.permute.xlu1 %3361 }
 0x905   :  { %v9572_v6 = vpop.permute.xlu0 %3363 }
 0x907   :  { %v9574_v43 = vpop.permute.xlu1 %3415 }
 0x909   :  { %v9576_v27 = vpop.permute.xlu0 %3417 }
 0x90b   :  { %v9578_v18 = vpop.permute.xlu1 %3423 }
 0x90d   :  { %v9580_v40 = vpop.permute.xlu0 %3425 }
 0x90f   :  { %v9582_v44 = vpop.permute.xlu1 %3477 }
 0x911   :  { %v9584_v37 = vpop.permute.xlu0 %3479 }
 0x913   :  { %v9586_v5 = vpop.permute.xlu1 %3485 }
 0x915   :  { %v9588_v28 = vpop.permute.xlu0 %3487 }
 0x917   :  { %v9590_v42 = vpop.permute.xlu1 %3539 }
 0x919   :  { %v9592_v50 = vpop.permute.xlu0 %3541 }
 0x91a   :  { %14444 = vst [vmem:[#allocation7_spill] sm:$0xff] %v9592_v50 }
 0x91b   :  { %v9594_v30 = vpop.permute.xlu1 %3547 }
 0x91d   :  { %v9599_v22 = vpop.permute.xlu0 %3549 }
 0x91e   :  { %14445 = vst [vmem:[#allocation8_spill] sm:$0xff] %v9599_v22 }
 0x91f   :  { %v3102_v24 = vpop.permute.xlu1 %3101 }
 0x920   :  { %v3117_v1 = vsel %vm83_vm1, %v9507_v53, %v3102_v24  ;;  %v3115_v47 = vsel %vm83_vm1, %v3102_v24, %v3106_v38 }
 0x921   :  { %v3104_v61 = vpop.permute.xlu0 %3103  ;;  %v3144_v21 = vmul.f32 %v3130_v11, %v3117_v1 }
 0x922   :  { %v3118_v20 = vsel %vm83_vm1, %v9509_v2, %v3104_v61  ;;  %v3116_v17 = vsel %vm83_vm1, %v3104_v61, %v9520_v51 }
 0x923   :  { %v3148_v45 = vmul.f32 %v3130_v11, %v3118_v20  ;;  %v3110_v4 = vpop.permute.xlu1 %3109  ;;  %v3149_v61 = vmul.f32 %v3134_v29, %v3116_v17 }
 0x924   :  { %v3113_v59 = vsel %vm83_vm1, %v3106_v38, %v3110_v4  ;;  %v3119_v36 = vsel %vm83_vm1, %v3110_v4, %v9507_v53  ;;  %v3145_v38 = vmul.f32 %v3134_v29, %v3115_v47 }
 0x925   :  { %v3152_v11 = vpack.c.bf16 %v3148_v45, %v3144_v21  ;;  %v3112_v1 = vpop.permute.xlu0 %3111  ;;  %v3143_v7 = vmul.f32 %v3126_v34, %v3119_v36  ;;  %v3146_v50 = vmul.f32 %v3138_v41, %v3113_v59  ;;  %v3188_v36 = vrot.slane %v7512_v9, %v7907_v13 }
 0x926   :  { %v3114_v20 = vsel %vm83_vm1, %v9520_v51, %v3112_v1  ;;  %v3120_v32 = vsel %vm83_vm1, %v3112_v1, %v9509_v2  ;;  %v3153_v45 = vpack.c.bf16 %v3149_v61, %v3145_v38 }
 0x927   :  { %v3147_v22 = vmul.f32 %v3126_v34, %v3120_v32  ;;  %v3150_v53 = vmul.f32 %v3138_v41, %v3114_v20  ;;  %v3164_v4 = vpop.permute.xlu1 %3163  ;;  %3689 = vmatprep.subr.bf16.mxu0 %v3152_v11  ;;  %v3200_v34 = vrot.slane %v7512_v9, %v7909_v14 }
 0x928   :  { %v3179_v24 = vsel %vm130_vm0, %v9526_v10, %v3164_v4 }
 0x929   :  { %v3151_v21 = vpack.c.bf16 %v3147_v22, %v3143_v7  ;;  %v3154_v17 = vpack.c.bf16 %v3150_v53, %v3146_v50  ;;  %v3166_v51 = vpop.permute.xlu0 %3165  ;;  %v3206_v41 = vmul.f32 %v3192_v23, %v3179_v24  ;;  %v7513_v7 = vld [vmem:[%s14422_s11 + $0x8] sm:$0xf]  ;;  %v3196_v50 = vrot.slane %v7512_v9, %v7913_v16 }
 0x92a   :  { %v3180_v2 = vsel %vm130_vm0, %v9528_v25, %v3166_v51  ;;  %v3178_v29 = vsel %vm130_vm0, %v3166_v51, %v9542_v57  ;;  %v3254_v53 = vrot.slane %v7513_v7, %v7911_v15 }
 0x92b   :  { %v3210_v59 = vmul.f32 %v3192_v23, %v3180_v2  ;;  %v3172_v47 = vpop.permute.xlu1 %3171  ;;  %3690 = vmatpush1.bf16.msra.mxu0 %v3151_v21  ;;  %3742 = vmatprep.subr.bf16.mxu1 %v3154_v17  ;;  %v3177_v23 = vsel %vm130_vm0, %v3164_v4, %v9537_v55  ;;  %v3211_v20 = vmul.f32 %v3196_v50, %v3178_v29 }
 0x92c   :  { %v3175_v22 = vsel %vm130_vm0, %v9537_v55, %v3172_v47  ;;  %v3181_v11 = vsel %vm130_vm0, %v3172_v47, %v9526_v10  ;;  %3743 = vmatpush1.bf16.msra.mxu1 %v3153_v45  ;;  %v3207_v55 = vmul.f32 %v3196_v50, %v3177_v23  ;;  %v7514_v50 = vld [vmem:[%s14422_s11 + $0xc] sm:$0xf] }
 0x92d   :  { %v3214_v1 = vpack.c.bf16 %v3210_v59, %v3206_v41  ;;  %v3174_v61 = vpop.permute.xlu0 %3173  ;;  %v3205_v38 = vmul.f32 %v3188_v36, %v3181_v11  ;;  %v3208_v10 = vmul.f32 %v3200_v34, %v3175_v22  ;;  %v3250_v41 = vrot.slane %v7513_v7, %v7907_v13 }
 0x92e   :  { %v3176_v9 = vsel %vm130_vm0, %v9542_v57, %v3174_v61  ;;  %v3182_v32 = vsel %vm130_vm0, %v3174_v61, %v9528_v25  ;;  %v3215_v2 = vpack.c.bf16 %v3211_v20, %v3207_v55  ;;  %v3258_v22 = vrot.slane %v7513_v7, %v7913_v16 }
 0x92f   :  { %v3209_v24 = vmul.f32 %v3188_v36, %v3182_v32  ;;  %v3212_v21 = vmul.f32 %v3200_v34, %v3176_v9  ;;  %v3226_v17 = vpop.permute.xlu1 %3225  ;;  %3691 = vmatprep.subr.bf16.mxu0 %v3214_v1  ;;  %v3262_v36 = vrot.slane %v7513_v7, %v7909_v14 }
 0x930   :  { %v3241_v4 = vsel %vm190_vm3, %v9547_v8, %v3226_v17  ;;  %v3239_v1 = vsel %vm190_vm3, %v3226_v17, %v9554_v19 }
 0x931   :  { %v3213_v51 = vpack.c.bf16 %v3209_v24, %v3205_v38  ;;  %v3216_v45 = vpack.c.bf16 %v3212_v21, %v3208_v10  ;;  %v3228_v57 = vpop.permute.xlu0 %3227  ;;  %v3268_v34 = vmul.f32 %v3254_v53, %v3241_v4 }
 0x932   :  { %v3242_v25 = vsel %vm190_vm3, %v9552_v33, %v3228_v57  ;;  %v3240_v29 = vsel %vm190_vm3, %v3228_v57, %v9556_v31  ;;  %v3324_v57 = vrot.slane %v7514_v50, %v7909_v14 }
 0x933   :  { %v3272_v59 = vmul.f32 %v3254_v53, %v3242_v25  ;;  %v3234_v47 = vpop.permute.xlu1 %3233  ;;  %3692 = vmatpush1.bf16.msra.mxu0 %v3213_v51  ;;  %3744 = vmatprep.subr.bf16.mxu1 %v3216_v45  ;;  %v3273_v9 = vmul.f32 %v3258_v22, %v3240_v29  ;;  %v3316_v53 = vrot.slane %v7514_v50, %v7911_v15 }
 0x934   :  { %v3237_v11 = vsel %vm190_vm3, %v9554_v19, %v3234_v47  ;;  %v3243_v23 = vsel %vm190_vm3, %v3234_v47, %v9547_v8  ;;  %3745 = vmatpush1.bf16.msra.mxu1 %v3215_v2  ;;  %v3269_v19 = vmul.f32 %v3258_v22, %v3239_v1  ;;  %v3312_v45 = vrot.slane %v7514_v50, %v7907_v13 }
 0x935   :  { %v3276_v61 = vpack.c.bf16 %v3272_v59, %v3268_v34  ;;  %v3236_v20 = vpop.permute.xlu0 %3235  ;;  %v3267_v38 = vmul.f32 %v3250_v41, %v3243_v23  ;;  %v3270_v8 = vmul.f32 %v3262_v36, %v3237_v11  ;;  %v7515_v34 = vld [vmem:[%s14422_s11 + $0x14] sm:$0xf]  ;;  %v3320_v29 = vrot.slane %v7514_v50, %v7913_v16 }
 0x936   :  { %v3238_v7 = vsel %vm190_vm3, %v9556_v31, %v3236_v20  ;;  %v3244_v32 = vsel %vm190_vm3, %v3236_v20, %v9552_v33  ;;  %v3277_v51 = vpack.c.bf16 %v3273_v9, %v3269_v19  ;;  %v3386_v20 = vrot.slane %v7515_v34, %v7911_v15 }
 0x937   :  { %v3271_v10 = vmul.f32 %v3250_v41, %v3244_v32  ;;  %v3274_v24 = vmul.f32 %v3262_v36, %v3238_v7  ;;  %v3288_v21 = vpop.permute.xlu1 %3287  ;;  %3693 = vmatprep.subr.bf16.mxu0 %v3276_v61  ;;  %v3390_v19 = vrot.slane %v7515_v34, %v7913_v16 }
 0x938   :  { %v3303_v17 = vsel %vm238_vm2, %v9558_v60, %v3288_v21  ;;  %v3301_v22 = vsel %vm238_vm2, %v3288_v21, %v9562_v58 }
 0x939   :  { %v3275_v55 = vpack.c.bf16 %v3271_v10, %v3267_v38  ;;  %v3278_v4 = vpack.c.bf16 %v3274_v24, %v3270_v8  ;;  %v3290_v31 = vpop.permute.xlu0 %3289  ;;  %v3330_v2 = vmul.f32 %v3316_v53, %v3303_v17  ;;  %v3348_v8 = vpack.c.bf16 %v9385_v48, %v9371_v39 }
 0x93a   :  { %v3304_v33 = vsel %vm238_vm2, %v9560_v56, %v3290_v31  ;;  %v3302_v25 = vsel %vm238_vm2, %v3290_v31, %v9564_v52  ;;  %v3382_v24 = vrot.slane %v7515_v34, %v7907_v13 }
 0x93b   :  { %v3334_v41 = vmul.f32 %v3316_v53, %v3304_v33  ;;  %v3296_v36 = vpop.permute.xlu1 %3295  ;;  %3694 = vmatpush1.bf16.msra.mxu0 %v3275_v55  ;;  %3746 = vmatprep.subr.bf16.mxu1 %v3278_v4  ;;  %v3335_v1 = vmul.f32 %v3320_v29, %v3302_v25 }
 0x93c   :  { %v3299_v59 = vsel %vm238_vm2, %v9562_v58, %v3296_v36  ;;  %v3305_v47 = vsel %vm238_vm2, %v3296_v36, %v9558_v60  ;;  %3747 = vmatpush1.bf16.msra.mxu1 %v3277_v51  ;;  %v3331_v58 = vmul.f32 %v3320_v29, %v3301_v22 }
 0x93d   :  { %v3338_v11 = vpack.c.bf16 %v3334_v41, %v3330_v2  ;;  %v3298_v23 = vpop.permute.xlu0 %3297  ;;  %v3329_v9 = vmul.f32 %v3312_v45, %v3305_v47  ;;  %v3332_v60 = vmul.f32 %v3324_v57, %v3299_v59 }
 0x93e   :  { %v3300_v50 = vsel %vm238_vm2, %v9564_v52, %v3298_v23  ;;  %v3306_v61 = vsel %vm238_vm2, %v3298_v23, %v9560_v56  ;;  %v3346_v52 = vpack.c.bf16 %v9355_v26, %v9341_v63  ;;  %v3339_v17 = vpack.c.bf16 %v3335_v1, %v3331_v58  ;;  %v7516_v26 = vld [vmem:[%s14422_s11 + $0x18] sm:$0xf] }
 0x93f   :  { %v3333_v7 = vmul.f32 %v3312_v45, %v3306_v61  ;;  %v3336_v32 = vmul.f32 %v3324_v57, %v3300_v50  ;;  %v3358_v53 = vpop.permute.xlu1 %3357  ;;  %3695 = vmatprep.subr.bf16.mxu0 %v3338_v11  ;;  %v3394_v63 = vrot.slane %v7515_v34, %v7909_v14  ;;  %v3444_v41 = vrot.slane %v7516_v26, %v7907_v13 }
 0x940   :  { %v3371_v38 = vsel %vm306_vm4, %v3358_v53, %v9570_v3  ;;  %v3373_v39 = vsel %vm306_vm4, %v9566_v54, %v3358_v53  ;;  %v3448_v29 = vrot.slane %v7516_v26, %v7911_v15  ;;  %v14446_v23 = vpack.c.bf16 %v9347_v0, %v9339_v62 }
 0x941   :  { %v3337_v56 = vpack.c.bf16 %v3333_v7, %v3329_v9  ;;  %v3340_v10 = vpack.c.bf16 %v3336_v32, %v3332_v60  ;;  %v3360_v21 = vpop.permute.xlu0 %3359  ;;  %v3400_v48 = vmul.f32 %v3386_v20, %v3371_v38  ;;  %v3399_v36 = vmul.f32 %v3382_v24, %v3373_v39  ;;  %v7517_v38 = vld [vmem:[%s14422_s11 + $0x1c] sm:$0xf] }
 0x942   :  { %v3372_v55 = vsel %vm306_vm4, %v3360_v21, %v9572_v6  ;;  %v3374_v4 = vsel %vm306_vm4, %v9568_v46, %v3360_v21  ;;  %v3452_v62 = vrot.slane %v7516_v26, %v7913_v16  ;;  %v3456_v32 = vrot.slane %v7516_v26, %v7909_v14 }
 0x943   :  { %v3404_v31 = vmul.f32 %v3386_v20, %v3372_v55  ;;  %v3366_v51 = vpop.permute.xlu1 %3365  ;;  %3696 = vmatpush1.bf16.msra.mxu0 %v3337_v56  ;;  %3748 = vmatprep.subr.bf16.mxu1 %v3340_v10  ;;  %v3403_v57 = vmul.f32 %v3382_v24, %v3374_v4 }
 0x944   :  { %v3369_v33 = vsel %vm306_vm4, %v9570_v3, %v3366_v51  ;;  %v3375_v45 = vsel %vm306_vm4, %v3366_v51, %v9566_v54  ;;  %3697 = vmatprep.subr.bf16.mxu0 %v3346_v52  ;;  %3749 = vmatpush1.bf16.msra.mxu1 %v3339_v17  ;;  %v3506_v17 = vrot.slane %v7517_v38, %v7907_v13 }
 0x945   :  { %v3408_v2 = vpack.c.bf16 %v3404_v31, %v3400_v48  ;;  %v3368_v25 = vpop.permute.xlu0 %3367  ;;  %3750 = vmatprep.subr.bf16.mxu1 %v3348_v8  ;;  %v3401_v54 = vmul.f32 %v3390_v19, %v3369_v33  ;;  %v3402_v59 = vmul.f32 %v3394_v63, %v3375_v45  ;;  %v3407_v50 = vpack.c.bf16 %v3403_v57, %v3399_v36 }
 0x946   :  { %v3370_v34 = vsel %vm306_vm4, %v9572_v6, %v3368_v25  ;;  %v3376_v3 = vsel %vm306_vm4, %v3368_v25, %v9568_v46  ;;  %v14447_v46 = vpack.c.bf16 %v9377_v49, %v9361_v35  ;;  %v3514_v45 = vrot.slane %v7517_v38, %v7913_v16 }
 0x947   :  { %v3405_v47 = vmul.f32 %v3390_v19, %v3370_v34  ;;  %v3406_v22 = vmul.f32 %v3394_v63, %v3376_v3  ;;  %v3420_v11 = vpop.permute.xlu1 %3419  ;;  %3698 = vmatpush1.bf16.msra.mxu0 %v14446_v23  ;;  %v3518_v57 = vrot.slane %v7517_v38, %v7909_v14  ;;  %v7518_v3 = vld [vmem:[%s14422_s11 + $0x20] sm:$0xf] }
 0x948   :  { %v3433_v1 = vsel %vm366_vm6, %v3420_v11, %v9578_v18  ;;  %v3435_v6 = vsel %vm366_vm6, %v9574_v43, %v3420_v11  ;;  %3699 = vmatprep.subr.bf16.mxu0 %v3408_v2  ;;  %3751 = vmatpush1.bf16.msra.mxu1 %v14447_v46 }
 0x949   :  { %v3409_v61 = vpack.c.bf16 %v3405_v47, %v3401_v54  ;;  %v3410_v20 = vpack.c.bf16 %v3406_v22, %v3402_v59  ;;  %v3422_v9 = vpop.permute.xlu0 %3421  ;;  %v3461_v0 = vmul.f32 %v3444_v41, %v3435_v6  ;;  %v3462_v53 = vmul.f32 %v3448_v29, %v3433_v1 }
 0x94a   :  { %v3434_v60 = vsel %vm366_vm6, %v3422_v9, %v9580_v40  ;;  %v3436_v7 = vsel %vm366_vm6, %v9576_v27, %v3422_v9  ;;  %v3568_v1 = vrot.slane %v7518_v3, %v7907_v13 }
 0x94b   :  { %v3465_v35 = vmul.f32 %v3444_v41, %v3436_v7  ;;  %v3466_v49 = vmul.f32 %v3448_v29, %v3434_v60  ;;  %v3428_v58 = vpop.permute.xlu1 %3427  ;;  %3752 = vmatprep.subr.bf16.mxu1 %v3410_v20  ;;  %3700 = vmatpush1.bf16.msra.mxu0 %v3407_v50  ;;  %v14449_v7 = vld [vmem:[#allocation7_spill] sm:$0xff] }
 0x94c   :  { %v3431_v52 = vsel %vm366_vm6, %v9578_v18, %v3428_v58  ;;  %v3437_v8 = vsel %vm366_vm6, %v3428_v58, %v9574_v43  ;;  %3753 = vmatpush1.bf16.msra.mxu1 %v3409_v61  ;;  %v3510_v18 = vrot.slane %v7517_v38, %v7911_v15 }
 0x94d   :  { %v3469_v56 = vpack.c.bf16 %v3465_v35, %v3461_v0  ;;  %v3470_v10 = vpack.c.bf16 %v3466_v49, %v3462_v53  ;;  %v3430_v24 = vpop.permute.xlu0 %3429  ;;  %v3463_v55 = vmul.f32 %v3452_v62, %v3431_v52  ;;  %v3464_v4 = vmul.f32 %v3456_v32, %v3437_v8  ;;  %v14448_v0 = vld [vmem:[#allocation8_spill] sm:$0xff] }
 0x94e   :  { %v3432_v21 = vsel %vm366_vm6, %v9580_v40, %v3430_v24  ;;  %v3438_v19 = vsel %vm366_vm6, %v3430_v24, %v9576_v27  ;;  %v3576_v53 = vrot.slane %v7518_v3, %v7913_v16  ;;  %v3580_v35 = vrot.slane %v7518_v3, %v7909_v14 }
 0x94f   :  { %v3467_v63 = vmul.f32 %v3452_v62, %v3432_v21  ;;  %v3468_v43 = vmul.f32 %v3456_v32, %v3438_v19  ;;  %v3482_v26 = vpop.permute.xlu1 %3481  ;;  %3701 = vmatprep.subr.bf16.mxu0 %v3470_v10 }
 0x950   :  { %v3495_v39 = vsel %vm414_vm5, %v3482_v26, %v9586_v5  ;;  %v3497_v40 = vsel %vm414_vm5, %v9582_v44, %v3482_v26  ;;  %3702 = vmatpush1.bf16.msra.mxu0 %v3469_v56 }
 0x951   :  { %v3471_v27 = vpack.c.bf16 %v3467_v63, %v3463_v55  ;;  %v3472_v48 = vpack.c.bf16 %v3468_v43, %v3464_v4  ;;  %v3484_v31 = vpop.permute.xlu0 %3483  ;;  %v3523_v2 = vmul.f32 %v3506_v17, %v3497_v40  ;;  %v3524_v25 = vmul.f32 %v3510_v18, %v3495_v39  ;;  %v7695_v43 = vld [vmem:[%s14136_s7 + $0x14] ss:$8 sps:$4 sm:$0xff]   ;;  %v7697_v40 = vld [vmem:[%s14136_s7 + $0x10] ss:$8 sps:$4 sm:$0xff]  }
 0x952   :  { %v3496_v51 = vsel %vm414_vm5, %v3484_v31, %v9588_v28  ;;  %v3498_v33 = vsel %vm414_vm5, %v9584_v37, %v3484_v31 }
 0x953   :  { %v3527_v41 = vmul.f32 %v3506_v17, %v3498_v33  ;;  %v3528_v36 = vmul.f32 %v3510_v18, %v3496_v51  ;;  %v3490_v34 = vpop.permute.xlu1 %3489  ;;  %3754 = vmatprep.subr.bf16.mxu1 %v3472_v48 }
 0x954   :  { %v3493_v29 = vsel %vm414_vm5, %v9586_v5, %v3490_v34  ;;  %v3499_v54 = vsel %vm414_vm5, %v3490_v34, %v9582_v44  ;;  %3755 = vmatpush1.bf16.msra.mxu1 %v3471_v27  ;;  %v3572_v5 = vrot.slane %v7518_v3, %v7911_v15 }
 0x955   :  { %v3531_v59 = vpack.c.bf16 %v3527_v41, %v3523_v2  ;;  %v3532_v47 = vpack.c.bf16 %v3528_v36, %v3524_v25  ;;  %v3492_v22 = vpop.permute.xlu0 %3491  ;;  %v3525_v6 = vmul.f32 %v3514_v45, %v3493_v29  ;;  %v3526_v46 = vmul.f32 %v3518_v57, %v3499_v54 }
 0x956   :  { %v3494_v11 = vsel %vm414_vm5, %v9588_v28, %v3492_v22  ;;  %v3500_v23 = vsel %vm414_vm5, %v3492_v22, %v9584_v37 }
 0x957   :  { %v3529_v50 = vmul.f32 %v3514_v45, %v3494_v11  ;;  %v3530_v44 = vmul.f32 %v3518_v57, %v3500_v23  ;;  %v3544_v61 = vpop.permute.xlu1 %3543  ;;  %3703 = vmatprep.subr.bf16.mxu0 %v3532_v47 }
 0x958   :  { %v3557_v20 = vsel %vm474_vm7, %v3544_v61, %v9594_v30  ;;  %v3559_v28 = vsel %vm474_vm7, %v9590_v42, %v3544_v61  ;;  %3704 = vmatpush1.bf16.msra.mxu0 %v3531_v59 }
 0x959   :  { %v3533_v37 = vpack.c.bf16 %v3529_v50, %v3525_v6  ;;  %v3534_v9 = vpack.c.bf16 %v3530_v44, %v3526_v46  ;;  %v3546_v62 = vpop.permute.xlu0 %3545  ;;  %v3585_v49 = vmul.f32 %v3568_v1, %v3559_v28  ;;  %v3586_v58 = vmul.f32 %v3572_v5, %v3557_v20 }
 0x95a   :  { %v3558_v60 = vsel %vm474_vm7, %v3546_v62, %v14448_v0  ;;  %v3560_v32 = vsel %vm474_vm7, %v14449_v7, %v3546_v62 }
 0x95b   :  { %v3589_v38 = vmul.f32 %v3568_v1, %v3560_v32  ;;  %v3590_v52 = vmul.f32 %v3572_v5, %v3558_v60  ;;  %v3552_v8 = vpop.permute.xlu1 %3551  ;;  %3756 = vmatprep.subr.bf16.mxu1 %v3534_v9 }
 0x95c   :  { %v3555_v56 = vsel %vm474_vm7, %v9594_v30, %v3552_v8  ;;  %v3561_v10 = vsel %vm474_vm7, %v3552_v8, %v9590_v42  ;;  %3757 = vmatpush1.bf16.msra.mxu1 %v3533_v37  ;;  %v7694_v42 = vld [vmem:[%s14136_s7] ss:$8 sps:$4 sm:$0xff]  }
 0x95d   :  { %v3593_v24 = vpack.c.bf16 %v3589_v38, %v3585_v49  ;;  %v3594_v21 = vpack.c.bf16 %v3590_v52, %v3586_v58  ;;  %v3554_v19 = vpop.permute.xlu0 %3553  ;;  %v3587_v55 = vmul.f32 %v3576_v53, %v3555_v56  ;;  %v3588_v4 = vmul.f32 %v3580_v35, %v3561_v10 }
 0x95e   :  { %v3556_v17 = vsel %vm474_vm7, %v14448_v0, %v3554_v19  ;;  %v3562_v18 = vsel %vm474_vm7, %v3554_v19, %v14449_v7 }
 0x95f   :  { %v3591_v63 = vmul.f32 %v3576_v53, %v3556_v17  ;;  %v3592_v30 = vmul.f32 %v3580_v35, %v3562_v18  ;;  %3705 = vmatprep.subr.bf16.mxu0 %v3594_v21 }
 0x960   :  { %3706 = vmatpush1.bf16.msra.mxu0 %v3593_v24 }
 0x961   :  { %v3595_v26 = vpack.c.bf16 %v3591_v63, %v3587_v55  ;;  %v3596_v39 = vpack.c.bf16 %v3592_v30, %v3588_v4 }
 0x963   :  { %3722 = vmatmul.mubr.bf16.vlgmr.msra.gmra.mrb[20].mxu0 %v7694_v42  ;;  %3758 = vmatprep.subr.bf16.mxu1 %v3596_v39 }
 0x964   :  { %3759 = vmatpush1.bf16.msra.mxu1 %v3595_v26  ;;  %7524 = vmatprep.mubr.msk.bf16.mxu0 %vm2331_vm10, %v7695_v43 }
 0x967   :  { %3775 = vmatmul.mubr.bf16.vlgmr.msra.gmra.mrb[20].mxu1 %v7694_v42 }
 0x968   :  { %7526 = vmatprep.mubr.msk.bf16.mxu1 %vm2331_vm10, %v7695_v43 }
 0x96b   :  { %3732 = vmatmul.mubr.bf16.gmra.mrb[24].mxu0 %v7697_v40 }
 0x96c   :  { %v3648_v27 = vpop.permute.xlu1 %3647 }
 0x96e   :  { %v3653_v33 = vpop.permute.xlu0 %3652 }
 0x96f   :  { %3785 = vmatmul.mubr.bf16.gmra.mrb[24].mxu1 %v7697_v40 }
 0x970   :  { %v10009_v32 = vpop.permute.xlu1 %3657 }
 0x972   :  { %v10013_v53 = vpop.permute.xlu0 %3662 }
 0xa36   :  { %v3723_v48 = vpop.f32.mrb[20].mxu0 }
 0xa37   :  { %v3724_v31 = vadd.f32 %v3723_v48, %v3648_v27  ;;  %v3725_v51 = vpop.f32.mrb[21].mxu0 }
 0xa38   :  { %v3727_v45 = vpop.f32.mrb[22].mxu0  ;;  %v3726_v20 = vadd.f32 %v3725_v51, %v3648_v27 }
 0xa39   :  { %v9865_v57 = vmax.f32 %v3724_v31, 0.0  ;;  %v3728_v2 = vadd.f32 %v3727_v45, %v3653_v33  ;;  %v3729_v25 = vpop.f32.mrb[23].mxu0 }
 0xa3a   :  { %v3776_v41 = vpop.f32.mrb[20].mxu1  ;;  %v3730_v28 = vadd.f32 %v3729_v25, %v3653_v33  ;;  %v9949_v37 = vmax.f32 %v3726_v20, 0.0 }
 0xa3b   :  { %14450 = vst [vmem:[#allocation9_spill] sm:$0xff] %v9865_v57  ;;  %v9867_v36 = vmax.f32 %v3728_v2, 0.0  ;;  %v3777_v34 = vadd.f32 %v3776_v41, %v3648_v27  ;;  %v3778_v3 = vpop.f32.mrb[21].mxu1  ;;  %3811 = vrot.lane.b32.xlu1 %v9865_v57, %s7731_s13 }
 0xa3c   :  { %v3780_v29 = vpop.f32.mrb[22].mxu1  ;;  %14454 = vst [vmem:[#allocation11_spill] sm:$0xff] %v9949_v37  ;;  %v3779_v9 = vadd.f32 %v3778_v3, %v3648_v27  ;;  %v9953_v62 = vmax.f32 %v3730_v28, 0.0 }
 0xa3d   :  { %14451 = vst [vmem:[#allocation8_spill] sm:$0xff] %v9867_v36  ;;  %v9871_v54 = vmax.f32 %v3777_v34, 0.0  ;;  %v3781_v59 = vadd.f32 %v3780_v29, %v3653_v33  ;;  %v3782_v47 = vpop.f32.mrb[23].mxu1  ;;  %3813 = vrot.lane.b32.xlu0 %v9867_v36, %s7731_s13 }
 0xa3e   :  { %v9877_v11 = vpop.f32.mrb[24].mxu0  ;;  %14455 = vst [vmem:[#allocation12_spill] sm:$0xff] %v9953_v62  ;;  %v3783_v0 = vadd.f32 %v3782_v47, %v3653_v33  ;;  %v9957_v60 = vmax.f32 %v3779_v9, 0.0 }
 0xa3f   :  { %14452 = vst [vmem:[#allocation7_spill] sm:$0xff] %v9871_v54  ;;  %v9879_v23 = vmax.f32 %v3781_v59, 0.0  ;;  %v9881_v1 = vpop.f32.mrb[25].mxu0  ;;  %3827 = vrot.lane.b32.xlu1 %v9871_v54, %s7731_s13  ;;  %v3734_v35 = vadd.f32 %v9877_v11, %v10009_v32 }
 0xa40   :  { %v9885_v5 = vpop.f32.mrb[26].mxu0  ;;  %14456 = vst [vmem:[#allocation13_spill] sm:$0xff] %v9957_v60  ;;  %v9961_v7 = vmax.f32 %v3783_v0, 0.0  ;;  %v3736_v11 = vadd.f32 %v9881_v1, %v10009_v32 }
 0xa41   :  { %14453 = vst [vmem:[#allocation10_spill] sm:$0xff] %v9879_v23  ;;  %v9887_v6 = vpop.f32.mrb[27].mxu0  ;;  %3829 = vrot.lane.b32.xlu0 %v9879_v23, %s7731_s13  ;;  %v3738_v58 = vadd.f32 %v9885_v5, %v10013_v53  ;;  %v10029_v52 = vmax.f32 %v3734_v35, 0.0 }
 0xa42   :  { %v9891_v46 = vpop.f32.mrb[24].mxu1  ;;  %14457 = vst [vmem:[#allocation14_spill] sm:$0xff] %v9961_v7  ;;  %v10160_v28 = vmax.f32 %v3736_v11, 0.0 }
 0xa43   :  { %v9893_v50 = vpop.f32.mrb[25].mxu1  ;;  %3913 = vrot.lane.b32.xlu1 %v9865_v57, %s7730_s23  ;;  %14458 = vst [vmem:[#allocation15_spill] sm:$0xff] %v10029_v52  ;;  %v3787_v8 = vadd.f32 %v9891_v46, %v10009_v32  ;;  %v10037_v10 = vmax.f32 %v3738_v58, 0.0  ;;  %v3859_v46 = vld [vmem:[%s14422_s11] sm:$0xf] }
 0xa44   :  { %v9897_v44 = vpop.f32.mrb[26].mxu1  ;;  %14476 = vst [vmem:[#allocation33_spill] sm:$0xff] %v10160_v28  ;;  %v3789_v1 = vadd.f32 %v9893_v50, %v10009_v32  ;;  %v10167_v9 = vrot.slane %v3859_v46, %v7911_v15  ;;  %v10182_v32 = vrot.slane %v3859_v46, %v7907_v13 }
 0xa45   :  { %v9899_v61 = vpop.f32.mrb[27].mxu1  ;;  %3915 = vrot.lane.b32.xlu0 %v9867_v36, %s7730_s23  ;;  %14459 = vst [vmem:[#allocation16_spill] sm:$0xff] %v10037_v10  ;;  %v3791_v24 = vadd.f32 %v9897_v44, %v10013_v53  ;;  %v10045_v19 = vmax.f32 %v3787_v8, 0.0  ;;  %v3740_v44 = vadd.f32 %v9887_v6, %v10013_v53 }
 0xa46   :  { %v3793_v58 = vadd.f32 %v9899_v61, %v10013_v53  ;;  %v10191_v61 = vrot.slane %v3859_v46, %v7909_v14 }
 0xa47   :  { %3929 = vrot.lane.b32.xlu1 %v9871_v54, %s7730_s23  ;;  %14460 = vst [vmem:[#allocation17_spill] sm:$0xff] %v10045_v19  ;;  %v10051_v18 = vmax.f32 %v3791_v24, 0.0  ;;  %v10172_v35 = vmax.f32 %v3740_v44, 0.0  ;;  %v10184_v24 = vmax.f32 %v3789_v1, 0.0 }
 0xa49   :  { %3931 = vrot.lane.b32.xlu0 %v9879_v23, %s7730_s23  ;;  %14461 = vst [vmem:[#allocation18_spill] sm:$0xff] %v10051_v18  ;;  %14477 = vst [vmem:[#allocation34_spill] sm:$0xff] %v10172_v35 }
 0xa4a   :  { %14478 = vst [vmem:[#allocation35_spill] sm:$0xff] %v10184_v24 }
 0xa4b   :  { %4015 = vrot.lane.b32.xlu1 %v9865_v57, %s7733_s26 }
 0xa4d   :  { %4017 = vrot.lane.b32.xlu0 %v9867_v36, %s7733_s26 }
 0xa4f   :  { %4031 = vrot.lane.b32.xlu1 %v9871_v54, %s7733_s26 }
 0xa51   :  { %4033 = vrot.lane.b32.xlu0 %v9879_v23, %s7733_s26 }
 0xa53   :  { %4117 = vrot.lane.b32.xlu1 %v9865_v57, %s7732_s25 }
 0xa55   :  { %4119 = vrot.lane.b32.xlu0 %v9867_v36, %s7732_s25 }
 0xa57   :  { %4133 = vrot.lane.b32.xlu1 %v9871_v54, %s7732_s25 }
 0xa59   :  { %4135 = vrot.lane.b32.xlu0 %v9879_v23, %s7732_s25 }
 0xa5b   :  { %4235 = vrot.lane.b32.xlu1 %v9865_v57, %s7734_s1 }
 0xa5d   :  { %4237 = vrot.lane.b32.xlu0 %v9867_v36, %s7734_s1 }
 0xa5f   :  { %4251 = vrot.lane.b32.xlu1 %v9871_v54, %s7734_s1 }
 0xa61   :  { %4253 = vrot.lane.b32.xlu0 %v9879_v23, %s7734_s1 }
 0xa63   :  { %4337 = vrot.lane.b32.xlu1 %v9865_v57, %s7736_s2 }
 0xa65   :  { %4339 = vrot.lane.b32.xlu0 %v9867_v36, %s7736_s2 }
 0xa67   :  { %4353 = vrot.lane.b32.xlu1 %v9871_v54, %s7736_s2 }
 0xa69   :  { %4355 = vrot.lane.b32.xlu0 %v9879_v23, %s7736_s2 }
 0xa6b   :  { %4439 = vrot.lane.b32.xlu1 %v9865_v57, %s14427_s4 }
 0xa6d   :  { %4441 = vrot.lane.b32.xlu0 %v9867_v36, %s14427_s4 }
 0xa6f   :  { %4455 = vrot.lane.b32.xlu1 %v9871_v54, %s14427_s4 }
 0xa71   :  { %4457 = vrot.lane.b32.xlu0 %v9879_v23, %s14427_s4 }
 0xa73   :  { %4541 = vrot.lane.b32.xlu1 %v9865_v57, %s7737_s28 }
 0xa75   :  { %4543 = vrot.lane.b32.xlu0 %v9867_v36, %s7737_s28 }
 0xa77   :  { %3819 = vrot.lane.b32.xlu1 %v9949_v37, %s7731_s13 }
 0xa79   :  { %3821 = vrot.lane.b32.xlu0 %v9953_v62, %s7731_s13 }
 0xa7b   :  { %3835 = vrot.lane.b32.xlu1 %v9957_v60, %s7731_s13 }
 0xa7d   :  { %3837 = vrot.lane.b32.xlu0 %v9961_v7, %s7731_s13 }
 0xa7f   :  { %3921 = vrot.lane.b32.xlu1 %v9949_v37, %s7730_s23 }
 0xa81   :  { %3923 = vrot.lane.b32.xlu0 %v9953_v62, %s7730_s23 }
 0xa83   :  { %3937 = vrot.lane.b32.xlu1 %v9957_v60, %s7730_s23 }
 0xa85   :  { %3939 = vrot.lane.b32.xlu0 %v9961_v7, %s7730_s23 }
 0xa87   :  { %4023 = vrot.lane.b32.xlu1 %v9949_v37, %s7733_s26 }
 0xa89   :  { %4025 = vrot.lane.b32.xlu0 %v9953_v62, %s7733_s26 }
 0xa8b   :  { %4039 = vrot.lane.b32.xlu1 %v9957_v60, %s7733_s26 }
 0xa8d   :  { %4041 = vrot.lane.b32.xlu0 %v9961_v7, %s7733_s26 }
 0xa8f   :  { %4125 = vrot.lane.b32.xlu1 %v9949_v37, %s7732_s25 }
 0xa91   :  { %4127 = vrot.lane.b32.xlu0 %v9953_v62, %s7732_s25 }
 0xa93   :  { %4141 = vrot.lane.b32.xlu1 %v9957_v60, %s7732_s25 }
 0xa95   :  { %4143 = vrot.lane.b32.xlu0 %v9961_v7, %s7732_s25 }
 0xa97   :  { %4243 = vrot.lane.b32.xlu1 %v9949_v37, %s7734_s1 }
 0xa99   :  { %4245 = vrot.lane.b32.xlu0 %v9953_v62, %s7734_s1 }
 0xa9b   :  { %4259 = vrot.lane.b32.xlu1 %v9957_v60, %s7734_s1 }
 0xa9d   :  { %4261 = vrot.lane.b32.xlu0 %v9961_v7, %s7734_s1 }
 0xa9f   :  { %4345 = vrot.lane.b32.xlu1 %v9949_v37, %s7736_s2 }
 0xaa1   :  { %4347 = vrot.lane.b32.xlu0 %v9953_v62, %s7736_s2 }
 0xaa3   :  { %4361 = vrot.lane.b32.xlu1 %v9957_v60, %s7736_s2 }
 0xaa5   :  { %4363 = vrot.lane.b32.xlu0 %v9961_v7, %s7736_s2 }
 0xaa7   :  { %4447 = vrot.lane.b32.xlu1 %v9949_v37, %s14427_s4 }
 0xaa9   :  { %4449 = vrot.lane.b32.xlu0 %v9953_v62, %s14427_s4 }
 0xaab   :  { %4463 = vrot.lane.b32.xlu1 %v9957_v60, %s14427_s4 }
 0xaad   :  { %4465 = vrot.lane.b32.xlu0 %v9961_v7, %s14427_s4  ;;  %v10021_v49 = vpop.permute.xlu1 %3811 }
 0xaaf   :  { %v10025_v38 = vpop.permute.xlu0 %3813  ;;  %4549 = vrot.lane.b32.xlu1 %v9949_v37, %s7737_s28 }
 0xab1   :  { %4551 = vrot.lane.b32.xlu0 %v9953_v62, %s7737_s28  ;;  %v10035_v56 = vpop.permute.xlu1 %3827 }
 0xab3   :  { %v10041_v21 = vpop.permute.xlu0 %3829  ;;  %3815 = vrot.lane.b32.xlu1 %v10029_v52, %s7731_s13 }
 0xab5   :  { %3817 = vrot.lane.b32.xlu0 %v10037_v10, %s7731_s13  ;;  %v10049_v17 = vpop.permute.xlu1 %3913 }
 0xab7   :  { %v10053_v55 = vpop.permute.xlu0 %3915  ;;  %3831 = vrot.lane.b32.xlu1 %v10045_v19, %s7731_s13 }
 0xab9   :  { %3833 = vrot.lane.b32.xlu0 %v10051_v18, %s7731_s13  ;;  %v10059_v4 = vpop.permute.xlu1 %3929 }
 0xabb   :  { %v10061_v63 = vpop.permute.xlu0 %3931  ;;  %3917 = vrot.lane.b32.xlu1 %v10029_v52, %s7730_s23 }
 0xabd   :  { %3919 = vrot.lane.b32.xlu0 %v10037_v10, %s7730_s23  ;;  %v10067_v30 = vpop.permute.xlu1 %4015 }
 0xabf   :  { %v10069_v42 = vpop.permute.xlu0 %4017  ;;  %3933 = vrot.lane.b32.xlu1 %v10045_v19, %s7730_s23 }
 0xac1   :  { %3935 = vrot.lane.b32.xlu0 %v10051_v18, %s7730_s23  ;;  %v10075_v43 = vpop.permute.xlu1 %4031 }
 0xac3   :  { %v10077_v26 = vpop.permute.xlu0 %4033  ;;  %4019 = vrot.lane.b32.xlu1 %v10029_v52, %s7733_s26 }
 0xac5   :  { %4021 = vrot.lane.b32.xlu0 %v10037_v10, %s7733_s26  ;;  %v10083_v39 = vpop.permute.xlu1 %4117 }
 0xac7   :  { %v10085_v40 = vpop.permute.xlu0 %4119  ;;  %4035 = vrot.lane.b32.xlu1 %v10045_v19, %s7733_s26 }
 0xac9   :  { %4037 = vrot.lane.b32.xlu0 %v10051_v18, %s7733_s26  ;;  %v10091_v27 = vpop.permute.xlu1 %4133 }
 0xacb   :  { %v10093_v48 = vpop.permute.xlu0 %4135  ;;  %4121 = vrot.lane.b32.xlu1 %v10029_v52, %s7732_s25 }
 0xacd   :  { %4123 = vrot.lane.b32.xlu0 %v10037_v10, %s7732_s25  ;;  %v10099_v31 = vpop.permute.xlu1 %4235 }
 0xace   :  { %14462 = vst [vmem:[#allocation19_spill] sm:$0xff] %v10099_v31 }
 0xacf   :  { %v10101_v51 = vpop.permute.xlu0 %4237  ;;  %4137 = vrot.lane.b32.xlu1 %v10045_v19, %s7732_s25 }
 0xad0   :  { %14463 = vst [vmem:[#allocation20_spill] sm:$0xff] %v10101_v51 }
 0xad1   :  { %4139 = vrot.lane.b32.xlu0 %v10051_v18, %s7732_s25  ;;  %v10107_v33 = vpop.permute.xlu1 %4251 }
 0xad2   :  { %14464 = vst [vmem:[#allocation21_spill] sm:$0xff] %v10107_v33 }
 0xad3   :  { %v10109_v45 = vpop.permute.xlu0 %4253  ;;  %4239 = vrot.lane.b32.xlu1 %v10029_v52, %s7734_s1 }
 0xad4   :  { %14465 = vst [vmem:[#allocation22_spill] sm:$0xff] %v10109_v45 }
 0xad5   :  { %4241 = vrot.lane.b32.xlu0 %v10037_v10, %s7734_s1  ;;  %v10115_v2 = vpop.permute.xlu1 %4337 }
 0xad6   :  { %14466 = vst [vmem:[#allocation23_spill] sm:$0xff] %v10115_v2 }
 0xad7   :  { %v10117_v25 = vpop.permute.xlu0 %4339  ;;  %4255 = vrot.lane.b32.xlu1 %v10045_v19, %s7734_s1 }
 0xad8   :  { %14467 = vst [vmem:[#allocation24_spill] sm:$0xff] %v10117_v25 }
 0xad9   :  { %4257 = vrot.lane.b32.xlu0 %v10051_v18, %s7734_s1  ;;  %v10123_v41 = vpop.permute.xlu1 %4353 }
 0xada   :  { %14468 = vst [vmem:[#allocation25_spill] sm:$0xff] %v10123_v41 }
 0xadb   :  { %v10125_v34 = vpop.permute.xlu0 %4355  ;;  %4341 = vrot.lane.b32.xlu1 %v10029_v52, %s7736_s2 }
 0xadc   :  { %14469 = vst [vmem:[#allocation26_spill] sm:$0xff] %v10125_v34 }
 0xadd   :  { %4343 = vrot.lane.b32.xlu0 %v10037_v10, %s7736_s2  ;;  %v10131_v3 = vpop.permute.xlu1 %4439 }
 0xade   :  { %14470 = vst [vmem:[#allocation27_spill] sm:$0xff] %v10131_v3 }
 0xadf   :  { %v10133_v29 = vpop.permute.xlu0 %4441  ;;  %4357 = vrot.lane.b32.xlu1 %v10045_v19, %s7736_s2 }
 0xae0   :  { %14471 = vst [vmem:[#allocation28_spill] sm:$0xff] %v10133_v29 }
 0xae1   :  { %4359 = vrot.lane.b32.xlu0 %v10051_v18, %s7736_s2  ;;  %v10139_v59 = vpop.permute.xlu1 %4455 }
 0xae2   :  { %14472 = vst [vmem:[#allocation29_spill] sm:$0xff] %v10139_v59 }
 0xae3   :  { %v10141_v47 = vpop.permute.xlu0 %4457  ;;  %4443 = vrot.lane.b32.xlu1 %v10029_v52, %s14427_s4 }
 0xae4   :  { %14473 = vst [vmem:[#allocation30_spill] sm:$0xff] %v10141_v47 }
 0xae5   :  { %4445 = vrot.lane.b32.xlu0 %v10037_v10, %s14427_s4  ;;  %v10149_v5 = vpop.permute.xlu1 %4541 }
 0xae6   :  { %14474 = vst [vmem:[#allocation31_spill] sm:$0xff] %v10149_v5 }
 0xae7   :  { %v10156_v20 = vpop.permute.xlu0 %4543  ;;  %4459 = vrot.lane.b32.xlu1 %v10045_v19, %s14427_s4 }
 0xae8   :  { %14475 = vst [vmem:[#allocation32_spill] sm:$0xff] %v10156_v20  ;;  %v10199_v20 = vmax.f32 %v3793_v58, 0.0 }
 0xae9   :  { %4461 = vrot.lane.b32.xlu0 %v10051_v18, %s14427_s4  ;;  %v3820_v0 = vpop.permute.xlu1 %3819 }
 0xaea   :  { %v3851_v6 = vsel %vm83_vm1, %v10021_v49, %v3820_v0  ;;  %14479 = vst [vmem:[#allocation36_spill] sm:$0xff] %v10199_v20  ;;  %v3847_v59 = vsel %vm83_vm1, %v3820_v0, %v10035_v56 }
 0xaeb   :  { %v3822_v8 = vpop.permute.xlu0 %3821  ;;  %3823 = vrot.lane.b32.xlu1 %v10160_v28, %s7731_s13  ;;  %v3882_v11 = vmul.f32 %v10167_v9, %v3851_v6  ;;  %v10202_v6 = vrot.slane %v3859_v46, %v7913_v16 }
 0xaec   :  { %v3852_v50 = vsel %vm83_vm1, %v10025_v38, %v3822_v8 }
 0xaed   :  { %v3886_v44 = vmul.f32 %v10167_v9, %v3852_v50  ;;  %3825 = vrot.lane.b32.xlu0 %v10172_v35, %s7731_s13  ;;  %v3836_v53 = vpop.permute.xlu1 %3835  ;;  %v3848_v50 = vsel %vm83_vm1, %v3822_v8, %v10041_v21 }
 0xaee   :  { %v3843_v22 = vsel %vm83_vm1, %v10035_v56, %v3836_v53  ;;  %v3855_v1 = vsel %vm83_vm1, %v3836_v53, %v10021_v49  ;;  %v3887_v0 = vmul.f32 %v10202_v6, %v3848_v50 }
 0xaef   :  { %v3898_v5 = vpack.c.bf16 %v3886_v44, %v3882_v11  ;;  %v3838_v47 = vpop.permute.xlu0 %3837  ;;  %3839 = vrot.lane.b32.xlu1 %v10184_v24, %s7731_s13  ;;  %v3881_v49 = vmul.f32 %v10182_v32, %v3855_v1  ;;  %v3884_v8 = vmul.f32 %v10191_v61, %v3843_v22  ;;  %v3883_v22 = vmul.f32 %v10202_v6, %v3847_v59 }
 0xaf0   :  { %v3844_v46 = vsel %vm83_vm1, %v10041_v21, %v3838_v47  ;;  %v3856_v58 = vsel %vm83_vm1, %v3838_v47, %v10025_v38 }
 0xaf1   :  { %v3885_v11 = vmul.f32 %v10182_v32, %v3856_v58  ;;  %v3888_v44 = vmul.f32 %v10191_v61, %v3844_v46  ;;  %3841 = vrot.lane.b32.xlu0 %v10199_v20, %s7731_s13  ;;  %v10224_v56 = vpop.permute.xlu1 %3921  ;;  %4784 = vmatprep.subr.bf16.mxu0 %v3898_v5  ;;  %v3899_v47 = vpack.c.bf16 %v3887_v0, %v3883_v22 }
 0xaf3   :  { %v3897_v53 = vpack.c.bf16 %v3885_v11, %v3881_v49  ;;  %v3900_v21 = vpack.c.bf16 %v3888_v44, %v3884_v8  ;;  %v10227_v1 = vpop.permute.xlu0 %3923  ;;  %3925 = vrot.lane.b32.xlu1 %v10160_v28, %s7730_s23 }
 0xaf5   :  { %3927 = vrot.lane.b32.xlu0 %v10172_v35, %s7730_s23  ;;  %v10234_v38 = vpop.permute.xlu1 %3937  ;;  %4785 = vmatpush1.bf16.msra.mxu0 %v3897_v53 }
 0xaf6   :  { %4890 = vmatprep.subr.bf16.mxu1 %v3900_v21 }
 0xaf7   :  { %v10236_v5 = vpop.permute.xlu0 %3939  ;;  %3941 = vrot.lane.b32.xlu1 %v10184_v24, %s7730_s23  ;;  %4891 = vmatpush1.bf16.msra.mxu1 %v3899_v47 }
 0xaf9   :  { %3943 = vrot.lane.b32.xlu0 %v10199_v20, %s7730_s23  ;;  %v10242_v50 = vpop.permute.xlu1 %4023 }
 0xafb   :  { %v10244_v59 = vpop.permute.xlu0 %4025  ;;  %4027 = vrot.lane.b32.xlu1 %v10160_v28, %s7733_s26 }
 0xafd   :  { %4029 = vrot.lane.b32.xlu0 %v10172_v35, %s7733_s26  ;;  %v10250_v49 = vpop.permute.xlu1 %4039 }
 0xaff   :  { %v10252_v46 = vpop.permute.xlu0 %4041  ;;  %4043 = vrot.lane.b32.xlu1 %v10184_v24, %s7733_s26 }
 0xb01   :  { %4045 = vrot.lane.b32.xlu0 %v10199_v20, %s7733_s26  ;;  %v10258_v58 = vpop.permute.xlu1 %4125 }
 0xb03   :  { %v10260_v8 = vpop.permute.xlu0 %4127  ;;  %4129 = vrot.lane.b32.xlu1 %v10160_v28, %s7732_s25 }
 0xb05   :  { %4131 = vrot.lane.b32.xlu0 %v10172_v35, %s7732_s25  ;;  %v10266_v11 = vpop.permute.xlu1 %4141 }
 0xb07   :  { %v10268_v44 = vpop.permute.xlu0 %4143  ;;  %4145 = vrot.lane.b32.xlu1 %v10184_v24, %s7732_s25 }
 0xb08   :  { %14480 = vst [vmem:[#allocation37_spill] sm:$0xff] %v10268_v44 }
 0xb09   :  { %4147 = vrot.lane.b32.xlu0 %v10199_v20, %s7732_s25  ;;  %v10274_v0 = vpop.permute.xlu1 %4243 }
 0xb0a   :  { %14481 = vst [vmem:[#allocation38_spill] sm:$0xff] %v10274_v0  ;;  %v4726_v0 = vld [vmem:[%s14139_s17 + $0x18] sm:$0xff] }
 0xb0b   :  { %v10276_v53 = vpop.permute.xlu0 %4245  ;;  %4557 = vrot.lane.b32.xlu1 %v9871_v54, %s7737_s28 }
 0xb0c   :  { %14482 = vst [vmem:[#allocation39_spill] sm:$0xff] %v10276_v53  ;;  %v4724_v53 = vld [vmem:[%s14139_s17 + $0x8] sm:$0xff] }
 0xb0d   :  { %4559 = vrot.lane.b32.xlu0 %v9879_v23, %s7737_s28  ;;  %v10282_v21 = vpop.permute.xlu1 %4259 }
 0xb0e   :  { %14483 = vst [vmem:[#allocation40_spill] sm:$0xff] %v10282_v21  ;;  %v4723_v21 = vld [vmem:[%s14139_s17] sm:$0xff] }
 0xb0f   :  { %v10284_v22 = vpop.permute.xlu0 %4261  ;;  %4247 = vrot.lane.b32.xlu1 %v10160_v28, %s7734_s1 }
 0xb10   :  { %14484 = vst [vmem:[#allocation41_spill] sm:$0xff] %v10284_v22 }
 0xb11   :  { %4567 = vrot.lane.b32.xlu0 %v9961_v7, %s7737_s28  ;;  %v10290_v47 = vpop.permute.xlu1 %4345  ;;  %v3953_v7 = vsel %vm130_vm0, %v10049_v17, %v10224_v56 }
 0xb12   :  { %14485 = vst [vmem:[#allocation42_spill] sm:$0xff] %v10290_v47 }
 0xb13   :  { %v10292_v57 = vpop.permute.xlu0 %4347  ;;  %4263 = vrot.lane.b32.xlu1 %v10184_v24, %s7734_s1 }
 0xb14   :  { %14486 = vst [vmem:[#allocation43_spill] sm:$0xff] %v10292_v57 }
 0xb15   :  { %4249 = vrot.lane.b32.xlu0 %v10172_v35, %s7734_s1  ;;  %v10298_v36 = vpop.permute.xlu1 %4361 }
 0xb16   :  { %14487 = vst [vmem:[#allocation44_spill] sm:$0xff] %v10298_v36 }
 0xb17   :  { %v10300_v29 = vpop.permute.xlu0 %4363  ;;  %4349 = vrot.lane.b32.xlu1 %v10160_v28, %s7736_s2 }
 0xb18   :  { %14488 = vst [vmem:[#allocation45_spill] sm:$0xff] %v10300_v29 }
 0xb19   :  { %4265 = vrot.lane.b32.xlu0 %v10199_v20, %s7734_s1  ;;  %v10306_v3 = vpop.permute.xlu1 %4447 }
 0xb1a   :  { %14489 = vst [vmem:[#allocation46_spill] sm:$0xff] %v10306_v3 }
 0xb1b   :  { %v10308_v2 = vpop.permute.xlu0 %4449  ;;  %4365 = vrot.lane.b32.xlu1 %v10184_v24, %s7736_s2 }
 0xb1c   :  { %14490 = vst [vmem:[#allocation47_spill] sm:$0xff] %v10308_v2  ;;  %v7700_v2 = vld [vmem:[%s14138_s8 + $0x4] ss:$12 sps:$4 sm:$0xff]  }
 0xb1d   :  { %4351 = vrot.lane.b32.xlu0 %v10172_v35, %s7736_s2  ;;  %v10314_v47 = vpop.permute.xlu1 %4463  ;;  %4816 = vmatprep.mubr.bf16.mxu0 %v7700_v2 }
 0xb1e   :  { %14491 = vst [vmem:[#allocation48_spill] sm:$0xff] %v10314_v47  ;;  %4922 = vmatprep.mubr.bf16.mxu1 %v7700_v2 }
 0xb1f   :  { %v10316_v36 = vpop.permute.xlu0 %4465  ;;  %4451 = vrot.lane.b32.xlu1 %v10160_v28, %s14427_s4 }
 0xb20   :  { %14492 = vst [vmem:[#allocation49_spill] sm:$0xff] %v10316_v36 }
 0xb21   :  { %4367 = vrot.lane.b32.xlu0 %v10199_v20, %s7736_s2  ;;  %v10322_v41 = vpop.permute.xlu1 %4549 }
 0xb22   :  { %14493 = vst [vmem:[#allocation50_spill] sm:$0xff] %v10322_v41 }
 0xb23   :  { %v10324_v3 = vpop.permute.xlu0 %4551  ;;  %4467 = vrot.lane.b32.xlu1 %v10184_v24, %s14427_s4 }
 0xb24   :  { %14494 = vst [vmem:[#allocation51_spill] sm:$0xff] %v10324_v3 }
 0xb25   :  { %4453 = vrot.lane.b32.xlu0 %v10172_v35, %s14427_s4  ;;  %v10333_v36 = vpop.permute.xlu1 %3815 }
 0xb27   :  { %v10335_v47 = vpop.permute.xlu0 %3817  ;;  %4565 = vrot.lane.b32.xlu1 %v9957_v60, %s7737_s28 }
 0xb29   :  { %4469 = vrot.lane.b32.xlu0 %v10199_v20, %s14427_s4  ;;  %v10341_v3 = vpop.permute.xlu1 %3831 }
 0xb2b   :  { %v10343_v41 = vpop.permute.xlu0 %3833  ;;  %4545 = vrot.lane.b32.xlu1 %v10029_v52, %s7737_s28 }
 0xb2d   :  { %4547 = vrot.lane.b32.xlu0 %v10037_v10, %s7737_s28  ;;  %v10349_v29 = vpop.permute.xlu1 %3917 }
 0xb2f   :  { %v10351_v2 = vpop.permute.xlu0 %3919  ;;  %4553 = vrot.lane.b32.xlu1 %v10160_v28, %s7737_s28 }
 0xb31   :  { %4563 = vrot.lane.b32.xlu0 %v10051_v18, %s7737_s28  ;;  %v10357_v34 = vpop.permute.xlu1 %3933 }
 0xb33   :  { %v10359_v25 = vpop.permute.xlu0 %3935  ;;  %4561 = vrot.lane.b32.xlu1 %v10045_v19, %s7737_s28 }
 0xb35   :  { %4555 = vrot.lane.b32.xlu0 %v10172_v35, %s7737_s28  ;;  %v10365_v57 = vpop.permute.xlu1 %4019 }
 0xb36   :  { %14495 = vst [vmem:[#allocation52_spill] sm:$0xff] %v10365_v57 }
 0xb37   :  { %v10367_v22 = vpop.permute.xlu0 %4021  ;;  %4569 = vrot.lane.b32.xlu1 %v10184_v24, %s7737_s28 }
 0xb38   :  { %14496 = vst [vmem:[#allocation53_spill] sm:$0xff] %v10367_v22  ;;  %v4725_v22 = vld [vmem:[%s14139_s17 + $0x10] sm:$0xff] }
 0xb39   :  { %4571 = vrot.lane.b32.xlu0 %v10199_v20, %s7737_s28  ;;  %v10376_v51 = vpop.permute.xlu1 %4035 }
 0xb3a   :  { %14497 = vst [vmem:[#allocation54_spill] sm:$0xff] %v10376_v51 }
 0xb3b   :  { %v10381_v45 = vpop.permute.xlu0 %4037  ;;  %4729 = vperm.xlu1 %7684, %v4723_v21  }
 0xb3c   :  { %14498 = vst [vmem:[#allocation55_spill] sm:$0xff] %v10381_v45 }
 0xb3d   :  { %4734 = vperm.xlu0 %7683, %v4724_v53   ;;  %v10386_v31 = vpop.permute.xlu1 %4121 }
 0xb3e   :  { %14499 = vst [vmem:[#allocation56_spill] sm:$0xff] %v10386_v31  ;;  %v7527_v31 = vld [vmem:[%s14422_s11 + $0x4] sm:$0xf] }
 0xb3f   :  { %v10391_v33 = vpop.permute.xlu0 %4123  ;;  %4739 = vperm.xlu1 %7684, %v4725_v22   ;;  %v10442_v52 = vrot.slane %v7527_v31, %v7907_v13  ;;  %v10445_v10 = vrot.slane %v7527_v31, %v7909_v14 }
 0xb40   :  { %14500 = vst [vmem:[#allocation57_spill] sm:$0xff] %v10391_v33 }
 0xb41   :  { %4744 = vperm.xlu0 %7683, %v4726_v0   ;;  %v10393_v51 = vpop.permute.xlu1 %4137  ;;  %v7528_v0 = vld [vmem:[%s14422_s11 + $0x8] sm:$0xf] }
 0xb42   :  { %14501 = vst [vmem:[#allocation58_spill] sm:$0xff] %v10393_v51  ;;  %v10439_v51 = vrot.slane %v7527_v31, %v7913_v16  ;;  %v10460_v19 = vrot.slane %v7528_v0, %v7909_v14 }
 0xb43   :  { %v10395_v57 = vpop.permute.xlu0 %4139 }
 0xb44   :  { %14502 = vst [vmem:[#allocation59_spill] sm:$0xff] %v10395_v57  ;;  %v10425_v57 = vrot.slane %v7527_v31, %v7911_v15 }
 0xb45   :  { %v10397_v21 = vpop.permute.xlu1 %4239 }
 0xb46   :  { %14503 = vst [vmem:[#allocation60_spill] sm:$0xff] %v10397_v21  ;;  %v7529_v21 = vld [vmem:[%s14422_s11 + $0xc] sm:$0xf] }
 0xb47   :  { %v10399_v45 = vpop.permute.xlu0 %4241  ;;  %v10463_v18 = vrot.slane %v7529_v21, %v7911_v15  ;;  %v10468_v24 = vrot.slane %v7529_v21, %v7913_v16  ;;  %v10471_v20 = vrot.slane %v7529_v21, %v7907_v13  ;;  %v10474_v54 = vrot.slane %v7529_v21, %v7909_v14 }
 0xb48   :  { %14504 = vst [vmem:[#allocation61_spill] sm:$0xff] %v10399_v45  ;;  %v7531_v45 = vld [vmem:[%s14422_s11 + $0x18] sm:$0xf] }
 0xb49   :  { %v10401_v44 = vpop.permute.xlu1 %4255  ;;  %v10492_v60 = vrot.slane %v7531_v45, %v7907_v13  ;;  %v10501_v37 = vrot.slane %v7531_v45, %v7911_v15  ;;  %v10504_v62 = vrot.slane %v7531_v45, %v7913_v16 }
 0xb4a   :  { %14505 = vst [vmem:[#allocation62_spill] sm:$0xff] %v10401_v44  ;;  %v10457_v44 = vrot.slane %v7528_v0, %v7907_v13 }
 0xb4b   :  { %v10403_v53 = vpop.permute.xlu0 %4257  ;;  %14514 = vst [vmem:[#allocation71_spill] sm:$0xff] %v10492_v60  ;;  %14516 = vst [vmem:[#allocation73_spill] sm:$0xff] %v10501_v37  ;;  %v3954_v37 = vsel %vm130_vm0, %v10053_v55, %v10227_v1  ;;  %v3950_v60 = vsel %vm130_vm0, %v10227_v1, %v10061_v63  ;;  %v3946_v1 = vsel %vm130_vm0, %v10061_v63, %v10236_v5 }
 0xb4c   :  { %14506 = vst [vmem:[#allocation63_spill] sm:$0xff] %v10403_v53  ;;  %v10454_v53 = vrot.slane %v7528_v0, %v7913_v16  ;;  %14517 = vst [vmem:[#allocation74_spill] sm:$0xff] %v10504_v62  ;;  %v4056_v63 = vsel %vm190_vm3, %v10069_v42, %v10244_v59 }
 0xb4d   :  { %v10411_v22 = vpop.permute.xlu1 %4341 }
 0xb4e   :  { %14507 = vst [vmem:[#allocation64_spill] sm:$0xff] %v10411_v22  ;;  %v7530_v22 = vld [vmem:[%s14422_s11 + $0x14] sm:$0xf] }
 0xb4f   :  { %v10430_v33 = vpop.permute.xlu0 %4343  ;;  %v10477_v23 = vrot.slane %v7530_v22, %v7907_v13  ;;  %v10483_v28 = vrot.slane %v7530_v22, %v7911_v15  ;;  %v10489_v35 = vrot.slane %v7530_v22, %v7909_v14 }
 0xb50   :  { %14508 = vst [vmem:[#allocation65_spill] sm:$0xff] %v10430_v33  ;;  %v10448_v33 = vrot.slane %v7528_v0, %v7911_v15  ;;  %v7532_v0 = vld [vmem:[%s14422_s11 + $0x1c] sm:$0xf] }
 0xb51   :  { %v10465_v31 = vpop.permute.xlu1 %4357  ;;  %14510 = vst [vmem:[#allocation67_spill] sm:$0xff] %v10477_v23  ;;  %14511 = vst [vmem:[#allocation68_spill] sm:$0xff] %v10483_v28  ;;  %v10523_v62 = vrot.slane %v7532_v0, %v7907_v13 }
 0xb52   :  { %14509 = vst [vmem:[#allocation66_spill] sm:$0xff] %v10465_v31  ;;  %v10486_v31 = vrot.slane %v7530_v22, %v7913_v16  ;;  %14513 = vst [vmem:[#allocation70_spill] sm:$0xff] %v10489_v35  ;;  %v10512_v22 = vld [vmem:[%s14422_s11 + $0x20] sm:$0xf]  ;;  %v10539_v35 = vrot.slane %v7532_v0, %v7913_v16 }
 0xb53   :  { %v10494_v21 = vpop.permute.xlu0 %4359  ;;  %14519 = vst [vmem:[#allocation76_spill] sm:$0xff] %v10523_v62  ;;  %v10542_v62 = vrot.slane %v7532_v0, %v7909_v14 }
 0xb54   :  { %14512 = vst [vmem:[#allocation69_spill] sm:$0xff] %v10486_v31  ;;  %14515 = vst [vmem:[#allocation72_spill] sm:$0xff] %v10494_v21  ;;  %v10507_v31 = vrot.slane %v7531_v45, %v7909_v14  ;;  %v3949_v21 = vsel %vm130_vm0, %v10224_v56, %v10059_v4  ;;  %v10526_v45 = vrot.slane %v7532_v0, %v7911_v15 }
 0xb55   :  { %v3958_v56 = vsel %vm130_vm0, %v10236_v5, %v10053_v55  ;;  %14522 = vst [vmem:[#allocation79_spill] sm:$0xff] %v10539_v35  ;;  %14523 = vst [vmem:[#allocation80_spill] sm:$0xff] %v10542_v62  ;;  %v10557_v55 = vrot.slane %v10512_v22, %v7907_v13  ;;  %v10562_v0 = vmul.f32 %v10439_v51, %v3949_v21 }
 0xb56   :  { %14518 = vst [vmem:[#allocation75_spill] sm:$0xff] %v10507_v31  ;;  %14520 = vst [vmem:[#allocation77_spill] sm:$0xff] %v10526_v45  ;;  %v10528_v31 = vpop.permute.xlu1 %4443  ;;  %v10545_v45 = vmul.f32 %v10425_v57, %v3953_v7  ;;  %v10565_v7 = vmul.f32 %v10425_v57, %v3954_v37  ;;  %v10576_v5 = vmul.f32 %v10439_v51, %v3950_v60 }
 0xb57   :  { %14521 = vst [vmem:[#allocation78_spill] sm:$0xff] %v10528_v31  ;;  %v3957_v31 = vsel %vm130_vm0, %v10234_v38, %v10049_v17  ;;  %14524 = vst [vmem:[#allocation81_spill] sm:$0xff] %v10557_v55  ;;  %v10559_v35 = vpop.permute.xlu0 %4445  ;;  %v4052_v17 = vsel %vm190_vm3, %v10244_v59, %v10077_v26  ;;  %v3945_v21 = vsel %vm130_vm0, %v10059_v4, %v10234_v38 }
 0xb58   :  { %14525 = vst [vmem:[#allocation82_spill] sm:$0xff] %v10559_v35  ;;  %v10583_v37 = vmul.f32 %v10442_v52, %v3958_v56  ;;  %v4060_v13 = vsel %vm190_vm3, %v10252_v46, %v10069_v42  ;;  %v10592_v59 = vmul.f32 %v10442_v52, %v3957_v31  ;;  %v10595_v60 = vmul.f32 %v10445_v10, %v3946_v1 }
 0xb59   :  { %v4051_v4 = vsel %vm190_vm3, %v10242_v50, %v10075_v43  ;;  %v4055_v38 = vsel %vm190_vm3, %v10067_v30, %v10242_v50  ;;  %v10606_v42 = vmul.f32 %v10448_v33, %v4056_v63  ;;  %v10609_v56 = vmul.f32 %v10454_v53, %v4052_v17 }
 0xb5a   :  { %v10589_v55 = vpop.permute.xlu1 %4459  ;;  %v4059_v31 = vsel %vm190_vm3, %v10250_v49, %v10067_v30  ;;  %v4048_v1 = vsel %vm190_vm3, %v10077_v26, %v10252_v46  ;;  %v10624_v63 = vmul.f32 %v10445_v10, %v3945_v21  ;;  %v4047_v17 = vsel %vm190_vm3, %v10075_v43, %v10250_v49 }
 0xb5b   :  { %14526 = vst [vmem:[#allocation83_spill] sm:$0xff] %v10589_v55  ;;  %14527 = vst [vmem:[#allocation84_spill] sm:$0xff] %v10609_v56  ;;  %v10619_v35 = vpop.permute.xlu0 %4461  ;;  %v10631_v30 = vmul.f32 %v10457_v44, %v4060_v13  ;;  %v10638_v46 = vmul.f32 %v10448_v33, %v4055_v38  ;;  %v10641_v21 = vmul.f32 %v10454_v53, %v4051_v4 }
 0xb5c   :  { %14528 = vst [vmem:[#allocation85_spill] sm:$0xff] %v10619_v35  ;;  %v10646_v43 = vmul.f32 %v10457_v44, %v4059_v31  ;;  %v10649_v13 = vmul.f32 %v10460_v19, %v4048_v1  ;;  %v10659_v55 = vmul.f32 %v10460_v19, %v4047_v17  ;;  %v4157_v31 = vsel %vm238_vm2, %v10083_v39, %v10258_v58 }
 0xb5d   :  { %14529 = vst [vmem:[#allocation86_spill] sm:$0xff] %v10641_v21  ;;  %v4153_v38 = vsel %vm238_vm2, %v10258_v58, %v10091_v27  ;;  %v10676_v17 = vrot.slane %v10512_v22, %v7911_v15  ;;  %v4158_v35 = vsel %vm238_vm2, %v10085_v40, %v10260_v8  ;;  %v10690_v15 = vmul.f32 %v10463_v18, %v4157_v31 }
 0xb5e   :  { %v3824_v50 = vpop.permute.xlu1 %3823  ;;  %v10699_v56 = vmul.f32 %v10468_v24, %v4153_v38  ;;  %v10709_v21 = vmul.f32 %v10463_v18, %v4158_v35 }
 0xb5f   :  { %v3853_v49 = vsel %vm83_vm1, %v10333_v36, %v3824_v50  ;;  %v3826_v1 = vpop.permute.xlu0 %3825  ;;  %14530 = vst [vmem:[#allocation87_spill] sm:$0xff] %v10676_v17 }
 0xb60   :  { %v3854_v4 = vsel %vm83_vm1, %v10335_v47, %v3826_v1  ;;  %v3890_v26 = vmul.f32 %v10167_v9, %v3853_v49  ;;  %v3850_v62 = vsel %vm83_vm1, %v3826_v1, %v10343_v41 }
 0xb61   :  { %v3894_v58 = vmul.f32 %v10167_v9, %v3854_v4  ;;  %v4154_v9 = vsel %vm238_vm2, %v10260_v8, %v10093_v48  ;;  %v3849_v4 = vsel %vm83_vm1, %v3824_v50, %v10341_v3  ;;  %v3895_v23 = vmul.f32 %v10202_v6, %v3850_v62 }
 0xb62   :  { %v3840_v28 = vpop.permute.xlu1 %3839  ;;  %v10723_v62 = vmul.f32 %v10468_v24, %v4154_v9  ;;  %v4161_v9 = vsel %vm238_vm2, %v10266_v11, %v10083_v39 }
 0xb63   :  { %v3845_v17 = vsel %vm83_vm1, %v10341_v3, %v3840_v28  ;;  %v3857_v49 = vsel %vm83_vm1, %v3840_v28, %v10333_v36  ;;  %v3902_v31 = vpack.c.bf16 %v3894_v58, %v3890_v26  ;;  %v3842_v1 = vpop.permute.xlu0 %3841  ;;  %v3891_v26 = vmul.f32 %v10202_v6, %v3849_v4 }
 0xb64   :  { %v3846_v36 = vsel %vm83_vm1, %v10343_v41, %v3842_v1  ;;  %v3858_v28 = vsel %vm83_vm1, %v3842_v1, %v10335_v47  ;;  %v3889_v8 = vmul.f32 %v10182_v32, %v3857_v49  ;;  %v3892_v38 = vmul.f32 %v10191_v61, %v3845_v17 }
 0xb65   :  { %v3893_v3 = vmul.f32 %v10182_v32, %v3858_v28  ;;  %v3896_v50 = vmul.f32 %v10191_v61, %v3846_v36  ;;  %4786 = vmatprep.subr.bf16.mxu0 %v3902_v31  ;;  %v10731_v47 = vrot.slane %v10512_v22, %v7913_v16  ;;  %v4149_v32 = vsel %vm238_vm2, %v10091_v27, %v10266_v11 }
 0xb66   :  { %v3926_v35 = vpop.permute.xlu1 %3925  ;;  %v10739_v49 = vrot.slane %v10512_v22, %v7909_v14  ;;  %v4204_v6 = vpack.c.bf16 %v10709_v21, %v10690_v15  ;;  %v3903_v4 = vpack.c.bf16 %v3895_v23, %v3891_v26  ;;  %v4205_v28 = vpack.c.bf16 %v10723_v62, %v10699_v56 }
 0xb67   :  { %v3955_v41 = vsel %vm130_vm0, %v10349_v29, %v3926_v35  ;;  %v3901_v61 = vpack.c.bf16 %v3893_v3, %v3889_v8  ;;  %v3904_v17 = vpack.c.bf16 %v3896_v50, %v3892_v38  ;;  %v3928_v58 = vpop.permute.xlu0 %3927  ;;  %v14531_v11 = vpack.c.bf16 %v10565_v7, %v10545_v45  ;;  %v14532_v8 = vld [vmem:[#allocation37_spill] sm:$0xff] }
 0xb68   :  { %v3956_v27 = vsel %vm130_vm0, %v10351_v2, %v3928_v58  ;;  %v3992_v31 = vmul.f32 %v10425_v57, %v3955_v41  ;;  %v3952_v22 = vsel %vm130_vm0, %v3928_v58, %v10359_v25  ;;  %v4162_v38 = vsel %vm238_vm2, %v14532_v8, %v10085_v40  ;;  %v14535_v58 = vld [vmem:[#allocation52_spill] sm:$0xff] }
 0xb69   :  { %v3996_v1 = vmul.f32 %v10425_v57, %v3956_v27  ;;  %4787 = vmatpush1.bf16.msra.mxu0 %v3901_v61  ;;  %4892 = vmatprep.subr.bf16.mxu1 %v3904_v17  ;;  %v10767_v57 = vmul.f32 %v10471_v20, %v4161_v9  ;;  %v3951_v3 = vsel %vm130_vm0, %v3926_v35, %v10357_v34  ;;  %v14537_v27 = vld [vmem:[#allocation21_spill] sm:$0xff] }
 0xb6a   :  { %v3942_v36 = vpop.permute.xlu1 %3941  ;;  %4788 = vmatprep.subr.bf16.mxu0 %v14531_v11  ;;  %4893 = vmatpush1.bf16.msra.mxu1 %v3903_v4  ;;  %v4150_v45 = vsel %vm238_vm2, %v10093_v48, %v14532_v8  ;;  %v3997_v7 = vmul.f32 %v10439_v51, %v3952_v22  ;;  %v14534_v48 = vpack.c.bf16 %v10583_v37, %v10592_v59  ;;  %v14539_v22 = vld [vmem:[#allocation19_spill] sm:$0xff] }
 0xb6b   :  { %v3947_v23 = vsel %vm130_vm0, %v10357_v34, %v3942_v36  ;;  %v3959_v39 = vsel %vm130_vm0, %v3942_v36, %v10349_v29  ;;  %v4004_v50 = vpack.c.bf16 %v3996_v1, %v3992_v31  ;;  %v3944_v26 = vpop.permute.xlu0 %3943  ;;  %v14533_v29 = vpack.c.bf16 %v10595_v60, %v10624_v63  ;;  %v14540_v1 = vld [vmem:[#allocation53_spill] sm:$0xff] }
 0xb6c   :  { %v3948_v40 = vsel %vm130_vm0, %v10359_v25, %v3944_v26  ;;  %v3960_v34 = vsel %vm130_vm0, %v3944_v26, %v10351_v2  ;;  %v3991_v35 = vmul.f32 %v10442_v52, %v3959_v39  ;;  %v3994_v60 = vmul.f32 %v10445_v10, %v3947_v23  ;;  %v14541_v23 = vld [vmem:[#allocation55_spill] sm:$0xff] }
 0xb6d   :  { %4894 = vmatprep.subr.bf16.mxu1 %v14533_v29  ;;  %v3995_v63 = vmul.f32 %v10442_v52, %v3960_v34  ;;  %v3998_v41 = vmul.f32 %v10445_v10, %v3948_v40  ;;  %4789 = vmatpush1.bf16.msra.mxu0 %v14534_v48  ;;  %v10798_v17 = vmul.f32 %v10471_v20, %v4162_v38 }
 0xb6e   :  { %v4028_v61 = vpop.permute.xlu1 %4027  ;;  %v3993_v25 = vmul.f32 %v10439_v51, %v3951_v3  ;;  %4790 = vmatprep.subr.bf16.mxu0 %v4004_v50  ;;  %v14536_v52 = vpack.c.bf16 %v10576_v5, %v10562_v0  ;;  %v10808_v10 = vmul.f32 %v10474_v54, %v4149_v32  ;;  %v10811_v37 = vmul.f32 %v10474_v54, %v4150_v45  ;;  %v14538_v51 = vld [vmem:[#allocation38_spill] sm:$0xff] }
 0xb6f   :  { %v4057_v2 = vsel %vm190_vm3, %v14535_v58, %v4028_v61  ;;  %v4003_v59 = vpack.c.bf16 %v3995_v63, %v3991_v35  ;;  %v4006_v9 = vpack.c.bf16 %v3998_v41, %v3994_v60  ;;  %v4030_v4 = vpop.permute.xlu0 %4029  ;;  %v4271_v31 = vsel %vm306_vm4, %v14538_v51, %v14537_v27  ;;  %v14542_v3 = vld [vmem:[#allocation54_spill] sm:$0xff] }
 0xb70   :  { %4895 = vmatpush1.bf16.msra.mxu1 %v14536_v52  ;;  %v4275_v0 = vsel %vm306_vm4, %v14539_v22, %v14538_v51  ;;  %v4005_v5 = vpack.c.bf16 %v3997_v7, %v3993_v25  ;;  %v4058_v32 = vsel %vm190_vm3, %v14540_v1, %v4030_v4  ;;  %v4094_v36 = vmul.f32 %v10448_v33, %v4057_v2  ;;  %v14544_v45 = vld [vmem:[#allocation22_spill] sm:$0xff]  ;;  %v14545_v7 = vld [vmem:[#allocation39_spill] sm:$0xff] }
 0xb71   :  { %v4054_v39 = vsel %vm190_vm3, %v4030_v4, %v14541_v23  ;;  %v4098_v11 = vmul.f32 %v10448_v33, %v4058_v32  ;;  %4791 = vmatpush1.bf16.msra.mxu0 %v4003_v59  ;;  %4896 = vmatprep.subr.bf16.mxu1 %v4006_v9  ;;  %v4203_v38 = vpack.c.bf16 %v10798_v17, %v10767_v57  ;;  %v14549_v2 = vld [vmem:[#allocation67_spill] sm:$0xff]  ;;  %v14551_v9 = vld [vmem:[#allocation84_spill] sm:$0xff]  ;;  %v14552_v4 = vld [vmem:[#allocation86_spill] sm:$0xff] }
 0xb72   :  { %v4044_v8 = vpop.permute.xlu1 %4043  ;;  %v14543_v29 = vpack.c.bf16 %v10606_v42, %v10638_v46  ;;  %v4206_v33 = vpack.c.bf16 %v10811_v37, %v10808_v10  ;;  %v4272_v57 = vsel %vm306_vm4, %v14545_v7, %v14544_v45  ;;  %v4053_v40 = vsel %vm190_vm3, %v4028_v61, %v14542_v3  ;;  %v14547_v42 = vld [vmem:[#allocation20_spill] sm:$0xff] }
 0xb73   :  { %v4049_v50 = vsel %vm190_vm3, %v14542_v3, %v4044_v8  ;;  %v4061_v26 = vsel %vm190_vm3, %v4044_v8, %v14535_v58  ;;  %v4106_v34 = vpack.c.bf16 %v4098_v11, %v4094_v36  ;;  %v4046_v35 = vpop.permute.xlu0 %4045  ;;  %v14546_v60 = vpack.c.bf16 %v10649_v13, %v10659_v55  ;;  %v14550_v37 = vld [vmem:[#allocation56_spill] sm:$0xff]  ;;  %v14557_v11 = vld [vmem:[#allocation59_spill] sm:$0xff] }
 0xb74   :  { %4792 = vmatprep.subr.bf16.mxu0 %v14543_v29  ;;  %4897 = vmatpush1.bf16.msra.mxu1 %v4005_v5  ;;  %v4276_v46 = vsel %vm306_vm4, %v14547_v42, %v14545_v7  ;;  %v4099_v63 = vmul.f32 %v10454_v53, %v4054_v39  ;;  %v4050_v41 = vsel %vm190_vm3, %v14541_v23, %v4046_v35  ;;  %v14556_v23 = vld [vmem:[#allocation57_spill] sm:$0xff] }
 0xb75   :  { %4898 = vmatprep.subr.bf16.mxu1 %v14546_v60  ;;  %v4062_v61 = vsel %vm190_vm3, %v4046_v35, %v14540_v1  ;;  %v4093_v48 = vmul.f32 %v10457_v44, %v4061_v26  ;;  %v4096_v55 = vmul.f32 %v10460_v19, %v4049_v50  ;;  %v4100_v17 = vmul.f32 %v10460_v19, %v4050_v41  ;;  %v14554_v19 = vld [vmem:[#allocation68_spill] sm:$0xff]  ;;  %v14558_v26 = vld [vmem:[#allocation58_spill] sm:$0xff] }
 0xb76   :  { %v4097_v13 = vmul.f32 %v10457_v44, %v4062_v61  ;;  %v4130_v25 = vpop.permute.xlu1 %4129  ;;  %v14548_v58 = vpack.c.bf16 %v10631_v30, %v10646_v43  ;;  %v10871_v52 = vmul.f32 %v14549_v2, %v4275_v0  ;;  %v4095_v10 = vmul.f32 %v10454_v53, %v4053_v40  ;;  %v14555_v1 = vld [vmem:[#allocation40_spill] sm:$0xff] }
 0xb77   :  { %v4159_v59 = vsel %vm238_vm2, %v14550_v37, %v4130_v25  ;;  %v14553_v44 = vpack.c.bf16 %v14551_v9, %v14552_v4  ;;  %v10881_v51 = vmul.f32 %v14554_v19, %v4271_v31  ;;  %v10884_v30 = vmul.f32 %v14549_v2, %v4276_v46  ;;  %v4132_v5 = vpop.permute.xlu0 %4131  ;;  %v14566_v4 = vld [vmem:[#allocation25_spill] sm:$0xff] }
 0xb78   :  { %4793 = vmatpush1.bf16.msra.mxu0 %v14548_v58  ;;  %v4105_v43 = vpack.c.bf16 %v4097_v13, %v4093_v48  ;;  %v4108_v0 = vpack.c.bf16 %v4100_v17, %v4096_v55  ;;  %v10887_v53 = vmul.f32 %v14554_v19, %v4272_v57  ;;  %v4267_v32 = vsel %vm306_vm4, %v14537_v27, %v14555_v1  ;;  %v14559_v57 = vld [vmem:[#allocation41_spill] sm:$0xff]  ;;  %v14561_v13 = vld [vmem:[#allocation70_spill] sm:$0xff]  ;;  %v14563_v17 = vld [vmem:[#allocation24_spill] sm:$0xff] }
 0xb79   :  { %4794 = vmatprep.subr.bf16.mxu0 %v4106_v34  ;;  %4899 = vmatpush1.bf16.msra.mxu1 %v14553_v44  ;;  %v4107_v36 = vpack.c.bf16 %v4099_v63, %v4095_v10  ;;  %v4160_v31 = vsel %vm238_vm2, %v14556_v23, %v4132_v5  ;;  %v4196_v39 = vmul.f32 %v10463_v18, %v4159_v59  ;;  %v14565_v59 = vld [vmem:[#allocation45_spill] sm:$0xff]  ;;  %v14567_v44 = vld [vmem:[#allocation42_spill] sm:$0xff] }
 0xb7a   :  { %v4156_v8 = vsel %vm238_vm2, %v4132_v5, %v14557_v11  ;;  %v4200_v3 = vmul.f32 %v10463_v18, %v4160_v31  ;;  %v4146_v50 = vpop.permute.xlu1 %4145  ;;  %4900 = vmatprep.subr.bf16.mxu1 %v4108_v0  ;;  %v4279_v27 = vsel %vm306_vm4, %v14555_v1, %v14539_v22  ;;  %v4321_v18 = vpack.c.bf16 %v10884_v30, %v10871_v52  ;;  %v14568_v0 = vld [vmem:[#allocation23_spill] sm:$0xff] }
 0xb7b   :  { %v4151_v29 = vsel %vm238_vm2, %v14558_v26, %v4146_v50  ;;  %v4163_v7 = vsel %vm238_vm2, %v4146_v50, %v14550_v37  ;;  %v4268_v22 = vsel %vm306_vm4, %v14544_v45, %v14559_v57  ;;  %v4155_v40 = vsel %vm238_vm2, %v4130_v25, %v14558_v26  ;;  %v4148_v35 = vpop.permute.xlu0 %4147  ;;  %v14564_v37 = vld [vmem:[#allocation26_spill] sm:$0xff] }
 0xb7c   :  { %4795 = vmatpush1.bf16.msra.mxu0 %v4105_v43  ;;  %v4208_v34 = vpack.c.bf16 %v4200_v3, %v4196_v39  ;;  %v4280_v15 = vsel %vm306_vm4, %v14559_v57, %v14547_v42  ;;  %v4201_v21 = vmul.f32 %v10468_v24, %v4156_v8  ;;  %v4164_v45 = vsel %vm238_vm2, %v4148_v35, %v14556_v23  ;;  %v14560_v42 = vld [vmem:[#allocation69_spill] sm:$0xff]  ;;  %v14570_v23 = vld [vmem:[#allocation44_spill] sm:$0xff]  ;;  %v14572_v8 = vld [vmem:[#allocation11_spill] sm:$0xff] }
 0xb7d   :  { %4796 = vmatprep.subr.bf16.mxu0 %v4204_v6  ;;  %4901 = vmatpush1.bf16.msra.mxu1 %v4107_v36  ;;  %v4152_v6 = vsel %vm238_vm2, %v14557_v11, %v4148_v35  ;;  %v4195_v60 = vmul.f32 %v10471_v20, %v4163_v7  ;;  %v4198_v46 = vmul.f32 %v10474_v54, %v4151_v29  ;;  %v14571_v11 = vld [vmem:[#allocation12_spill] sm:$0xff]  ;;  %v14575_v29 = vld [vmem:[#allocation74_spill] sm:$0xff]  ;;  %v14576_v57 = vld [vmem:[#allocation75_spill] sm:$0xff] }
 0xb7e   :  { %4902 = vmatprep.subr.bf16.mxu1 %v4206_v33  ;;  %v4199_v33 = vmul.f32 %v10471_v20, %v4164_v45  ;;  %v4202_v63 = vmul.f32 %v10474_v54, %v4152_v6  ;;  %v10938_v41 = vpop.permute.xlu1 %4557  ;;  %v10941_v61 = vmul.f32 %v14560_v42, %v4267_v32  ;;  %v10944_v48 = vmul.f32 %v14560_v42, %v4268_v22  ;;  %v14562_v54 = vld [vmem:[#allocation43_spill] sm:$0xff]  ;;  %v14578_v35 = vld [vmem:[#allocation13_spill] sm:$0xff] }
 0xb7f   :  { %v4197_v55 = vmul.f32 %v10468_v24, %v4155_v40  ;;  %v10951_v20 = vmul.f32 %v14561_v13, %v4280_v15  ;;  %v10957_v10 = vpop.permute.xlu0 %4559  ;;  %v4374_v24 = vsel %vm366_vm6, %v14562_v54, %v14564_v37  ;;  %v4370_v56 = vsel %vm366_vm6, %v14564_v37, %v14565_v59  ;;  %v14569_v32 = vld [vmem:[#allocation71_spill] sm:$0xff] }
 0xb80   :  { %4797 = vmatpush1.bf16.msra.mxu0 %v4203_v38  ;;  %v4378_v38 = vsel %vm366_vm6, %v14563_v17, %v14562_v54  ;;  %v4207_v25 = vpack.c.bf16 %v4199_v33, %v4195_v60  ;;  %v4210_v58 = vpack.c.bf16 %v4202_v63, %v4198_v46  ;;  %v4382_v62 = vsel %vm366_vm6, %v14565_v59, %v14563_v17  ;;  %v14580_v46 = vld [vmem:[#allocation46_spill] sm:$0xff]  ;;  %v14581_v33 = vld [vmem:[#allocation27_spill] sm:$0xff]  ;;  %v14584_v54 = vld [vmem:[#allocation8_spill] sm:$0xff] }
 0xb81   :  { %4798 = vmatprep.subr.bf16.mxu0 %v4208_v34  ;;  %4903 = vmatpush1.bf16.msra.mxu1 %v4205_v28  ;;  %v4209_v28 = vpack.c.bf16 %v4201_v21, %v4197_v55  ;;  %v4308_v9 = vmul.f32 %v14561_v13, %v4279_v27  ;;  %v4373_v43 = vsel %vm366_vm6, %v14567_v44, %v14566_v4  ;;  %v14574_v27 = vld [vmem:[#allocation73_spill] sm:$0xff]  ;;  %v14577_v34 = vld [vmem:[#allocation14_spill] sm:$0xff] }
 0xb82   :  { %v4377_v5 = vsel %vm366_vm6, %v14568_v0, %v14567_v44  ;;  %v4248_v1 = vpop.permute.xlu1 %4247  ;;  %4904 = vmatprep.subr.bf16.mxu1 %v4210_v58  ;;  %v10981_v36 = vmul.f32 %v14569_v32, %v4378_v38  ;;  %v4369_v31 = vsel %vm366_vm6, %v14566_v4, %v14570_v23  ;;  %v4381_v39 = vsel %vm366_vm6, %v14570_v23, %v14568_v0  ;;  %v14585_v17 = vld [vmem:[#allocation9_spill] sm:$0xff]  ;;  %v14593_v4 = vld [vmem:[#allocation7_spill] sm:$0xff]  ;;  %v14595_v23 = vld [vmem:[#allocation30_spill] sm:$0xff] }
 0xb83   :  { %v14573_v3 = vpack.c.bf16 %v14571_v11, %v14572_v8  ;;  %v4322_v50 = vpack.c.bf16 %v10887_v53, %v10881_v51  ;;  %v10997_v26 = vmul.f32 %v14574_v27, %v4374_v24  ;;  %v11000_v7 = vmul.f32 %v14575_v29, %v4370_v56  ;;  %v11005_v40 = vpop.permute.xlu0 %4567  ;;  %v14587_v58 = vld [vmem:[#allocation29_spill] sm:$0xff]  ;;  %v14588_v24 = vld [vmem:[#allocation62_spill] sm:$0xff]  ;;  %v14596_v11 = vld [vmem:[#allocation36_spill] sm:$0xff] }
 0xb84   :  { %4799 = vmatpush1.bf16.msra.mxu0 %v4207_v25  ;;  %v11003_v22 = vmul.f32 %v14576_v57, %v4382_v62  ;;  %v14579_v15 = vpack.c.bf16 %v14577_v34, %v14578_v35  ;;  %v4323_v21 = vpack.c.bf16 %v10944_v48, %v10941_v61  ;;  %v4324_v51 = vpack.c.bf16 %v10951_v20, %v4308_v9  ;;  %v14582_v61 = vld [vmem:[#allocation47_spill] sm:$0xff]  ;;  %v14583_v48 = vld [vmem:[#allocation28_spill] sm:$0xff]  ;;  %v14589_v56 = vld [vmem:[#allocation34_spill] sm:$0xff] }
 0xb85   :  { %4800 = vmatprep.subr.bf16.mxu0 %v14573_v3  ;;  %4905 = vmatpush1.bf16.msra.mxu1 %v4209_v28  ;;  %v11014_v53 = vmul.f32 %v14569_v32, %v4377_v5  ;;  %v11017_v6 = vmul.f32 %v14574_v27, %v4373_v43  ;;  %v11020_v45 = vmul.f32 %v14575_v29, %v4369_v31  ;;  %v14590_v62 = vld [vmem:[#allocation33_spill] sm:$0xff]  ;;  %v14592_v9 = vld [vmem:[#allocation10_spill] sm:$0xff]  ;;  %v14597_v8 = vld [vmem:[#allocation35_spill] sm:$0xff] }
 0xb86   :  { %4906 = vmatprep.subr.bf16.mxu1 %v14579_v15  ;;  %v11023_v60 = vmul.f32 %v14576_v57, %v4381_v39  ;;  %v4479_v63 = vsel %vm414_vm5, %v14581_v33, %v14580_v46  ;;  %v4480_v55 = vsel %vm414_vm5, %v14583_v48, %v14582_v61  ;;  %v4264_v20 = vpop.permute.xlu1 %4263  ;;  %v14586_v38 = vpack.c.bf16 %v14584_v54, %v14585_v17  ;;  %v14599_v34 = vld [vmem:[#allocation76_spill] sm:$0xff]  ;;  %v14600_v15 = vld [vmem:[#allocation63_spill] sm:$0xff] }
 0xb87   :  { %v4423_v25 = vpack.c.bf16 %v10981_v36, %v11014_v53  ;;  %v4475_v37 = vsel %vm414_vm5, %v14580_v46, %v14587_v58  ;;  %v4273_v59 = vsel %vm306_vm4, %v4248_v1, %v14588_v24  ;;  %v14591_v28 = vpack.c.bf16 %v14589_v56, %v14590_v62  ;;  %v4250_v39 = vpop.permute.xlu0 %4249  ;;  %v14601_v46 = vld [vmem:[#allocation61_spill] sm:$0xff] }
 0xb88   :  { %4801 = vmatpush1.bf16.msra.mxu0 %v14586_v38  ;;  %v14594_v44 = vpack.c.bf16 %v14592_v9, %v14593_v4  ;;  %v4424_v43 = vpack.c.bf16 %v10997_v26, %v11017_v6  ;;  %v4425_v0 = vpack.c.bf16 %v11000_v7, %v11020_v45  ;;  %v4426_v5 = vpack.c.bf16 %v11003_v22, %v11023_v60  ;;  %v14603_v38 = vld [vmem:[#allocation60_spill] sm:$0xff]  ;;  %v14605_v9 = vld [vmem:[#allocation15_spill] sm:$0xff]  ;;  %v14625_v45 = vld [vmem:[#allocation82_spill] sm:$0xff] }
 0xb89   :  { %4802 = vmatprep.subr.bf16.mxu0 %v14591_v28  ;;  %v4476_v31 = vsel %vm414_vm5, %v14582_v61, %v14595_v23  ;;  %v14598_v3 = vpack.c.bf16 %v14596_v11, %v14597_v8  ;;  %v11065_v35 = vmul.f32 %v14599_v34, %v4479_v63  ;;  %v11068_v26 = vmul.f32 %v14599_v34, %v4480_v55  ;;  %v14602_v61 = vld [vmem:[#allocation77_spill] sm:$0xff]  ;;  %v14604_v28 = vld [vmem:[#allocation16_spill] sm:$0xff] }
 0xb8a   :  { %4907 = vmatpush1.bf16.msra.mxu1 %v14594_v44  ;;  %v4274_v6 = vsel %vm306_vm4, %v4250_v39, %v14600_v15  ;;  %v4278_v54 = vsel %vm306_vm4, %v14601_v46, %v4250_v39  ;;  %v11077_v17 = vmul.f32 %v14602_v61, %v4475_v37  ;;  %v4277_v56 = vsel %vm306_vm4, %v14603_v38, %v4248_v1  ;;  %v4350_v62 = vpop.permute.xlu1 %4349  ;;  %v14608_v39 = vld [vmem:[#allocation17_spill] sm:$0xff]  ;;  %v14610_v11 = vld [vmem:[#allocation48_spill] sm:$0xff] }
 0xb8b   :  { %4908 = vmatprep.subr.bf16.mxu1 %v14598_v3  ;;  %v4314_v63 = vmul.f32 %v14554_v19, %v4273_v59  ;;  %v4318_v55 = vmul.f32 %v14554_v19, %v4274_v6  ;;  %v14606_v4 = vpack.c.bf16 %v14604_v28, %v14605_v9  ;;  %v11088_v44 = vmul.f32 %v14602_v61, %v4476_v31  ;;  %v14607_v59 = vld [vmem:[#allocation18_spill] sm:$0xff]  ;;  %v4266_v6 = vpop.permute.xlu0 %4265  ;;  %v14613_v9 = vld [vmem:[#allocation79_spill] sm:$0xff] }
 0xb8c   :  { %v4269_v37 = vsel %vm306_vm4, %v14588_v24, %v4264_v20  ;;  %v4281_v1 = vsel %vm306_vm4, %v4264_v20, %v14603_v38  ;;  %v14609_v19 = vpack.c.bf16 %v14607_v59, %v14608_v39  ;;  %v4471_v8 = vsel %vm414_vm5, %v14587_v58, %v14610_v11  ;;  %v14616_v59 = vld [vmem:[#allocation65_spill] sm:$0xff] }
 0xb8d   :  { %4803 = vmatpush1.bf16.msra.mxu0 %v14606_v4  ;;  %v4483_v31 = vsel %vm414_vm5, %v14610_v11, %v14581_v33  ;;  %v4317_v24 = vmul.f32 %v14549_v2, %v4278_v54  ;;  %v4326_v3 = vpack.c.bf16 %v4318_v55, %v4314_v63  ;;  %v4313_v20 = vmul.f32 %v14549_v2, %v4277_v56  ;;  %v14612_v56 = vld [vmem:[#allocation66_spill] sm:$0xff] }
 0xb8e   :  { %4804 = vmatprep.subr.bf16.mxu0 %v4322_v50  ;;  %4909 = vmatpush1.bf16.msra.mxu1 %v14609_v19  ;;  %v4525_v50 = vpack.c.bf16 %v11068_v26, %v11065_v35  ;;  %v4270_v38 = vsel %vm306_vm4, %v14600_v15, %v4266_v6  ;;  %v4282_v58 = vsel %vm306_vm4, %v4266_v6, %v14601_v46  ;;  %v4366_v55 = vpop.permute.xlu1 %4365  ;;  %v14611_v15 = vld [vmem:[#allocation49_spill] sm:$0xff]  ;;  %v7698_v26 = vld [vmem:[%s14138_s8] ss:$12 sps:$4 sm:$0xff]  }
 0xb8f   :  { %4910 = vmatprep.subr.bf16.mxu1 %v4324_v51  ;;  %v4315_v33 = vmul.f32 %v14560_v42, %v4269_v37  ;;  %v4316_v54 = vmul.f32 %v14561_v13, %v4281_v1  ;;  %v4319_v63 = vmul.f32 %v14560_v42, %v4270_v38  ;;  %v4320_v51 = vmul.f32 %v14561_v13, %v4282_v58  ;;  %v4352_v13 = vpop.permute.xlu0 %4351  ;;  %v14614_v37 = vld [vmem:[#allocation64_spill] sm:$0xff]  ;;  %v14618_v38 = vld [vmem:[#allocation50_spill] sm:$0xff]  ;;  %v14619_v58 = vld [vmem:[#allocation31_spill] sm:$0xff] }
 0xb90   :  { %v4526_v2 = vpack.c.bf16 %v11088_v44, %v11077_v17  ;;  %v4472_v46 = vsel %vm414_vm5, %v14595_v23, %v14611_v15  ;;  %v4375_v28 = vsel %vm366_vm6, %v4350_v62, %v14612_v56  ;;  %v4484_v52 = vsel %vm414_vm5, %v14611_v15, %v14583_v48  ;;  %v14615_v1 = vld [vmem:[#allocation72_spill] sm:$0xff] }
 0xb91   :  { %4805 = vmatpush1.bf16.msra.mxu0 %v4321_v18  ;;  %v4325_v30 = vpack.c.bf16 %v4317_v24, %v4313_v20  ;;  %v4327_v18 = vpack.c.bf16 %v4319_v63, %v4315_v33  ;;  %v4328_v42 = vpack.c.bf16 %v4320_v51, %v4316_v54  ;;  %v11138_v4 = vmul.f32 %v14613_v9, %v4471_v8  ;;  %v14617_v24 = vld [vmem:[#allocation80_spill] sm:$0xff] }
 0xb92   :  { %4806 = vmatprep.subr.bf16.mxu0 %v4326_v3  ;;  %4911 = vmatpush1.bf16.msra.mxu1 %v4323_v21  ;;  %v4379_v23 = vsel %vm366_vm6, %v14614_v37, %v4350_v62  ;;  %v4376_v21 = vsel %vm366_vm6, %v4352_v13, %v14615_v1  ;;  %v4380_v39 = vsel %vm366_vm6, %v14616_v59, %v4352_v13  ;;  %v4452_v8 = vpop.permute.xlu1 %4451 }
 0xb93   :  { %v4416_v48 = vmul.f32 %v14574_v27, %v4375_v28  ;;  %v4371_v19 = vsel %vm366_vm6, %v14612_v56, %v4366_v55  ;;  %v4420_v11 = vmul.f32 %v14574_v27, %v4376_v21  ;;  %4912 = vmatprep.subr.bf16.mxu1 %v4328_v42  ;;  %v11155_v62 = vmul.f32 %v14613_v9, %v4472_v46  ;;  %v4368_v63 = vpop.permute.xlu0 %4367  ;;  %v14620_v46 = vld [vmem:[#allocation83_spill] sm:$0xff]  ;;  %v14623_v42 = vld [vmem:[#allocation78_spill] sm:$0xff] }
 0xb94   :  { %v4516_v3 = vmul.f32 %v14617_v24, %v4484_v52  ;;  %v4383_v6 = vsel %vm366_vm6, %v4366_v55, %v14614_v37  ;;  %v4512_v20 = vmul.f32 %v14617_v24, %v4483_v31  ;;  %v11166_v27 = vsel %vm474_vm7, %v14619_v58, %v14618_v38  ;;  %v14621_v52 = vld [vmem:[#allocation51_spill] sm:$0xff]  ;;  %v14624_v37 = vld [vmem:[#allocation85_spill] sm:$0xff] }
 0xb95   :  { %4807 = vmatpush1.bf16.msra.mxu0 %v4325_v30  ;;  %v4419_v33 = vmul.f32 %v14569_v32, %v4380_v39  ;;  %v4428_v54 = vpack.c.bf16 %v4420_v11, %v4416_v48  ;;  %v4415_v51 = vmul.f32 %v14569_v32, %v4379_v23  ;;  %v4372_v31 = vsel %vm366_vm6, %v14615_v1, %v4368_v63  ;;  %v14622_v30 = vld [vmem:[#allocation32_spill] sm:$0xff]  ;;  %v14626_v48 = vld [vmem:[#allocation87_spill] sm:$0xff] }
 0xb96   :  { %4808 = vmatprep.subr.bf16.mxu0 %v4424_v43  ;;  %4913 = vmatpush1.bf16.msra.mxu1 %v4327_v18  ;;  %v4417_v43 = vmul.f32 %v14575_v29, %v4371_v19  ;;  %v4384_v55 = vsel %vm366_vm6, %v4368_v63, %v14616_v59  ;;  %v4418_v15 = vmul.f32 %v14576_v57, %v4383_v6  ;;  %v4468_v60 = vpop.permute.xlu1 %4467  ;;  %v14627_v63 = vld [vmem:[#allocation81_spill] sm:$0xff] }
 0xb97   :  { %4914 = vmatprep.subr.bf16.mxu1 %v4426_v5  ;;  %v4477_v56 = vsel %vm414_vm5, %v4452_v8, %v14620_v46  ;;  %v4421_v22 = vmul.f32 %v14575_v29, %v4372_v31  ;;  %v4422_v32 = vmul.f32 %v14576_v57, %v4384_v55  ;;  %v4527_v5 = vpack.c.bf16 %v11155_v62, %v11138_v4 }
 0xb98   :  { %v4528_v28 = vpack.c.bf16 %v4516_v3, %v4512_v20  ;;  %v4582_v18 = vsel %vm474_vm7, %v14622_v30, %v14621_v52  ;;  %v4578_v36 = vsel %vm474_vm7, %v14621_v52, %v10957_v10  ;;  %v4427_v29 = vpack.c.bf16 %v4419_v33, %v4415_v51 }
 0xb99   :  { %4809 = vmatpush1.bf16.msra.mxu0 %v4423_v25  ;;  %v4429_v57 = vpack.c.bf16 %v4421_v22, %v4417_v43  ;;  %v4430_v53 = vpack.c.bf16 %v4422_v32, %v4418_v15  ;;  %v4454_v25 = vpop.permute.xlu0 %4453  ;;  %v4481_v13 = vsel %vm414_vm5, %v14623_v42, %v4452_v8  ;;  %v4518_v4 = vmul.f32 %v14602_v61, %v4477_v56  ;;  %v7701_v22 = vld [vmem:[%s14138_s8 + $0x1c] ss:$12 sps:$4 sm:$0xff]  }
 0xb9a   :  { %4810 = vmatprep.subr.bf16.mxu0 %v4428_v54  ;;  %4915 = vmatpush1.bf16.msra.mxu1 %v4425_v0  ;;  %v4478_v7 = vsel %vm414_vm5, %v4454_v25, %v14624_v37  ;;  %v4482_v0 = vsel %vm414_vm5, %v14625_v45, %v4454_v25  ;;  %v4473_v23 = vsel %vm414_vm5, %v14620_v46, %v4468_v60  ;;  %v4566_v59 = vpop.permute.xlu1 %4565 }
 0xb9b   :  { %v4485_v1 = vsel %vm414_vm5, %v4468_v60, %v14623_v42  ;;  %v4522_v21 = vmul.f32 %v14602_v61, %v4478_v7  ;;  %4916 = vmatprep.subr.bf16.mxu1 %v4430_v53  ;;  %v4577_v39 = vsel %vm474_vm7, %v14618_v38, %v10938_v41  ;;  %v4616_v19 = vmul.f32 %v14626_v48, %v4578_v36 }
 0xb9c   :  { %v4585_v11 = vsel %vm474_vm7, %v4566_v59, %v14619_v58  ;;  %v4586_v61 = vsel %vm474_vm7, %v11005_v40, %v14622_v30  ;;  %v4517_v8 = vmul.f32 %v14599_v34, %v4481_v13  ;;  %v4521_v62 = vmul.f32 %v14599_v34, %v4482_v0 }
 0xb9d   :  { %4811 = vmatpush1.bf16.msra.mxu0 %v4427_v29  ;;  %v4530_v3 = vpack.c.bf16 %v4522_v21, %v4518_v4  ;;  %v4470_v6 = vpop.permute.xlu0 %4469  ;;  %v4519_v20 = vmul.f32 %v14613_v9, %v4473_v23  ;;  %v4520_v38 = vmul.f32 %v14617_v24, %v4485_v1  ;;  %v4614_v34 = vmul.f32 %v10739_v49, %v4585_v11  ;;  %v7703_v29 = vld [vmem:[%s14138_s8 + $0x18] ss:$12 sps:$4 sm:$0xff]  }
 0xb9e   :  { %4812 = vmatprep.subr.bf16.mxu0 %v4526_v2  ;;  %4917 = vmatpush1.bf16.msra.mxu1 %v4429_v57  ;;  %v4474_v17 = vsel %vm414_vm5, %v14624_v37, %v4470_v6  ;;  %v4486_v44 = vsel %vm414_vm5, %v4470_v6, %v14625_v45  ;;  %v4573_v2 = vsel %vm474_vm7, %v10938_v41, %v4566_v59  ;;  %v4546_v54 = vpop.permute.xlu1 %4545 }
 0xb9f   :  { %4918 = vmatprep.subr.bf16.mxu1 %v4528_v28  ;;  %v4523_v58 = vmul.f32 %v14613_v9, %v4474_v17  ;;  %v4524_v33 = vmul.f32 %v14617_v24, %v4486_v44  ;;  %v4615_v51 = vmul.f32 %v14627_v63, %v4582_v18  ;;  %v4612_v43 = vmul.f32 %v14626_v48, %v4577_v39 }
 0xba0   :  { %v4574_v41 = vsel %vm474_vm7, %v10957_v10, %v11005_v40  ;;  %v4618_v9 = vmul.f32 %v10739_v49, %v4586_v61  ;;  %v4529_v31 = vpack.c.bf16 %v4521_v62, %v4517_v8  ;;  %v4613_v35 = vmul.f32 %v10731_v47, %v4573_v2  ;;  %v7704_v8 = vld [vmem:[%s14138_s8 + $0x8] ss:$12 sps:$4 sm:$0xff]  }
 0xba1   :  { %4813 = vmatpush1.bf16.msra.mxu0 %v4525_v50  ;;  %v4531_v24 = vpack.c.bf16 %v4523_v58, %v4519_v20  ;;  %v4532_v55 = vpack.c.bf16 %v4524_v33, %v4520_v38  ;;  %v4548_v15 = vpop.permute.xlu0 %4547  ;;  %v4628_v46 = vpack.c.bf16 %v4616_v19, %v4612_v43  ;;  %v4611_v50 = vmul.f32 %v14627_v63, %v11166_v27 }
 0xba2   :  { %4814 = vmatprep.subr.bf16.mxu0 %v4530_v3  ;;  %4919 = vmatpush1.bf16.msra.mxu1 %v4527_v5  ;;  %v4630_v56 = vpack.c.bf16 %v4618_v9, %v4614_v34  ;;  %v4554_v10 = vpop.permute.xlu1 %4553  ;;  %v4617_v40 = vmul.f32 %v10731_v47, %v4574_v41  ;;  %v14628_v19 = vmov 0  }
 0xba3   :  { %4920 = vmatprep.subr.bf16.mxu1 %v4532_v55  ;;  %v4627_v32 = vpack.c.bf16 %v4615_v51, %v4611_v50  ;;  %v4583_v27 = vsel %vm474_vm7, %v4546_v54, %v4554_v10 }
 0xba4   :  { %v4629_v5 = vpack.c.bf16 %v4617_v40, %v4613_v35  ;;  %v4619_v57 = vmul.f32 %v14627_v63, %v4583_v27 }
 0xba5   :  { %4815 = vmatpush1.bf16.msra.mxu0 %v4529_v31  ;;  %v4564_v60 = vpop.permute.xlu0 %4563 }
 0xba6   :  { %4837 = vmatprep.subr.bf16.mxu0 %v4628_v46  ;;  %4921 = vmatpush1.bf16.msra.mxu1 %v4531_v24  ;;  %v4562_v28 = vpop.permute.xlu1 %4561 }
 0xba7   :  { %4943 = vmatprep.subr.bf16.mxu1 %v4630_v56  ;;  %v4579_v52 = vsel %vm474_vm7, %v4554_v10, %v4562_v28 }
 0xba8   :  { %4817 = vmatmul.mubr.bf16.vlgmr.msra.gmra.mrb[28].mxu0 %v7698_v26  ;;  %v4620_v53 = vmul.f32 %v14626_v48, %v4579_v52 }
 0xba9   :  { %4838 = vmatpush1.bf16.msra.mxu0 %v4627_v32  ;;  %4923 = vmatmul.mubr.bf16.vlgmr.msra.gmra.mrb[28].mxu1 %v7698_v26  ;;  %v4556_v30 = vpop.permute.xlu0 %4555 }
 0xbaa   :  { %4944 = vmatpush1.bf16.msra.mxu1 %v4629_v5  ;;  %4826 = vmatprep.mubr.bf16.mxu0 %v7701_v22  ;;  %v4580_v18 = vsel %vm474_vm7, %v4556_v30, %v4564_v60  ;;  %v4584_v36 = vsel %vm474_vm7, %v4548_v15, %v4556_v30  ;;  %v4570_v13 = vpop.permute.xlu1 %4569 }
 0xbab   :  { %4932 = vmatprep.mubr.bf16.mxu1 %v7701_v22  ;;  %v4623_v25 = vmul.f32 %v14627_v63, %v4584_v36  ;;  %v4624_v42 = vmul.f32 %v14626_v48, %v4580_v18  ;;  %v4575_v4 = vsel %vm474_vm7, %v4562_v28, %v4570_v13  ;;  %v4587_v37 = vsel %vm474_vm7, %v4570_v13, %v4546_v54 }
 0xbac   :  { %v4621_v23 = vmul.f32 %v10731_v47, %v4575_v4  ;;  %v4622_v59 = vmul.f32 %v10739_v49, %v4587_v37 }
 0xbad   :  { %v4631_v7 = vpack.c.bf16 %v4623_v25, %v4619_v57  ;;  %v4632_v45 = vpack.c.bf16 %v4624_v42, %v4620_v53  ;;  %v4572_v0 = vpop.permute.xlu0 %4571 }
 0xbae   :  { %v4576_v1 = vsel %vm474_vm7, %v4564_v60, %v4572_v0  ;;  %v4588_v21 = vsel %vm474_vm7, %v4572_v0, %v4548_v15 }
 0xbaf   :  { %v4625_v39 = vmul.f32 %v10731_v47, %v4576_v1  ;;  %v4626_v48 = vmul.f32 %v10739_v49, %v4588_v21  ;;  %4839 = vmatprep.subr.bf16.mxu0 %v4632_v45  ;;  %v7705_v47 = vld [vmem:[%s14138_s8 + $0x20] ss:$12 sps:$4 sm:$0xff]  }
 0xbb0   :  { %4827 = vmatmul.mubr.bf16.gmra.mrb[32].mxu0 %v7703_v29 }
 0xbb1   :  { %4933 = vmatmul.mubr.bf16.gmra.mrb[32].mxu1 %v7703_v29  ;;  %4840 = vmatpush1.bf16.msra.mxu0 %v4631_v7  ;;  %v4633_v11 = vpack.c.bf16 %v4625_v39, %v4621_v23  ;;  %v4634_v61 = vpack.c.bf16 %v4626_v48, %v4622_v59 }
 0xbb2   :  { %4869 = vmatprep.mubr.bf16.mxu0 %v14628_v19  ;;  %4975 = vmatprep.mubr.bf16.mxu1 %v14628_v19 }
 0xbb3   :  { %4945 = vmatprep.subr.bf16.mxu1 %v4634_v61 }
 0xbb4   :  { %4946 = vmatpush1.bf16.msra.mxu1 %v4633_v11 }
 0xbb8   :  { %7540 = vmatmul.mubr.msk.bf16.vlgmr.msra.gmra.mrb[28].mxu0 %vm4777_vm11, %v7704_v8 }
 0xbb9   :  { %7542 = vmatmul.mubr.msk.bf16.vlgmr.msra.gmra.mrb[28].mxu1 %vm4777_vm11, %v7704_v8  ;;  %4879 = vmatprep.mubr.bf16.mxu0 %v14628_v19 }
 0xbba   :  { %4985 = vmatprep.mubr.bf16.mxu1 %v14628_v19  ;;  %v4730_v49 = vpop.permute.xlu1 %4729 }
 0xbbc   :  { %v4735_v62 = vpop.permute.xlu0 %4734 }
 0xbbe   :  { %v4740_v50 = vpop.permute.xlu1 %4739 }
 0xbc0   :  { %7541 = vmatmul.mubr.msk.bf16.gmra.mrb[32].mxu0 %vm4777_vm11, %v7705_v47  ;;  %v4745_v40 = vpop.permute.xlu0 %4744 }
 0xbc1   :  { %7543 = vmatmul.mubr.msk.bf16.gmra.mrb[32].mxu1 %vm4777_vm11, %v7705_v47 }
 0xc8b   :  { %v4871_v3 = vpop.f32.mrb[28].mxu0 }
 0xc8c   :  { %v7578_v6 = vadd.f32 %v4871_v3, %v4730_v49  ;;  %v4873_v20 = vpop.f32.mrb[29].mxu0  ;;  %v4977_v38 = vpop.f32.mrb[28].mxu1 }
 0xc8d   :  { %v7579_v17 = vadd.f32 %v4873_v20, %v4730_v49  ;;  %v7586_v44 = vadd.f32 %v4977_v38, %v4730_v49  ;;  %v4875_v2 = vpop.f32.mrb[30].mxu0  ;;  %v4979_v34 = vpop.f32.mrb[29].mxu1 }
 0xc8e   :  { %v11311_v58 = vmax.f32 %v7578_v6, 0.0  ;;  %v7580_v33 = vadd.f32 %v4875_v2, %v4735_v62  ;;  %v7587_v54 = vadd.f32 %v4979_v34, %v4730_v49  ;;  %v4877_v63 = vpop.f32.mrb[31].mxu0  ;;  %v4981_v51 = vpop.f32.mrb[30].mxu1 }
 0xc8f   :  { %v11313_v43 = vmax.f32 %v7579_v17, 0.0  ;;  %v11315_v41 = vmax.f32 %v7586_v44, 0.0  ;;  %v7581_v9 = vadd.f32 %v4877_v63, %v4735_v62  ;;  %v7588_v31 = vadd.f32 %v4981_v51, %v4735_v62  ;;  %v4983_v24 = vpop.f32.mrb[31].mxu1 }
 0xc90   :  { %14629 = vst [vmem:[#allocation37_spill] sm:$0xff] %v11311_v58  ;;  %5012 = vst [vmem:[%s14140_s21] sm:$0xff] %v11311_v58  ;;  %v11321_v55 = vmax.f32 %v7580_v33, 0.0  ;;  %v11323_v15 = vmax.f32 %v7587_v54, 0.0  ;;  %v7589_v46 = vadd.f32 %v4983_v24, %v4735_v62  ;;  %5028 = vrot.lane.b32.xlu1 %v11311_v58, %s7731_s13 }
 0xc91   :  { %14630 = vst [vmem:[#allocation52_spill] sm:$0xff] %v11313_v43  ;;  %14631 = vst [vmem:[#allocation21_spill] sm:$0xff] %v11315_v41  ;;  %v11335_v35 = vmax.f32 %v7581_v9, 0.0  ;;  %v11337_v26 = vmax.f32 %v7588_v31, 0.0 }
 0xc92   :  { %14632 = vst [vmem:[#allocation38_spill] sm:$0xff] %v11321_v55  ;;  %14633 = vst [vmem:[#allocation19_spill] sm:$0xff] %v11323_v15  ;;  %v11347_v56 = vmax.f32 %v7589_v46, 0.0  ;;  %5030 = vrot.lane.b32.xlu0 %v11321_v55, %s7731_s13 }
 0xc93   :  { %5013 = vst [vmem:[%s14140_s21 + $0x8] sm:$0xff] %v11313_v43  ;;  %5014 = vst [vmem:[%s14140_s21 + $0x10] sm:$0xff] %v11315_v41  ;;  %v4881_v22 = vpop.f32.mrb[32].mxu0 }
 0xc94   :  { %14634 = vst [vmem:[#allocation53_spill] sm:$0xff] %v11335_v35  ;;  %14635 = vst [vmem:[#allocation55_spill] sm:$0xff] %v11337_v26  ;;  %v7582_v32 = vadd.f32 %v4881_v22, %v4740_v50  ;;  %v4883_v60 = vpop.f32.mrb[33].mxu0  ;;  %v4987_v5 = vpop.f32.mrb[32].mxu1  ;;  %5044 = vrot.lane.b32.xlu1 %v11315_v41, %s7731_s13 }
 0xc95   :  { %5016 = vst [vmem:[%s14140_s21 + $0x20] sm:$0xff] %v11321_v55  ;;  %5015 = vst [vmem:[%s14140_s21 + $0x18] sm:$0xff] %v11323_v15  ;;  %v7583_v28 = vadd.f32 %v4883_v60, %v4740_v50  ;;  %v7590_v27 = vadd.f32 %v4987_v5, %v4740_v50  ;;  %v4885_v52 = vpop.f32.mrb[34].mxu0  ;;  %v4989_v30 = vpop.f32.mrb[33].mxu1  ;;  %v5076_v60 = vld [vmem:[%s14422_s11] sm:$0xf] }
 0xc96   :  { %14636 = vst [vmem:[#allocation54_spill] sm:$0xff] %v11347_v56  ;;  %5017 = vst [vmem:[%s14140_s21 + $0x28] sm:$0xff] %v11335_v35  ;;  %v11367_v18 = vmax.f32 %v7582_v32, 0.0  ;;  %v7584_v36 = vadd.f32 %v4885_v52, %v4745_v40  ;;  %v7591_v29 = vadd.f32 %v4989_v30, %v4740_v50  ;;  %v4887_v57 = vpop.f32.mrb[35].mxu0  ;;  %v4991_v53 = vpop.f32.mrb[34].mxu1  ;;  %5046 = vrot.lane.b32.xlu0 %v11337_v26, %s7731_s13 }
 0xc97   :  { %5018 = vst [vmem:[%s14140_s21 + $0x30] sm:$0xff] %v11337_v26  ;;  %5019 = vst [vmem:[%s14140_s21 + $0x38] sm:$0xff] %v11347_v56  ;;  %v11371_v25 = vmax.f32 %v7583_v28, 0.0  ;;  %v11373_v42 = vmax.f32 %v7590_v27, 0.0  ;;  %v7585_v13 = vadd.f32 %v4887_v57, %v4745_v40  ;;  %v7592_v4 = vadd.f32 %v4991_v53, %v4745_v40  ;;  %v4993_v37 = vpop.f32.mrb[35].mxu1  ;;  %v14659_v28 = vld [vmem:[#allocation5_spill] sm:$0xff] }
 0xc98   :  { %14637 = vst [vmem:[#allocation22_spill] sm:$0xff] %v11367_v18  ;;  %5020 = vst [vmem:[%s14140_s21 + $0x40] sm:$0xff] %v11367_v18  ;;  %v11379_v7 = vmax.f32 %v7584_v36, 0.0  ;;  %v11381_v45 = vmax.f32 %v7591_v29, 0.0  ;;  %v7593_v0 = vadd.f32 %v4993_v37, %v4745_v40  ;;  %5130 = vrot.lane.b32.xlu1 %v11311_v58, %s7730_s23  ;;  %v11649_v27 = vrot.slane %v5076_v60, %v14659_v28  ;;  %v14660_v57 = vld [vmem:[#allocation3_spill] sm:$0xff] }
 0xc99   :  { %14638 = vst [vmem:[#allocation39_spill] sm:$0xff] %v11371_v25  ;;  %14639 = vst [vmem:[#allocation20_spill] sm:$0xff] %v11373_v42  ;;  %v11393_v23 = vmax.f32 %v7585_v13, 0.0  ;;  %v11395_v1 = vmax.f32 %v7592_v4, 0.0  ;;  %v11660_v53 = vrot.slane %v5076_v60, %v14660_v57  ;;  %v11667_v37 = vrot.slane %v5076_v60, %v7909_v14 }
 0xc9a   :  { %14640 = vst [vmem:[#allocation67_spill] sm:$0xff] %v11379_v7  ;;  %14641 = vst [vmem:[#allocation56_spill] sm:$0xff] %v11381_v45  ;;  %v11405_v21 = vmax.f32 %v7593_v0, 0.0  ;;  %5132 = vrot.lane.b32.xlu0 %v11321_v55, %s7730_s23 }
 0xc9b   :  { %5021 = vst [vmem:[%s14140_s21 + $0x48] sm:$0xff] %v11371_v25  ;;  %5022 = vst [vmem:[%s14140_s21 + $0x50] sm:$0xff] %v11373_v42 }
 0xc9c   :  { %14642 = vst [vmem:[#allocation84_spill] sm:$0xff] %v11393_v23  ;;  %14643 = vst [vmem:[#allocation86_spill] sm:$0xff] %v11395_v1  ;;  %5146 = vrot.lane.b32.xlu1 %v11315_v41, %s7730_s23 }
 0xc9d   :  { %5024 = vst [vmem:[%s14140_s21 + $0x60] sm:$0xff] %v11379_v7  ;;  %5023 = vst [vmem:[%s14140_s21 + $0x58] sm:$0xff] %v11381_v45 }
 0xc9e   :  { %14644 = vst [vmem:[#allocation68_spill] sm:$0xff] %v11405_v21  ;;  %5025 = vst [vmem:[%s14140_s21 + $0x68] sm:$0xff] %v11393_v23  ;;  %5148 = vrot.lane.b32.xlu0 %v11337_v26, %s7730_s23 }
 0xc9f   :  { %5026 = vst [vmem:[%s14140_s21 + $0x70] sm:$0xff] %v11395_v1  ;;  %5027 = vst [vmem:[%s14140_s21 + $0x78] sm:$0xff] %v11405_v21 }
 0xca0   :  { %5232 = vrot.lane.b32.xlu1 %v11311_v58, %s7733_s26 }
 0xca2   :  { %5234 = vrot.lane.b32.xlu0 %v11321_v55, %s7733_s26 }
 0xca4   :  { %5248 = vrot.lane.b32.xlu1 %v11315_v41, %s7733_s26 }
 0xca6   :  { %5250 = vrot.lane.b32.xlu0 %v11337_v26, %s7733_s26 }
 0xca8   :  { %5334 = vrot.lane.b32.xlu1 %v11311_v58, %s7732_s25 }
 0xcaa   :  { %5336 = vrot.lane.b32.xlu0 %v11321_v55, %s7732_s25 }
 0xcac   :  { %5350 = vrot.lane.b32.xlu1 %v11315_v41, %s7732_s25 }
 0xcae   :  { %5352 = vrot.lane.b32.xlu0 %v11337_v26, %s7732_s25 }
 0xcb0   :  { %5452 = vrot.lane.b32.xlu1 %v11311_v58, %s7734_s1 }
 0xcb2   :  { %5454 = vrot.lane.b32.xlu0 %v11321_v55, %s7734_s1 }
 0xcb4   :  { %5468 = vrot.lane.b32.xlu1 %v11315_v41, %s7734_s1 }
 0xcb6   :  { %5470 = vrot.lane.b32.xlu0 %v11337_v26, %s7734_s1 }
 0xcb8   :  { %5554 = vrot.lane.b32.xlu1 %v11311_v58, %s7736_s2 }
 0xcba   :  { %5556 = vrot.lane.b32.xlu0 %v11321_v55, %s7736_s2 }
 0xcbc   :  { %5570 = vrot.lane.b32.xlu1 %v11315_v41, %s7736_s2 }
 0xcbe   :  { %5572 = vrot.lane.b32.xlu0 %v11337_v26, %s7736_s2 }
 0xcc0   :  { %5656 = vrot.lane.b32.xlu1 %v11311_v58, %s14427_s4 }
 0xcc2   :  { %5658 = vrot.lane.b32.xlu0 %v11321_v55, %s14427_s4 }
 0xcc4   :  { %5672 = vrot.lane.b32.xlu1 %v11315_v41, %s14427_s4 }
 0xcc6   :  { %5674 = vrot.lane.b32.xlu0 %v11337_v26, %s14427_s4 }
 0xcc8   :  { %5758 = vrot.lane.b32.xlu1 %v11311_v58, %s7737_s28 }
 0xcca   :  { %5760 = vrot.lane.b32.xlu0 %v11321_v55, %s7737_s28 }
 0xccc   :  { %5036 = vrot.lane.b32.xlu1 %v11313_v43, %s7731_s13 }
 0xcce   :  { %5038 = vrot.lane.b32.xlu0 %v11335_v35, %s7731_s13 }
 0xcd0   :  { %5052 = vrot.lane.b32.xlu1 %v11323_v15, %s7731_s13 }
 0xcd2   :  { %5054 = vrot.lane.b32.xlu0 %v11347_v56, %s7731_s13 }
 0xcd4   :  { %5138 = vrot.lane.b32.xlu1 %v11313_v43, %s7730_s23 }
 0xcd6   :  { %5140 = vrot.lane.b32.xlu0 %v11335_v35, %s7730_s23 }
 0xcd8   :  { %5154 = vrot.lane.b32.xlu1 %v11323_v15, %s7730_s23 }
 0xcda   :  { %5156 = vrot.lane.b32.xlu0 %v11347_v56, %s7730_s23 }
 0xcdc   :  { %5240 = vrot.lane.b32.xlu1 %v11313_v43, %s7733_s26 }
 0xcde   :  { %5242 = vrot.lane.b32.xlu0 %v11335_v35, %s7733_s26 }
 0xce0   :  { %5256 = vrot.lane.b32.xlu1 %v11323_v15, %s7733_s26 }
 0xce2   :  { %5258 = vrot.lane.b32.xlu0 %v11347_v56, %s7733_s26 }
 0xce4   :  { %5342 = vrot.lane.b32.xlu1 %v11313_v43, %s7732_s25 }
 0xce6   :  { %5344 = vrot.lane.b32.xlu0 %v11335_v35, %s7732_s25 }
 0xce8   :  { %5358 = vrot.lane.b32.xlu1 %v11323_v15, %s7732_s25 }
 0xcea   :  { %5360 = vrot.lane.b32.xlu0 %v11347_v56, %s7732_s25 }
 0xcec   :  { %5460 = vrot.lane.b32.xlu1 %v11313_v43, %s7734_s1 }
 0xcee   :  { %5462 = vrot.lane.b32.xlu0 %v11335_v35, %s7734_s1 }
 0xcf0   :  { %5476 = vrot.lane.b32.xlu1 %v11323_v15, %s7734_s1 }
 0xcf2   :  { %5478 = vrot.lane.b32.xlu0 %v11347_v56, %s7734_s1 }
 0xcf4   :  { %5562 = vrot.lane.b32.xlu1 %v11313_v43, %s7736_s2 }
 0xcf6   :  { %5564 = vrot.lane.b32.xlu0 %v11335_v35, %s7736_s2 }
 0xcf8   :  { %5578 = vrot.lane.b32.xlu1 %v11323_v15, %s7736_s2 }
 0xcfa   :  { %5580 = vrot.lane.b32.xlu0 %v11347_v56, %s7736_s2 }
 0xcfc   :  { %5664 = vrot.lane.b32.xlu1 %v11313_v43, %s14427_s4 }
 0xcfe   :  { %5666 = vrot.lane.b32.xlu0 %v11335_v35, %s14427_s4 }
 0xd00   :  { %5680 = vrot.lane.b32.xlu1 %v11323_v15, %s14427_s4 }
 0xd02   :  { %5682 = vrot.lane.b32.xlu0 %v11347_v56, %s14427_s4  ;;  %v11525_v59 = vpop.permute.xlu1 %5028 }
 0xd04   :  { %v11527_v39 = vpop.permute.xlu0 %5030  ;;  %5766 = vrot.lane.b32.xlu1 %v11313_v43, %s7737_s28 }
 0xd06   :  { %5768 = vrot.lane.b32.xlu0 %v11335_v35, %s7737_s28  ;;  %v11533_v48 = vpop.permute.xlu1 %5044 }
 0xd08   :  { %v11535_v11 = vpop.permute.xlu0 %5046  ;;  %5032 = vrot.lane.b32.xlu1 %v11367_v18, %s7731_s13 }
 0xd0a   :  { %5034 = vrot.lane.b32.xlu0 %v11379_v7, %s7731_s13  ;;  %v11541_v61 = vpop.permute.xlu1 %5130 }
 0xd0c   :  { %v11543_v8 = vpop.permute.xlu0 %5132  ;;  %5048 = vrot.lane.b32.xlu1 %v11373_v42, %s7731_s13 }
 0xd0e   :  { %5050 = vrot.lane.b32.xlu0 %v11395_v1, %s7731_s13  ;;  %v11549_v47 = vpop.permute.xlu1 %5146 }
 0xd10   :  { %v11551_v49 = vpop.permute.xlu0 %5148  ;;  %5134 = vrot.lane.b32.xlu1 %v11367_v18, %s7730_s23 }
 0xd12   :  { %5136 = vrot.lane.b32.xlu0 %v11379_v7, %s7730_s23  ;;  %v11557_v62 = vpop.permute.xlu1 %5232 }
 0xd14   :  { %v11559_v3 = vpop.permute.xlu0 %5234  ;;  %5150 = vrot.lane.b32.xlu1 %v11373_v42, %s7730_s23 }
 0xd16   :  { %5152 = vrot.lane.b32.xlu0 %v11395_v1, %s7730_s23  ;;  %v11565_v6 = vpop.permute.xlu1 %5248 }
 0xd18   :  { %v11567_v20 = vpop.permute.xlu0 %5250  ;;  %5236 = vrot.lane.b32.xlu1 %v11367_v18, %s7733_s26 }
 0xd1a   :  { %5238 = vrot.lane.b32.xlu0 %v11379_v7, %s7733_s26  ;;  %v11573_v38 = vpop.permute.xlu1 %5334 }
 0xd1c   :  { %v11575_v17 = vpop.permute.xlu0 %5336  ;;  %5252 = vrot.lane.b32.xlu1 %v11373_v42, %s7733_s26 }
 0xd1e   :  { %5254 = vrot.lane.b32.xlu0 %v11395_v1, %s7733_s26  ;;  %v11581_v44 = vpop.permute.xlu1 %5350 }
 0xd20   :  { %v11583_v2 = vpop.permute.xlu0 %5352  ;;  %5338 = vrot.lane.b32.xlu1 %v11367_v18, %s7732_s25 }
 0xd22   :  { %5340 = vrot.lane.b32.xlu0 %v11379_v7, %s7732_s25  ;;  %v11589_v34 = vpop.permute.xlu1 %5452 }
 0xd23   :  { %14645 = vst [vmem:[#allocation40_spill] sm:$0xff] %v11589_v34 }
 0xd24   :  { %v11591_v33 = vpop.permute.xlu0 %5454  ;;  %5354 = vrot.lane.b32.xlu1 %v11373_v42, %s7732_s25 }
 0xd25   :  { %14646 = vst [vmem:[#allocation57_spill] sm:$0xff] %v11591_v33 }
 0xd26   :  { %5356 = vrot.lane.b32.xlu0 %v11395_v1, %s7732_s25  ;;  %v11597_v54 = vpop.permute.xlu1 %5468 }
 0xd27   :  { %14647 = vst [vmem:[#allocation59_spill] sm:$0xff] %v11597_v54 }
 0xd28   :  { %v11599_v63 = vpop.permute.xlu0 %5470  ;;  %5456 = vrot.lane.b32.xlu1 %v11367_v18, %s7734_s1 }
 0xd29   :  { %14648 = vst [vmem:[#allocation58_spill] sm:$0xff] %v11599_v63 }
 0xd2a   :  { %5458 = vrot.lane.b32.xlu0 %v11379_v7, %s7734_s1  ;;  %v11605_v51 = vpop.permute.xlu1 %5554 }
 0xd2b   :  { %14649 = vst [vmem:[#allocation41_spill] sm:$0xff] %v11605_v51 }
 0xd2c   :  { %v11607_v9 = vpop.permute.xlu0 %5556  ;;  %5472 = vrot.lane.b32.xlu1 %v11373_v42, %s7734_s1 }
 0xd2d   :  { %14650 = vst [vmem:[#allocation69_spill] sm:$0xff] %v11607_v9 }
 0xd2e   :  { %5474 = vrot.lane.b32.xlu0 %v11395_v1, %s7734_s1  ;;  %v11613_v31 = vpop.permute.xlu1 %5570 }
 0xd2f   :  { %14651 = vst [vmem:[#allocation70_spill] sm:$0xff] %v11613_v31 }
 0xd30   :  { %v11615_v24 = vpop.permute.xlu0 %5572  ;;  %5558 = vrot.lane.b32.xlu1 %v11367_v18, %s7736_s2 }
 0xd31   :  { %14652 = vst [vmem:[#allocation43_spill] sm:$0xff] %v11615_v24 }
 0xd32   :  { %5560 = vrot.lane.b32.xlu0 %v11379_v7, %s7736_s2  ;;  %v11621_v46 = vpop.permute.xlu1 %5656 }
 0xd33   :  { %14653 = vst [vmem:[#allocation24_spill] sm:$0xff] %v11621_v46 }
 0xd34   :  { %v11623_v50 = vpop.permute.xlu0 %5658  ;;  %5574 = vrot.lane.b32.xlu1 %v11373_v42, %s7736_s2 }
 0xd35   :  { %14654 = vst [vmem:[#allocation26_spill] sm:$0xff] %v11623_v50 }
 0xd36   :  { %5576 = vrot.lane.b32.xlu0 %v11395_v1, %s7736_s2  ;;  %v11629_v40 = vpop.permute.xlu1 %5672 }
 0xd37   :  { %14655 = vst [vmem:[#allocation45_spill] sm:$0xff] %v11629_v40 }
 0xd38   :  { %v11631_v22 = vpop.permute.xlu0 %5674  ;;  %5660 = vrot.lane.b32.xlu1 %v11367_v18, %s14427_s4 }
 0xd39   :  { %14656 = vst [vmem:[#allocation25_spill] sm:$0xff] %v11631_v22 }
 0xd3a   :  { %5662 = vrot.lane.b32.xlu0 %v11379_v7, %s14427_s4  ;;  %v11637_v32 = vpop.permute.xlu1 %5758 }
 0xd3b   :  { %14657 = vst [vmem:[#allocation42_spill] sm:$0xff] %v11637_v32 }
 0xd3c   :  { %v11642_v5 = vpop.permute.xlu0 %5760  ;;  %5676 = vrot.lane.b32.xlu1 %v11373_v42, %s14427_s4 }
 0xd3d   :  { %14658 = vst [vmem:[#allocation23_spill] sm:$0xff] %v11642_v5  ;;  %v11676_v5 = vrot.slane %v5076_v60, %v7913_v16 }
 0xd3e   :  { %5678 = vrot.lane.b32.xlu0 %v11395_v1, %s14427_s4  ;;  %v5037_v52 = vpop.permute.xlu1 %5036 }
 0xd3f   :  { %v5068_v30 = vsel %vm83_vm1, %v11525_v59, %v5037_v52  ;;  %v5064_v22 = vsel %vm83_vm1, %v5037_v52, %v11533_v48 }
 0xd40   :  { %v5039_v36 = vpop.permute.xlu0 %5038  ;;  %5040 = vrot.lane.b32.xlu1 %v11371_v25, %s7731_s13  ;;  %v5099_v13 = vmul.f32 %v11649_v27, %v5068_v30 }
 0xd41   :  { %v5069_v29 = vsel %vm83_vm1, %v11527_v39, %v5039_v36  ;;  %v5065_v30 = vsel %vm83_vm1, %v5039_v36, %v11535_v11 }
 0xd42   :  { %v5103_v4 = vmul.f32 %v11649_v27, %v5069_v29  ;;  %5042 = vrot.lane.b32.xlu0 %v11393_v23, %s7731_s13  ;;  %v5053_v0 = vpop.permute.xlu1 %5052 }
 0xd43   :  { %v5060_v10 = vsel %vm83_vm1, %v11533_v48, %v5053_v0  ;;  %v5072_v19 = vsel %vm83_vm1, %v5053_v0, %v11525_v59 }
 0xd44   :  { %v5115_v29 = vpack.c.bf16 %v5103_v4, %v5099_v13  ;;  %v5055_v32 = vpop.permute.xlu0 %5054  ;;  %5056 = vrot.lane.b32.xlu1 %v11381_v45, %s7731_s13  ;;  %v5098_v40 = vmul.f32 %v11660_v53, %v5072_v19  ;;  %v5101_v36 = vmul.f32 %v11667_v37, %v5060_v10  ;;  %v5104_v19 = vmul.f32 %v11676_v5, %v5065_v30 }
 0xd45   :  { %v5061_v59 = vsel %vm83_vm1, %v11535_v11, %v5055_v32  ;;  %v5073_v60 = vsel %vm83_vm1, %v5055_v32, %v11527_v39  ;;  %v5100_v10 = vmul.f32 %v11676_v5, %v5064_v22 }
 0xd46   :  { %v5102_v13 = vmul.f32 %v11660_v53, %v5073_v60  ;;  %v5105_v4 = vmul.f32 %v11667_v37, %v5061_v59  ;;  %5058 = vrot.lane.b32.xlu0 %v11405_v21, %s7731_s13  ;;  %v11698_v48 = vpop.permute.xlu1 %5138  ;;  %6000 = vmatprep.subr.bf16.mxu0 %v5115_v29 }
 0xd47   :  { %v5116_v32 = vpack.c.bf16 %v5104_v19, %v5100_v10 }
 0xd48   :  { %v5114_v52 = vpack.c.bf16 %v5102_v13, %v5098_v40  ;;  %v5117_v11 = vpack.c.bf16 %v5105_v4, %v5101_v36  ;;  %v11701_v0 = vpop.permute.xlu0 %5140  ;;  %5142 = vrot.lane.b32.xlu1 %v11371_v25, %s7730_s23 }
 0xd4a   :  { %5144 = vrot.lane.b32.xlu0 %v11393_v23, %s7730_s23  ;;  %v11708_v39 = vpop.permute.xlu1 %5154  ;;  %6001 = vmatpush1.bf16.msra.mxu0 %v5114_v52 }
 0xd4b   :  { %6106 = vmatprep.subr.bf16.mxu1 %v5117_v11 }
 0xd4c   :  { %v11710_v29 = vpop.permute.xlu0 %5156  ;;  %5158 = vrot.lane.b32.xlu1 %v11381_v45, %s7730_s23  ;;  %6107 = vmatpush1.bf16.msra.mxu1 %v5116_v32 }
 0xd4e   :  { %5160 = vrot.lane.b32.xlu0 %v11405_v21, %s7730_s23  ;;  %v11716_v40 = vpop.permute.xlu1 %5240 }
 0xd50   :  { %v11718_v22 = vpop.permute.xlu0 %5242  ;;  %5244 = vrot.lane.b32.xlu1 %v11371_v25, %s7733_s26 }
 0xd52   :  { %5246 = vrot.lane.b32.xlu0 %v11393_v23, %s7733_s26  ;;  %v11724_v30 = vpop.permute.xlu1 %5256 }
 0xd54   :  { %v11726_v59 = vpop.permute.xlu0 %5258  ;;  %5260 = vrot.lane.b32.xlu1 %v11381_v45, %s7733_s26 }
 0xd56   :  { %5262 = vrot.lane.b32.xlu0 %v11405_v21, %s7733_s26  ;;  %v11732_v60 = vpop.permute.xlu1 %5342 }
 0xd58   :  { %v11734_v36 = vpop.permute.xlu0 %5344  ;;  %5346 = vrot.lane.b32.xlu1 %v11371_v25, %s7732_s25 }
 0xd5a   :  { %5348 = vrot.lane.b32.xlu0 %v11393_v23, %s7732_s25  ;;  %v11740_v13 = vpop.permute.xlu1 %5358 }
 0xd5c   :  { %v11742_v4 = vpop.permute.xlu0 %5360  ;;  %5362 = vrot.lane.b32.xlu1 %v11381_v45, %s7732_s25 }
 0xd5d   :  { %14661 = vst [vmem:[#allocation71_spill] sm:$0xff] %v11742_v4 }
 0xd5e   :  { %5364 = vrot.lane.b32.xlu0 %v11405_v21, %s7732_s25  ;;  %v11748_v19 = vpop.permute.xlu1 %5460 }
 0xd5f   :  { %14662 = vst [vmem:[#allocation44_spill] sm:$0xff] %v11748_v19  ;;  %v5943_v19 = vld [vmem:[%s14142_s18 + $0x18] sm:$0xff] }
 0xd60   :  { %v11750_v52 = vpop.permute.xlu0 %5462  ;;  %5774 = vrot.lane.b32.xlu1 %v11315_v41, %s7737_s28 }
 0xd61   :  { %14663 = vst [vmem:[#allocation12_spill] sm:$0xff] %v11750_v52  ;;  %v5941_v52 = vld [vmem:[%s14142_s18 + $0x8] sm:$0xff] }
 0xd62   :  { %5776 = vrot.lane.b32.xlu0 %v11337_v26, %s7737_s28  ;;  %v11756_v11 = vpop.permute.xlu1 %5476 }
 0xd63   :  { %14664 = vst [vmem:[#allocation11_spill] sm:$0xff] %v11756_v11  ;;  %v5940_v11 = vld [vmem:[%s14142_s18] sm:$0xff] }
 0xd64   :  { %v11758_v10 = vpop.permute.xlu0 %5478  ;;  %5464 = vrot.lane.b32.xlu1 %v11371_v25, %s7734_s1 }
 0xd65   :  { %14665 = vst [vmem:[#allocation73_spill] sm:$0xff] %v11758_v10 }
 0xd66   :  { %5784 = vrot.lane.b32.xlu0 %v11347_v56, %s7737_s28  ;;  %v11764_v32 = vpop.permute.xlu1 %5562  ;;  %v5170_v56 = vsel %vm130_vm0, %v11541_v61, %v11698_v48 }
 0xd67   :  { %14666 = vst [vmem:[#allocation74_spill] sm:$0xff] %v11764_v32 }
 0xd68   :  { %v11766_v58 = vpop.permute.xlu0 %5564  ;;  %5480 = vrot.lane.b32.xlu1 %v11381_v45, %s7734_s1 }
 0xd69   :  { %14667 = vst [vmem:[#allocation75_spill] sm:$0xff] %v11766_v58 }
 0xd6a   :  { %5466 = vrot.lane.b32.xlu0 %v11393_v23, %s7734_s1  ;;  %v11772_v55 = vpop.permute.xlu1 %5578 }
 0xd6b   :  { %14668 = vst [vmem:[#allocation14_spill] sm:$0xff] %v11772_v55 }
 0xd6c   :  { %v11774_v50 = vpop.permute.xlu0 %5580  ;;  %5566 = vrot.lane.b32.xlu1 %v11371_v25, %s7736_s2 }
 0xd6d   :  { %14669 = vst [vmem:[#allocation13_spill] sm:$0xff] %v11774_v50 }
 0xd6e   :  { %5482 = vrot.lane.b32.xlu0 %v11405_v21, %s7734_s1  ;;  %v11780_v46 = vpop.permute.xlu1 %5664 }
 0xd6f   :  { %14670 = vst [vmem:[#allocation46_spill] sm:$0xff] %v11780_v46 }
 0xd70   :  { %v11782_v51 = vpop.permute.xlu0 %5666  ;;  %5582 = vrot.lane.b32.xlu1 %v11381_v45, %s7736_s2 }
 0xd71   :  { %14671 = vst [vmem:[#allocation27_spill] sm:$0xff] %v11782_v51  ;;  %v7708_v51 = vld [vmem:[%s14141_s9 + $0x4] ss:$12 sps:$4 sm:$0xff]  }
 0xd72   :  { %5568 = vrot.lane.b32.xlu0 %v11393_v23, %s7736_s2  ;;  %v11788_v32 = vpop.permute.xlu1 %5680  ;;  %6032 = vmatprep.mubr.bf16.mxu0 %v7708_v51 }
 0xd73   :  { %14672 = vst [vmem:[#allocation47_spill] sm:$0xff] %v11788_v32  ;;  %6138 = vmatprep.mubr.bf16.mxu1 %v7708_v51 }
 0xd74   :  { %v11790_v55 = vpop.permute.xlu0 %5682  ;;  %5668 = vrot.lane.b32.xlu1 %v11371_v25, %s14427_s4 }
 0xd75   :  { %14673 = vst [vmem:[#allocation28_spill] sm:$0xff] %v11790_v55 }
 0xd76   :  { %5584 = vrot.lane.b32.xlu0 %v11405_v21, %s7736_s2  ;;  %v11796_v31 = vpop.permute.xlu1 %5766 }
 0xd77   :  { %14674 = vst [vmem:[#allocation8_spill] sm:$0xff] %v11796_v31 }
 0xd78   :  { %v11798_v46 = vpop.permute.xlu0 %5768  ;;  %5684 = vrot.lane.b32.xlu1 %v11381_v45, %s14427_s4 }
 0xd79   :  { %14675 = vst [vmem:[#allocation9_spill] sm:$0xff] %v11798_v46 }
 0xd7a   :  { %5670 = vrot.lane.b32.xlu0 %v11393_v23, %s14427_s4  ;;  %v11807_v55 = vpop.permute.xlu1 %5032 }
 0xd7c   :  { %v11809_v32 = vpop.permute.xlu0 %5034  ;;  %5782 = vrot.lane.b32.xlu1 %v11323_v15, %s7737_s28 }
 0xd7e   :  { %5686 = vrot.lane.b32.xlu0 %v11405_v21, %s14427_s4  ;;  %v11815_v46 = vpop.permute.xlu1 %5048 }
 0xd80   :  { %v11817_v31 = vpop.permute.xlu0 %5050  ;;  %5762 = vrot.lane.b32.xlu1 %v11367_v18, %s7737_s28 }
 0xd82   :  { %5764 = vrot.lane.b32.xlu0 %v11379_v7, %s7737_s28  ;;  %v11823_v50 = vpop.permute.xlu1 %5134 }
 0xd84   :  { %v11825_v51 = vpop.permute.xlu0 %5136  ;;  %5770 = vrot.lane.b32.xlu1 %v11371_v25, %s7737_s28 }
 0xd86   :  { %5780 = vrot.lane.b32.xlu0 %v11395_v1, %s7737_s28  ;;  %v11831_v24 = vpop.permute.xlu1 %5150 }
 0xd88   :  { %v11833_v9 = vpop.permute.xlu0 %5152  ;;  %5778 = vrot.lane.b32.xlu1 %v11373_v42, %s7737_s28 }
 0xd8a   :  { %5772 = vrot.lane.b32.xlu0 %v11393_v23, %s7737_s28  ;;  %v11839_v58 = vpop.permute.xlu1 %5236 }
 0xd8b   :  { %14676 = vst [vmem:[#allocation29_spill] sm:$0xff] %v11839_v58 }
 0xd8c   :  { %v11841_v10 = vpop.permute.xlu0 %5238  ;;  %5786 = vrot.lane.b32.xlu1 %v11381_v45, %s7737_s28 }
 0xd8d   :  { %14677 = vst [vmem:[#allocation62_spill] sm:$0xff] %v11841_v10  ;;  %v5942_v10 = vld [vmem:[%s14142_s18 + $0x10] sm:$0xff] }
 0xd8e   :  { %5788 = vrot.lane.b32.xlu0 %v11405_v21, %s7737_s28  ;;  %v11850_v33 = vpop.permute.xlu1 %5252 }
 0xd8f   :  { %14678 = vst [vmem:[#allocation34_spill] sm:$0xff] %v11850_v33 }
 0xd90   :  { %v11855_v63 = vpop.permute.xlu0 %5254  ;;  %5946 = vperm.xlu1 %7684, %v5940_v11  }
 0xd91   :  { %14679 = vst [vmem:[#allocation33_spill] sm:$0xff] %v11855_v63 }
 0xd92   :  { %5951 = vperm.xlu0 %7683, %v5941_v52   ;;  %v11860_v34 = vpop.permute.xlu1 %5338 }
 0xd93   :  { %14680 = vst [vmem:[#allocation10_spill] sm:$0xff] %v11860_v34  ;;  %v7544_v34 = vld [vmem:[%s14422_s11 + $0x4] sm:$0xf] }
 0xd94   :  { %v11865_v54 = vpop.permute.xlu0 %5340  ;;  %5956 = vperm.xlu1 %7684, %v5942_v10   ;;  %v11916_v18 = vrot.slane %v7544_v34, %v14660_v57  ;;  %v11919_v7 = vrot.slane %v7544_v34, %v7909_v14 }
 0xd95   :  { %14681 = vst [vmem:[#allocation7_spill] sm:$0xff] %v11865_v54 }
 0xd96   :  { %5961 = vperm.xlu0 %7683, %v5943_v19   ;;  %v11867_v33 = vpop.permute.xlu1 %5354  ;;  %v7545_v19 = vld [vmem:[%s14422_s11 + $0x8] sm:$0xf] }
 0xd97   :  { %14682 = vst [vmem:[#allocation30_spill] sm:$0xff] %v11867_v33  ;;  %v11913_v33 = vrot.slane %v7544_v34, %v7913_v16  ;;  %v11934_v42 = vrot.slane %v7545_v19, %v7909_v14 }
 0xd98   :  { %v11869_v58 = vpop.permute.xlu0 %5356 }
 0xd99   :  { %14683 = vst [vmem:[#allocation36_spill] sm:$0xff] %v11869_v58  ;;  %v11899_v58 = vrot.slane %v7544_v34, %v14659_v28 }
 0xd9a   :  { %v11871_v11 = vpop.permute.xlu1 %5456 }
 0xd9b   :  { %14684 = vst [vmem:[#allocation35_spill] sm:$0xff] %v11871_v11  ;;  %v7546_v11 = vld [vmem:[%s14422_s11 + $0xc] sm:$0xf] }
 0xd9c   :  { %v11873_v63 = vpop.permute.xlu0 %5458  ;;  %v11937_v1 = vrot.slane %v7546_v11, %v14659_v28  ;;  %v11942_v45 = vrot.slane %v7546_v11, %v7913_v16  ;;  %v11945_v21 = vrot.slane %v7546_v11, %v14660_v57  ;;  %v11948_v41 = vrot.slane %v7546_v11, %v7909_v14 }
 0xd9d   :  { %14685 = vst [vmem:[#allocation76_spill] sm:$0xff] %v11873_v63  ;;  %v7548_v63 = vld [vmem:[%s14422_s11 + $0x18] sm:$0xf] }
 0xd9e   :  { %v11875_v4 = vpop.permute.xlu1 %5472  ;;  %v11966_v15 = vrot.slane %v7548_v63, %v14660_v57  ;;  %v11975_v43 = vrot.slane %v7548_v63, %v14659_v28  ;;  %v11978_v35 = vrot.slane %v7548_v63, %v7913_v16 }
 0xd9f   :  { %14686 = vst [vmem:[#allocation63_spill] sm:$0xff] %v11875_v4  ;;  %v11931_v4 = vrot.slane %v7545_v19, %v14660_v57 }
 0xda0   :  { %v11877_v52 = vpop.permute.xlu0 %5474  ;;  %14695 = vst [vmem:[#allocation49_spill] sm:$0xff] %v11966_v15  ;;  %14697 = vst [vmem:[#allocation79_spill] sm:$0xff] %v11975_v43  ;;  %v5171_v43 = vsel %vm130_vm0, %v11543_v8, %v11701_v0  ;;  %v5167_v15 = vsel %vm130_vm0, %v11701_v0, %v11551_v49  ;;  %v5163_v0 = vsel %vm130_vm0, %v11551_v49, %v11710_v29 }
 0xda1   :  { %14687 = vst [vmem:[#allocation61_spill] sm:$0xff] %v11877_v52  ;;  %v11928_v52 = vrot.slane %v7545_v19, %v7913_v16  ;;  %14698 = vst [vmem:[#allocation64_spill] sm:$0xff] %v11978_v35  ;;  %v5273_v49 = vsel %vm190_vm3, %v11559_v3, %v11718_v22 }
 0xda2   :  { %v11885_v10 = vpop.permute.xlu1 %5558 }
 0xda3   :  { %14688 = vst [vmem:[#allocation77_spill] sm:$0xff] %v11885_v10  ;;  %v7547_v10 = vld [vmem:[%s14422_s11 + $0x14] sm:$0xf] }
 0xda4   :  { %v11904_v54 = vpop.permute.xlu0 %5560  ;;  %v11951_v26 = vrot.slane %v7547_v10, %v14660_v57  ;;  %v11957_v25 = vrot.slane %v7547_v10, %v14659_v28  ;;  %v11963_v23 = vrot.slane %v7547_v10, %v7909_v14 }
 0xda5   :  { %14689 = vst [vmem:[#allocation60_spill] sm:$0xff] %v11904_v54  ;;  %v11922_v54 = vrot.slane %v7545_v19, %v14659_v28  ;;  %v7549_v19 = vld [vmem:[%s14422_s11 + $0x1c] sm:$0xf] }
 0xda6   :  { %v11939_v34 = vpop.permute.xlu1 %5574  ;;  %14691 = vst [vmem:[#allocation15_spill] sm:$0xff] %v11951_v26  ;;  %14692 = vst [vmem:[#allocation18_spill] sm:$0xff] %v11957_v25  ;;  %v11997_v35 = vrot.slane %v7549_v19, %v14660_v57 }
 0xda7   :  { %14690 = vst [vmem:[#allocation16_spill] sm:$0xff] %v11939_v34  ;;  %v11960_v34 = vrot.slane %v7547_v10, %v7913_v16  ;;  %14694 = vst [vmem:[#allocation48_spill] sm:$0xff] %v11963_v23  ;;  %v11986_v10 = vld [vmem:[%s14422_s11 + $0x20] sm:$0xf]  ;;  %v12013_v23 = vrot.slane %v7549_v19, %v7913_v16 }
 0xda8   :  { %v11968_v11 = vpop.permute.xlu0 %5576  ;;  %14700 = vst [vmem:[#allocation65_spill] sm:$0xff] %v11997_v35  ;;  %v12016_v35 = vrot.slane %v7549_v19, %v7909_v14 }
 0xda9   :  { %14693 = vst [vmem:[#allocation17_spill] sm:$0xff] %v11960_v34  ;;  %14696 = vst [vmem:[#allocation66_spill] sm:$0xff] %v11968_v11  ;;  %v11981_v34 = vrot.slane %v7548_v63, %v7909_v14  ;;  %v5166_v11 = vsel %vm130_vm0, %v11698_v48, %v11549_v47  ;;  %v12000_v63 = vrot.slane %v7549_v19, %v14659_v28 }
 0xdaa   :  { %v5175_v48 = vsel %vm130_vm0, %v11710_v29, %v11543_v8  ;;  %14703 = vst [vmem:[#allocation31_spill] sm:$0xff] %v12013_v23  ;;  %14704 = vst [vmem:[#allocation83_spill] sm:$0xff] %v12016_v35  ;;  %v12031_v8 = vrot.slane %v11986_v10, %v14660_v57  ;;  %v12036_v19 = vmul.f32 %v11913_v33, %v5166_v11 }
 0xdab   :  { %14699 = vst [vmem:[#allocation72_spill] sm:$0xff] %v11981_v34  ;;  %14701 = vst [vmem:[#allocation80_spill] sm:$0xff] %v12000_v63  ;;  %v12002_v34 = vpop.permute.xlu1 %5660  ;;  %v12019_v63 = vmul.f32 %v11899_v58, %v5170_v56  ;;  %v12039_v56 = vmul.f32 %v11899_v58, %v5171_v43  ;;  %v12050_v29 = vmul.f32 %v11913_v33, %v5167_v15 }
 0xdac   :  { %14702 = vst [vmem:[#allocation50_spill] sm:$0xff] %v12002_v34  ;;  %v5174_v34 = vsel %vm130_vm0, %v11708_v39, %v11541_v61  ;;  %14705 = vst [vmem:[#allocation51_spill] sm:$0xff] %v12031_v8  ;;  %v12033_v23 = vpop.permute.xlu0 %5662  ;;  %v5269_v61 = vsel %vm190_vm3, %v11718_v22, %v11567_v20  ;;  %v5162_v11 = vsel %vm130_vm0, %v11549_v47, %v11708_v39 }
 0xdad   :  { %14706 = vst [vmem:[#allocation32_spill] sm:$0xff] %v12033_v23  ;;  %v12057_v43 = vmul.f32 %v11916_v18, %v5175_v48  ;;  %v5277_v57 = vsel %vm190_vm3, %v11726_v59, %v11559_v3  ;;  %v12066_v22 = vmul.f32 %v11916_v18, %v5174_v34  ;;  %v12069_v15 = vmul.f32 %v11919_v7, %v5163_v0 }
 0xdae   :  { %v5268_v47 = vsel %vm190_vm3, %v11716_v40, %v11565_v6  ;;  %v5272_v39 = vsel %vm190_vm3, %v11557_v62, %v11716_v40  ;;  %v12080_v3 = vmul.f32 %v11922_v54, %v5273_v49  ;;  %v12083_v48 = vmul.f32 %v11928_v52, %v5269_v61 }
 0xdaf   :  { %v12063_v8 = vpop.permute.xlu1 %5676  ;;  %v5276_v34 = vsel %vm190_vm3, %v11724_v30, %v11557_v62  ;;  %v5265_v0 = vsel %vm190_vm3, %v11567_v20, %v11726_v59  ;;  %v12098_v49 = vmul.f32 %v11919_v7, %v5162_v11  ;;  %v5264_v61 = vsel %vm190_vm3, %v11565_v6, %v11724_v30 }
 0xdb0   :  { %14707 = vst [vmem:[#allocation78_spill] sm:$0xff] %v12063_v8  ;;  %14708 = vst [vmem:[#allocation85_spill] sm:$0xff] %v12083_v48  ;;  %v12093_v23 = vpop.permute.xlu0 %5678  ;;  %v12105_v62 = vmul.f32 %v11931_v4, %v5277_v57  ;;  %v12112_v59 = vmul.f32 %v11922_v54, %v5272_v39  ;;  %v12115_v11 = vmul.f32 %v11928_v52, %v5268_v47 }
 0xdb1   :  { %14709 = vst [vmem:[#allocation82_spill] sm:$0xff] %v12093_v23  ;;  %v12120_v6 = vmul.f32 %v11931_v4, %v5276_v34  ;;  %v12123_v57 = vmul.f32 %v11934_v42, %v5265_v0  ;;  %v12133_v8 = vmul.f32 %v11934_v42, %v5264_v61  ;;  %v5374_v34 = vsel %vm238_vm2, %v11573_v38, %v11732_v60 }
 0xdb2   :  { %14710 = vst [vmem:[#allocation87_spill] sm:$0xff] %v12115_v11  ;;  %v5370_v39 = vsel %vm238_vm2, %v11732_v60, %v11581_v44  ;;  %v12150_v61 = vrot.slane %v11986_v10, %v14659_v28  ;;  %v5375_v23 = vsel %vm238_vm2, %v11575_v17, %v11734_v36  ;;  %v12164_v28 = vmul.f32 %v11937_v1, %v5374_v34 }
 0xdb3   :  { %v5041_v40 = vpop.permute.xlu1 %5040  ;;  %v12173_v48 = vmul.f32 %v11942_v45, %v5370_v39  ;;  %v12183_v11 = vmul.f32 %v11937_v1, %v5375_v23 }
 0xdb4   :  { %v5070_v30 = vsel %vm83_vm1, %v11807_v55, %v5041_v40  ;;  %v5043_v0 = vpop.permute.xlu0 %5042  ;;  %14711 = vst [vmem:[#allocation81_spill] sm:$0xff] %v12150_v61 }
 0xdb5   :  { %v5071_v47 = vsel %vm83_vm1, %v11809_v32, %v5043_v0  ;;  %v5107_v20 = vmul.f32 %v11649_v27, %v5070_v30  ;;  %v5067_v35 = vsel %vm83_vm1, %v5043_v0, %v11817_v31 }
 0xdb6   :  { %v5111_v60 = vmul.f32 %v11649_v27, %v5071_v47  ;;  %v5371_v27 = vsel %vm238_vm2, %v11734_v36, %v11583_v2  ;;  %v5066_v47 = vsel %vm83_vm1, %v5041_v40, %v11815_v46  ;;  %v5112_v26 = vmul.f32 %v11676_v5, %v5067_v35 }
 0xdb7   :  { %v5057_v25 = vpop.permute.xlu1 %5056  ;;  %v12197_v35 = vmul.f32 %v11942_v45, %v5371_v27  ;;  %v5378_v27 = vsel %vm238_vm2, %v11740_v13, %v11573_v38 }
 0xdb8   :  { %v5062_v61 = vsel %vm83_vm1, %v11815_v46, %v5057_v25  ;;  %v5074_v30 = vsel %vm83_vm1, %v5057_v25, %v11807_v55  ;;  %v5119_v34 = vpack.c.bf16 %v5111_v60, %v5107_v20  ;;  %v5059_v0 = vpop.permute.xlu0 %5058  ;;  %v5108_v20 = vmul.f32 %v11676_v5, %v5066_v47 }
 0xdb9   :  { %v5063_v55 = vsel %vm83_vm1, %v11817_v31, %v5059_v0  ;;  %v5075_v25 = vsel %vm83_vm1, %v5059_v0, %v11809_v32  ;;  %v5106_v36 = vmul.f32 %v11660_v53, %v5074_v30  ;;  %v5109_v39 = vmul.f32 %v11667_v37, %v5062_v61 }
 0xdba   :  { %v5110_v46 = vmul.f32 %v11660_v53, %v5075_v25  ;;  %v5113_v40 = vmul.f32 %v11667_v37, %v5063_v55  ;;  %6002 = vmatprep.subr.bf16.mxu0 %v5119_v34  ;;  %v12205_v32 = vrot.slane %v11986_v10, %v7913_v16  ;;  %v5366_v53 = vsel %vm238_vm2, %v11581_v44, %v11740_v13 }
 0xdbb   :  { %v5143_v23 = vpop.permute.xlu1 %5142  ;;  %v12213_v30 = vrot.slane %v11986_v10, %v7909_v14  ;;  %v5421_v5 = vpack.c.bf16 %v12183_v11, %v12164_v28  ;;  %v5120_v47 = vpack.c.bf16 %v5112_v26, %v5108_v20  ;;  %v5422_v25 = vpack.c.bf16 %v12197_v35, %v12173_v48 }
 0xdbc   :  { %v5172_v31 = vsel %vm130_vm0, %v11823_v50, %v5143_v23  ;;  %v5118_v37 = vpack.c.bf16 %v5110_v46, %v5106_v36  ;;  %v5121_v61 = vpack.c.bf16 %v5113_v40, %v5109_v39  ;;  %v5145_v60 = vpop.permute.xlu0 %5144  ;;  %v14712_v13 = vpack.c.bf16 %v12039_v56, %v12019_v63  ;;  %v14713_v36 = vld [vmem:[#allocation71_spill] sm:$0xff] }
 0xdbd   :  { %v5173_v44 = vsel %vm130_vm0, %v11825_v51, %v5145_v60  ;;  %v5209_v34 = vmul.f32 %v11899_v58, %v5172_v31  ;;  %v5169_v10 = vsel %vm130_vm0, %v5145_v60, %v11833_v9  ;;  %v5379_v39 = vsel %vm238_vm2, %v14713_v36, %v11575_v17  ;;  %v14716_v60 = vld [vmem:[#allocation29_spill] sm:$0xff] }
 0xdbe   :  { %v5213_v0 = vmul.f32 %v11899_v58, %v5173_v44  ;;  %6003 = vmatpush1.bf16.msra.mxu0 %v5118_v37  ;;  %6108 = vmatprep.subr.bf16.mxu1 %v5121_v61  ;;  %v12241_v58 = vmul.f32 %v11945_v21, %v5378_v27  ;;  %v5168_v46 = vsel %vm130_vm0, %v5143_v23, %v11831_v24  ;;  %v14718_v44 = vld [vmem:[#allocation59_spill] sm:$0xff] }
 0xdbf   :  { %v5159_v55 = vpop.permute.xlu1 %5158  ;;  %6004 = vmatprep.subr.bf16.mxu0 %v14712_v13  ;;  %6109 = vmatpush1.bf16.msra.mxu1 %v5120_v47  ;;  %v5367_v63 = vsel %vm238_vm2, %v11583_v2, %v14713_v36  ;;  %v5214_v56 = vmul.f32 %v11913_v33, %v5169_v10  ;;  %v14715_v2 = vpack.c.bf16 %v12057_v43, %v12066_v22  ;;  %v14720_v10 = vld [vmem:[#allocation40_spill] sm:$0xff] }
 0xdc0   :  { %v5164_v26 = vsel %vm130_vm0, %v11831_v24, %v5159_v55  ;;  %v5176_v38 = vsel %vm130_vm0, %v5159_v55, %v11823_v50  ;;  %v5221_v40 = vpack.c.bf16 %v5213_v0, %v5209_v34  ;;  %v5161_v20 = vpop.permute.xlu0 %5160  ;;  %v14714_v50 = vpack.c.bf16 %v12069_v15, %v12098_v49  ;;  %v14721_v0 = vld [vmem:[#allocation62_spill] sm:$0xff] }
 0xdc1   :  { %v5165_v17 = vsel %vm130_vm0, %v11833_v9, %v5161_v20  ;;  %v5177_v24 = vsel %vm130_vm0, %v5161_v20, %v11825_v51  ;;  %v5208_v23 = vmul.f32 %v11916_v18, %v5176_v38  ;;  %v5211_v15 = vmul.f32 %v11919_v7, %v5164_v26  ;;  %v14722_v26 = vld [vmem:[#allocation33_spill] sm:$0xff] }
 0xdc2   :  { %6110 = vmatprep.subr.bf16.mxu1 %v14714_v50  ;;  %v5212_v49 = vmul.f32 %v11916_v18, %v5177_v24  ;;  %v5215_v31 = vmul.f32 %v11919_v7, %v5165_v17  ;;  %6005 = vmatpush1.bf16.msra.mxu0 %v14715_v2  ;;  %v12272_v61 = vmul.f32 %v11945_v21, %v5379_v39 }
 0xdc3   :  { %v5245_v37 = vpop.permute.xlu1 %5244  ;;  %v5210_v9 = vmul.f32 %v11913_v33, %v5168_v46  ;;  %6006 = vmatprep.subr.bf16.mxu0 %v5221_v40  ;;  %v14717_v18 = vpack.c.bf16 %v12050_v29, %v12036_v19  ;;  %v12282_v7 = vmul.f32 %v11948_v41, %v5366_v53  ;;  %v12285_v43 = vmul.f32 %v11948_v41, %v5367_v63  ;;  %v14719_v33 = vld [vmem:[#allocation44_spill] sm:$0xff]  ;;  %v14723_v46 = vld [vmem:[#allocation34_spill] sm:$0xff] }
 0xdc4   :  { %v5274_v51 = vsel %vm190_vm3, %v14716_v60, %v5245_v37  ;;  %v5220_v22 = vpack.c.bf16 %v5212_v49, %v5208_v23  ;;  %v5223_v27 = vpack.c.bf16 %v5215_v31, %v5211_v15  ;;  %v5247_v47 = vpop.permute.xlu0 %5246  ;;  %v5488_v34 = vsel %vm306_vm4, %v14719_v33, %v14718_v44  ;;  %v14725_v63 = vld [vmem:[#allocation58_spill] sm:$0xff] }
 0xdc5   :  { %6111 = vmatpush1.bf16.msra.mxu1 %v14717_v18  ;;  %v5492_v19 = vsel %vm306_vm4, %v14720_v10, %v14719_v33  ;;  %v5222_v29 = vpack.c.bf16 %v5214_v56, %v5210_v9  ;;  %v5275_v53 = vsel %vm190_vm3, %v14721_v0, %v5247_v47  ;;  %v5311_v55 = vmul.f32 %v11922_v54, %v5274_v51  ;;  %v14726_v56 = vld [vmem:[#allocation12_spill] sm:$0xff]  ;;  %v14730_v51 = vld [vmem:[#allocation15_spill] sm:$0xff] }
 0xdc6   :  { %v5271_v38 = vsel %vm190_vm3, %v5247_v47, %v14722_v26  ;;  %v5315_v13 = vmul.f32 %v11922_v54, %v5275_v53  ;;  %6007 = vmatpush1.bf16.msra.mxu0 %v5220_v22  ;;  %6112 = vmatprep.subr.bf16.mxu1 %v5223_v27  ;;  %v5420_v39 = vpack.c.bf16 %v12272_v61, %v12241_v58  ;;  %v14732_v27 = vld [vmem:[#allocation85_spill] sm:$0xff]  ;;  %v14733_v47 = vld [vmem:[#allocation87_spill] sm:$0xff] }
 0xdc7   :  { %v5261_v36 = vpop.permute.xlu1 %5260  ;;  %v14724_v50 = vpack.c.bf16 %v12080_v3, %v12112_v59  ;;  %v5423_v54 = vpack.c.bf16 %v12285_v43, %v12282_v7  ;;  %v5489_v58 = vsel %vm306_vm4, %v14726_v56, %v14725_v63  ;;  %v5270_v17 = vsel %vm190_vm3, %v5245_v37, %v14723_v46  ;;  %v14728_v3 = vld [vmem:[#allocation57_spill] sm:$0xff]  ;;  %v14731_v43 = vld [vmem:[#allocation10_spill] sm:$0xff] }
 0xdc8   :  { %v5266_v40 = vsel %vm190_vm3, %v14723_v46, %v5261_v36  ;;  %v5278_v20 = vsel %vm190_vm3, %v5261_v36, %v14716_v60  ;;  %v5323_v24 = vpack.c.bf16 %v5315_v13, %v5311_v55  ;;  %v5263_v23 = vpop.permute.xlu0 %5262  ;;  %v14727_v15 = vpack.c.bf16 %v12123_v57, %v12133_v8  ;;  %v14738_v13 = vld [vmem:[#allocation36_spill] sm:$0xff] }
 0xdc9   :  { %6008 = vmatprep.subr.bf16.mxu0 %v14724_v50  ;;  %6113 = vmatpush1.bf16.msra.mxu1 %v5222_v29  ;;  %v5493_v59 = vsel %vm306_vm4, %v14728_v3, %v14726_v56  ;;  %v5316_v49 = vmul.f32 %v11928_v52, %v5271_v38  ;;  %v5267_v31 = vsel %vm190_vm3, %v14722_v26, %v5263_v23  ;;  %v14737_v26 = vld [vmem:[#allocation7_spill] sm:$0xff] }
 0xdca   :  { %6114 = vmatprep.subr.bf16.mxu1 %v14727_v15  ;;  %v5279_v37 = vsel %vm190_vm3, %v5263_v23, %v14721_v0  ;;  %v5310_v2 = vmul.f32 %v11931_v4, %v5278_v20  ;;  %v5313_v8 = vmul.f32 %v11934_v42, %v5266_v40  ;;  %v5317_v61 = vmul.f32 %v11934_v42, %v5267_v31  ;;  %v14735_v42 = vld [vmem:[#allocation18_spill] sm:$0xff]  ;;  %v14736_v0 = vld [vmem:[#allocation11_spill] sm:$0xff] }
 0xdcb   :  { %v5314_v57 = vmul.f32 %v11931_v4, %v5279_v37  ;;  %v5347_v9 = vpop.permute.xlu1 %5346  ;;  %v14729_v60 = vpack.c.bf16 %v12105_v62, %v12120_v6  ;;  %v12345_v18 = vmul.f32 %v14730_v51, %v5492_v19  ;;  %v5312_v7 = vmul.f32 %v11928_v52, %v5270_v17  ;;  %v14739_v20 = vld [vmem:[#allocation30_spill] sm:$0xff] }
 0xdcc   :  { %v5376_v22 = vsel %vm238_vm2, %v14731_v43, %v5347_v9  ;;  %v14734_v4 = vpack.c.bf16 %v14732_v27, %v14733_v47  ;;  %v12355_v33 = vmul.f32 %v14735_v42, %v5488_v34  ;;  %v12358_v62 = vmul.f32 %v14730_v51, %v5493_v59  ;;  %v5349_v29 = vpop.permute.xlu0 %5348  ;;  %v14747_v47 = vld [vmem:[#allocation70_spill] sm:$0xff] }
 0xdcd   :  { %6009 = vmatpush1.bf16.msra.mxu0 %v14729_v60  ;;  %v5322_v6 = vpack.c.bf16 %v5314_v57, %v5310_v2  ;;  %v5325_v19 = vpack.c.bf16 %v5317_v61, %v5313_v8  ;;  %v12361_v52 = vmul.f32 %v14735_v42, %v5489_v58  ;;  %v5484_v53 = vsel %vm306_vm4, %v14718_v44, %v14736_v0  ;;  %v14740_v58 = vld [vmem:[#allocation73_spill] sm:$0xff]  ;;  %v14742_v57 = vld [vmem:[#allocation48_spill] sm:$0xff] }
 0xdce   :  { %6010 = vmatprep.subr.bf16.mxu0 %v5323_v24  ;;  %6115 = vmatpush1.bf16.msra.mxu1 %v14734_v4  ;;  %v5324_v55 = vpack.c.bf16 %v5316_v49, %v5312_v7  ;;  %v5377_v34 = vsel %vm238_vm2, %v14737_v26, %v5349_v29  ;;  %v5413_v38 = vmul.f32 %v11937_v1, %v5376_v22  ;;  %v14744_v61 = vld [vmem:[#allocation69_spill] sm:$0xff]  ;;  %v14748_v4 = vld [vmem:[#allocation74_spill] sm:$0xff] }
 0xdcf   :  { %v5373_v36 = vsel %vm238_vm2, %v5349_v29, %v14738_v13  ;;  %v5417_v46 = vmul.f32 %v11937_v1, %v5377_v34  ;;  %v5363_v40 = vpop.permute.xlu1 %5362  ;;  %6116 = vmatprep.subr.bf16.mxu1 %v5325_v19  ;;  %v5496_v44 = vsel %vm306_vm4, %v14736_v0, %v14720_v10  ;;  %v5538_v1 = vpack.c.bf16 %v12358_v62, %v12345_v18  ;;  %v14746_v22 = vld [vmem:[#allocation13_spill] sm:$0xff] }
 0xdd0   :  { %v5368_v50 = vsel %vm238_vm2, %v14739_v20, %v5363_v40  ;;  %v5380_v56 = vsel %vm238_vm2, %v5363_v40, %v14731_v43  ;;  %v5485_v10 = vsel %vm306_vm4, %v14725_v63, %v14740_v58  ;;  %v5372_v17 = vsel %vm238_vm2, %v5347_v9, %v14739_v20  ;;  %v5365_v23 = vpop.permute.xlu0 %5364  ;;  %v14745_v43 = vld [vmem:[#allocation43_spill] sm:$0xff]  ;;  %v14749_v19 = vld [vmem:[#allocation41_spill] sm:$0xff] }
 0xdd1   :  { %6011 = vmatpush1.bf16.msra.mxu0 %v5322_v6  ;;  %v5425_v24 = vpack.c.bf16 %v5417_v46, %v5413_v38  ;;  %v5497_v28 = vsel %vm306_vm4, %v14740_v58, %v14728_v3  ;;  %v5418_v11 = vmul.f32 %v11942_v45, %v5373_v36  ;;  %v5381_v63 = vsel %vm238_vm2, %v5365_v23, %v14737_v26  ;;  %v14741_v3 = vld [vmem:[#allocation17_spill] sm:$0xff]  ;;  %v14751_v26 = vld [vmem:[#allocation14_spill] sm:$0xff]  ;;  %v14753_v36 = vld [vmem:[#allocation52_spill] sm:$0xff] }
 0xdd2   :  { %6012 = vmatprep.subr.bf16.mxu0 %v5421_v5  ;;  %6117 = vmatpush1.bf16.msra.mxu1 %v5324_v55  ;;  %v5369_v5 = vsel %vm238_vm2, %v14738_v13, %v5365_v23  ;;  %v5412_v15 = vmul.f32 %v11945_v21, %v5380_v56  ;;  %v5415_v59 = vmul.f32 %v11948_v41, %v5368_v50  ;;  %v14752_v13 = vld [vmem:[#allocation53_spill] sm:$0xff]  ;;  %v14756_v50 = vld [vmem:[#allocation64_spill] sm:$0xff]  ;;  %v14759_v23 = vld [vmem:[#allocation19_spill] sm:$0xff] }
 0xdd3   :  { %6118 = vmatprep.subr.bf16.mxu1 %v5423_v54  ;;  %v5416_v54 = vmul.f32 %v11945_v21, %v5381_v63  ;;  %v5419_v49 = vmul.f32 %v11948_v41, %v5369_v5  ;;  %v12412_v31 = vpop.permute.xlu1 %5774  ;;  %v12415_v37 = vmul.f32 %v14741_v3, %v5484_v53  ;;  %v12418_v2 = vmul.f32 %v14741_v3, %v5485_v10  ;;  %v14743_v41 = vld [vmem:[#allocation75_spill] sm:$0xff]  ;;  %v14750_v53 = vld [vmem:[#allocation49_spill] sm:$0xff]  ;;  %v14757_v58 = vld [vmem:[#allocation72_spill] sm:$0xff] }
 0xdd4   :  { %v5414_v8 = vmul.f32 %v11942_v45, %v5372_v17  ;;  %v12425_v21 = vmul.f32 %v14742_v57, %v5497_v28  ;;  %v12431_v7 = vpop.permute.xlu0 %5776  ;;  %v5591_v45 = vsel %vm366_vm6, %v14743_v41, %v14745_v43  ;;  %v5587_v48 = vsel %vm366_vm6, %v14745_v43, %v14746_v22 }
 0xdd5   :  { %6013 = vmatpush1.bf16.msra.mxu0 %v5420_v39  ;;  %v5595_v39 = vsel %vm366_vm6, %v14744_v61, %v14743_v41  ;;  %v5424_v9 = vpack.c.bf16 %v5416_v54, %v5412_v15  ;;  %v5427_v60 = vpack.c.bf16 %v5419_v49, %v5415_v59  ;;  %v5599_v35 = vsel %vm366_vm6, %v14746_v22, %v14744_v61  ;;  %v14761_v59 = vld [vmem:[#allocation46_spill] sm:$0xff]  ;;  %v14762_v54 = vld [vmem:[#allocation24_spill] sm:$0xff]  ;;  %v14766_v61 = vld [vmem:[#allocation37_spill] sm:$0xff] }
 0xdd6   :  { %6014 = vmatprep.subr.bf16.mxu0 %v5425_v24  ;;  %6119 = vmatpush1.bf16.msra.mxu1 %v5422_v25  ;;  %v5426_v25 = vpack.c.bf16 %v5418_v11, %v5414_v8  ;;  %v5525_v27 = vmul.f32 %v14742_v57, %v5496_v44  ;;  %v5590_v6 = vsel %vm366_vm6, %v14748_v4, %v14747_v47  ;;  %v14755_v44 = vld [vmem:[#allocation79_spill] sm:$0xff]  ;;  %v14758_v24 = vld [vmem:[#allocation54_spill] sm:$0xff] }
 0xdd7   :  { %v5594_v29 = vsel %vm366_vm6, %v14749_v19, %v14748_v4  ;;  %v5465_v0 = vpop.permute.xlu1 %5464  ;;  %6120 = vmatprep.subr.bf16.mxu1 %v5427_v60  ;;  %v12455_v55 = vmul.f32 %v14750_v53, %v5595_v39  ;;  %v5586_v34 = vsel %vm366_vm6, %v14747_v47, %v14751_v26  ;;  %v5598_v38 = vsel %vm366_vm6, %v14751_v26, %v14749_v19  ;;  %v14765_v41 = vld [vmem:[#allocation38_spill] sm:$0xff]  ;;  %v14768_v60 = vld [vmem:[#allocation45_spill] sm:$0xff] }
 0xdd8   :  { %v14754_v46 = vpack.c.bf16 %v14752_v13, %v14753_v36  ;;  %v5539_v40 = vpack.c.bf16 %v12361_v52, %v12355_v33  ;;  %v12471_v20 = vmul.f32 %v14755_v44, %v5591_v45  ;;  %v12474_v56 = vmul.f32 %v14756_v50, %v5587_v48  ;;  %v12479_v17 = vpop.permute.xlu0 %5784  ;;  %v14769_v45 = vld [vmem:[#allocation63_spill] sm:$0xff]  ;;  %v14770_v48 = vld [vmem:[#allocation84_spill] sm:$0xff]  ;;  %v14774_v47 = vld [vmem:[#allocation21_spill] sm:$0xff] }
 0xdd9   :  { %6015 = vmatpush1.bf16.msra.mxu0 %v5424_v9  ;;  %v12477_v10 = vmul.f32 %v14757_v58, %v5599_v35  ;;  %v14760_v28 = vpack.c.bf16 %v14758_v24, %v14759_v23  ;;  %v5540_v11 = vpack.c.bf16 %v12418_v2, %v12415_v37  ;;  %v5541_v33 = vpack.c.bf16 %v12425_v21, %v5525_v27  ;;  %v14763_v37 = vld [vmem:[#allocation27_spill] sm:$0xff]  ;;  %v14764_v2 = vld [vmem:[#allocation26_spill] sm:$0xff]  ;;  %v14776_v26 = vld [vmem:[#allocation25_spill] sm:$0xff] }
 0xdda   :  { %6016 = vmatprep.subr.bf16.mxu0 %v14754_v46  ;;  %6121 = vmatpush1.bf16.msra.mxu1 %v5426_v25  ;;  %v12488_v52 = vmul.f32 %v14750_v53, %v5594_v29  ;;  %v12491_v5 = vmul.f32 %v14755_v44, %v5590_v6  ;;  %v12494_v63 = vmul.f32 %v14756_v50, %v5586_v34  ;;  %v14771_v35 = vld [vmem:[#allocation39_spill] sm:$0xff]  ;;  %v14777_v13 = vld [vmem:[#allocation68_spill] sm:$0xff]  ;;  %v14780_v24 = vld [vmem:[#allocation65_spill] sm:$0xff] }
 0xddb   :  { %6122 = vmatprep.subr.bf16.mxu1 %v14760_v28  ;;  %v12497_v15 = vmul.f32 %v14757_v58, %v5598_v38  ;;  %v5696_v49 = vsel %vm414_vm5, %v14762_v54, %v14761_v59  ;;  %v5697_v8 = vsel %vm414_vm5, %v14764_v2, %v14763_v37  ;;  %v5481_v21 = vpop.permute.xlu1 %5480  ;;  %v14767_v39 = vpack.c.bf16 %v14765_v41, %v14766_v61  ;;  %v14773_v27 = vld [vmem:[#allocation55_spill] sm:$0xff]  ;;  %v14778_v36 = vld [vmem:[#allocation56_spill] sm:$0xff]  ;;  %v14781_v28 = vld [vmem:[#allocation61_spill] sm:$0xff] }
 0xddc   :  { %v5640_v9 = vpack.c.bf16 %v12455_v55, %v12488_v52  ;;  %v5692_v43 = vsel %vm414_vm5, %v14761_v59, %v14768_v60  ;;  %v5490_v22 = vsel %vm306_vm4, %v5465_v0, %v14769_v45  ;;  %v14772_v25 = vpack.c.bf16 %v14770_v48, %v14771_v35  ;;  %v5467_v38 = vpop.permute.xlu0 %5466  ;;  %v14782_v59 = vld [vmem:[#allocation76_spill] sm:$0xff] }
 0xddd   :  { %6017 = vmatpush1.bf16.msra.mxu0 %v14767_v39  ;;  %v14775_v4 = vpack.c.bf16 %v14773_v27, %v14774_v47  ;;  %v5641_v6 = vpack.c.bf16 %v12471_v20, %v12491_v5  ;;  %v5642_v19 = vpack.c.bf16 %v12474_v56, %v12494_v63  ;;  %v5643_v29 = vpack.c.bf16 %v12477_v10, %v12497_v15  ;;  %v14784_v39 = vld [vmem:[#allocation35_spill] sm:$0xff]  ;;  %v14786_v27 = vld [vmem:[#allocation22_spill] sm:$0xff]  ;;  %v14806_v63 = vld [vmem:[#allocation32_spill] sm:$0xff] }
 0xdde   :  { %6018 = vmatprep.subr.bf16.mxu0 %v14772_v25  ;;  %v5693_v34 = vsel %vm414_vm5, %v14763_v37, %v14776_v26  ;;  %v14779_v46 = vpack.c.bf16 %v14777_v13, %v14778_v36  ;;  %v12539_v23 = vmul.f32 %v14780_v24, %v5696_v49  ;;  %v12542_v20 = vmul.f32 %v14780_v24, %v5697_v8  ;;  %v14783_v37 = vld [vmem:[#allocation80_spill] sm:$0xff]  ;;  %v14785_v25 = vld [vmem:[#allocation67_spill] sm:$0xff] }
 0xddf   :  { %6123 = vmatpush1.bf16.msra.mxu1 %v14775_v4  ;;  %v5491_v5 = vsel %vm306_vm4, %v5467_v38, %v14781_v28  ;;  %v5495_v41 = vsel %vm306_vm4, %v14782_v59, %v5467_v38  ;;  %v12551_v61 = vmul.f32 %v14783_v37, %v5692_v43  ;;  %v5494_v48 = vsel %vm306_vm4, %v14784_v39, %v5465_v0  ;;  %v5567_v35 = vpop.permute.xlu1 %5566  ;;  %v14789_v38 = vld [vmem:[#allocation20_spill] sm:$0xff]  ;;  %v14791_v13 = vld [vmem:[#allocation47_spill] sm:$0xff] }
 0xde0   :  { %6124 = vmatprep.subr.bf16.mxu1 %v14779_v46  ;;  %v5531_v49 = vmul.f32 %v14735_v42, %v5490_v22  ;;  %v5535_v8 = vmul.f32 %v14735_v42, %v5491_v5  ;;  %v14787_v47 = vpack.c.bf16 %v14785_v25, %v14786_v27  ;;  %v12562_v4 = vmul.f32 %v14783_v37, %v5693_v34  ;;  %v14788_v22 = vld [vmem:[#allocation86_spill] sm:$0xff]  ;;  %v5483_v5 = vpop.permute.xlu0 %5482  ;;  %v14794_v27 = vld [vmem:[#allocation31_spill] sm:$0xff] }
 0xde1   :  { %v5486_v43 = vsel %vm306_vm4, %v14769_v45, %v5481_v21  ;;  %v5498_v0 = vsel %vm306_vm4, %v5481_v21, %v14784_v39  ;;  %v14790_v42 = vpack.c.bf16 %v14788_v22, %v14789_v38  ;;  %v5688_v36 = vsel %vm414_vm5, %v14768_v60, %v14791_v13  ;;  %v14797_v22 = vld [vmem:[#allocation60_spill] sm:$0xff] }
 0xde2   :  { %6019 = vmatpush1.bf16.msra.mxu0 %v14787_v47  ;;  %v5700_v34 = vsel %vm414_vm5, %v14791_v13, %v14762_v54  ;;  %v5534_v45 = vmul.f32 %v14730_v51, %v5495_v41  ;;  %v5543_v46 = vpack.c.bf16 %v5535_v8, %v5531_v49  ;;  %v5530_v21 = vmul.f32 %v14730_v51, %v5494_v48  ;;  %v14793_v48 = vld [vmem:[#allocation16_spill] sm:$0xff] }
 0xde3   :  { %6020 = vmatprep.subr.bf16.mxu0 %v5539_v40  ;;  %6125 = vmatpush1.bf16.msra.mxu1 %v14790_v42  ;;  %v5742_v40 = vpack.c.bf16 %v12542_v20, %v12539_v23  ;;  %v5487_v39 = vsel %vm306_vm4, %v14781_v28, %v5483_v5  ;;  %v5499_v60 = vsel %vm306_vm4, %v5483_v5, %v14782_v59  ;;  %v5583_v8 = vpop.permute.xlu1 %5582  ;;  %v14792_v28 = vld [vmem:[#allocation28_spill] sm:$0xff] }
 0xde4   :  { %6126 = vmatprep.subr.bf16.mxu1 %v5541_v33  ;;  %v5532_v54 = vmul.f32 %v14741_v3, %v5486_v43  ;;  %v5533_v41 = vmul.f32 %v14742_v57, %v5498_v0  ;;  %v5536_v49 = vmul.f32 %v14741_v3, %v5487_v39  ;;  %v5537_v33 = vmul.f32 %v14742_v57, %v5499_v60  ;;  %v5569_v57 = vpop.permute.xlu0 %5568  ;;  %v14795_v43 = vld [vmem:[#allocation77_spill] sm:$0xff]  ;;  %v14796_v0 = vld [vmem:[#allocation66_spill] sm:$0xff]  ;;  %v14799_v39 = vld [vmem:[#allocation8_spill] sm:$0xff] }
 0xde5   :  { %v5743_v51 = vpack.c.bf16 %v12562_v4, %v12551_v61  ;;  %v5689_v59 = vsel %vm414_vm5, %v14776_v26, %v14792_v28  ;;  %v5592_v25 = vsel %vm366_vm6, %v5567_v35, %v14793_v48  ;;  %v5701_v18 = vsel %vm414_vm5, %v14792_v28, %v14764_v2  ;;  %v14800_v60 = vld [vmem:[#allocation42_spill] sm:$0xff]  ;;  %v7706_v20 = vld [vmem:[%s14141_s9] ss:$12 sps:$4 sm:$0xff]  }
 0xde6   :  { %6021 = vmatpush1.bf16.msra.mxu0 %v5538_v1  ;;  %v5542_v62 = vpack.c.bf16 %v5534_v45, %v5530_v21  ;;  %v5544_v1 = vpack.c.bf16 %v5536_v49, %v5532_v54  ;;  %v5545_v3 = vpack.c.bf16 %v5537_v33, %v5533_v41  ;;  %v12612_v47 = vmul.f32 %v14794_v27, %v5688_v36  ;;  %v14798_v45 = vld [vmem:[#allocation83_spill] sm:$0xff] }
 0xde7   :  { %6022 = vmatprep.subr.bf16.mxu0 %v5543_v46  ;;  %6127 = vmatpush1.bf16.msra.mxu1 %v5540_v11  ;;  %v5596_v26 = vsel %vm366_vm6, %v14795_v43, %v5567_v35  ;;  %v5593_v11 = vsel %vm366_vm6, %v5569_v57, %v14796_v0  ;;  %v5597_v38 = vsel %vm366_vm6, %v14797_v22, %v5569_v57  ;;  %v5669_v36 = vpop.permute.xlu1 %5668 }
 0xde8   :  { %v5633_v2 = vmul.f32 %v14755_v44, %v5592_v25  ;;  %v5588_v42 = vsel %vm366_vm6, %v14793_v48, %v5583_v8  ;;  %v5637_v13 = vmul.f32 %v14755_v44, %v5593_v11  ;;  %6128 = vmatprep.subr.bf16.mxu1 %v5545_v3  ;;  %v12629_v35 = vmul.f32 %v14794_v27, %v5689_v59  ;;  %v5585_v49 = vpop.permute.xlu0 %5584  ;;  %v14801_v59 = vld [vmem:[#allocation78_spill] sm:$0xff] }
 0xde9   :  { %v5733_v46 = vmul.f32 %v14798_v45, %v5701_v18  ;;  %v5600_v5 = vsel %vm366_vm6, %v5583_v8, %v14795_v43  ;;  %v5729_v21 = vmul.f32 %v14798_v45, %v5700_v34  ;;  %v12640_v44 = vsel %vm474_vm7, %v14800_v60, %v14799_v39  ;;  %v14802_v18 = vld [vmem:[#allocation9_spill] sm:$0xff]  ;;  %v14804_v3 = vld [vmem:[#allocation50_spill] sm:$0xff] }
 0xdea   :  { %6023 = vmatpush1.bf16.msra.mxu0 %v5542_v62  ;;  %v5636_v54 = vmul.f32 %v14750_v53, %v5597_v38  ;;  %v5645_v41 = vpack.c.bf16 %v5637_v13, %v5633_v2  ;;  %v5632_v33 = vmul.f32 %v14750_v53, %v5596_v26  ;;  %v5589_v34 = vsel %vm366_vm6, %v14796_v0, %v5585_v49  ;;  %v14803_v62 = vld [vmem:[#allocation23_spill] sm:$0xff]  ;;  %v14805_v43 = vld [vmem:[#allocation82_spill] sm:$0xff]  ;;  %v14807_v2 = vld [vmem:[#allocation81_spill] sm:$0xff] }
 0xdeb   :  { %6024 = vmatprep.subr.bf16.mxu0 %v5641_v6  ;;  %6129 = vmatpush1.bf16.msra.mxu1 %v5544_v1  ;;  %v5634_v6 = vmul.f32 %v14756_v50, %v5588_v42  ;;  %v5601_v8 = vsel %vm366_vm6, %v5585_v49, %v14797_v22  ;;  %v5635_v28 = vmul.f32 %v14757_v58, %v5600_v5  ;;  %v5685_v15 = vpop.permute.xlu1 %5684  ;;  %v14808_v49 = vld [vmem:[#allocation51_spill] sm:$0xff] }
 0xdec   :  { %6130 = vmatprep.subr.bf16.mxu1 %v5643_v29  ;;  %v5694_v48 = vsel %vm414_vm5, %v5669_v36, %v14801_v59  ;;  %v5638_v10 = vmul.f32 %v14756_v50, %v5589_v34  ;;  %v5639_v53 = vmul.f32 %v14757_v58, %v5601_v8  ;;  %v5744_v29 = vpack.c.bf16 %v12629_v35, %v12612_v47 }
 0xded   :  { %v5745_v25 = vpack.c.bf16 %v5733_v46, %v5729_v21  ;;  %v5799_v1 = vsel %vm474_vm7, %v14803_v62, %v14802_v18  ;;  %v5795_v55 = vsel %vm474_vm7, %v14802_v18, %v12431_v7  ;;  %v5644_v50 = vpack.c.bf16 %v5636_v54, %v5632_v33 }
 0xdee   :  { %6025 = vmatpush1.bf16.msra.mxu0 %v5640_v9  ;;  %v5646_v58 = vpack.c.bf16 %v5638_v10, %v5634_v6  ;;  %v5647_v52 = vpack.c.bf16 %v5639_v53, %v5635_v28  ;;  %v5671_v9 = vpop.permute.xlu0 %5670  ;;  %v5698_v57 = vsel %vm414_vm5, %v14804_v3, %v5669_v36  ;;  %v5735_v47 = vmul.f32 %v14783_v37, %v5694_v48  ;;  %v7709_v10 = vld [vmem:[%s14141_s9 + $0x1c] ss:$12 sps:$4 sm:$0xff]  }
 0xdef   :  { %6026 = vmatprep.subr.bf16.mxu0 %v5645_v41  ;;  %6131 = vmatpush1.bf16.msra.mxu1 %v5642_v19  ;;  %v5695_v56 = vsel %vm414_vm5, %v5671_v9, %v14805_v43  ;;  %v5699_v19 = vsel %vm414_vm5, %v14806_v63, %v5671_v9  ;;  %v5690_v26 = vsel %vm414_vm5, %v14801_v59, %v5685_v15  ;;  %v5783_v22 = vpop.permute.xlu1 %5782 }
 0xdf0   :  { %v5702_v0 = vsel %vm414_vm5, %v5685_v15, %v14804_v3  ;;  %v5739_v11 = vmul.f32 %v14783_v37, %v5695_v56  ;;  %6132 = vmatprep.subr.bf16.mxu1 %v5647_v52  ;;  %v5794_v38 = vsel %vm474_vm7, %v14799_v39, %v12412_v31  ;;  %v5833_v42 = vmul.f32 %v14807_v2, %v5795_v55 }
 0xdf1   :  { %v5802_v13 = vsel %vm474_vm7, %v5783_v22, %v14800_v60  ;;  %v5803_v37 = vsel %vm474_vm7, %v12479_v17, %v14803_v62  ;;  %v5734_v36 = vmul.f32 %v14780_v24, %v5698_v57  ;;  %v5738_v35 = vmul.f32 %v14780_v24, %v5699_v19 }
 0xdf2   :  { %6027 = vmatpush1.bf16.msra.mxu0 %v5644_v50  ;;  %v5747_v46 = vpack.c.bf16 %v5739_v11, %v5735_v47  ;;  %v5687_v5 = vpop.permute.xlu0 %5686  ;;  %v5736_v21 = vmul.f32 %v14794_v27, %v5690_v26  ;;  %v5737_v39 = vmul.f32 %v14798_v45, %v5702_v0  ;;  %v5831_v24 = vmul.f32 %v12213_v30, %v5802_v13  ;;  %v7711_v50 = vld [vmem:[%s14141_s9 + $0x18] ss:$12 sps:$4 sm:$0xff]  }
 0xdf3   :  { %6028 = vmatprep.subr.bf16.mxu0 %v5743_v51  ;;  %6133 = vmatpush1.bf16.msra.mxu1 %v5646_v58  ;;  %v5691_v61 = vsel %vm414_vm5, %v14805_v43, %v5687_v5  ;;  %v5703_v4 = vsel %vm414_vm5, %v5687_v5, %v14806_v63  ;;  %v5790_v51 = vsel %vm474_vm7, %v12412_v31, %v5783_v22  ;;  %v5763_v41 = vpop.permute.xlu1 %5762 }
 0xdf4   :  { %6134 = vmatprep.subr.bf16.mxu1 %v5745_v25  ;;  %v5740_v60 = vmul.f32 %v14794_v27, %v5691_v61  ;;  %v5741_v54 = vmul.f32 %v14798_v45, %v5703_v4  ;;  %v5832_v33 = vmul.f32 %v14808_v49, %v5799_v1  ;;  %v5829_v6 = vmul.f32 %v14807_v2, %v5794_v38 }
 0xdf5   :  { %v5791_v31 = vsel %vm474_vm7, %v12431_v7, %v12479_v17  ;;  %v5835_v27 = vmul.f32 %v12213_v30, %v5803_v37  ;;  %v5746_v34 = vpack.c.bf16 %v5738_v35, %v5734_v36  ;;  %v5830_v23 = vmul.f32 %v12205_v32, %v5790_v51  ;;  %v7712_v36 = vld [vmem:[%s14141_s9 + $0x8] ss:$12 sps:$4 sm:$0xff]  }
 0xdf6   :  { %6029 = vmatpush1.bf16.msra.mxu0 %v5742_v40  ;;  %v5748_v45 = vpack.c.bf16 %v5740_v60, %v5736_v21  ;;  %v5749_v8 = vpack.c.bf16 %v5741_v54, %v5737_v39  ;;  %v5765_v28 = vpop.permute.xlu0 %5764  ;;  %v5845_v59 = vpack.c.bf16 %v5833_v42, %v5829_v6  ;;  %v5828_v40 = vmul.f32 %v14808_v49, %v12640_v44 }
 0xdf7   :  { %6030 = vmatprep.subr.bf16.mxu0 %v5747_v46  ;;  %6135 = vmatpush1.bf16.msra.mxu1 %v5744_v29  ;;  %v5847_v48 = vpack.c.bf16 %v5835_v27, %v5831_v24  ;;  %v5771_v7 = vpop.permute.xlu1 %5770  ;;  %v5834_v17 = vmul.f32 %v12205_v32, %v5791_v31  ;;  %v14809_v42 = vmov 0  }
 0xdf8   :  { %6136 = vmatprep.subr.bf16.mxu1 %v5749_v8  ;;  %v5844_v53 = vpack.c.bf16 %v5832_v33, %v5828_v40  ;;  %v5800_v44 = vsel %vm474_vm7, %v5763_v41, %v5771_v7 }
 0xdf9   :  { %v5846_v29 = vpack.c.bf16 %v5834_v17, %v5830_v23  ;;  %v5836_v58 = vmul.f32 %v14808_v49, %v5800_v44 }
 0xdfa   :  { %6031 = vmatpush1.bf16.msra.mxu0 %v5746_v34  ;;  %v5781_v15 = vpop.permute.xlu0 %5780 }
 0xdfb   :  { %6053 = vmatprep.subr.bf16.mxu0 %v5845_v59  ;;  %6137 = vmatpush1.bf16.msra.mxu1 %v5748_v45  ;;  %v5779_v25 = vpop.permute.xlu1 %5778 }
 0xdfc   :  { %6159 = vmatprep.subr.bf16.mxu1 %v5847_v48  ;;  %v5796_v18 = vsel %vm474_vm7, %v5771_v7, %v5779_v25 }
 0xdfd   :  { %6033 = vmatmul.mubr.bf16.vlgmr.msra.gmra.mrb[36].mxu0 %v7706_v20  ;;  %v5837_v52 = vmul.f32 %v14807_v2, %v5796_v18 }
 0xdfe   :  { %6054 = vmatpush1.bf16.msra.mxu0 %v5844_v53  ;;  %6139 = vmatmul.mubr.bf16.vlgmr.msra.gmra.mrb[36].mxu1 %v7706_v20  ;;  %v5773_v62 = vpop.permute.xlu0 %5772 }
 0xdff   :  { %6160 = vmatpush1.bf16.msra.mxu1 %v5846_v29  ;;  %6042 = vmatprep.mubr.bf16.mxu0 %v7709_v10  ;;  %v5797_v1 = vsel %vm474_vm7, %v5773_v62, %v5781_v15  ;;  %v5801_v55 = vsel %vm474_vm7, %v5765_v28, %v5773_v62  ;;  %v5787_v57 = vpop.permute.xlu1 %5786 }
 0xe00   :  { %6148 = vmatprep.mubr.bf16.mxu1 %v7709_v10  ;;  %v5840_v9 = vmul.f32 %v14808_v49, %v5801_v55  ;;  %v5841_v3 = vmul.f32 %v14807_v2, %v5797_v1  ;;  %v5792_v47 = vsel %vm474_vm7, %v5779_v25, %v5787_v57  ;;  %v5804_v43 = vsel %vm474_vm7, %v5787_v57, %v5763_v41 }
 0xe01   :  { %v5838_v26 = vmul.f32 %v12205_v32, %v5792_v47  ;;  %v5839_v22 = vmul.f32 %v12213_v30, %v5804_v43 }
 0xe02   :  { %v5848_v56 = vpack.c.bf16 %v5840_v9, %v5836_v58  ;;  %v5849_v63 = vpack.c.bf16 %v5841_v3, %v5837_v52  ;;  %v5789_v19 = vpop.permute.xlu0 %5788 }
 0xe03   :  { %v5793_v0 = vsel %vm474_vm7, %v5781_v15, %v5789_v19  ;;  %v5805_v11 = vsel %vm474_vm7, %v5789_v19, %v5765_v28 }
 0xe04   :  { %v5842_v38 = vmul.f32 %v12205_v32, %v5793_v0  ;;  %v5843_v2 = vmul.f32 %v12213_v30, %v5805_v11  ;;  %6055 = vmatprep.subr.bf16.mxu0 %v5849_v63  ;;  %v7713_v32 = vld [vmem:[%s14141_s9 + $0x20] ss:$12 sps:$4 sm:$0xff]  }
 0xe05   :  { %6043 = vmatmul.mubr.bf16.gmra.mrb[40].mxu0 %v7711_v50 }
 0xe06   :  { %6149 = vmatmul.mubr.bf16.gmra.mrb[40].mxu1 %v7711_v50  ;;  %6056 = vmatpush1.bf16.msra.mxu0 %v5848_v56  ;;  %v5850_v13 = vpack.c.bf16 %v5842_v38, %v5838_v26  ;;  %v5851_v37 = vpack.c.bf16 %v5843_v2, %v5839_v22 }
 0xe07   :  { %6085 = vmatprep.mubr.bf16.mxu0 %v14809_v42  ;;  %6191 = vmatprep.mubr.bf16.mxu1 %v14809_v42 }
 0xe08   :  { %6161 = vmatprep.subr.bf16.mxu1 %v5851_v37 }
 0xe09   :  { %6162 = vmatpush1.bf16.msra.mxu1 %v5850_v13 }
 0xe0d   :  { %7557 = vmatmul.mubr.msk.bf16.vlgmr.msra.gmra.mrb[36].mxu0 %vm4777_vm11, %v7712_v36 }
 0xe0e   :  { %7559 = vmatmul.mubr.msk.bf16.vlgmr.msra.gmra.mrb[36].mxu1 %vm4777_vm11, %v7712_v36  ;;  %6095 = vmatprep.mubr.bf16.mxu0 %v14809_v42 }
 0xe0f   :  { %6201 = vmatprep.mubr.bf16.mxu1 %v14809_v42  ;;  %v5947_v30 = vpop.permute.xlu1 %5946 }
 0xe11   :  { %v5952_v35 = vpop.permute.xlu0 %5951 }
 0xe13   :  { %v5957_v20 = vpop.permute.xlu1 %5956 }
 0xe15   :  { %7558 = vmatmul.mubr.msk.bf16.gmra.mrb[40].mxu0 %vm4777_vm11, %v7713_v32  ;;  %v5962_v17 = vpop.permute.xlu0 %5961 }
 0xe16   :  { %7560 = vmatmul.mubr.msk.bf16.gmra.mrb[40].mxu1 %vm4777_vm11, %v7713_v32 }
 0xee0   :  { %v6087_v46 = vpop.f32.mrb[36].mxu0 }
 0xee1   :  { %v7594_v5 = vadd.f32 %v6087_v46, %v5947_v30  ;;  %v6089_v21 = vpop.f32.mrb[37].mxu0  ;;  %v6193_v39 = vpop.f32.mrb[36].mxu1 }
 0xee2   :  { %v7595_v61 = vadd.f32 %v6089_v21, %v5947_v30  ;;  %v7602_v4 = vadd.f32 %v6193_v39, %v5947_v30  ;;  %v6091_v51 = vpop.f32.mrb[38].mxu0  ;;  %v6195_v24 = vpop.f32.mrb[37].mxu1 }
 0xee3   :  { %v12785_v60 = vmax.f32 %v7594_v5, 0.0  ;;  %v7596_v54 = vadd.f32 %v6091_v51, %v5952_v35  ;;  %v7603_v41 = vadd.f32 %v6195_v24, %v5947_v30  ;;  %v6093_v49 = vpop.f32.mrb[39].mxu0  ;;  %v6197_v33 = vpop.f32.mrb[38].mxu1 }
 0xee4   :  { %v7597_v6 = vadd.f32 %v6093_v49, %v5952_v35  ;;  %v7604_v31 = vadd.f32 %v6197_v33, %v5952_v35  ;;  %v6199_v27 = vpop.f32.mrb[39].mxu1  ;;  %v12791_v8 = vmax.f32 %v7595_v61, 0.0  ;;  %v12793_v28 = vmax.f32 %v7602_v4, 0.0 }
 0xee5   :  { %v12787_v34 = vmax.f32 %v7596_v54, 0.0  ;;  %v7605_v45 = vadd.f32 %v6199_v27, %v5952_v35  ;;  %6228 = vrot.lane.b32.xlu1 %v12785_v60, %s7731_s13  ;;  %v12799_v40 = vmax.f32 %v7603_v41, 0.0 }
 0xee6   :  { %v12795_v59 = vmax.f32 %v7597_v6, 0.0  ;;  %v12797_v23 = vmax.f32 %v7604_v31, 0.0 }
 0xee7   :  { %v12801_v48 = vmax.f32 %v7605_v45, 0.0  ;;  %6230 = vrot.lane.b32.xlu0 %v12787_v34, %s7731_s13  ;;  %v6636_v7 = vpack.c.bf16 %v12787_v34, %v12785_v60 }
 0xee8   :  { %v6097_v10 = vpop.f32.mrb[40].mxu0  ;;  %v6637_v53 = vpack.c.bf16 %v12795_v59, %v12791_v8  ;;  %v6638_v15 = vpack.c.bf16 %v12797_v23, %v12793_v28 }
 0xee9   :  { %v7598_v29 = vadd.f32 %v6097_v10, %v5957_v20  ;;  %v6099_v25 = vpop.f32.mrb[41].mxu0  ;;  %v6203_v44 = vpop.f32.mrb[40].mxu1  ;;  %6244 = vrot.lane.b32.xlu1 %v12793_v28, %s7731_s13  ;;  %v6639_v18 = vpack.c.bf16 %v12801_v48, %v12799_v40  ;;  %6644 = vst [vmem:[#allocation2 + $0x100] sm:$0xff] %v6636_v7 }
 0xeea   :  { %v7599_v62 = vadd.f32 %v6099_v25, %v5957_v20  ;;  %v7606_v1 = vadd.f32 %v6203_v44, %v5957_v20  ;;  %v6101_v55 = vpop.f32.mrb[42].mxu0  ;;  %v6205_v50 = vpop.f32.mrb[41].mxu1  ;;  %6645 = vst [vmem:[#allocation2 + $0x108] sm:$0xff] %v6637_v53  ;;  %6646 = vst [vmem:[#allocation2 + $0x110] sm:$0xff] %v6638_v15  ;;  %v6276_v25 = vld [vmem:[%s14422_s11] sm:$0xf] }
 0xeeb   :  { %v7600_v58 = vadd.f32 %v6101_v55, %v5962_v17  ;;  %v7607_v52 = vadd.f32 %v6205_v50, %v5957_v20  ;;  %v6103_v9 = vpop.f32.mrb[43].mxu0  ;;  %v6207_v3 = vpop.f32.mrb[42].mxu1  ;;  %6246 = vrot.lane.b32.xlu0 %v12797_v23, %s7731_s13  ;;  %6647 = vst [vmem:[#allocation2 + $0x118] sm:$0xff] %v6639_v18  ;;  %v12817_v56 = vmax.f32 %v7598_v29, 0.0  ;;  %v14813_v18 = vld [vmem:[#allocation5_spill] sm:$0xff] }
 0xeec   :  { %v7601_v57 = vadd.f32 %v6103_v9, %v5962_v17  ;;  %v7608_v47 = vadd.f32 %v6207_v3, %v5962_v17  ;;  %v6209_v43 = vpop.f32.mrb[43].mxu1  ;;  %v12823_v26 = vmax.f32 %v7599_v62, 0.0  ;;  %v12825_v0 = vmax.f32 %v7606_v1, 0.0 }
 0xeed   :  { %v12819_v63 = vmax.f32 %v7600_v58, 0.0  ;;  %v7609_v19 = vadd.f32 %v6209_v43, %v5962_v17  ;;  %6330 = vrot.lane.b32.xlu1 %v12785_v60, %s7730_s23  ;;  %v12831_v38 = vmax.f32 %v7607_v52, 0.0  ;;  %v13073_v62 = vrot.slane %v6276_v25, %v14813_v18 }
 0xeee   :  { %14810 = vst [vmem:[#allocation71_spill] sm:$0xff] %v12825_v0  ;;  %v12827_v11 = vmax.f32 %v7601_v57, 0.0  ;;  %v12829_v22 = vmax.f32 %v7608_v47, 0.0  ;;  %v13076_v1 = vrot.slane %v6276_v25, %v7913_v16  ;;  %v14814_v57 = vld [vmem:[#allocation3_spill] sm:$0xff]  ;;  %v13096_v43 = vrot.slane %v6276_v25, %v7909_v14 }
 0xeef   :  { %v12833_v2 = vmax.f32 %v7609_v19, 0.0  ;;  %6332 = vrot.lane.b32.xlu0 %v12787_v34, %s7730_s23  ;;  %v6640_v13 = vpack.c.bf16 %v12819_v63, %v12817_v56  ;;  %v13093_v47 = vrot.slane %v6276_v25, %v14814_v57  ;;  %v7561_v19 = vld [vmem:[%s14422_s11 + $0x4] sm:$0xf] }
 0xef0   :  { %v6641_v37 = vpack.c.bf16 %v12827_v11, %v12823_v26  ;;  %v6642_v36 = vpack.c.bf16 %v12829_v22, %v12825_v0 }
 0xef1   :  { %6346 = vrot.lane.b32.xlu1 %v12793_v28, %s7730_s23  ;;  %v6643_v32 = vpack.c.bf16 %v12833_v2, %v12831_v38  ;;  %6648 = vst [vmem:[#allocation2 + $0x120] sm:$0xff] %v6640_v13 }
 0xef2   :  { %6649 = vst [vmem:[#allocation2 + $0x128] sm:$0xff] %v6641_v37  ;;  %6650 = vst [vmem:[#allocation2 + $0x130] sm:$0xff] %v6642_v36 }
 0xef3   :  { %6348 = vrot.lane.b32.xlu0 %v12797_v23, %s7730_s23  ;;  %6651 = vst [vmem:[#allocation2 + $0x138] sm:$0xff] %v6643_v32 }
 0xef5   :  { %6432 = vrot.lane.b32.xlu1 %v12785_v60, %s7733_s26 }
 0xef7   :  { %6434 = vrot.lane.b32.xlu0 %v12787_v34, %s7733_s26 }
 0xef9   :  { %6448 = vrot.lane.b32.xlu1 %v12793_v28, %s7733_s26 }
 0xefb   :  { %6450 = vrot.lane.b32.xlu0 %v12797_v23, %s7733_s26 }
 0xefd   :  { %6534 = vrot.lane.b32.xlu1 %v12785_v60, %s7732_s25 }
 0xeff   :  { %6536 = vrot.lane.b32.xlu0 %v12787_v34, %s7732_s25 }
 0xf01   :  { %6550 = vrot.lane.b32.xlu1 %v12793_v28, %s7732_s25 }
 0xf03   :  { %6552 = vrot.lane.b32.xlu0 %v12797_v23, %s7732_s25 }
 0xf05   :  { %6652 = vrot.lane.b32.xlu1 %v12785_v60, %s7734_s1 }
 0xf07   :  { %6654 = vrot.lane.b32.xlu0 %v12787_v34, %s7734_s1 }
 0xf09   :  { %6668 = vrot.lane.b32.xlu1 %v12793_v28, %s7734_s1 }
 0xf0b   :  { %6670 = vrot.lane.b32.xlu0 %v12797_v23, %s7734_s1 }
 0xf0d   :  { %6754 = vrot.lane.b32.xlu1 %v12785_v60, %s7736_s2 }
 0xf0f   :  { %6756 = vrot.lane.b32.xlu0 %v12787_v34, %s7736_s2 }
 0xf11   :  { %6770 = vrot.lane.b32.xlu1 %v12793_v28, %s7736_s2 }
 0xf13   :  { %6772 = vrot.lane.b32.xlu0 %v12797_v23, %s7736_s2 }
 0xf15   :  { %6856 = vrot.lane.b32.xlu1 %v12785_v60, %s14427_s4 }
 0xf17   :  { %6858 = vrot.lane.b32.xlu0 %v12787_v34, %s14427_s4 }
 0xf19   :  { %6872 = vrot.lane.b32.xlu1 %v12793_v28, %s14427_s4 }
 0xf1b   :  { %6874 = vrot.lane.b32.xlu0 %v12797_v23, %s14427_s4 }
 0xf1d   :  { %6958 = vrot.lane.b32.xlu1 %v12785_v60, %s7737_s28 }
 0xf1f   :  { %6960 = vrot.lane.b32.xlu0 %v12787_v34, %s7737_s28 }
 0xf21   :  { %6236 = vrot.lane.b32.xlu1 %v12791_v8, %s7731_s13 }
 0xf23   :  { %6238 = vrot.lane.b32.xlu0 %v12795_v59, %s7731_s13 }
 0xf25   :  { %6252 = vrot.lane.b32.xlu1 %v12799_v40, %s7731_s13 }
 0xf27   :  { %6254 = vrot.lane.b32.xlu0 %v12801_v48, %s7731_s13 }
 0xf29   :  { %6338 = vrot.lane.b32.xlu1 %v12791_v8, %s7730_s23 }
 0xf2b   :  { %6340 = vrot.lane.b32.xlu0 %v12795_v59, %s7730_s23 }
 0xf2d   :  { %6354 = vrot.lane.b32.xlu1 %v12799_v40, %s7730_s23 }
 0xf2f   :  { %6356 = vrot.lane.b32.xlu0 %v12801_v48, %s7730_s23 }
 0xf31   :  { %6440 = vrot.lane.b32.xlu1 %v12791_v8, %s7733_s26 }
 0xf33   :  { %6442 = vrot.lane.b32.xlu0 %v12795_v59, %s7733_s26 }
 0xf35   :  { %6456 = vrot.lane.b32.xlu1 %v12799_v40, %s7733_s26 }
 0xf37   :  { %6458 = vrot.lane.b32.xlu0 %v12801_v48, %s7733_s26 }
 0xf39   :  { %6542 = vrot.lane.b32.xlu1 %v12791_v8, %s7732_s25 }
 0xf3b   :  { %6544 = vrot.lane.b32.xlu0 %v12795_v59, %s7732_s25 }
 0xf3d   :  { %6558 = vrot.lane.b32.xlu1 %v12799_v40, %s7732_s25 }
 0xf3f   :  { %6560 = vrot.lane.b32.xlu0 %v12801_v48, %s7732_s25 }
 0xf41   :  { %6660 = vrot.lane.b32.xlu1 %v12791_v8, %s7734_s1 }
 0xf43   :  { %6662 = vrot.lane.b32.xlu0 %v12795_v59, %s7734_s1 }
 0xf45   :  { %6676 = vrot.lane.b32.xlu1 %v12799_v40, %s7734_s1 }
 0xf47   :  { %6678 = vrot.lane.b32.xlu0 %v12801_v48, %s7734_s1 }
 0xf49   :  { %6762 = vrot.lane.b32.xlu1 %v12791_v8, %s7736_s2 }
 0xf4b   :  { %6764 = vrot.lane.b32.xlu0 %v12795_v59, %s7736_s2 }
 0xf4d   :  { %6778 = vrot.lane.b32.xlu1 %v12799_v40, %s7736_s2 }
 0xf4f   :  { %6780 = vrot.lane.b32.xlu0 %v12801_v48, %s7736_s2 }
 0xf51   :  { %6864 = vrot.lane.b32.xlu1 %v12791_v8, %s14427_s4 }
 0xf53   :  { %6866 = vrot.lane.b32.xlu0 %v12795_v59, %s14427_s4 }
 0xf55   :  { %6880 = vrot.lane.b32.xlu1 %v12799_v40, %s14427_s4 }
 0xf57   :  { %6882 = vrot.lane.b32.xlu0 %v12801_v48, %s14427_s4  ;;  %v12949_v30 = vpop.permute.xlu1 %6228 }
 0xf59   :  { %v12951_v35 = vpop.permute.xlu0 %6230  ;;  %6966 = vrot.lane.b32.xlu1 %v12791_v8, %s7737_s28 }
 0xf5b   :  { %6968 = vrot.lane.b32.xlu0 %v12795_v59, %s7737_s28  ;;  %v12957_v46 = vpop.permute.xlu1 %6244 }
 0xf5d   :  { %v12959_v5 = vpop.permute.xlu0 %6246  ;;  %6232 = vrot.lane.b32.xlu1 %v12817_v56, %s7731_s13 }
 0xf5f   :  { %6234 = vrot.lane.b32.xlu0 %v12819_v63, %s7731_s13  ;;  %v12965_v21 = vpop.permute.xlu1 %6330 }
 0xf61   :  { %v12967_v39 = vpop.permute.xlu0 %6332  ;;  %6248 = vrot.lane.b32.xlu1 %v12825_v0, %s7731_s13 }
 0xf63   :  { %6250 = vrot.lane.b32.xlu0 %v12829_v22, %s7731_s13  ;;  %v12973_v61 = vpop.permute.xlu1 %6346 }
 0xf65   :  { %v12975_v4 = vpop.permute.xlu0 %6348  ;;  %6334 = vrot.lane.b32.xlu1 %v12817_v56, %s7730_s23 }
 0xf67   :  { %6336 = vrot.lane.b32.xlu0 %v12819_v63, %s7730_s23  ;;  %v12981_v51 = vpop.permute.xlu1 %6432 }
 0xf69   :  { %v12983_v24 = vpop.permute.xlu0 %6434  ;;  %6350 = vrot.lane.b32.xlu1 %v12825_v0, %s7730_s23 }
 0xf6b   :  { %6352 = vrot.lane.b32.xlu0 %v12829_v22, %s7730_s23  ;;  %v12989_v60 = vpop.permute.xlu1 %6448 }
 0xf6d   :  { %v12991_v54 = vpop.permute.xlu0 %6450  ;;  %6436 = vrot.lane.b32.xlu1 %v12817_v56, %s7733_s26 }
 0xf6f   :  { %6438 = vrot.lane.b32.xlu0 %v12819_v63, %s7733_s26  ;;  %v12997_v41 = vpop.permute.xlu1 %6534 }
 0xf71   :  { %v12999_v49 = vpop.permute.xlu0 %6536  ;;  %6452 = vrot.lane.b32.xlu1 %v12825_v0, %s7733_s26 }
 0xf73   :  { %6454 = vrot.lane.b32.xlu0 %v12829_v22, %s7733_s26  ;;  %v13005_v33 = vpop.permute.xlu1 %6550 }
 0xf75   :  { %v13007_v6 = vpop.permute.xlu0 %6552  ;;  %6538 = vrot.lane.b32.xlu1 %v12817_v56, %s7732_s25 }
 0xf77   :  { %6540 = vrot.lane.b32.xlu0 %v12819_v63, %s7732_s25  ;;  %v13013_v31 = vpop.permute.xlu1 %6652 }
 0xf79   :  { %v13015_v27 = vpop.permute.xlu0 %6654  ;;  %6554 = vrot.lane.b32.xlu1 %v12825_v0, %s7732_s25 }
 0xf7b   :  { %6556 = vrot.lane.b32.xlu0 %v12829_v22, %s7732_s25  ;;  %v13021_v34 = vpop.permute.xlu1 %6668 }
 0xf7d   :  { %v13023_v45 = vpop.permute.xlu0 %6670  ;;  %6656 = vrot.lane.b32.xlu1 %v12817_v56, %s7734_s1 }
 0xf7f   :  { %6658 = vrot.lane.b32.xlu0 %v12819_v63, %s7734_s1  ;;  %v13029_v8 = vpop.permute.xlu1 %6754 }
 0xf81   :  { %v13031_v59 = vpop.permute.xlu0 %6756  ;;  %6672 = vrot.lane.b32.xlu1 %v12825_v0, %s7734_s1 }
 0xf83   :  { %6674 = vrot.lane.b32.xlu0 %v12829_v22, %s7734_s1  ;;  %v13037_v20 = vpop.permute.xlu1 %6770 }
 0xf85   :  { %v13039_v7 = vpop.permute.xlu0 %6772  ;;  %6758 = vrot.lane.b32.xlu1 %v12817_v56, %s7736_s2 }
 0xf87   :  { %6760 = vrot.lane.b32.xlu0 %v12819_v63, %s7736_s2  ;;  %v13045_v17 = vpop.permute.xlu1 %6856 }
 0xf89   :  { %v13047_v10 = vpop.permute.xlu0 %6858  ;;  %6774 = vrot.lane.b32.xlu1 %v12825_v0, %s7736_s2 }
 0xf8b   :  { %6776 = vrot.lane.b32.xlu0 %v12829_v22, %s7736_s2  ;;  %v13053_v53 = vpop.permute.xlu1 %6872 }
 0xf8d   :  { %v13055_v15 = vpop.permute.xlu0 %6874  ;;  %6860 = vrot.lane.b32.xlu1 %v12817_v56, %s14427_s4 }
 0xf8f   :  { %6862 = vrot.lane.b32.xlu0 %v12819_v63, %s14427_s4  ;;  %v13061_v29 = vpop.permute.xlu1 %6958 }
 0xf90   :  { %14811 = vst [vmem:[#allocation29_spill] sm:$0xff] %v13061_v29 }
 0xf91   :  { %v13066_v44 = vpop.permute.xlu0 %6960  ;;  %6876 = vrot.lane.b32.xlu1 %v12825_v0, %s14427_s4 }
 0xf92   :  { %14812 = vst [vmem:[#allocation59_spill] sm:$0xff] %v13066_v44 }
 0xf93   :  { %6878 = vrot.lane.b32.xlu0 %v12829_v22, %s14427_s4  ;;  %v6237_v55 = vpop.permute.xlu1 %6236 }
 0xf94   :  { %v6264_v50 = vsel %vm83_vm1, %v6237_v55, %v12957_v46  ;;  %v6268_v58 = vsel %vm83_vm1, %v12949_v30, %v6237_v55 }
 0xf95   :  { %v6239_v52 = vpop.permute.xlu0 %6238  ;;  %6240 = vrot.lane.b32.xlu1 %v12823_v26, %s7731_s13  ;;  %v6299_v13 = vmul.f32 %v13073_v62, %v6268_v58  ;;  %v6300_v37 = vmul.f32 %v13076_v1, %v6264_v50  ;;  %v13116_v50 = vrot.slane %v7561_v19, %v14813_v18 }
 0xf96   :  { %v6265_v9 = vsel %vm83_vm1, %v6239_v52, %v12959_v5  ;;  %v6269_v3 = vsel %vm83_vm1, %v12951_v35, %v6239_v52 }
 0xf97   :  { %v6303_v36 = vmul.f32 %v13073_v62, %v6269_v3  ;;  %v6304_v32 = vmul.f32 %v13076_v1, %v6265_v9  ;;  %6242 = vrot.lane.b32.xlu0 %v12827_v11, %s7731_s13  ;;  %v6253_v55 = vpop.permute.xlu1 %6252 }
 0xf98   :  { %v6260_v25 = vsel %vm83_vm1, %v12957_v46, %v6253_v55  ;;  %v6272_v52 = vsel %vm83_vm1, %v6253_v55, %v12949_v30  ;;  %v13126_v30 = vrot.slane %v7561_v19, %v7913_v16 }
 0xf99   :  { %v6315_v42 = vpack.c.bf16 %v6303_v36, %v6299_v13  ;;  %v6316_v58 = vpack.c.bf16 %v6304_v32, %v6300_v37  ;;  %v6255_v0 = vpop.permute.xlu0 %6254  ;;  %6256 = vrot.lane.b32.xlu1 %v12831_v38, %s7731_s13  ;;  %v6298_v9 = vmul.f32 %v13093_v47, %v6272_v52  ;;  %v6301_v13 = vmul.f32 %v13096_v43, %v6260_v25 }
 0xf9a   :  { %v6261_v3 = vsel %vm83_vm1, %v12959_v5, %v6255_v0  ;;  %v6273_v46 = vsel %vm83_vm1, %v6255_v0, %v12951_v35  ;;  %14815 = vst [vmem:[#allocation44_spill] sm:$0xff] %v13126_v30  ;;  %v13142_v52 = vrot.slane %v7561_v19, %v14814_v57 }
 0xf9b   :  { %6323 = vst [vmem:[#allocation2 + $0x8] sm:$0xff] %v6315_v42  ;;  %6324 = vst [vmem:[#allocation2 + $0x10] sm:$0xff] %v6316_v58  ;;  %v6302_v37 = vmul.f32 %v13093_v47, %v6273_v46  ;;  %v6305_v36 = vmul.f32 %v13096_v43, %v6261_v3  ;;  %6258 = vrot.lane.b32.xlu0 %v12833_v2, %s7731_s13  ;;  %v6339_v32 = vpop.permute.xlu1 %6338  ;;  %7200 = vmatprep.subr.bf16.mxu0 %v6315_v42 }
 0xf9c   :  { %v6366_v0 = vsel %vm130_vm0, %v6339_v32, %v12973_v61  ;;  %v6370_v35 = vsel %vm130_vm0, %v12965_v21, %v6339_v32 }
 0xf9d   :  { %v6314_v5 = vpack.c.bf16 %v6302_v37, %v6298_v9  ;;  %v6317_v55 = vpack.c.bf16 %v6305_v36, %v6301_v13  ;;  %v6341_v25 = vpop.permute.xlu0 %6340  ;;  %6342 = vrot.lane.b32.xlu1 %v12823_v26, %s7730_s23  ;;  %v6401_v3 = vmul.f32 %v13116_v50, %v6370_v35  ;;  %v13152_v9 = vrot.slane %v7561_v19, %v7909_v14  ;;  %v7562_v35 = vld [vmem:[%s14422_s11 + $0x8] sm:$0xf] }
 0xf9e   :  { %v6367_v42 = vsel %vm130_vm0, %v6341_v25, %v12975_v4  ;;  %v6371_v46 = vsel %vm130_vm0, %v12967_v39, %v6341_v25  ;;  %v6402_v13 = vmul.f32 %v13126_v30, %v6366_v0 }
 0xf9f   :  { %6322 = vst [vmem:[#allocation2] sm:$0xff] %v6314_v5  ;;  %6325 = vst [vmem:[#allocation2 + $0x18] sm:$0xff] %v6317_v55  ;;  %v6405_v37 = vmul.f32 %v13116_v50, %v6371_v46  ;;  %v6406_v36 = vmul.f32 %v13126_v30, %v6367_v42  ;;  %6344 = vrot.lane.b32.xlu0 %v12827_v11, %s7730_s23  ;;  %v6355_v32 = vpop.permute.xlu1 %6354  ;;  %7201 = vmatpush1.bf16.msra.mxu0 %v6314_v5 }
 0xfa0   :  { %v6362_v19 = vsel %vm130_vm0, %v12973_v61, %v6355_v32  ;;  %v6374_v0 = vsel %vm130_vm0, %v6355_v32, %v12965_v21  ;;  %7306 = vmatprep.subr.bf16.mxu1 %v6317_v55  ;;  %v13181_v30 = vrot.slane %v7562_v35, %v14813_v18  ;;  %v13184_v21 = vrot.slane %v7562_v35, %v7913_v16 }
 0xfa1   :  { %v13168_v25 = vpack.c.bf16 %v6405_v37, %v6401_v3  ;;  %v13170_v42 = vpack.c.bf16 %v6406_v36, %v6402_v13  ;;  %v6357_v46 = vpop.permute.xlu0 %6356  ;;  %6358 = vrot.lane.b32.xlu1 %v12831_v38, %s7730_s23  ;;  %7307 = vmatpush1.bf16.msra.mxu1 %v6316_v58  ;;  %v6400_v55 = vmul.f32 %v13142_v52, %v6374_v0 }
 0xfa2   :  { %v6363_v5 = vsel %vm130_vm0, %v12975_v4, %v6357_v46  ;;  %v6375_v61 = vsel %vm130_vm0, %v6357_v46, %v12967_v39  ;;  %14816 = vst [vmem:[#allocation40_spill] sm:$0xff] %v13181_v30  ;;  %14817 = vst [vmem:[#allocation62_spill] sm:$0xff] %v13184_v21  ;;  %v6403_v3 = vmul.f32 %v13152_v9, %v6362_v19 }
 0xfa3   :  { %6425 = vst [vmem:[#allocation2 + $0x48] sm:$0xff] %v13168_v25  ;;  %6426 = vst [vmem:[#allocation2 + $0x50] sm:$0xff] %v13170_v42  ;;  %v6404_v4 = vmul.f32 %v13142_v52, %v6375_v61  ;;  %v6407_v13 = vmul.f32 %v13152_v9, %v6363_v5  ;;  %6360 = vrot.lane.b32.xlu0 %v12833_v2, %s7730_s23  ;;  %v6441_v39 = vpop.permute.xlu1 %6440  ;;  %v13213_v5 = vrot.slane %v7562_v35, %v14814_v57 }
 0xfa4   :  { %v6468_v58 = vsel %vm190_vm3, %v6441_v39, %v12989_v60  ;;  %v6472_v37 = vsel %vm190_vm3, %v12981_v51, %v6441_v39  ;;  %v13216_v61 = vrot.slane %v7562_v35, %v7909_v14  ;;  %v7563_v35 = vld [vmem:[%s14422_s11 + $0xc] sm:$0xf] }
 0xfa5   :  { %v13200_v36 = vpack.c.bf16 %v6404_v4, %v6400_v55  ;;  %v13202_v32 = vpack.c.bf16 %v6407_v13, %v6403_v3  ;;  %v6443_v19 = vpop.permute.xlu0 %6442  ;;  %6444 = vrot.lane.b32.xlu1 %v12823_v26, %s7733_s26  ;;  %v6503_v55 = vmul.f32 %v13181_v30, %v6472_v37  ;;  %v6504_v3 = vmul.f32 %v13184_v21, %v6468_v58 }
 0xfa6   :  { %v6469_v0 = vsel %vm190_vm3, %v6443_v19, %v12991_v54  ;;  %v6473_v46 = vsel %vm190_vm3, %v12983_v24, %v6443_v19 }
 0xfa7   :  { %6424 = vst [vmem:[#allocation2 + $0x40] sm:$0xff] %v13200_v36  ;;  %6427 = vst [vmem:[#allocation2 + $0x58] sm:$0xff] %v13202_v32  ;;  %v6507_v4 = vmul.f32 %v13181_v30, %v6473_v46  ;;  %v6508_v13 = vmul.f32 %v13184_v21, %v6469_v0  ;;  %6446 = vrot.lane.b32.xlu0 %v12827_v11, %s7733_s26  ;;  %v6457_v39 = vpop.permute.xlu1 %6456  ;;  %v13248_v30 = vrot.slane %v7563_v35, %v14813_v18 }
 0xfa8   :  { %v6464_v19 = vsel %vm190_vm3, %v12989_v60, %v6457_v39  ;;  %v6476_v58 = vsel %vm190_vm3, %v6457_v39, %v12981_v51  ;;  %v13251_v51 = vrot.slane %v7563_v35, %v7913_v16 }
 0xfa9   :  { %v13235_v37 = vpack.c.bf16 %v6507_v4, %v6503_v55  ;;  %v13237_v46 = vpack.c.bf16 %v6508_v13, %v6504_v3  ;;  %v6459_v0 = vpop.permute.xlu0 %6458  ;;  %6460 = vrot.lane.b32.xlu1 %v12831_v38, %s7733_s26  ;;  %14819 = vst [vmem:[#allocation34_spill] sm:$0xff] %v13248_v30  ;;  %v6502_v55 = vmul.f32 %v13213_v5, %v6476_v58 }
 0xfaa   :  { %v6465_v21 = vsel %vm190_vm3, %v12991_v54, %v6459_v0  ;;  %v6477_v60 = vsel %vm190_vm3, %v6459_v0, %v12983_v24  ;;  %14820 = vst [vmem:[#allocation58_spill] sm:$0xff] %v13251_v51  ;;  %v6505_v3 = vmul.f32 %v13216_v61, %v6464_v19 }
 0xfab   :  { %14818 = vst [vmem:[#allocation33_spill] sm:$0xff] %v13237_v46  ;;  %6527 = vst [vmem:[#allocation2 + $0x88] sm:$0xff] %v13235_v37  ;;  %v6506_v54 = vmul.f32 %v13213_v5, %v6477_v60  ;;  %v6509_v4 = vmul.f32 %v13216_v61, %v6465_v21  ;;  %6462 = vrot.lane.b32.xlu0 %v12833_v2, %s7733_s26  ;;  %v6543_v24 = vpop.permute.xlu1 %6542 }
 0xfac   :  { %6528 = vst [vmem:[#allocation2 + $0x90] sm:$0xff] %v13237_v46  ;;  %v6570_v13 = vsel %vm238_vm2, %v6543_v24, %v13005_v33  ;;  %v6574_v39 = vsel %vm238_vm2, %v12997_v41, %v6543_v24  ;;  %v13280_v46 = vrot.slane %v7563_v35, %v14814_v57 }
 0xfad   :  { %v13267_v0 = vpack.c.bf16 %v6506_v54, %v6502_v55  ;;  %v13269_v58 = vpack.c.bf16 %v6509_v4, %v6505_v3  ;;  %v6545_v19 = vpop.permute.xlu0 %6544  ;;  %6546 = vrot.lane.b32.xlu1 %v12823_v26, %s7732_s25  ;;  %v13283_v55 = vrot.slane %v7563_v35, %v7909_v14  ;;  %v13288_v3 = vmul.f32 %v13248_v30, %v6574_v39 }
 0xfae   :  { %v6571_v21 = vsel %vm238_vm2, %v6545_v19, %v13007_v6  ;;  %v6575_v60 = vsel %vm238_vm2, %v12999_v49, %v6545_v19  ;;  %v13291_v54 = vmul.f32 %v13251_v51, %v6570_v13  ;;  %v7564_v19 = vld [vmem:[%s14422_s11 + $0x14] sm:$0xf] }
 0xfaf   :  { %14821 = vst [vmem:[#allocation12_spill] sm:$0xff] %v13283_v55  ;;  %6526 = vst [vmem:[#allocation2 + $0x80] sm:$0xff] %v13267_v0  ;;  %v13294_v4 = vmul.f32 %v13248_v30, %v6575_v60  ;;  %v13297_v24 = vmul.f32 %v13251_v51, %v6571_v21  ;;  %6548 = vrot.lane.b32.xlu0 %v12827_v11, %s7732_s25  ;;  %v6559_v35 = vpop.permute.xlu1 %6558 }
 0xfb0   :  { %6529 = vst [vmem:[#allocation2 + $0x98] sm:$0xff] %v13269_v58  ;;  %14822 = vst [vmem:[#allocation57_spill] sm:$0xff] %v13291_v54  ;;  %v6566_v39 = vsel %vm238_vm2, %v13005_v33, %v6559_v35  ;;  %v6578_v13 = vsel %vm238_vm2, %v6559_v35, %v12997_v41  ;;  %v13323_v41 = vrot.slane %v7564_v19, %v14814_v57 }
 0xfb1   :  { %14823 = vst [vmem:[#allocation15_spill] sm:$0xff] %v13297_v24  ;;  %v6561_v51 = vpop.permute.xlu0 %6560  ;;  %6562 = vrot.lane.b32.xlu1 %v12831_v38, %s7732_s25  ;;  %v13326_v35 = vrot.slane %v7564_v19, %v14813_v18  ;;  %v13329_v60 = vmul.f32 %v13280_v46, %v6578_v13  ;;  %v13332_v21 = vmul.f32 %v13283_v55, %v6566_v39 }
 0xfb2   :  { %v6567_v30 = vsel %vm238_vm2, %v13007_v6, %v6561_v51  ;;  %v6579_v33 = vsel %vm238_vm2, %v6561_v51, %v12999_v49  ;;  %v13364_v39 = vrot.slane %v7564_v19, %v7909_v14 }
 0xfb3   :  { %14824 = vst [vmem:[#allocation10_spill] sm:$0xff] %v13326_v35  ;;  %14825 = vst [vmem:[#allocation85_spill] sm:$0xff] %v13329_v60  ;;  %v13335_v54 = vmul.f32 %v13280_v46, %v6579_v33  ;;  %v13338_v6 = vmul.f32 %v13283_v55, %v6567_v30  ;;  %6564 = vrot.lane.b32.xlu0 %v12833_v2, %s7732_s25  ;;  %v6661_v49 = vpop.permute.xlu1 %6660 }
 0xfb4   :  { %v6688_v51 = vsel %vm306_vm4, %v6661_v49, %v13021_v34  ;;  %v6692_v13 = vsel %vm306_vm4, %v13013_v31, %v6661_v49  ;;  %v13361_v49 = vrot.slane %v7564_v19, %v7913_v16  ;;  %14828 = vst [vmem:[#allocation11_spill] sm:$0xff] %v13364_v39  ;;  %v7565_v19 = vld [vmem:[%s14422_s11 + $0x18] sm:$0xf] }
 0xfb5   :  { %14826 = vst [vmem:[#allocation87_spill] sm:$0xff] %v13335_v54  ;;  %v6663_v30 = vpop.permute.xlu0 %6662  ;;  %6974 = vrot.lane.b32.xlu1 %v12793_v28, %s7737_s28  ;;  %v13367_v33 = vmul.f32 %v13323_v41, %v6692_v13  ;;  %v13370_v60 = vmul.f32 %v13326_v35, %v6688_v51 }
 0xfb6   :  { %v6689_v24 = vsel %vm306_vm4, %v6663_v30, %v13023_v45  ;;  %v6693_v55 = vsel %vm306_vm4, %v13015_v27, %v6663_v30  ;;  %14827 = vst [vmem:[#allocation18_spill] sm:$0xff] %v13361_v49 }
 0xfb7   :  { %14829 = vst [vmem:[#allocation7_spill] sm:$0xff] %v13367_v33  ;;  %v13373_v28 = vmul.f32 %v13323_v41, %v6693_v55  ;;  %v13376_v54 = vmul.f32 %v13326_v35, %v6689_v24  ;;  %6976 = vrot.lane.b32.xlu0 %v12797_v23, %s7737_s28  ;;  %v6677_v30 = vpop.permute.xlu1 %6676 }
 0xfb8   :  { %v6684_v13 = vsel %vm306_vm4, %v13021_v34, %v6677_v30  ;;  %v6696_v55 = vsel %vm306_vm4, %v6677_v30, %v13013_v31  ;;  %v13402_v31 = vrot.slane %v7565_v19, %v14814_v57  ;;  %v13405_v30 = vrot.slane %v7565_v19, %v14813_v18 }
 0xfb9   :  { %14830 = vst [vmem:[#allocation36_spill] sm:$0xff] %v13373_v28  ;;  %v6679_v23 = vpop.permute.xlu0 %6678  ;;  %6664 = vrot.lane.b32.xlu1 %v12823_v26, %s7734_s1  ;;  %v13408_v24 = vmul.f32 %v13361_v49, %v6684_v13  ;;  %v13411_v51 = vmul.f32 %v13364_v39, %v6696_v55  ;;  %v13443_v55 = vrot.slane %v7565_v19, %v7909_v14 }
 0xfba   :  { %v6685_v35 = vsel %vm306_vm4, %v13023_v45, %v6679_v23  ;;  %v6697_v34 = vsel %vm306_vm4, %v6679_v23, %v13015_v27  ;;  %14831 = vst [vmem:[#allocation30_spill] sm:$0xff] %v13402_v31  ;;  %14832 = vst [vmem:[#allocation73_spill] sm:$0xff] %v13405_v30 }
 0xfbb   :  { %14833 = vst [vmem:[#allocation17_spill] sm:$0xff] %v13408_v24  ;;  %14834 = vst [vmem:[#allocation48_spill] sm:$0xff] %v13411_v51  ;;  %v13414_v33 = vmul.f32 %v13361_v49, %v6685_v35  ;;  %v13417_v45 = vmul.f32 %v13364_v39, %v6697_v34  ;;  %6984 = vrot.lane.b32.xlu0 %v12801_v48, %s7737_s28  ;;  %v6763_v27 = vpop.permute.xlu1 %6762 }
 0xfbc   :  { %v6790_v23 = vsel %vm366_vm6, %v6763_v27, %v13037_v20  ;;  %v6794_v13 = vsel %vm366_vm6, %v13029_v8, %v6763_v27  ;;  %v13440_v27 = vrot.slane %v7565_v19, %v7913_v16  ;;  %14838 = vst [vmem:[#allocation13_spill] sm:$0xff] %v13443_v55  ;;  %v7566_v19 = vld [vmem:[%s14422_s11 + $0x1c] sm:$0xf] }
 0xfbd   :  { %14835 = vst [vmem:[#allocation75_spill] sm:$0xff] %v13414_v33  ;;  %14836 = vst [vmem:[#allocation69_spill] sm:$0xff] %v13417_v45  ;;  %v6765_v34 = vpop.permute.xlu0 %6764  ;;  %6680 = vrot.lane.b32.xlu1 %v12831_v38, %s7734_s1  ;;  %v13446_v35 = vmul.f32 %v13402_v31, %v6794_v13  ;;  %v13449_v24 = vmul.f32 %v13405_v30, %v6790_v23 }
 0xfbe   :  { %v6791_v48 = vsel %vm366_vm6, %v6765_v34, %v13039_v7  ;;  %v6795_v28 = vsel %vm366_vm6, %v13031_v59, %v6765_v34  ;;  %14837 = vst [vmem:[#allocation43_spill] sm:$0xff] %v13440_v27 }
 0xfbf   :  { %14839 = vst [vmem:[#allocation70_spill] sm:$0xff] %v13446_v35  ;;  %14840 = vst [vmem:[#allocation74_spill] sm:$0xff] %v13449_v24  ;;  %v13452_v33 = vmul.f32 %v13402_v31, %v6795_v28  ;;  %v13455_v39 = vmul.f32 %v13405_v30, %v6791_v48  ;;  %6666 = vrot.lane.b32.xlu0 %v12827_v11, %s7734_s1  ;;  %v6779_v34 = vpop.permute.xlu1 %6778 }
 0xfc0   :  { %v6786_v13 = vsel %vm366_vm6, %v13037_v20, %v6779_v34  ;;  %v6798_v28 = vsel %vm366_vm6, %v6779_v34, %v13029_v8  ;;  %v13481_v8 = vrot.slane %v7566_v19, %v14814_v57  ;;  %v13484_v34 = vrot.slane %v7566_v19, %v14813_v18 }
 0xfc1   :  { %14841 = vst [vmem:[#allocation41_spill] sm:$0xff] %v13452_v33  ;;  %14842 = vst [vmem:[#allocation49_spill] sm:$0xff] %v13455_v39  ;;  %v6781_v30 = vpop.permute.xlu0 %6780  ;;  %6766 = vrot.lane.b32.xlu1 %v12823_v26, %s7736_s2  ;;  %v13487_v23 = vmul.f32 %v13440_v27, %v6786_v13  ;;  %v13490_v48 = vmul.f32 %v13443_v55, %v6798_v28  ;;  %v13522_v28 = vrot.slane %v7566_v19, %v7909_v14 }
 0xfc2   :  { %v6787_v31 = vsel %vm366_vm6, %v13039_v7, %v6781_v30  ;;  %v6799_v20 = vsel %vm366_vm6, %v6781_v30, %v13031_v59  ;;  %14843 = vst [vmem:[#allocation14_spill] sm:$0xff] %v13481_v8  ;;  %14844 = vst [vmem:[#allocation53_spill] sm:$0xff] %v13484_v34 }
 0xfc3   :  { %14845 = vst [vmem:[#allocation52_spill] sm:$0xff] %v13487_v23  ;;  %14846 = vst [vmem:[#allocation79_spill] sm:$0xff] %v13490_v48  ;;  %v13493_v35 = vmul.f32 %v13440_v27, %v6787_v31  ;;  %v13496_v7 = vmul.f32 %v13443_v55, %v6799_v20  ;;  %6682 = vrot.lane.b32.xlu0 %v12833_v2, %s7734_s1  ;;  %v6865_v59 = vpop.permute.xlu1 %6864 }
 0xfc4   :  { %v6892_v30 = vsel %vm414_vm5, %v6865_v59, %v13053_v53  ;;  %v6896_v13 = vsel %vm414_vm5, %v13045_v17, %v6865_v59  ;;  %v13519_v59 = vrot.slane %v7566_v19, %v7913_v16  ;;  %14850 = vst [vmem:[#allocation19_spill] sm:$0xff] %v13522_v28  ;;  %v13541_v19 = vld [vmem:[%s14422_s11 + $0x20] sm:$0xf] }
 0xfc5   :  { %14847 = vst [vmem:[#allocation64_spill] sm:$0xff] %v13493_v35  ;;  %14848 = vst [vmem:[#allocation72_spill] sm:$0xff] %v13496_v7  ;;  %v6867_v20 = vpop.permute.xlu0 %6866  ;;  %6782 = vrot.lane.b32.xlu1 %v12831_v38, %s7736_s2  ;;  %v13525_v31 = vmul.f32 %v13481_v8, %v6896_v13  ;;  %v13528_v23 = vmul.f32 %v13484_v34, %v6892_v30 }
 0xfc6   :  { %v6893_v33 = vsel %vm414_vm5, %v6867_v20, %v13055_v15  ;;  %v6897_v55 = vsel %vm414_vm5, %v13047_v10, %v6867_v20  ;;  %14849 = vst [vmem:[#allocation54_spill] sm:$0xff] %v13519_v59 }
 0xfc7   :  { %14851 = vst [vmem:[#allocation46_spill] sm:$0xff] %v13525_v31  ;;  %14852 = vst [vmem:[#allocation24_spill] sm:$0xff] %v13528_v23  ;;  %v13531_v35 = vmul.f32 %v13481_v8, %v6897_v55  ;;  %v13534_v27 = vmul.f32 %v13484_v34, %v6893_v33  ;;  %6768 = vrot.lane.b32.xlu0 %v12827_v11, %s7736_s2  ;;  %v6881_v20 = vpop.permute.xlu1 %6880 }
 0xfc8   :  { %v6888_v30 = vsel %vm414_vm5, %v13053_v53, %v6881_v20  ;;  %v6900_v55 = vsel %vm414_vm5, %v6881_v20, %v13045_v17  ;;  %v13563_v17 = vrot.slane %v13541_v19, %v14814_v57 }
 0xfc9   :  { %14853 = vst [vmem:[#allocation27_spill] sm:$0xff] %v13531_v35  ;;  %14854 = vst [vmem:[#allocation26_spill] sm:$0xff] %v13534_v27  ;;  %v6883_v34 = vpop.permute.xlu0 %6882  ;;  %6868 = vrot.lane.b32.xlu1 %v12823_v26, %s14427_s4  ;;  %v13566_v20 = vmul.f32 %v13519_v59, %v6888_v30  ;;  %v13569_v33 = vmul.f32 %v13522_v28, %v6900_v55  ;;  %v7716_v30 = vld [vmem:[%s14143_s10 + $0x4] ss:$12 sps:$4 sm:$0xff]  }
 0xfca   :  { %v6889_v8 = vsel %vm414_vm5, %v13055_v15, %v6883_v34  ;;  %v6901_v53 = vsel %vm414_vm5, %v6883_v34, %v13047_v10  ;;  %14855 = vst [vmem:[#allocation38_spill] sm:$0xff] %v13563_v17  ;;  %7232 = vmatprep.mubr.bf16.mxu0 %v7716_v30  ;;  %7338 = vmatprep.mubr.bf16.mxu1 %v7716_v30 }
 0xfcb   :  { %14856 = vst [vmem:[#allocation37_spill] sm:$0xff] %v13566_v20  ;;  %14857 = vst [vmem:[#allocation45_spill] sm:$0xff] %v13569_v33  ;;  %v13572_v13 = vmul.f32 %v13519_v59, %v6889_v8  ;;  %v13575_v31 = vmul.f32 %v13522_v28, %v6901_v53  ;;  %6784 = vrot.lane.b32.xlu0 %v12833_v2, %s7736_s2  ;;  %v13579_v10 = vpop.permute.xlu1 %6966 }
 0xfcc   :  { %v6998_v15 = vsel %vm474_vm7, %v13061_v29, %v13579_v10 }
 0xfcd   :  { %14858 = vst [vmem:[#allocation63_spill] sm:$0xff] %v13572_v13  ;;  %14859 = vst [vmem:[#allocation84_spill] sm:$0xff] %v13575_v31  ;;  %v13589_v34 = vpop.permute.xlu0 %6968  ;;  %6884 = vrot.lane.b32.xlu1 %v12831_v38, %s14427_s4  ;;  %v13601_v53 = vmul.f32 %v13563_v17, %v6998_v15 }
 0xfce   :  { %v6999_v55 = vsel %vm474_vm7, %v13066_v44, %v13589_v34 }
 0xfcf   :  { %14860 = vst [vmem:[#allocation39_spill] sm:$0xff] %v13601_v53  ;;  %v13604_v57 = vmul.f32 %v13563_v17, %v6999_v55  ;;  %6870 = vrot.lane.b32.xlu0 %v12827_v11, %s14427_s4  ;;  %v13608_v8 = vpop.permute.xlu1 %6232  ;;  %v14862_v53 = vld [vmem:[#allocation71_spill] sm:$0xff] }
 0xfd1   :  { %14861 = vst [vmem:[#allocation55_spill] sm:$0xff] %v13604_v57  ;;  %v13612_v13 = vpop.permute.xlu0 %6234  ;;  %6982 = vrot.lane.b32.xlu1 %v12799_v40, %s7737_s28 }
 0xfd3   :  { %6886 = vrot.lane.b32.xlu0 %v12833_v2, %s14427_s4  ;;  %v6249_v15 = vpop.permute.xlu1 %6248 }
 0xfd5   :  { %v6251_v55 = vpop.permute.xlu0 %6250  ;;  %6962 = vrot.lane.b32.xlu1 %v12817_v56, %s7737_s28 }
 0xfd7   :  { %6964 = vrot.lane.b32.xlu0 %v12819_v63, %s7737_s28  ;;  %v13622_v30 = vpop.permute.xlu1 %6334 }
 0xfd9   :  { %v13624_v17 = vpop.permute.xlu0 %6336  ;;  %6970 = vrot.lane.b32.xlu1 %v12823_v26, %s7737_s28  ;;  %v7140_v26 = vld [vmem:[%s14144_s19] sm:$0xff] }
 0xfdb   :  { %6980 = vrot.lane.b32.xlu0 %v12829_v22, %s7737_s28  ;;  %v13630_v40 = vpop.permute.xlu1 %6350 }
 0xfdd   :  { %v13632_v20 = vpop.permute.xlu0 %6352  ;;  %6978 = vrot.lane.b32.xlu1 %v14862_v53, %s7737_s28 }
 0xfdf   :  { %6972 = vrot.lane.b32.xlu0 %v12827_v11, %s7737_s28  ;;  %v13638_v56 = vpop.permute.xlu1 %6436  ;;  %v7141_v11 = vld [vmem:[%s14144_s19 + $0x8] sm:$0xff] }
 0xfe1   :  { %v13640_v63 = vpop.permute.xlu0 %6438  ;;  %6986 = vrot.lane.b32.xlu1 %v12831_v38, %s7737_s28  ;;  %v7142_v38 = vld [vmem:[%s14144_s19 + $0x10] sm:$0xff] }
 0xfe3   :  { %6988 = vrot.lane.b32.xlu0 %v12833_v2, %s7737_s28  ;;  %v13649_v22 = vpop.permute.xlu1 %6452  ;;  %v7143_v2 = vld [vmem:[%s14144_s19 + $0x18] sm:$0xff] }
 0xfe5   :  { %v13654_v53 = vpop.permute.xlu0 %6454  ;;  %7146 = vperm.xlu1 %7684, %v7140_v26  }
 0xfe7   :  { %7151 = vperm.xlu0 %7683, %v7141_v11   ;;  %v13659_v57 = vpop.permute.xlu1 %6538 }
 0xfe9   :  { %v13664_v35 = vpop.permute.xlu0 %6540  ;;  %7156 = vperm.xlu1 %7684, %v7142_v38  }
 0xfeb   :  { %7161 = vperm.xlu0 %7683, %v7143_v2   ;;  %v13666_v28 = vpop.permute.xlu1 %6554 }
 0xfed   :  { %v13668_v59 = vpop.permute.xlu0 %6556 }
 0xfef   :  { %v13670_v26 = vpop.permute.xlu1 %6656 }
 0xff1   :  { %v13672_v33 = vpop.permute.xlu0 %6658 }
 0xff3   :  { %v13674_v31 = vpop.permute.xlu1 %6672 }
 0xff5   :  { %v13676_v11 = vpop.permute.xlu0 %6674 }
 0xff7   :  { %v13678_v23 = vpop.permute.xlu1 %6758 }
 0xff8   :  { %14863 = vst [vmem:[#allocation21_spill] sm:$0xff] %v13678_v23 }
 0xff9   :  { %v13680_v27 = vpop.permute.xlu0 %6760 }
 0xffa   :  { %14864 = vst [vmem:[#allocation25_spill] sm:$0xff] %v13680_v27 }
 0xffb   :  { %v13682_v29 = vpop.permute.xlu1 %6774 }
 0xffc   :  { %14865 = vst [vmem:[#allocation68_spill] sm:$0xff] %v13682_v29 }
 0xffd   :  { %v13684_v38 = vpop.permute.xlu0 %6776 }
 0xffe   :  { %14866 = vst [vmem:[#allocation56_spill] sm:$0xff] %v13684_v38 }
 0xfff   :  { %v13686_v2 = vpop.permute.xlu1 %6860 }
0x1000   :  { %14867 = vst [vmem:[#allocation65_spill] sm:$0xff] %v13686_v2 }
0x1001   :  { %v13688_v44 = vpop.permute.xlu0 %6862 }
0x1002   :  { %14868 = vst [vmem:[#allocation61_spill] sm:$0xff] %v13688_v44 }
0x1003   :  { %v13690_v14 = vpop.permute.xlu1 %6876 }
0x1004   :  { %14869 = vst [vmem:[#allocation76_spill] sm:$0xff] %v13690_v14 }
0x1005   :  { %v13692_v48 = vpop.permute.xlu0 %6878 }
0x1006   :  { %14870 = vst [vmem:[#allocation80_spill] sm:$0xff] %v13692_v48 }
0x1007   :  { %v6241_v7 = vpop.permute.xlu1 %6240 }
0x1008   :  { %v6266_v16 = vsel %vm83_vm1, %v6241_v7, %v6249_v15  ;;  %v6270_v24 = vsel %vm83_vm1, %v13608_v8, %v6241_v7 }
0x1009   :  { %v6243_v39 = vpop.permute.xlu0 %6242  ;;  %v6307_v14 = vmul.f32 %v13073_v62, %v6270_v24  ;;  %v6308_v48 = vmul.f32 %v13076_v1, %v6266_v16 }
0x100a   :  { %v6267_v27 = vsel %vm83_vm1, %v6243_v39, %v6251_v55  ;;  %v6271_v44 = vsel %vm83_vm1, %v13612_v13, %v6243_v39 }
0x100b   :  { %v6311_v2 = vmul.f32 %v13073_v62, %v6271_v44  ;;  %v6312_v38 = vmul.f32 %v13076_v1, %v6267_v27  ;;  %v6257_v23 = vpop.permute.xlu1 %6256 }
0x100c   :  { %v6262_v7 = vsel %vm83_vm1, %v6249_v15, %v6257_v23  ;;  %v6274_v29 = vsel %vm83_vm1, %v6257_v23, %v13608_v8 }
0x100d   :  { %v6319_v49 = vpack.c.bf16 %v6311_v2, %v6307_v14  ;;  %v6320_v51 = vpack.c.bf16 %v6312_v38, %v6308_v48  ;;  %v6259_v45 = vpop.permute.xlu0 %6258  ;;  %v6306_v44 = vmul.f32 %v13093_v47, %v6274_v29  ;;  %v6309_v62 = vmul.f32 %v13096_v43, %v6262_v7 }
0x100e   :  { %v6263_v39 = vsel %vm83_vm1, %v6251_v55, %v6259_v45  ;;  %v6275_v16 = vsel %vm83_vm1, %v6259_v45, %v13612_v13 }
0x100f   :  { %6327 = vst [vmem:[#allocation2 + $0x28] sm:$0xff] %v6319_v49  ;;  %6328 = vst [vmem:[#allocation2 + $0x30] sm:$0xff] %v6320_v51  ;;  %v6310_v1 = vmul.f32 %v13093_v47, %v6275_v16  ;;  %v6313_v24 = vmul.f32 %v13096_v43, %v6263_v39  ;;  %v6343_v14 = vpop.permute.xlu1 %6342  ;;  %7202 = vmatprep.subr.bf16.mxu0 %v6319_v49  ;;  %v14871_v49 = vld [vmem:[#allocation44_spill] sm:$0xff] }
0x1010   :  { %v6368_v27 = vsel %vm130_vm0, %v6343_v14, %v13630_v40  ;;  %v6372_v45 = vsel %vm130_vm0, %v13622_v30, %v6343_v14 }
0x1011   :  { %v6318_v23 = vpack.c.bf16 %v6310_v1, %v6306_v44  ;;  %v6321_v48 = vpack.c.bf16 %v6313_v24, %v6309_v62  ;;  %v6345_v13 = vpop.permute.xlu0 %6344  ;;  %v6409_v29 = vmul.f32 %v13116_v50, %v6372_v45  ;;  %v6410_v8 = vmul.f32 %v14871_v49, %v6368_v27  ;;  %v14873_v45 = vld [vmem:[#allocation62_spill] sm:$0xff] }
0x1012   :  { %v6369_v47 = vsel %vm130_vm0, %v6345_v13, %v13632_v20  ;;  %v6373_v43 = vsel %vm130_vm0, %v13624_v17, %v6345_v13 }
0x1013   :  { %6326 = vst [vmem:[#allocation2 + $0x20] sm:$0xff] %v6318_v23  ;;  %6329 = vst [vmem:[#allocation2 + $0x38] sm:$0xff] %v6321_v48  ;;  %v6413_v15 = vmul.f32 %v13116_v50, %v6373_v43  ;;  %v6414_v55 = vmul.f32 %v14871_v49, %v6369_v47  ;;  %v6359_v38 = vpop.permute.xlu1 %6358  ;;  %7203 = vmatpush1.bf16.msra.mxu0 %v6318_v23  ;;  %7308 = vmatprep.subr.bf16.mxu1 %v6321_v48 }
0x1014   :  { %v6364_v2 = vsel %vm130_vm0, %v13630_v40, %v6359_v38  ;;  %v6376_v7 = vsel %vm130_vm0, %v6359_v38, %v13622_v30  ;;  %7204 = vmatprep.subr.bf16.mxu0 %v13168_v25  ;;  %7309 = vmatpush1.bf16.msra.mxu1 %v6320_v51 }
0x1015   :  { %v6421_v39 = vpack.c.bf16 %v6413_v15, %v6409_v29  ;;  %v6422_v16 = vpack.c.bf16 %v6414_v55, %v6410_v8  ;;  %v6361_v44 = vpop.permute.xlu0 %6360  ;;  %7310 = vmatprep.subr.bf16.mxu1 %v13202_v32  ;;  %v6408_v30 = vmul.f32 %v13142_v52, %v6376_v7  ;;  %v6411_v25 = vmul.f32 %v13152_v9, %v6364_v2 }
0x1016   :  { %v6365_v50 = vsel %vm130_vm0, %v13632_v20, %v6361_v44  ;;  %v6377_v40 = vsel %vm130_vm0, %v6361_v44, %v13624_v17 }
0x1017   :  { %6429 = vst [vmem:[#allocation2 + $0x68] sm:$0xff] %v6421_v39  ;;  %6430 = vst [vmem:[#allocation2 + $0x70] sm:$0xff] %v6422_v16  ;;  %v6412_v51 = vmul.f32 %v13142_v52, %v6377_v40  ;;  %v6415_v62 = vmul.f32 %v13152_v9, %v6365_v50  ;;  %v6445_v1 = vpop.permute.xlu1 %6444  ;;  %7205 = vmatpush1.bf16.msra.mxu0 %v13200_v36  ;;  %v14872_v52 = vld [vmem:[#allocation40_spill] sm:$0xff]  ;;  %v14876_v50 = vld [vmem:[#allocation58_spill] sm:$0xff] }
0x1018   :  { %v6470_v32 = vsel %vm190_vm3, %v6445_v1, %v13649_v22  ;;  %v6474_v17 = vsel %vm190_vm3, %v13638_v56, %v6445_v1  ;;  %7206 = vmatprep.subr.bf16.mxu0 %v6421_v39  ;;  %7311 = vmatpush1.bf16.msra.mxu1 %v13170_v42 }
0x1019   :  { %v6420_v20 = vpack.c.bf16 %v6412_v51, %v6408_v30  ;;  %v6423_v24 = vpack.c.bf16 %v6415_v62, %v6411_v25  ;;  %v6447_v14 = vpop.permute.xlu0 %6446  ;;  %v6511_v27 = vmul.f32 %v14872_v52, %v6474_v17  ;;  %v6512_v23 = vmul.f32 %v14873_v45, %v6470_v32 }
0x101a   :  { %v6471_v9 = vsel %vm190_vm3, %v6447_v14, %v13654_v53  ;;  %v6475_v36 = vsel %vm190_vm3, %v13640_v63, %v6447_v14  ;;  %v14877_v32 = vpack.c.bf16 %v13294_v4, %v13288_v3  ;;  %v14878_v14 = vpack.c.bf16 %v13338_v6, %v13332_v21 }
0x101b   :  { %6428 = vst [vmem:[#allocation2 + $0x60] sm:$0xff] %v6420_v20  ;;  %6431 = vst [vmem:[#allocation2 + $0x78] sm:$0xff] %v6423_v24  ;;  %v6515_v48 = vmul.f32 %v14872_v52, %v6475_v36  ;;  %v6516_v42 = vmul.f32 %v14873_v45, %v6471_v9  ;;  %v6461_v13 = vpop.permute.xlu1 %6460  ;;  %7207 = vmatpush1.bf16.msra.mxu0 %v6420_v20  ;;  %7312 = vmatprep.subr.bf16.mxu1 %v6423_v24  ;;  %v14879_v52 = vld [vmem:[#allocation12_spill] sm:$0xff]  ;;  %v14880_v36 = vld [vmem:[#allocation87_spill] sm:$0xff] }
0x101c   :  { %v6466_v29 = vsel %vm190_vm3, %v13649_v22, %v6461_v13  ;;  %v6478_v47 = vsel %vm190_vm3, %v6461_v13, %v13638_v56  ;;  %7208 = vmatprep.subr.bf16.mxu0 %v13235_v37  ;;  %7313 = vmatpush1.bf16.msra.mxu1 %v6422_v16  ;;  %v13830_v3 = vrot.slane %v13541_v19, %v14813_v18 }
0x101d   :  { %v6523_v43 = vpack.c.bf16 %v6515_v48, %v6511_v27  ;;  %v6524_v49 = vpack.c.bf16 %v6516_v42, %v6512_v23  ;;  %v6463_v8 = vpop.permute.xlu0 %6462  ;;  %7314 = vmatprep.subr.bf16.mxu1 %v13269_v58  ;;  %v6510_v55 = vmul.f32 %v13213_v5, %v6478_v47  ;;  %v6513_v56 = vmul.f32 %v13216_v61, %v6466_v29  ;;  %v14884_v23 = vld [vmem:[#allocation57_spill] sm:$0xff] }
0x101e   :  { %v6467_v15 = vsel %vm190_vm3, %v13654_v53, %v6463_v8  ;;  %v6479_v22 = vsel %vm190_vm3, %v6463_v8, %v13640_v63  ;;  %v14874_v63 = vld [vmem:[#allocation33_spill] sm:$0xff] }
0x101f   :  { %v6514_v37 = vmul.f32 %v13213_v5, %v6479_v22  ;;  %v6517_v38 = vmul.f32 %v13216_v61, %v6467_v15  ;;  %v6547_v2 = vpop.permute.xlu1 %6546  ;;  %7209 = vmatpush1.bf16.msra.mxu0 %v13267_v0  ;;  %v14875_v5 = vld [vmem:[#allocation34_spill] sm:$0xff] }
0x1020   :  { %v6572_v58 = vsel %vm238_vm2, %v6547_v2, %v13666_v28  ;;  %v6576_v53 = vsel %vm238_vm2, %v13659_v57, %v6547_v2  ;;  %7210 = vmatprep.subr.bf16.mxu0 %v6523_v43  ;;  %7315 = vmatpush1.bf16.msra.mxu1 %v14874_v63  ;;  %v7723_v22 = vld [vmem:[#allocation2 + $0x118] sm:$0xff]  ;;  %v7726_v2 = vld [vmem:[#allocation2 + $0x110] sm:$0xff] }
0x1021   :  { %v6522_v7 = vpack.c.bf16 %v6514_v37, %v6510_v55  ;;  %v6525_v39 = vpack.c.bf16 %v6517_v38, %v6513_v56  ;;  %v6549_v16 = vpop.permute.xlu0 %6548  ;;  %v6613_v44 = vmul.f32 %v14875_v5, %v6576_v53  ;;  %v6614_v40 = vmul.f32 %v14876_v50, %v6572_v58  ;;  %v7724_v37 = vld [vmem:[#allocation2 + $0x100] sm:$0xff]  ;;  %v7725_v38 = vld [vmem:[#allocation2 + $0x128] sm:$0xff]  ;;  %v7727_v53 = vld [vmem:[#allocation2 + $0x138] sm:$0xff] }
0x1022   :  { %v6573_v61 = vsel %vm238_vm2, %v6549_v16, %v13668_v59  ;;  %v6577_v0 = vsel %vm238_vm2, %v13664_v35, %v6549_v16 }
0x1023   :  { %v6617_v30 = vmul.f32 %v14875_v5, %v6577_v0  ;;  %v6618_v25 = vmul.f32 %v14876_v50, %v6573_v61  ;;  %v6563_v51 = vpop.permute.xlu1 %6562  ;;  %7211 = vmatpush1.bf16.msra.mxu0 %v6522_v7  ;;  %7316 = vmatprep.subr.bf16.mxu1 %v6525_v39  ;;  %v14886_v7 = vld [vmem:[#allocation10_spill] sm:$0xff] }
0x1024   :  { %v6568_v62 = vsel %vm238_vm2, %v13666_v28, %v6563_v51  ;;  %v6580_v1 = vsel %vm238_vm2, %v6563_v51, %v13659_v57  ;;  %7212 = vmatprep.subr.bf16.mxu0 %v14877_v32  ;;  %7317 = vmatpush1.bf16.msra.mxu1 %v6524_v49  ;;  %v7722_v49 = vld [vmem:[#allocation2 + $0x108] sm:$0xff]  ;;  %v7729_v51 = vld [vmem:[#allocation2 + $0x130] sm:$0xff] }
0x1025   :  { %v6625_v17 = vpack.c.bf16 %v6617_v30, %v6613_v44  ;;  %v6626_v20 = vpack.c.bf16 %v6618_v25, %v6614_v40  ;;  %v6565_v24 = vpop.permute.xlu0 %6564  ;;  %7318 = vmatprep.subr.bf16.mxu1 %v14878_v14  ;;  %v6612_v4 = vmul.f32 %v13280_v46, %v6580_v1  ;;  %v6615_v27 = vmul.f32 %v14879_v52, %v6568_v62  ;;  %v7728_v30 = vld [vmem:[#allocation2 + $0x120] sm:$0xff]  ;;  %v14888_v32 = vld [vmem:[#allocation69_spill] sm:$0xff] }
0x1026   :  { %v6569_v28 = vsel %vm238_vm2, %v13668_v59, %v6565_v24  ;;  %v6581_v57 = vsel %vm238_vm2, %v6565_v24, %v13664_v35  ;;  %v14881_v59 = vld [vmem:[#allocation85_spill] sm:$0xff]  ;;  %v14883_v35 = vld [vmem:[#allocation15_spill] sm:$0xff]  ;;  %v14887_v25 = vpack.c.bf16 %v13376_v54, %v13370_v60  ;;  %v14893_v60 = vld [vmem:[#allocation68_spill] sm:$0xff] }
0x1027   :  { %v6616_v9 = vmul.f32 %v13280_v46, %v6581_v57  ;;  %v6619_v21 = vmul.f32 %v14879_v52, %v6569_v28  ;;  %v13836_v6 = vpop.permute.xlu1 %6974  ;;  %v14882_v45 = vpack.c.bf16 %v14880_v36, %v14881_v59  ;;  %v14885_v48 = vpack.c.bf16 %v14883_v35, %v14884_v23  ;;  %v14892_v24 = vld [vmem:[#allocation11_spill] sm:$0xff]  ;;  %v14895_v36 = vld [vmem:[#allocation36_spill] sm:$0xff] }
0x1028   :  { %v6994_v18 = vsel %vm474_vm7, %v13579_v10, %v13836_v6  ;;  %v14896_v59 = vld [vmem:[#allocation7_spill] sm:$0xff] }
0x1029   :  { %7213 = vmatpush1.bf16.msra.mxu0 %v14882_v45  ;;  %7319 = vmatpush1.bf16.msra.mxu1 %v14885_v48  ;;  %v6624_v42 = vpack.c.bf16 %v6616_v9, %v6612_v4  ;;  %v6627_v46 = vpack.c.bf16 %v6619_v21, %v6615_v27  ;;  %v13848_v13 = vpop.permute.xlu0 %6976  ;;  %v13855_v47 = vmul.f32 %v13830_v3, %v6994_v18  ;;  %v14894_v4 = vld [vmem:[#allocation21_spill] sm:$0xff]  ;;  %v14898_v45 = vld [vmem:[#allocation75_spill] sm:$0xff] }
0x102a   :  { %7214 = vmatprep.subr.bf16.mxu0 %v6625_v17  ;;  %v6995_v29 = vsel %vm474_vm7, %v13589_v34, %v13848_v13  ;;  %v14889_v17 = vld [vmem:[#allocation48_spill] sm:$0xff] }
0x102b   :  { %v13858_v43 = vmul.f32 %v13830_v3, %v6995_v29  ;;  %v6665_v10 = vpop.permute.xlu1 %6664  ;;  %7320 = vmatprep.subr.bf16.mxu1 %v6627_v46  ;;  %v14902_v29 = vld [vmem:[#allocation73_spill] sm:$0xff] }
0x102c   :  { %v6690_v34 = vsel %vm306_vm4, %v6665_v10, %v13674_v31  ;;  %v6694_v55 = vsel %vm306_vm4, %v13670_v26, %v6665_v10 }
0x102d   :  { %7215 = vmatpush1.bf16.msra.mxu0 %v6624_v42  ;;  %7321 = vmatpush1.bf16.msra.mxu1 %v6626_v20  ;;  %v7045_v8 = vpack.c.bf16 %v13858_v43, %v13855_v47  ;;  %v13862_v15 = vpop.permute.xlu0 %6984  ;;  %v6730_v63 = vmul.f32 %v13323_v41, %v6694_v55  ;;  %v6731_v39 = vmul.f32 %v14886_v7, %v6690_v34  ;;  %v14901_v42 = vld [vmem:[#allocation30_spill] sm:$0xff]  ;;  %v14904_v34 = vld [vmem:[#allocation25_spill] sm:$0xff] }
0x102e   :  { %7216 = vmatprep.subr.bf16.mxu0 %v7722_v49  ;;  %7322 = vmatprep.subr.bf16.mxu1 %v7723_v22  ;;  %v14890_v20 = vpack.c.bf16 %v14888_v32, %v14889_v17  ;;  %v14903_v49 = vld [vmem:[#allocation56_spill] sm:$0xff]  ;;  %v14914_v32 = vld [vmem:[#allocation13_spill] sm:$0xff] }
0x102f   :  { %v6681_v56 = vpop.permute.xlu1 %6680 }
0x1030   :  { %v6686_v44 = vsel %vm306_vm4, %v13674_v31, %v6681_v56  ;;  %v6698_v61 = vsel %vm306_vm4, %v6681_v56, %v13670_v26  ;;  %v14891_v26 = vld [vmem:[#allocation18_spill] sm:$0xff] }
0x1031   :  { %7217 = vmatpush1.bf16.msra.mxu0 %v7724_v37  ;;  %7323 = vmatpush1.bf16.msra.mxu1 %v7726_v2  ;;  %v6667_v58 = vpop.permute.xlu0 %6666  ;;  %v6733_v14 = vmul.f32 %v14892_v24, %v6698_v61 }
0x1032   :  { %7218 = vmatprep.subr.bf16.mxu0 %v7725_v38  ;;  %7324 = vmatprep.subr.bf16.mxu1 %v7727_v53  ;;  %v6691_v16 = vsel %vm306_vm4, %v6667_v58, %v13676_v11  ;;  %v6695_v5 = vsel %vm306_vm4, %v13672_v33, %v6667_v58  ;;  %v14905_v53 = vld [vmem:[#allocation49_spill] sm:$0xff] }
0x1033   :  { %v6734_v0 = vmul.f32 %v13323_v41, %v6695_v5  ;;  %v6735_v50 = vmul.f32 %v14886_v7, %v6691_v16  ;;  %v6767_v40 = vpop.permute.xlu1 %6766  ;;  %v6732_v41 = vmul.f32 %v14891_v26, %v6686_v44  ;;  %v6991_v5 = vsel %vm474_vm7, %v13848_v13, %v13862_v15 }
0x1034   :  { %v6792_v57 = vsel %vm366_vm6, %v6767_v40, %v14893_v60  ;;  %v6796_v52 = vsel %vm366_vm6, %v14894_v4, %v6767_v40  ;;  %v14910_v40 = vld [vmem:[#allocation79_spill] sm:$0xff] }
0x1035   :  { %7219 = vmatpush1.bf16.msra.mxu0 %v7728_v30  ;;  %7325 = vmatpush1.bf16.msra.mxu1 %v7729_v51  ;;  %v6742_v62 = vpack.c.bf16 %v6734_v0, %v6730_v63  ;;  %v6743_v1 = vpack.c.bf16 %v6735_v50, %v6731_v39  ;;  %v6683_v31 = vpop.permute.xlu0 %6682  ;;  %v6832_v46 = vmul.f32 %v14901_v42, %v6796_v52  ;;  %v14906_v63 = vld [vmem:[#allocation74_spill] sm:$0xff]  ;;  %v14909_v50 = vld [vmem:[#allocation72_spill] sm:$0xff]  ;;  %v14920_v52 = vld [vmem:[#allocation59_spill] sm:$0xff] }
0x1036   :  { %7220 = vmatprep.subr.bf16.mxu0 %v14887_v25  ;;  %7326 = vmatprep.subr.bf16.mxu1 %v14890_v20  ;;  %v6687_v28 = vsel %vm306_vm4, %v13676_v11, %v6683_v31  ;;  %v6699_v54 = vsel %vm306_vm4, %v6683_v31, %v13672_v33  ;;  %v14897_v11 = vpack.c.bf16 %v14895_v36, %v14896_v59  ;;  %v14899_v33 = vld [vmem:[#allocation17_spill] sm:$0xff]  ;;  %v14908_v39 = vld [vmem:[#allocation6_spill] sm:$0xff]  ;;  %v14912_v25 = vld [vmem:[#allocation43_spill] sm:$0xff] }
0x1037   :  { %v6736_v27 = vmul.f32 %v14891_v26, %v6687_v28  ;;  %v6737_v9 = vmul.f32 %v14892_v24, %v6699_v54  ;;  %v6783_v21 = vpop.permute.xlu1 %6782  ;;  %v14900_v18 = vpack.c.bf16 %v14898_v45, %v14899_v33  ;;  %v6833_v10 = vmul.f32 %v14902_v29, %v6792_v57  ;;  %v14915_v20 = vld [vmem:[#allocation76_spill] sm:$0xff]  ;;  %v14916_v28 = vld [vmem:[#allocation41_spill] sm:$0xff]  ;;  %v14917_v54 = vld [vmem:[#allocation70_spill] sm:$0xff] }
0x1038   :  { %v6788_v56 = vsel %vm366_vm6, %v14893_v60, %v6783_v21  ;;  %v6800_v58 = vsel %vm366_vm6, %v6783_v21, %v14894_v4  ;;  %v14907_v7 = vpack.c.bf16 %v14905_v53, %v14906_v63  ;;  %v13935_v16 = vrot.slane %v13541_v19, %v14908_v39  ;;  %v14919_v57 = vld [vmem:[#allocation4_spill] sm:$0xff] }
0x1039   :  { %7221 = vmatpush1.bf16.msra.mxu0 %v14897_v11  ;;  %7327 = vmatpush1.bf16.msra.mxu1 %v14900_v18  ;;  %v6744_v35 = vpack.c.bf16 %v6736_v27, %v6732_v41  ;;  %v6745_v23 = vpack.c.bf16 %v6737_v9, %v6733_v14  ;;  %v6769_v48 = vpop.permute.xlu0 %6768  ;;  %v14911_v30 = vpack.c.bf16 %v14909_v50, %v14910_v40  ;;  %v14921_v9 = vld [vmem:[#allocation64_spill] sm:$0xff]  ;;  %v14924_v11 = vld [vmem:[#allocation14_spill] sm:$0xff] }
0x103a   :  { %7222 = vmatprep.subr.bf16.mxu0 %v6743_v1  ;;  %v6793_v22 = vsel %vm366_vm6, %v6769_v48, %v14903_v49  ;;  %v6797_v55 = vsel %vm366_vm6, %v14904_v34, %v6769_v48  ;;  %v6834_v51 = vmul.f32 %v14912_v25, %v6788_v56  ;;  %v6835_v17 = vmul.f32 %v14914_v32, %v6800_v58  ;;  %v14922_v21 = vld [vmem:[#allocation52_spill] sm:$0xff] }
0x103b   :  { %v6836_v37 = vmul.f32 %v14901_v42, %v6797_v55  ;;  %v6837_v38 = vmul.f32 %v14902_v29, %v6793_v22  ;;  %v6869_v2 = vpop.permute.xlu1 %6868  ;;  %7328 = vmatprep.subr.bf16.mxu1 %v6745_v23  ;;  %v14918_v60 = vpack.c.bf16 %v14916_v28, %v14917_v54  ;;  %v13965_v4 = vrot.slane %v13541_v19, %v14919_v57  ;;  %v14925_v23 = vld [vmem:[#allocation53_spill] sm:$0xff]  ;;  %v14926_v42 = vld [vmem:[#allocation80_spill] sm:$0xff] }
0x103c   :  { %v6894_v26 = vsel %vm414_vm5, %v6869_v2, %v14915_v20  ;;  %v7003_v27 = vsel %vm474_vm7, %v13862_v15, %v14920_v52  ;;  %v14923_v36 = vpack.c.bf16 %v14921_v9, %v14922_v21  ;;  %v7034_v59 = vmul.f32 %v13935_v16, %v6991_v5  ;;  %v14930_v58 = vld [vmem:[#allocation24_spill] sm:$0xff] }
0x103d   :  { %7223 = vmatpush1.bf16.msra.mxu0 %v6742_v62  ;;  %7329 = vmatpush1.bf16.msra.mxu1 %v6744_v35  ;;  %v6844_v44 = vpack.c.bf16 %v6836_v37, %v6832_v46  ;;  %v6845_v61 = vpack.c.bf16 %v6837_v38, %v6833_v10  ;;  %v6785_v0 = vpop.permute.xlu0 %6784  ;;  %v14913_v62 = vld [vmem:[#allocation65_spill] sm:$0xff]  ;;  %v6935_v19 = vmul.f32 %v14925_v23, %v6894_v26  ;;  %v14938_v26 = vld [vmem:[#allocation46_spill] sm:$0xff]  ;;  %v7714_v52 = vld [vmem:[%s14143_s10] ss:$12 sps:$4 sm:$0xff]  }
0x103e   :  { %7224 = vmatprep.subr.bf16.mxu0 %v14907_v7  ;;  %7330 = vmatprep.subr.bf16.mxu1 %v14911_v30  ;;  %v6898_v1 = vsel %vm414_vm5, %v14913_v62, %v6869_v2  ;;  %v6789_v31 = vsel %vm366_vm6, %v14903_v49, %v6785_v0  ;;  %v6801_v13 = vsel %vm366_vm6, %v6785_v0, %v14904_v34  ;;  %v14927_v46 = vld [vmem:[#allocation61_spill] sm:$0xff]  ;;  %v14929_v2 = vld [vmem:[#allocation26_spill] sm:$0xff]  ;;  %v14936_v30 = vld [vmem:[#allocation19_spill] sm:$0xff] }
0x103f   :  { %v6838_v41 = vmul.f32 %v14912_v25, %v6789_v31  ;;  %v6839_v24 = vmul.f32 %v14914_v32, %v6801_v13  ;;  %v6885_v14 = vpop.permute.xlu1 %6884  ;;  %v6934_v45 = vmul.f32 %v14924_v11, %v6898_v1  ;;  %v7035_v55 = vmul.f32 %v13965_v4, %v7003_v27  ;;  %v14928_v37 = vld [vmem:[#allocation29_spill] sm:$0xff]  ;;  %v7717_v9 = vld [vmem:[%s14143_s10 + $0x1c] ss:$12 sps:$4 sm:$0xff]  }
0x1040   :  { %v6890_v48 = vsel %vm414_vm5, %v14915_v20, %v6885_v14  ;;  %v6902_v10 = vsel %vm414_vm5, %v6885_v14, %v14913_v62  ;;  %v14931_v53 = vpack.c.bf16 %v14929_v2, %v14930_v58  ;;  %v14933_v0 = vld [vmem:[#allocation45_spill] sm:$0xff]  ;;  %v14937_v20 = vld [vmem:[#allocation27_spill] sm:$0xff]  ;;  %v14947_v58 = vmov 0  }
0x1041   :  { %7225 = vmatpush1.bf16.msra.mxu0 %v14918_v60  ;;  %7331 = vmatpush1.bf16.msra.mxu1 %v14923_v36  ;;  %v6846_v33 = vpack.c.bf16 %v6838_v41, %v6834_v51  ;;  %v6847_v18 = vpack.c.bf16 %v6839_v24, %v6835_v17  ;;  %v6871_v35 = vpop.permute.xlu0 %6870  ;;  %v6937_v25 = vmul.f32 %v14936_v30, %v6902_v10  ;;  %v14940_v24 = vld [vmem:[#allocation63_spill] sm:$0xff]  ;;  %v14941_v14 = vld [vmem:[#allocation37_spill] sm:$0xff] }
0x1042   :  { %7226 = vmatprep.subr.bf16.mxu0 %v6845_v61  ;;  %v6895_v15 = vsel %vm414_vm5, %v6871_v35, %v14926_v42  ;;  %v6899_v29 = vsel %vm414_vm5, %v14927_v46, %v6871_v35  ;;  %v14932_v61 = vld [vmem:[#allocation84_spill] sm:$0xff]  ;;  %v14939_v41 = vpack.c.bf16 %v14937_v20, %v14938_v26  ;;  %v14942_v28 = vpack.c.bf16 %v14940_v24, %v14941_v14  ;;  %v7719_v35 = vld [vmem:[%s14143_s10 + $0x18] ss:$12 sps:$4 sm:$0xff]  }
0x1043   :  { %v6938_v49 = vmul.f32 %v14924_v11, %v6899_v29  ;;  %v6939_v22 = vmul.f32 %v14925_v23, %v6895_v15  ;;  %v6983_v34 = vpop.permute.xlu1 %6982  ;;  %7332 = vmatprep.subr.bf16.mxu1 %v6847_v18  ;;  %v14934_v50 = vpack.c.bf16 %v14932_v61, %v14933_v0  ;;  %v14944_v11 = vld [vmem:[#allocation39_spill] sm:$0xff]  ;;  %v14946_v23 = vld [vmem:[#allocation38_spill] sm:$0xff] }
0x1044   :  { %v6990_v56 = vsel %vm474_vm7, %v13836_v6, %v6983_v34  ;;  %v7002_v38 = vsel %vm474_vm7, %v6983_v34, %v14928_v37  ;;  %v14935_v6 = vld [vmem:[#allocation54_spill] sm:$0xff] }
0x1045   :  { %7227 = vmatpush1.bf16.msra.mxu0 %v6844_v44  ;;  %7333 = vmatpush1.bf16.msra.mxu1 %v6846_v33  ;;  %v6946_v63 = vpack.c.bf16 %v6938_v49, %v6934_v45  ;;  %v6947_v7 = vpack.c.bf16 %v6939_v22, %v6935_v19  ;;  %v7030_v39 = vmul.f32 %v13935_v16, %v6990_v56  ;;  %v6887_v44 = vpop.permute.xlu0 %6886 }
0x1046   :  { %7228 = vmatprep.subr.bf16.mxu0 %v14931_v53  ;;  %v7031_v5 = vmul.f32 %v13965_v4, %v7002_v38  ;;  %7334 = vmatprep.subr.bf16.mxu1 %v14934_v50  ;;  %v6936_v40 = vmul.f32 %v14935_v6, %v6890_v48  ;;  %v6891_v51 = vsel %vm414_vm5, %v14926_v42, %v6887_v44 }
0x1047   :  { %v6903_v62 = vsel %vm414_vm5, %v6887_v44, %v14927_v46  ;;  %v7046_v1 = vpack.c.bf16 %v7034_v59, %v7030_v39  ;;  %v6940_v13 = vmul.f32 %v14935_v6, %v6891_v51  ;;  %v6963_v17 = vpop.permute.xlu1 %6962  ;;  %v14943_v59 = vld [vmem:[#allocation55_spill] sm:$0xff] }
0x1048   :  { %v7047_v31 = vpack.c.bf16 %v7035_v55, %v7031_v5  ;;  %v6941_v32 = vmul.f32 %v14936_v30, %v6903_v62  ;;  %v14945_v45 = vpack.c.bf16 %v14943_v59, %v14944_v11 }
0x1049   :  { %7229 = vmatpush1.bf16.msra.mxu0 %v14939_v41  ;;  %7335 = vmatpush1.bf16.msra.mxu1 %v14942_v28  ;;  %v6948_v54 = vpack.c.bf16 %v6940_v13, %v6936_v40  ;;  %v6965_v57 = vpop.permute.xlu0 %6964 }
0x104a   :  { %7230 = vmatprep.subr.bf16.mxu0 %v6947_v7  ;;  %v6949_v60 = vpack.c.bf16 %v6941_v32, %v6937_v25 }
0x104b   :  { %v6971_v27 = vpop.permute.xlu1 %6970 }
0x104c   :  { %7336 = vmatprep.subr.bf16.mxu1 %v6949_v60  ;;  %v7000_v33 = vsel %vm474_vm7, %v6963_v17, %v6971_v27 }
0x104d   :  { %7231 = vmatpush1.bf16.msra.mxu0 %v6946_v63  ;;  %7337 = vmatpush1.bf16.msra.mxu1 %v6948_v54  ;;  %v6981_v21 = vpop.permute.xlu0 %6980  ;;  %v7036_v19 = vmul.f32 %v14946_v23, %v7000_v33 }
0x104e   :  { %7253 = vmatprep.subr.bf16.mxu0 %v7045_v8  ;;  %7359 = vmatprep.subr.bf16.mxu1 %v7047_v31 }
0x104f   :  { %v6979_v36 = vpop.permute.xlu1 %6978 }
0x1050   :  { %7233 = vmatmul.mubr.bf16.vlgmr.msra.gmra.mrb[44].mxu0 %v7714_v52  ;;  %7339 = vmatmul.mubr.bf16.vlgmr.msra.gmra.mrb[44].mxu1 %v7714_v52  ;;  %v6996_v47 = vsel %vm474_vm7, %v6971_v27, %v6979_v36 }
0x1051   :  { %7254 = vmatpush1.bf16.msra.mxu0 %v14945_v45  ;;  %7360 = vmatpush1.bf16.msra.mxu1 %v7046_v1  ;;  %v6973_v43 = vpop.permute.xlu0 %6972  ;;  %v7037_v48 = vmul.f32 %v13830_v3, %v6996_v47 }
0x1052   :  { %7242 = vmatprep.mubr.bf16.mxu0 %v7717_v9  ;;  %7348 = vmatprep.mubr.bf16.mxu1 %v7717_v9  ;;  %v6997_v8 = vsel %vm474_vm7, %v6973_v43, %v6981_v21  ;;  %v7001_v18 = vsel %vm474_vm7, %v6965_v57, %v6973_v43 }
0x1053   :  { %v7040_v42 = vmul.f32 %v14946_v23, %v7001_v18  ;;  %v7041_v15 = vmul.f32 %v13830_v3, %v6997_v8  ;;  %v6987_v46 = vpop.permute.xlu1 %6986 }
0x1054   :  { %v6992_v29 = vsel %vm474_vm7, %v6979_v36, %v6987_v46  ;;  %v7004_v10 = vsel %vm474_vm7, %v6987_v46, %v6963_v17 }
0x1055   :  { %v7048_v49 = vpack.c.bf16 %v7040_v42, %v7036_v19  ;;  %v7049_v22 = vpack.c.bf16 %v7041_v15, %v7037_v48  ;;  %v6989_v34 = vpop.permute.xlu0 %6988  ;;  %v7038_v55 = vmul.f32 %v13935_v16, %v6992_v29  ;;  %v7039_v3 = vmul.f32 %v13965_v4, %v7004_v10 }
0x1056   :  { %v6993_v56 = vsel %vm474_vm7, %v6981_v21, %v6989_v34  ;;  %v7005_v37 = vsel %vm474_vm7, %v6989_v34, %v6965_v57 }
0x1057   :  { %v7042_v38 = vmul.f32 %v13935_v16, %v6993_v56  ;;  %v7043_v2 = vmul.f32 %v13965_v4, %v7005_v37  ;;  %7255 = vmatprep.subr.bf16.mxu0 %v7049_v22  ;;  %v7721_v16 = vld [vmem:[%s14143_s10 + $0x20] ss:$12 sps:$4 sm:$0xff]  }
0x1058   :  { %7243 = vmatmul.mubr.bf16.gmra.mrb[48].mxu0 %v7719_v35  ;;  %7349 = vmatmul.mubr.bf16.gmra.mrb[48].mxu1 %v7719_v35 }
0x1059   :  { %7256 = vmatpush1.bf16.msra.mxu0 %v7048_v49  ;;  %7285 = vmatprep.mubr.bf16.mxu0 %v14947_v58  ;;  %v7050_v53 = vpack.c.bf16 %v7042_v38, %v7038_v55  ;;  %v7051_v63 = vpack.c.bf16 %v7043_v2, %v7039_v3 }
0x105a   :  { %7391 = vmatprep.mubr.bf16.mxu1 %v14947_v58 }
0x105b   :  { %7361 = vmatprep.subr.bf16.mxu1 %v7051_v63 }
0x105c   :  { %7362 = vmatpush1.bf16.msra.mxu1 %v7050_v53 }
0x1060   :  { %7574 = vmatmul.mubr.msk.bf16.vlgmr.msra.gmra.mrb[44].mxu0 %vm4777_vm11, %v7720_v12  ;;  %7576 = vmatmul.mubr.msk.bf16.vlgmr.msra.gmra.mrb[44].mxu1 %vm4777_vm11, %v7720_v12 }
0x1061   :  { %7295 = vmatprep.mubr.bf16.mxu0 %v14947_v58  ;;  %7401 = vmatprep.mubr.bf16.mxu1 %v14947_v58 }
0x1064   :  { %v7147_v4 = vpop.permute.xlu1 %7146 }
0x1066   :  { %v7152_v7 = vpop.permute.xlu0 %7151 }
0x1068   :  { %7575 = vmatmul.mubr.msk.bf16.gmra.mrb[48].mxu0 %vm4777_vm11, %v7721_v16  ;;  %7577 = vmatmul.mubr.msk.bf16.gmra.mrb[48].mxu1 %vm4777_vm11, %v7721_v16  ;;  %v7157_v54 = vpop.permute.xlu1 %7156 }
0x106a   :  { %v7162_v57 = vpop.permute.xlu0 %7161 }
0x1133   :  { %v7287_v39 = vpop.f32.mrb[44].mxu0  ;;  %v7393_v61 = vpop.f32.mrb[44].mxu1 }
0x1134   :  { %v7610_v5 = vadd.f32 %v7287_v39, %v7147_v4  ;;  %v7289_v44 = vpop.f32.mrb[45].mxu0  ;;  %v7618_v50 = vadd.f32 %v7393_v61, %v7147_v4  ;;  %v7395_v40 = vpop.f32.mrb[45].mxu1 }
0x1135   :  { %v7611_v0 = vadd.f32 %v7289_v44, %v7147_v4  ;;  %v7291_v6 = vpop.f32.mrb[46].mxu0  ;;  %v7619_v51 = vadd.f32 %v7395_v40, %v7147_v4  ;;  %v7397_v1 = vpop.f32.mrb[46].mxu1 }
0x1136   :  { %v7412_v30 = vmax.f32 %v7610_v5, 0.0  ;;  %v7612_v25 = vadd.f32 %v7291_v6, %v7152_v7  ;;  %v7293_v62 = vpop.f32.mrb[47].mxu0  ;;  %v7414_v13 = vmax.f32 %v7618_v50, 0.0  ;;  %v7620_v17 = vadd.f32 %v7397_v1, %v7152_v7  ;;  %v7399_v20 = vpop.f32.mrb[47].mxu1 }
0x1137   :  { %v7413_v31 = vmax.f32 %v7611_v0, 0.0  ;;  %v7613_v32 = vadd.f32 %v7293_v62, %v7152_v7  ;;  %v7415_v41 = vmax.f32 %v7619_v51, 0.0  ;;  %v7621_v24 = vadd.f32 %v7399_v20, %v7152_v7 }
0x1138   :  { %7428 = vst [vmem:[%s14145_s22] sm:$0xff] %v7412_v30  ;;  %v7416_v26 = vmax.f32 %v7612_v25, 0.0  ;;  %7430 = vst [vmem:[%s14145_s22 + $0x10] sm:$0xff] %v7414_v13  ;;  %v7418_v28 = vmax.f32 %v7620_v17, 0.0 }
0x1139   :  { %7429 = vst [vmem:[%s14145_s22 + $0x8] sm:$0xff] %v7413_v31  ;;  %v7417_v14 = vmax.f32 %v7613_v32, 0.0  ;;  %7431 = vst [vmem:[%s14145_s22 + $0x18] sm:$0xff] %v7415_v41  ;;  %v7419_v60 = vmax.f32 %v7621_v24, 0.0 }
0x113a   :  { %7432 = vst [vmem:[%s14145_s22 + $0x20] sm:$0xff] %v7416_v26  ;;  %7434 = vst [vmem:[%s14145_s22 + $0x30] sm:$0xff] %v7418_v28 }
0x113b   :  { %7433 = vst [vmem:[%s14145_s22 + $0x28] sm:$0xff] %v7417_v14  ;;  %v7297_v52 = vpop.f32.mrb[48].mxu0  ;;  %7435 = vst [vmem:[%s14145_s22 + $0x38] sm:$0xff] %v7419_v60  ;;  %v7403_v21 = vpop.f32.mrb[48].mxu1 }
0x113c   :  { %v7614_v27 = vadd.f32 %v7297_v52, %v7157_v54  ;;  %v7299_v9 = vpop.f32.mrb[49].mxu0  ;;  %v7622_v59 = vadd.f32 %v7403_v21, %v7157_v54  ;;  %v7405_v45 = vpop.f32.mrb[49].mxu1 }
0x113d   :  { %v7615_v36 = vadd.f32 %v7299_v9, %v7157_v54  ;;  %v7301_v11 = vpop.f32.mrb[50].mxu0  ;;  %v7623_v43 = vadd.f32 %v7405_v45, %v7157_v54  ;;  %v7407_v18 = vpop.f32.mrb[50].mxu1 }
0x113e   :  { %v7420_v33 = vmax.f32 %v7614_v27, 0.0  ;;  %v7616_v47 = vadd.f32 %v7301_v11, %v7162_v57  ;;  %v7303_v8 = vpop.f32.mrb[51].mxu0  ;;  %v7422_v23 = vmax.f32 %v7622_v59, 0.0  ;;  %v7624_v48 = vadd.f32 %v7407_v18, %v7162_v57  ;;  %v7409_v42 = vpop.f32.mrb[51].mxu1 }
0x113f   :  { %v7421_v35 = vmax.f32 %v7615_v36, 0.0  ;;  %v7617_v19 = vadd.f32 %v7303_v8, %v7162_v57  ;;  %v7423_v46 = vmax.f32 %v7623_v43, 0.0  ;;  %v7625_v29 = vadd.f32 %v7409_v42, %v7162_v57 }
0x1140   :  { %7436 = vst [vmem:[%s14145_s22 + $0x40] sm:$0xff] %v7420_v33  ;;  %v7424_v15 = vmax.f32 %v7616_v47, 0.0  ;;  %7438 = vst [vmem:[%s14145_s22 + $0x50] sm:$0xff] %v7422_v23  ;;  %v7426_v49 = vmax.f32 %v7624_v48, 0.0 }
0x1141   :  { %7437 = vst [vmem:[%s14145_s22 + $0x48] sm:$0xff] %v7421_v35  ;;  %v7425_v10 = vmax.f32 %v7617_v19, 0.0  ;;  %7439 = vst [vmem:[%s14145_s22 + $0x58] sm:$0xff] %v7423_v46  ;;  %v7427_v22 = vmax.f32 %v7625_v29, 0.0 }
0x1142   :  { %7440 = vst [vmem:[%s14145_s22 + $0x60] sm:$0xff] %v7424_v15  ;;  %7442 = vst [vmem:[%s14145_s22 + $0x70] sm:$0xff] %v7426_v49 }
0x1143   :  { %7441 = vst [vmem:[%s14145_s22 + $0x68] sm:$0xff] %v7425_v10  ;;  %7443 = vst [vmem:[%s14145_s22 + $0x78] sm:$0xff] %v7427_v22 }

</bundles_post_ra>
